<compile_context>
chip_gen: v6e
topology: v6e:2x2x1
jax: 0.10.0
libtpu: 0.0.40
codegen_flags: <defaults>
</compile_context>

<pallas_src>
import functools

import numpy as np
import jax
import jax.numpy as jnp
from jax.experimental import pallas as pl
from jax.experimental.pallas import tpu as pltpu

BD = 256  # Block_dimension from the PyTorch module


def _sparse_linear_kernel(cnt_ref, col_ref, idx_ref,
                          xd_ref, xs_ref, wt_ref, sw_ref, out_ref,
                          *, kbt, sched_w):
    """grid = (Mp//tm, N//BD, kbt + max_sparse_per_row); axis 2 is reduction."""
    del col_ref  # only used by the index_maps
    j = pl.program_id(1)          # output column block
    k = pl.program_id(2)          # reduction step: kbt dense blocks, then sparse

    # Dense phase: out_block_j (+)= x[:, k*tk:(k+1)*tk] @ W.T[k*tk:(k+1)*tk, j]
    # k == 0 writes (folds the zero-init away); k > 0 accumulates in f32.
    @pl.when(k == 0)
    def _():
        out_ref[...] = jnp.dot(xd_ref[...], wt_ref[...],
                               preferred_element_type=jnp.float32)

    @pl.when(jnp.logical_and(k > 0, k < kbt))
    def _():
        out_ref[...] += jnp.dot(xd_ref[...], wt_ref[...],
                                preferred_element_type=jnp.float32)

    # Sparse phase: t-th scheduled entry for this output block (if any):
    #   out_block_j += x[:, c*BD:(c+1)*BD] @ selected_weight[i].T
    @pl.when(k >= kbt)
    def _():
        t = k - kbt

        @pl.when(t < cnt_ref[j])
        def _():
            i = idx_ref[j * sched_w + t]
            out_ref[...] += jnp.dot(xs_ref[...], sw_ref[i],
                                    preferred_element_type=jnp.float32)


def _build_schedule(index_list, nb_n, kb):
    """Per-output-block sparse schedule, flattened to 1-D for SMEM economy."""
    per_j = [[] for _ in range(nb_n)]
    for i, (r, c) in enumerate(index_list):
        assert 0 <= r < nb_n and 0 <= c < kb, "index_list entry out of range"
        per_j[r].append((c, i))
    max_cnt = max(len(v) for v in per_j)
    sched_w = max(max_cnt, 1)                      # keep SMEM arrays non-empty
    cnt = np.zeros((nb_n,), np.int32)
    col = np.zeros((nb_n, sched_w), np.int32)
    idx = np.zeros((nb_n, sched_w), np.int32)
    prev_col = 0                                   # carry across rows: no DMA bounce
    for j in range(nb_n):
        entries = per_j[j]
        cnt[j] = len(entries)
        for t in range(sched_w):
            if t < len(entries):
                col[j, t], idx[j, t] = entries[t]
            elif entries:
                col[j, t] = col[j, t - 1]          # repeat -> suppress x DMA
                idx[j, t] = idx[j, t - 1]
            else:
                col[j, t] = prev_col               # empty row -> keep last block
                idx[j, t] = 0
        prev_col = int(col[j, sched_w - 1])
    return (jnp.asarray(cnt), jnp.asarray(col.reshape(-1)),
            jnp.asarray(idx.reshape(-1)), max_cnt, sched_w)


def sparse_linear_forward(x, weight, selected_weight, index_list, *,
                          tm=512, tk_max=2048, compute_dtype=None,
                          vmem_budget_bytes=40 * 1024 * 1024):
    """x: (B, S, K); weight: (N, K); selected_weight: (n_idx*BD, BD).

    tm: target M tile. Raise toward 1024 with compute_dtype=jnp.bfloat16 on
    v6e/v7x to reach the MXU roofline; the VMEM-aware cap below shrinks it
    again if the double-buffered working set would not fit.
    """
    B, S, K = x.shape
    N, Kw = weight.shape
    assert Kw == K and K % BD == 0 and N % BD == 0
    out_dtype = x.dtype
    n_idx = len(index_list)
    nb_n = N // BD
    kb = K // BD

    cdt = jnp.dtype(compute_dtype) if compute_dtype is not None else jnp.dtype(x.dtype)
    item = cdt.itemsize
    align = 16 if item < 4 else 8          # bf16 packs 2 rows per sublane

    # Dense reduction tile: largest multiple of BD dividing K, capped at tk_max.
    tk = BD
    c = (min(K, max(tk_max, BD)) // BD) * BD
    while c >= BD:
        if K % c == 0:
            tk = c
            break
        c -= BD

    # M tiling (round tm up to the packing-friendly alignment).
    M = B * S
    tm_eff = max(align, min(tm, M))
    tm_eff = ((tm_eff + align - 1) // align) * align

    # Keep the double-buffered working set within a v7x-safe VMEM budget.
    n_sw = max(n_idx, 1)

    def _working_set(tm_, tk_):
        return (2 * tm_ * tk_ * item          # xd (dense x view)
                + 2 * tm_ * BD * item         # xs (sparse x view)
                + 2 * tk_ * BD * item         # W.T stripe
                + 2 * n_sw * BD * BD * item   # resident selected_weight blocks
                + 2 * tm_ * BD * 4)           # f32 output block

    while _working_set(tm_eff, tk) > vmem_budget_bytes and tm_eff > 2 * align:
        tm_eff = max(align, ((tm_eff // 2) // align) * align)
    while _working_set(tm_eff, tk) > vmem_budget_bytes and tk > BD:
        tk2 = tk - BD
        while tk2 > BD and K % tk2 != 0:
            tk2 -= BD
        tk = tk2

    kbt = K // tk
    Mp = ((M + tm_eff - 1) // tm_eff) * tm_eff

    x2 = x.reshape(M, K)
    if Mp != M:
        x2 = jnp.pad(x2, ((0, Mp - M), (0, 0)))

    # Pre-transpose weights so the kernel never transposes on the XLU.
    wt = weight.T                                              # (K, N)
    if n_idx > 0:
        swt = jnp.transpose(selected_weight.reshape(n_idx, BD, BD),
                            (0, 2, 1))                         # blocks pre-.T'd
    else:
        swt = jnp.zeros((1, BD, BD), dtype=weight.dtype)

    if compute_dtype is not None:                              # bf16 on v5e/v6e/v7x
        x2 = x2.astype(compute_dtype)
        wt = wt.astype(compute_dtype)
        swt = swt.astype(compute_dtype)

    cnt, col, idx, max_cnt, sched_w = _build_schedule(index_list, nb_n, kb)
    grid = (Mp // tm_eff, nb_n, kbt + max_cnt)

    # index_maps: scalar-prefetched (cnt, col, idx) arrive as trailing refs.
    def xd_map(m, j, k, cnt_r, col_r, idx_r):
        return (m, jnp.minimum(k, kbt - 1))          # frozen on sparse steps

    def xs_map(m, j, k, cnt_r, col_r, idx_r):
        t = jnp.clip(k - kbt, 0, sched_w - 1)        # dense steps prefetch t=0
        return (m, col_r[j * sched_w + t])           # padded steps repeat -> no DMA

    def wt_map(m, j, k, cnt_r, col_r, idx_r):
        return (jnp.minimum(k, kbt - 1), j)          # frozen on sparse steps

    def sw_map(m, j, k, cnt_r, col_r, idx_r):
        return (0, 0, 0)                             # VMEM-resident (one DMA)

    def out_map(m, j, k, cnt_r, col_r, idx_r):
        return (m, j)

    flops = 2 * Mp * K * N + 2 * Mp * BD * BD * n_idx
    bytes_accessed = (Mp * K * item
                      + (Mp // tm_eff) * K * N * item
                      + n_sw * BD * BD * item
                      + Mp * N * 4)
    vmem_limit = int(min(max(_working_set(tm_eff, tk) + (8 << 20), 32 << 20),
                         64 << 20))

    out2 = pl.pallas_call(
        functools.partial(_sparse_linear_kernel, kbt=kbt, sched_w=sched_w),
        out_shape=jax.ShapeDtypeStruct((Mp, N), jnp.float32),
        grid_spec=pltpu.PrefetchScalarGridSpec(
            num_scalar_prefetch=3,
            grid=grid,
            in_specs=[
                pl.BlockSpec((tm_eff, tk), xd_map),       # x (dense view)
                pl.BlockSpec((tm_eff, BD), xs_map),       # x (sparse view)
                pl.BlockSpec((tk, BD), wt_map),           # W.T stripe
                pl.BlockSpec((n_sw, BD, BD), sw_map),     # selected_weight blocks
            ],
            out_specs=pl.BlockSpec((tm_eff, BD), out_map),
        ),
        compiler_params=pltpu.CompilerParams(
            dimension_semantics=("parallel", "parallel", "arbitrary"),
            vmem_limit_bytes=vmem_limit),
        cost_estimate=pl.CostEstimate(flops=int(flops), transcendentals=0,
                                      bytes_accessed=int(bytes_accessed)),
    )(cnt, col, idx, x2, x2, wt, swt)

    if Mp != M:
        out2 = out2[:M]
    if out2.dtype != out_dtype:
        out2 = out2.astype(out_dtype)
    return out2.reshape(B, S, N)


def make_params(key, in_features, out_features, index_list):
    """Deterministic parameter construction mirroring the module __init__."""
    weight = jax.random.normal(key, (out_features, in_features),
                               jnp.float32) * 0.02
    if index_list:
        blocks = [weight[r * BD:(r + 1) * BD, c * BD:(c + 1) * BD]
                  for (r, c) in index_list]
        selected_weight = jnp.concatenate(blocks, axis=0)    # (n_idx*BD, BD)
    else:
        selected_weight = jnp.zeros((0, BD), jnp.float32)
    return weight, selected_weight


def reference_forward(x, weight, selected_weight, index_list):
    out = jnp.einsum("bsk,nk->bsn", x, weight)
    for i, (r, c) in enumerate(index_list):
        sw = selected_weight[i * BD:(i + 1) * BD, :]
        xb = x[:, :, c * BD:(c + 1) * BD]
        out = out.at[:, :, r * BD:(r + 1) * BD].add(
            jnp.einsum("bsk,nk->bsn", xb, sw))
    return out


if __name__ == "__main__":
    key = jax.random.PRNGKey(0)
    kx, kp = jax.random.split(key)

    # Small shapes consistent with the module: (B, S, K) inputs, K and N
    # multiples of Block_dimension=256; heterogeneous sparse fan-out per row.
    B, S = 2, 256
    in_features, out_features = 512, 768
    index_list = [(0, 1), (2, 0), (0, 0)]   # row 0: 2 entries, row 1: 0, row 2: 1

    x = jax.random.normal(kx, (B, S, in_features), jnp.float32)
    weight, selected_weight = make_params(kp, in_features, out_features,
                                          index_list)
    ref = reference_forward(x, weight, selected_weight, index_list)

    # f32 path (exact f32 GEMM semantics not bit-preserved on the MXU; see review).
    out = jax.block_until_ready(
        sparse_linear_forward(x, weight, selected_weight, index_list))
    assert out.shape == (B, S, out_features)
    assert jnp.allclose(out, ref, atol=1e-2, rtol=1e-3), "f32 mismatch vs reference"

    # Empty index_list path (plain matmul; exercises the n_idx == 0 guard).
    w2, sw2 = make_params(kp, in_features, out_features, [])
    out0 = jax.block_until_ready(sparse_linear_forward(x, w2, sw2, []))
    ref0 = reference_forward(x, w2, sw2, [])
    assert jnp.allclose(out0, ref0, atol=1e-2, rtol=1e-3), "empty-index mismatch"

    # bf16 MXU path (recommended on v5e/v6e/v7x): bf16 operands, f32 accumulation.
    out_bf16 = jax.block_until_ready(
        sparse_linear_forward(x, weight, selected_weight, index_list,
                              tm=1024, compute_dtype=jnp.bfloat16))
    assert out_bf16.dtype == jnp.float32
    assert jnp.allclose(out_bf16, ref, atol=2e-1, rtol=1e-1), "bf16 mismatch"

    # Non-divisible M path (row padding) with a smaller tile.
    x_odd = x[:, :200, :]
    ref_odd = reference_forward(x_odd, weight, selected_weight, index_list)
    out_odd = jax.block_until_ready(
        sparse_linear_forward(x_odd, weight, selected_weight, index_list,
                              tm=256))
    assert jnp.allclose(out_odd, ref_odd, atol=1e-2, rtol=1e-3), "padded-M mismatch"

    print("KERNEL_OK")
</pallas_src>

<mosaic_0001>
module attributes {stable_mosaic.version = 11 : i64} {
  func.func @_sparse_linear_kernel(%arg0: i32, %arg1: i32, %arg2: i32, %arg3: memref<3xi32, #tpu.memory_space<smem>>, %arg4: memref<6xi32, #tpu.memory_space<smem>>, %arg5: memref<6xi32, #tpu.memory_space<smem>>, %arg6: memref<512x512xf32, #tpu.memory_space<vmem>>, %arg7: memref<512x256xf32, #tpu.memory_space<vmem>>, %arg8: memref<512x256xf32, #tpu.memory_space<vmem>>, %arg9: memref<3x256x256xf32, #tpu.memory_space<vmem>>, %arg10: memref<512x256xf32, #tpu.memory_space<vmem>>) attributes {dimension_semantics = [#tpu.dimension_semantics<parallel>, #tpu.dimension_semantics<parallel>, #tpu.dimension_semantics<arbitrary>], iteration_bounds = array<i64: 1, 3, 3>, scalar_prefetch = 3 : i64, scratch_operands = 0 : i64, tpu.core_type = #tpu.core_type<tc>, window_params = [{transform_indices = @transform_0, window_bounds = array<i64: 512, 512>}, {transform_indices = @transform_1, window_bounds = array<i64: 512, 256>}, {transform_indices = @transform_2, window_bounds = array<i64: 512, 256>}, {pipeline_mode = #tpu.pipeline_mode<synchronous>, transform_indices = @transform_3, window_bounds = array<i64: 3, 256, 256>}, {transform_indices = @transform_4, window_bounds = array<i64: 512, 256>}]} {
    %c0_i32 = arith.constant 0 : i32
    %0 = arith.cmpi eq, %arg2, %c0_i32 : i32
    %1 = arith.extui %0 : i1 to i32
    %c0_i32_0 = arith.constant 0 : i32
    %2 = arith.cmpi ne, %1, %c0_i32_0 : i32
    scf.if %2 {
      %c0 = arith.constant 0 : index
      %c0_5 = arith.constant 0 : index
      %11 = vector.load %arg6[%c0, %c0_5] : memref<512x512xf32, #tpu.memory_space<vmem>>, vector<512x512xf32>
      %c0_6 = arith.constant 0 : index
      %c0_7 = arith.constant 0 : index
      %12 = vector.load %arg8[%c0_6, %c0_7] : memref<512x256xf32, #tpu.memory_space<vmem>>, vector<512x256xf32>
      %cst = arith.constant dense<0.000000e+00> : vector<512x256xf32>
      %13 = tpu.matmul %11, %12, %cst {dimension_numbers = #tpu.dot_dimension_numbers<[1], [0], [0], [1], [0, 0, 1, 1], [], []>} : vector<512x512xf32>, vector<512x256xf32>, vector<512x256xf32> -> vector<512x256xf32>
      %c0_8 = arith.constant 0 : index
      %c0_9 = arith.constant 0 : index
      %14 = vector.load %arg10[%c0_8, %c0_9] : memref<512x256xf32, #tpu.memory_space<vmem>>, vector<512x256xf32>
      tpu.vector_store %arg10[%c0_8, %c0_9], %13 {strides = array<i32>} : memref<512x256xf32, #tpu.memory_space<vmem>>, vector<512x256xf32>,
    } else {
    }
    %c0_i32_1 = arith.constant 0 : i32
    %3 = arith.cmpi sgt, %arg2, %c0_i32_1 : i32
    %c1_i32 = arith.constant 1 : i32
    %4 = arith.cmpi slt, %arg2, %c1_i32 : i32
    %5 = arith.andi %3, %4 : i1
    %6 = arith.extui %5 : i1 to i32
    %c0_i32_2 = arith.constant 0 : i32
    %7 = arith.cmpi ne, %6, %c0_i32_2 : i32
    scf.if %7 {
      %c0 = arith.constant 0 : index
      %c0_5 = arith.constant 0 : index
      %11 = vector.load %arg10[%c0, %c0_5] : memref<512x256xf32, #tpu.memory_space<vmem>>, vector<512x256xf32>
      %c0_6 = arith.constant 0 : index
      %c0_7 = arith.constant 0 : index
      %12 = vector.load %arg6[%c0_6, %c0_7] : memref<512x512xf32, #tpu.memory_space<vmem>>, vector<512x512xf32>
      %c0_8 = arith.constant 0 : index
      %c0_9 = arith.constant 0 : index
      %13 = vector.load %arg8[%c0_8, %c0_9] : memref<512x256xf32, #tpu.memory_space<vmem>>, vector<512x256xf32>
      %cst = arith.constant dense<0.000000e+00> : vector<512x256xf32>
      %14 = tpu.matmul %12, %13, %cst {dimension_numbers = #tpu.dot_dimension_numbers<[1], [0], [0], [1], [0, 0, 1, 1], [], []>} : vector<512x512xf32>, vector<512x256xf32>, vector<512x256xf32> -> vector<512x256xf32>
      %15 = arith.addf %11, %14 : vector<512x256xf32>
      %c0_10 = arith.constant 0 : index
      %c0_11 = arith.constant 0 : index
      %16 = vector.load %arg10[%c0_10, %c0_11] : memref<512x256xf32, #tpu.memory_space<vmem>>, vector<512x256xf32>
      tpu.vector_store %arg10[%c0_10, %c0_11], %15 {strides = array<i32>} : memref<512x256xf32, #tpu.memory_space<vmem>>, vector<512x256xf32>,
    } else {
    }
    %c1_i32_3 = arith.constant 1 : i32
    %8 = arith.cmpi sge, %arg2, %c1_i32_3 : i32
    %9 = arith.extui %8 : i1 to i32
    %c0_i32_4 = arith.constant 0 : i32
    %10 = arith.cmpi ne, %9, %c0_i32_4 : i32
    scf.if %10 {
      %c1_i32_5 = arith.constant 1 : i32
      %11 = arith.subi %arg2, %c1_i32_5 : i32
      %12 = arith.index_cast %arg1 : i32 to index
      %13 = memref.load %arg3[%12] : memref<3xi32, #tpu.memory_space<smem>>
      %14 = arith.cmpi slt, %11, %13 : i32
      %15 = arith.extui %14 : i1 to i32
      %c0_i32_6 = arith.constant 0 : i32
      %16 = arith.cmpi ne, %15, %c0_i32_6 : i32
      scf.if %16 {
        %c2_i32 = arith.constant 2 : i32
        %17 = arith.muli %arg1, %c2_i32 : i32
        %18 = arith.addi %17, %11 : i32
        %19 = arith.index_cast %18 : i32 to index
        %20 = memref.load %arg5[%19] : memref<6xi32, #tpu.memory_space<smem>>
        %c0 = arith.constant 0 : index
        %c0_7 = arith.constant 0 : index
        %21 = vector.load %arg10[%c0, %c0_7] : memref<512x256xf32, #tpu.memory_space<vmem>>, vector<512x256xf32>
        %c0_8 = arith.constant 0 : index
        %c0_9 = arith.constant 0 : index
        %22 = vector.load %arg7[%c0_8, %c0_9] : memref<512x256xf32, #tpu.memory_space<vmem>>, vector<512x256xf32>
        %23 = arith.index_cast %20 : i32 to index
        %c0_10 = arith.constant 0 : index
        %c0_11 = arith.constant 0 : index
        %24 = vector.load %arg9[%23, %c0_10, %c0_11] : memref<3x256x256xf32, #tpu.memory_space<vmem>>, vector<1x256x256xf32>
        %25 = vector.shape_cast %24 : vector<1x256x256xf32> to vector<256x256xf32>
        %cst = arith.constant dense<0.000000e+00> : vector<512x256xf32>
        %26 = tpu.matmul %22, %25, %cst {dimension_numbers = #tpu.dot_dimension_numbers<[1], [0], [0], [1], [0, 0, 1, 1], [], []>} : vector<512x256xf32>, vector<256x256xf32>, vector<512x256xf32> -> vector<512x256xf32>
        %27 = arith.addf %21, %26 : vector<512x256xf32>
        %c0_12 = arith.constant 0 : index
        %c0_13 = arith.constant 0 : index
        %28 = vector.load %arg10[%c0_12, %c0_13] : memref<512x256xf32, #tpu.memory_space<vmem>>, vector<512x256xf32>
        tpu.vector_store %arg10[%c0_12, %c0_13], %27 {strides = array<i32>} : memref<512x256xf32, #tpu.memory_space<vmem>>, vector<512x256xf32>,
      } else {
      }
    } else {
    }
    return
  }
  func.func @transform_0(%arg0: i32, %arg1: i32, %arg2: i32, %arg3: memref<3xi32, #tpu.memory_space<smem>>, %arg4: memref<6xi32, #tpu.memory_space<smem>>, %arg5: memref<6xi32, #tpu.memory_space<smem>>) -> (i32, i32) {
    %c0_i32 = arith.constant 0 : i32
    %0 = arith.minsi %arg2, %c0_i32 : i32
    %c0_i32_0 = arith.constant 0 : i32
    return %arg0, %0 : i32, i32
  }
  func.func @transform_1(%arg0: i32, %arg1: i32, %arg2: i32, %arg3: memref<3xi32, #tpu.memory_space<smem>>, %arg4: memref<6xi32, #tpu.memory_space<smem>>, %arg5: memref<6xi32, #tpu.memory_space<smem>>) -> (i32, i32) {
    %c1_i32 = arith.constant 1 : i32
    %0 = arith.subi %arg2, %c1_i32 : i32
    %c0_i32 = arith.constant 0 : i32
    %c1_i32_0 = arith.constant 1 : i32
    %1 = arith.maxsi %c0_i32, %0 : i32
    %2 = arith.minsi %c1_i32_0, %1 : i32
    %c2_i32 = arith.constant 2 : i32
    %3 = arith.muli %arg1, %c2_i32 : i32
    %4 = arith.addi %3, %2 : i32
    %5 = arith.index_cast %4 : i32 to index
    %6 = memref.load %arg4[%5] : memref<6xi32, #tpu.memory_space<smem>>
    %c0_i32_1 = arith.constant 0 : i32
    return %arg0, %6 : i32, i32
  }
  func.func @transform_2(%arg0: i32, %arg1: i32, %arg2: i32, %arg3: memref<3xi32, #tpu.memory_space<smem>>, %arg4: memref<6xi32, #tpu.memory_space<smem>>, %arg5: memref<6xi32, #tpu.memory_space<smem>>) -> (i32, i32) {
    %c0_i32 = arith.constant 0 : i32
    %0 = arith.minsi %arg2, %c0_i32 : i32
    %c0_i32_0 = arith.constant 0 : i32
    return %0, %arg1 : i32, i32
  }
  func.func @transform_3(%arg0: i32, %arg1: i32, %arg2: i32, %arg3: memref<3xi32, #tpu.memory_space<smem>>, %arg4: memref<6xi32, #tpu.memory_space<smem>>, %arg5: memref<6xi32, #tpu.memory_space<smem>>) -> (i32, i32, i32) {
    %c0_i32 = arith.constant 0 : i32
    %c0_i32_0 = arith.constant 0 : i32
    %c0_i32_1 = arith.constant 0 : i32
    %c0_i32_2 = arith.constant 0 : i32
    return %c0_i32, %c0_i32_0, %c0_i32_1 : i32, i32, i32
  }
  func.func @transform_4(%arg0: i32, %arg1: i32, %arg2: i32, %arg3: memref<3xi32, #tpu.memory_space<smem>>, %arg4: memref<6xi32, #tpu.memory_space<smem>>, %arg5: memref<6xi32, #tpu.memory_space<smem>>) -> (i32, i32) {
    %c0_i32 = arith.constant 0 : i32
    return %arg0, %arg1 : i32, i32
  }
}

</mosaic_0001>

<bundles_post_ra>
// kernel: tpu_custom_call.1
= control target key start
LH: loop header
LB: loop body
LE: loop exit
PB: predicated region body
PF: predicated region fallthrough
CT: control target
= control target key end

     0   :  { %s5341_s24 = smov [#allocation3]   ;;  %s5342_s27 = smov [#allocation4]   ;;  %s7429_s0 = inlined_call_operand.hbm [shape: s32[3], index: 0, kind: input, shape index: {}]   ;;  %s7430_s3 = inlined_call_operand.hbm [shape: f32[512,512], index: 3, kind: input, shape index: {}]   ;;  %s7431_s4 = inlined_call_operand.hbm [shape: f32[512,512], index: 4, kind: input, shape index: {}]   ;;  %s7432_s5 = inlined_call_operand.hbm [shape: f32[512,768], index: 5, kind: input, shape index: {}]   ;;  %s7433_s6 = inlined_call_operand.hbm [shape: f32[3,256,256], index: 6, kind: input, shape index: {}]   ;;  %s7434_s7 = inlined_call_operand.hbm [shape: f32[512,768], index: 7, kind: output, shape index: {}]   ;;  %s7435_s1 = inlined_call_operand.hbm [shape: s32[6], index: 1, kind: input, shape index: {}]   ;;  %s7436_s2 = inlined_call_operand.hbm [shape: s32[6], index: 2, kind: input, shape index: {}]  }
   0x1   :  { %7461 = sst [smem:[#allocation34_spill]] %s7430_s3  ;;  %s5343_s30 = smov [#allocation5]  }
   0x2   :  { %7462 = sst [smem:[#allocation35_spill]] %s7431_s4 }
   0x3   :  { %7463 = sst [smem:[#allocation36_spill]] %s7432_s5 }
   0x4   :  { %7464 = sst [smem:[#allocation37_spill]] %s7433_s6 }
   0x5   :  { %7465 = sst [smem:[#allocation38_spill]] %s7434_s7 }
   0x6   :  { %13 = dma.hbm_to_smem %s7429_s0, 16, %s5341_s24, [#allocation2] }
   0x7   :  { %15 = dma.hbm_to_smem %s7435_s1, 16, %s5342_s27, [#allocation2] }
   0x8   :  { %17 = dma.hbm_to_smem %s7436_s2, 16, %s5343_s30, [#allocation2] }
   0x9   :  { %5253 = dma.done.wait [#allocation2], 48 }
   0xa   :  { %5254 = vsyncadd [#allocation2], 4294967248 }
   0xb   :  { %19 = sfence }
   0xc   :  { %20 = vsyncpa [#allocation7], 0 }
   0xd   :  { %22 = vsyncpa [#allocation7 + $0x1], 0 }
   0xe   :  { %23 = vsyncpa [#allocation10], 0 }
   0xf   :  { %25 = vsyncpa [#allocation10 + $0x1], 0 }
  0x10   :  { %26 = vsyncpa [#allocation13], 0 }
  0x11   :  { %27 = vsyncpa [#allocation8], 0 }
  0x12   :  { %29 = vsyncpa [#allocation8 + $0x1], 0  ;;  %s5406_s0 = smov 0   ;;  %s5408_s10 = smov 0  }
  0x13   :  { %s5410_s1 = smov 0   ;;  %s5412_s11 = smov 0  }
  0x14   :  { %s5414_s12 = smov 0   ;;  %s5416_s2 = smov 0  }
  0x15   :  { %s5418_s13 = smov 0   ;;  %s5420_s14 = smov 0  }
  0x16   :  { %s5422_s15 = smov 0   ;;  %s5424_s16 = smov 0  }
  0x17   :  { %s5426_s17 = smov 0   ;;  %s5428_s18 = smov 0  }
  0x18   :  { %s5430_s19 = smov 0   ;;  %s5432_s20 = smov 0  }
  0x19   :  { %s5434_s21 = smov 0   ;;  %s5436_s22 = smov 0  }
  0x1a LB: > { %7466 = sst [smem:[#allocation23_spill]] %s5287_s1  ;;  %s47_s23 = sadd.s32 1, %s5331_s20  ;;  %s5339_s22 = sphi %s5436_s22, %s35_s22   ;;  %s5335_s21 = sphi %s5434_s21, %s7531_s21   ;;  %s5331_s20 = sphi %s5432_s20, %s7530_s20   ;;  %s5327_s19 = sphi %s5430_s19, %s7529_s19   ;;  %s5323_s18 = sphi %s5428_s18, %s7528_s18   ;;  %s5319_s17 = sphi %s5426_s17, %s7411_s17   ;;  %s5315_s16 = sphi %s5424_s16, %s7539_s16   ;;  %s5311_s15 = sphi %s5422_s15, %s7527_s15   ;;  %s5307_s14 = sphi %s5420_s14, %s7538_s14   ;;  %s5303_s13 = sphi %s5418_s13, %s7537_s13   ;;  %s5299_s2 = sphi %s5416_s2, %s7536_s2   ;;  %s5295_s12 = sphi %s5414_s12, %s7535_s12   ;;  %s5291_s11 = sphi %s5412_s11, %s7534_s11   ;;  %s5287_s1 = sphi %s5410_s1, %s7524_s1   ;;  %s5283_s10 = sphi %s5408_s10, %s7533_s10   ;;  %s5279_s0 = sphi %s5406_s0, %s7532_s0  }
  0x1b   : > { %7467 = sst [smem:[#allocation24_spill]] %s5299_s2  ;;  %s50_s24 = sadd.s32 1, %s5335_s21 }
  0x1c   : > { %7468 = sst [smem:[#allocation25_spill]] %s5311_s15  ;;  %p48_p0 = scmp.ge.s32.totalorder %s47_s23, 3 }
  0x1d   : > { %7469 = sst [smem:[#allocation26_spill]] %s5323_s18  ;;  %p7448_p1 = scmp.eq.s32.totalorder %s5339_s22, 0 }
  0x1e   : > { %7470 = sst [smem:[#allocation27_spill]] %s5327_s19  ;;  %s4711_s25 = sadd.s32 4294967295, %s5331_s20 }
  0x1f   : > { %7471 = sst [smem:[#allocation28_spill]] %s5331_s20  ;;  %s4717_s26 = sshll.u32 %s5335_s21, 1 }
  0x20   : > { %7472 = sst [smem:[#allocation29_spill]] %s5335_s21  ;;  %s7541_s23 = smov (%p48_p0, %s47_s23), 0 }
  0x21   : > { %7473 = sst [smem:[#allocation30_spill]] %s7541_s23  ;;  %s7543_s24 = smov (!%p48_p0, %s50_s24), %s5335_s21 }
  0x22   : > { %p91_p2 = scmp.gt.s32.totalorder %s4711_s25, 0  ;;  %p4712_p3 = scmp.lt.s32.totalorder %s4711_s25, 1 }
  0x23   : > { %p52_p4 = scmp.ge.s32.totalorder %s7543_s24, 3  ;;  %s4718_s27 = sadd.s32 4294967295, %s7541_s23 }
  0x24   : > { %s7545_s25 = smov (!%p91_p2, %s4711_s25), 0  ;;  %p99_p5 = scmp.gt.s32.totalorder %s4718_s27, 0 }
  0x25   : > { %s7547_s24 = smov (%p52_p4, %s7543_s24), 0  ;;  %s7549_s25 = smov (!%p4712_p3, %s7545_s25), 1 }
  0x26   : > { %7474 = sst [smem:[#allocation31_spill]] %s7547_s24  ;;  %p4719_p6 = scmp.lt.s32.totalorder %s4718_s27, 1 }
  0x27   : > { %s96_s28 = sadd.s32 %s7549_s25, %s4717_s26  ;;  %s4724_s29 = sshll.u32 %s7547_s24, 1 }
  0x28   : > { %s97_s30 = sld [smem:[#allocation4 + %s96_s28]]  ;;  %s111_s8 = sadd.s32 1, %s5311_s15 }
  0x29   : > { %s7551_s27 = smov (!%p99_p5, %s4718_s27), 0  ;;  %p118_p7 = scmp.ne.s32.totalorder %s5311_s15, %s5307_s14 }
  0x2a   : > { %s7553_s27 = smov (!%p4719_p6, %s7551_s27), 1  ;;  %p7447_p10 = scmp.lt.s32.totalorder %s5339_s22, 9 }
  0x2b   : > { %p5505_p9 = por %p118_p7, %p7448_p1  ;;  %s104_s23 = sadd.s32 %s7553_s27, %s4724_s29 }
  0x2c   : > { %s105_s25 = sld [smem:[#allocation4 + %s104_s23]]  ;;  %s268_s26 = sand.u32 1, %s5339_s22  }
  0x2d   : > { %s270_s20 = sand.u32 1, %s5311_s15   ;;  %p5516_p11 = pnand %p7447_p10, %p5505_p9 }
  0x2e   : > { %s4731_s7 = sshll.u32 %s270_s20, 10  ;;  %s7555_s28 = smov (!%p5505_p9, %s96_s28), 0 }
  0x2f   : > { %s4842_s18 = scalar_select %p5505_p9, [#allocation4], [#allocation15] }
  0x30   : > { %s272_s2 = scalar_lea.vmem [#allocation9], %s4731_s7  ;;  %s7559_s28 = smov (!%p7447_p10, %s7555_s28), 0 }
  0x31   : > { %s290_s3 = sshll.u32 %s272_s2, 4  ;;  %s7557_s18 = smov (!%p7447_p10, %s4842_s18), [#allocation16]  ;;  %s5522_s3 = int_to_ptr.vmem [resolvable:$true] %s290_s3 }
  0x32   : > { %s107_s5 = ssub.s32 %s97_s30, %s105_s25  ;;  %s280_s20 = sld [smem:[%s7557_s18 + %s7559_s28]] }
  0x33   : > { %p109_p12 = scmp.eq.s32.totalorder %s107_s5, 0  ;;  %s7478_s4 = sld [smem:[#allocation35_spill]] }
  0x34   : > { %s5538_s5 = scalar_lea.sflag [#allocation10], %s268_s26  ;;  %p5051_p0 = pneg %p5516_p11 }
  0x35   : > { %s5527_s23 = scalar_select %p109_p12, %s5311_s15, %s111_s8  }
  0x37   : > { %7477 = sst [smem:[#allocation32_spill]] %s5527_s23 }
  0x38   : > { %s4771_s27 = sshll.u32 %s280_s20, 8 }
  0x39   : > { %s5536_s24 = scalar_lea.hbm %s7478_s4, %s4771_s27  ;;  %s5054_s18 = scalar_lea.hbm %s7478_s4, 32768 }
  0x3a   : > { %s5049_s7 = scalar_lea.hbm %s5536_s24, 16384  ;;  %p5055_p4 = scmp.lt.s32.totalorder %s5536_s24, %s7478_s4 }
  0x3b   : > { %p5050_p13 = scmp.ne.s32.totalorder %s5536_s24, %s5049_s7  ;;  %p5056_p5 = scmp.lt.s32.totalorder %s5054_s18, %s5049_s7 }
  0x3d   : > { %p5052_p2 = pnand %p5051_p0, %p5050_p13  ;;  %p5057_p6 = por %p5056_p5, %p5055_p4 }
  0x3f   : > { %p5053_p3 = pneg %p5052_p2 }
  0x41   : > { %p5058_p7 = pnand %p5057_p6, %p5053_p3 }
  0x43   : > { %5061 = shalt.err (!%p5058_p7)
}
  0x44   : > { %s5062_s21 = scalar_lea.vmem %s5522_s3, 16384  ;;  %s5344_s9 = smov [#allocation9]  }
  0x45   : > { %p5063_p9 = scmp.ne.s32.totalorder %s5522_s3, %s5062_s21  ;;  %s5067_s25 = sshll.u32 %s5344_s9, 4  ;;  %s5068_s25 = int_to_ptr.vmem [resolvable:$false] %s5067_s25 }
  0x46   : > { %s5069_s26 = scalar_lea.vmem %s5068_s25, 32768  ;;  %p5070_p2 = scmp.lt.s32.totalorder %s5522_s3, %s5068_s25 }
  0x47   : > { %p5065_p12 = pnand %p5063_p9, %p5051_p0  ;;  %p5071_p10 = scmp.lt.s32.totalorder %s5069_s26, %s5062_s21 }
  0x49   : > { %p5066_p13 = pneg %p5065_p12  ;;  %p5072_p1 = por %p5071_p10, %p5070_p2 }
  0x4b   : > { %p5073_p8 = pnand %p5072_p1, %p5066_p13 }
  0x4d   : > { %5076 = shalt.err (!%p5073_p8)
}
  0x4e   : > { %s7453_s20 = smov 512   ;;  %s7451_s27 = smov 256  }
  0x4f   : > { %s7452_s29 = smov 16   ;;  %s5563_s7 = sadd.s32 4294967295, %s5339_s22  }
  0x50   : > { %4865 = dma.hbm_to_vmem [thread:$0]  (!%p5516_p11), %s5536_s24, 16384, %s5522_s3, %s5538_s5, %s7453_s20, %s7451_s27, %s7452_s29  }
  0x51   : > { %s4710_s2 = sadd.s32 4294967294, %s5339_s22   ;;  %p7454_p1 = scmp.eq.s32.totalorder %s5563_s7, 0 }
  0x52   : > { %p156_p8 = scmp.ne.s32.totalorder %s5295_s12, %s5291_s11  ;;  %p202_p10 = scmp.ne.s32.totalorder %s5287_s1, %s5283_s10 }
  0x53   : > { %p203_p0 = scmp.eq.s32.totalorder %s5563_s7, 8  ;;  %p7479_p3 = scmp.ne.s32.totalorder %s5307_s14, %s5303_s13 }
  0x54   : > { %p5583_p11 = por %p156_p8, %p7454_p1  ;;  %p208_p6 = scmp.ne.s32.totalorder %s5283_s10, %s5279_s0 }
  0x55   : > { %p5577_p4 = por %p7479_p3, %p7454_p1  ;;  %p5587_p5 = por %p203_p0, %p202_p10 }
  0x56   : > { %s7481_s3 = scalar_select %p5583_p11, 1, 0 }
  0x57   : > { %s7480_s19 = scalar_select %p5577_p4, 1, 0 }
  0x58   : > { %s7482_s24 = scalar_select %p5587_p5, 1, 0 }
  0x59   : > { %p209_p7 = scmp.eq.s32.totalorder %s4710_s2, 8  ;;  %p4725_p9 = scmp.ge.s32.totalorder %s5339_s22, 1 }
  0x5a   : > { %p216_p12 = scmp.lt.s32.totalorder %s5339_s22, 10  ;;  %s5348_s30 = smov [#allocation12]  }
  0x5b   : > { %p5595_p13 = por %p209_p7, %p208_p6  ;;  %s228_s18 = sshll.u32 %s5348_s30, 4  ;;  %s229_s18 = int_to_ptr.vmem [resolvable:$true] %s228_s18 }
  0x5c   : > { %p5599_p2 = pnand %p4725_p9, %p216_p12  ;;  %s5088_s28 = scalar_lea.vmem %s229_s18, 24576 }
  0x5d   : > { %s7483_s11 = scalar_select %p5595_p13, 1, 0 }
  0x5e   : > { %s7484_s13 = scalar_select %p5599_p2, 1, 0 }
  0x5f   : > { %p4853_p8 = pneg %p5599_p2  ;;  %p5089_p3 = scmp.ne.s32.totalorder %s229_s18, %s5088_s28 }
  0x60   : > { %p5096_p7 = scmp.lt.s32.totalorder %s229_s18, %s229_s18  ;;  %p5097_p11 = scmp.lt.s32.totalorder %s5088_s28, %s5088_s28 }
  0x61   : > { %p4854_p10 = pnand %p4853_p8, %p7454_p1 }
  0x62   : > { %p5098_p13 = por %p5097_p11, %p5096_p7 }
  0x63   : > { %p5079_p0 = pneg %p4854_p10 }
  0x65   : > { %p5091_p5 = pnand %p5089_p3, %p5079_p0 }
  0x67   : > { %p5092_p6 = pneg %p5091_p5 }
  0x69   : > { %p5099_p9 = pnand %p5098_p13, %p5092_p6 }
  0x6b   : > { %5102 = shalt.err (!%p5099_p9)
}
  0x6c   : > { %s7485_s6 = sld [smem:[#allocation37_spill]]  ;;  %p5276_p11 = scmp.ne.s32.totalorder %s5319_s17, 0 }
  0x6d   : > { %s7486_s9 = sld [smem:[#allocation31_spill]]  ;;  %p80_p5 = scmp.ne.s32.totalorder %s5319_s17, %s5315_s16 }
  0x6e   : > { %s7487_s25 = sld [smem:[#allocation29_spill]]  ;;  %p7488_p12 = scmp.eq.s32.totalorder %s5339_s22, 0 }
  0x6f   : > { %p5620_p8 = por %p7454_p1, %p80_p5  ;;  %s192_s28 = sadd.s32 1, %s5287_s1 }
  0x70   : > { %p76_p13 = por %p5276_p11, %p7488_p12 }
  0x71   : > { %s7489_s26 = scalar_select %p5620_p8, 1, 0 }
  0x72   : > { %4856 = dma.hbm_to_vmem [thread:$0]  (!%p4854_p10), %s7485_s6, 24576, %s229_s18, [#allocation13], %s7451_s27, %s7451_s27, %s7452_s29  }
  0x73   : > { %s5349_s18 = smov [#allocation6]   ;;  %p7492_p10 = scmp.lt.s32.totalorder %s5339_s22, 9 }
  0x74   : > { %s139_s2 = ssub.s32 %s7487_s25, %s7486_s9  ;;  %s258_s21 = sshll.u32 %s5349_s18, 4  ;;  %s259_s21 = int_to_ptr.vmem [resolvable:$true] %s258_s21 }
  0x75   : > { %p5626_p0 = scmp.eq.s32.totalorder %s139_s2, 0  ;;  %p5638_p3 = pnand %p7492_p10, %p76_p13 }
  0x76   : > { %s7494_s2 = sld [smem:[#allocation34_spill]] }
  0x77   : > { %s7490_s30 = scalar_select %p5626_p0, 1, 0 }
  0x78   : > { %s5634_s8 = scalar_select %p5626_p0, %s5287_s1, %s192_s28  }
  0x79   : > { %p5105_p7 = pneg %p5638_p3 }
  0x7a   : > { %7491 = sst [smem:[#allocation33_spill]] %s5634_s8 }
  0x7c   : > { %s7495_s29 = smov %s7494_s2  ;;  %s5103_s20 = scalar_lea.hbm %s7494_s2, 32768 }
  0x7d   : > { %p5104_p6 = scmp.ne.s32.totalorder %s7495_s29, %s5103_s20  ;;  %p5110_p5 = scmp.lt.s32.totalorder %s5103_s20, %s5103_s20 }
  0x7f   : > { %p5106_p9 = pnand %p5105_p7, %p5104_p6 }
  0x81   : > { %p5107_p11 = pneg %p5106_p9 }
  0x83   : > { %p5112_p12 = pnand %p5110_p5, %p5107_p11 }
  0x85   : > { %5115 = shalt.err (!%p5112_p12)
}
  0x86   : > { %s5116_s28 = scalar_lea.vmem %s259_s21, 32768  ;;  %s5123_s18 = scalar_lea.vmem %s259_s21, 65536 }
  0x87   : > { %p5117_p13 = scmp.ne.s32.totalorder %s259_s21, %s5116_s28  ;;  %p5124_p4 = scmp.lt.s32.totalorder %s259_s21, %s259_s21 }
  0x88   : > { %p5125_p8 = scmp.lt.s32.totalorder %s5123_s18, %s5116_s28 }
  0x89   : > { %p5119_p10 = pnand %p5117_p13, %p5105_p7 }
  0x8a   : > { %p5126_p2 = por %p5125_p8, %p5124_p4 }
  0x8b   : > { %p5120_p1 = pneg %p5119_p10 }
  0x8d   : > { %p5127_p0 = pnand %p5126_p2, %p5120_p1 }
  0x8f   : > { %5130 = shalt.err (!%p5127_p0)
}
  0x90   : > { %s5350_s27 = smov 32   ;;  %s7496_s4 = smov 512  }
  0x91   : > { %s7497_s20 = sld [smem:[#allocation24_spill]]  ;;  %s5275_s2 = sshll.u32 %s7487_s25, 8 }
  0x92   : > { %4860 = dma.hbm_to_vmem [thread:$0]  (!%p5638_p3), %s7495_s29, 32768, %s259_s21, [#allocation7], %s7496_s4, %s7496_s4, %s5350_s27  }
  0x93   : > { %p7498_p4 = scmp.ne.s32.totalorder %s7490_s30, 0  ;;  %p7499_p2 = scmp.eq.s32.totalorder %s5339_s22, 0 }
  0x94   : > { %s7500_s15 = sld [smem:[#allocation36_spill]]  ;;  %p7502_p0 = scmp.lt.s32.totalorder %s5339_s22, 9 }
  0x97   : > { %s143_s28 = sadd.s32 1, %s7497_s20  ;;  %p150_p1 = scmp.ne.s32.totalorder %s7497_s20, %s5295_s12 }
  0x98   : > { %s5664_s16 = scalar_select %p7498_p4, %s7497_s20, %s143_s28  }
  0x99   : > { %p152_p8 = por %p150_p1, %p7499_p2  ;;  %s302_s18 = sand.u32 1, %s7497_s20  }
  0x9a   : > { %s4741_s6 = sshll.u32 %s302_s18, 10  ;;  %s7501_s8 = smov %s7500_s15 }
  0x9b   : > { %s5672_s1 = scalar_lea.hbm %s7500_s15, %s5275_s2  ;;  %p5676_p6 = pnand %p7502_p0, %p152_p8 }
  0x9c   : > { %s304_s25 = scalar_lea.vmem [#allocation11], %s4741_s6  ;;  %s5131_s27 = scalar_lea.hbm %s5672_s1, 16384 }
  0x9d   : > { %s316_s30 = sshll.u32 %s304_s25, 4  ;;  %p5132_p3 = scmp.ne.s32.totalorder %s5672_s1, %s5131_s27  ;;  %s317_s30 = int_to_ptr.vmem [resolvable:$true] %s316_s30 }
  0x9e   : > { %p5133_p7 = pneg %p5676_p6  ;;  %s5136_s4 = scalar_lea.hbm %s7501_s8, 49152 }
  0x9f   : > { %p5138_p5 = scmp.lt.s32.totalorder %s5136_s4, %s5131_s27 }
  0xa0   : > { %p5134_p9 = pnand %p5133_p7, %p5132_p3 }
  0xa2   : > { %p5135_p11 = pneg %p5134_p9 }
  0xa4   : > { %p5140_p12 = pnand %p5138_p5, %p5135_p11 }
  0xa6   : > { %5143 = shalt.err (!%p5140_p12)
}
  0xa7   : > { %s5144_s20 = scalar_lea.vmem %s317_s30, 16384  ;;  %s5351_s2 = smov [#allocation11]  }
  0xa8   : > { %p5145_p13 = scmp.ne.s32.totalorder %s317_s30, %s5144_s20  ;;  %s5149_s28 = sshll.u32 %s5351_s2, 4  ;;  %s5150_s28 = int_to_ptr.vmem [resolvable:$false] %s5149_s28 }
  0xa9   : > { %s5151_s18 = scalar_lea.vmem %s5150_s28, 32768  ;;  %p5152_p4 = scmp.lt.s32.totalorder %s317_s30, %s5150_s28 }
  0xaa   : > { %p5147_p10 = pnand %p5145_p13, %p5133_p7  ;;  %p5153_p2 = scmp.lt.s32.totalorder %s5151_s18, %s5144_s20 }
  0xac   : > { %p5148_p1 = pneg %p5147_p10  ;;  %p5154_p8 = por %p5153_p2, %p5152_p4 }
  0xae   : > { %p5155_p0 = pnand %p5154_p8, %p5148_p1 }
  0xb0   : > { %5158 = shalt.err (!%p5155_p0)
}
  0xb1   : > { %s5352_s6 = smov 768   ;;  %s7504_s9 = smov 16  }
  0xb2   : > { %s7505_s25 = smov 256   ;;  %p7506_p3 = scmp.ne.s32.totalorder %s7484_s13, 0 }
  0xb3   : > { %4868 = dma.hbm_to_vmem [thread:$0]  (!%p5676_p6), %s5672_s1, 16384, %s317_s30, %s5538_s5, %s5352_s6, %s7505_s25, %s7504_s9  }
  0xb4   : > { %328 = sbr.rel (%p7506_p3) target bundleno = 1707 (0x6ab), region = 36  ;;  %s330_s27 = sand.u32 (!%p7506_p3), 1, %s5319_s17  }
  0xb5   : > { %s4747_s23 = sshll.u32 (!%p7506_p3), %s330_s27, 11  ;;  %s331_s15 = scalar_lea.sflag (!%p7506_p3), [#allocation7], %s330_s27 }
  0xb6   : > { %s5696_s4 = scalar_lea.vmem (!%p7506_p3), [#allocation6], %s4747_s23  ;;  %p7507_p7 = scmp.ne.s32.totalorder (!%p7506_p3), %s7489_s26, 0 }
  0xb9   : > { %5256 = dma.done.wait (%p7507_p7), %s331_s15, 32768  }
  0xba   : > { %5258 = vsyncadd (%p7507_p7), %s331_s15, 4294934528  ;;  %s339_s21 = sand.u32 1, %s5563_s7   ;;  %s341_s1 = sand.u32 1, %s5307_s14  }
  0xbb   : > { %s4748_s5 = sshll.u32 %s341_s1, 10  ;;  %s340_s13 = scalar_lea.sflag [#allocation10], %s339_s21 }
  0xbc   : > { %s5704_s30 = scalar_lea.vmem [#allocation9], %s4748_s5  ;;  %p7508_p6 = scmp.ne.s32.totalorder %s7480_s19, 0 }
  0xbe   : > { %5260 = dma.done.wait (%p7508_p6), %s340_s13, 16384  }
  0xbf   : > { %5262 = vsyncadd (%p7508_p6), %s340_s13, 4294950912  ;;  %s350_s20 = sand.u32 1, %s5295_s12   ;;  %p7509_p9 = scmp.ne.s32.totalorder %s7481_s3, 0 }
  0xc0   : > { %s4749_s2 = sshll.u32 %s350_s20, 10 }
  0xc1   : > { %s5711_s26 = scalar_lea.vmem [#allocation11], %s4749_s2 }
  0xc2   : > { %5264 = dma.done.wait (%p7509_p9), %s340_s13, 16384  }
  0xc3   : > { %5266 = vsyncadd (%p7509_p9), %s340_s13, 4294950912  ;;  %p7510_p11 = scmp.eq.s32.totalorder %s5563_s7, 0 }
  0xc5   : > { %5268 = dma.done.wait (%p7510_p11), [#allocation13], 24576   ;;  %p7511_p5 = pmov %p7510_p11 }
  0xc6   : > { %s388_s19 = sand.u32 1, %s5283_s10   ;;  %s7512_s6 = sld [smem:[#allocation26_spill]] }
  0xc7   : > { %5270 = vsyncadd (%p7511_p5), [#allocation13], 4294942720  ;;  %s4751_s28 = sshll.u32 %s388_s19, 10 }
  0xc8   : > { %s5724_s18 = scalar_lea.vmem [#allocation14], %s4751_s28 }
  0xcc   : > { %p4752_p12 = scmp.ne.s32.totalorder %s7512_s6, 0 }
  0xce   : > { %414 = sbr.rel (%p4752_p12) target bundleno = 728 (0x2d8), region = 56 }
  0xd3   : > { %v702_v0 = vld [vmem:[%s5711_s26 + $0xf8] sm:$0xff]  ;;  %v701_v2 = vld [vmem:[%s5711_s26 + $0xf0] sm:$0xff]  ;;  %v700_v4 = vld [vmem:[%s5711_s26 + $0xe8] sm:$0xff] }
  0xd4   : > { %v766_v1 = vld [vmem:[%s5711_s26 + $0x2f8] sm:$0xff]  ;;  %799 = vmatprep.subr.mxu0 %v702_v0  ;;  %v765_v3 = vld [vmem:[%s5711_s26 + $0x2f0] sm:$0xff]  ;;  %v764_v5 = vld [vmem:[%s5711_s26 + $0x2e8] sm:$0xff] }
  0xd5   : > { %1248 = vmatprep.subr.mxu1 %v766_v1  ;;  %800 = vmatpush1.msra.mxu0 %v701_v2  ;;  %v699_v6 = vld [vmem:[%s5711_s26 + $0xe0] sm:$0xff]  ;;  %v698_v8 = vld [vmem:[%s5711_s26 + $0xd8] sm:$0xff]  ;;  %v697_v10 = vld [vmem:[%s5711_s26 + $0xd0] sm:$0xff] }
  0xd6   : > { %1249 = vmatpush1.msra.mxu1 %v765_v3  ;;  %v763_v7 = vld [vmem:[%s5711_s26 + $0x2e0] sm:$0xff]  ;;  %801 = vmatprep.subr.mxu0 %v700_v4  ;;  %v762_v9 = vld [vmem:[%s5711_s26 + $0x2d8] sm:$0xff]  ;;  %v761_v11 = vld [vmem:[%s5711_s26 + $0x2d0] sm:$0xff] }
  0xd7   : > { %1250 = vmatprep.subr.mxu1 %v764_v5  ;;  %802 = vmatpush1.msra.mxu0 %v699_v6  ;;  %v696_v12 = vld [vmem:[%s5711_s26 + $0xc8] sm:$0xff]  ;;  %v695_v14 = vld [vmem:[%s5711_s26 + $0xc0] sm:$0xff]  ;;  %v694_v16 = vld [vmem:[%s5711_s26 + $0xb8] sm:$0xff] }
  0xd8   : > { %1251 = vmatpush1.msra.mxu1 %v763_v7  ;;  %v760_v13 = vld [vmem:[%s5711_s26 + $0x2c8] sm:$0xff]  ;;  %803 = vmatprep.subr.mxu0 %v698_v8  ;;  %v759_v15 = vld [vmem:[%s5711_s26 + $0x2c0] sm:$0xff]  ;;  %v758_v17 = vld [vmem:[%s5711_s26 + $0x2b8] sm:$0xff] }
  0xd9   : > { %1252 = vmatprep.subr.mxu1 %v762_v9  ;;  %804 = vmatpush1.msra.mxu0 %v697_v10  ;;  %v693_v18 = vld [vmem:[%s5711_s26 + $0xb0] sm:$0xff]  ;;  %v692_v20 = vld [vmem:[%s5711_s26 + $0xa8] sm:$0xff]  ;;  %v691_v22 = vld [vmem:[%s5711_s26 + $0xa0] sm:$0xff] }
  0xda   : > { %1253 = vmatpush1.msra.mxu1 %v761_v11  ;;  %805 = vmatprep.subr.mxu0 %v696_v12  ;;  %v757_v19 = vld [vmem:[%s5711_s26 + $0x2b0] sm:$0xff]  ;;  %v756_v21 = vld [vmem:[%s5711_s26 + $0x2a8] sm:$0xff]  ;;  %v755_v23 = vld [vmem:[%s5711_s26 + $0x2a0] sm:$0xff] }
  0xdb   : > { %1254 = vmatprep.subr.mxu1 %v760_v13  ;;  %806 = vmatpush1.msra.mxu0 %v695_v14  ;;  %v690_v24 = vld [vmem:[%s5711_s26 + $0x98] sm:$0xff]  ;;  %v689_v26 = vld [vmem:[%s5711_s26 + $0x90] sm:$0xff]  ;;  %v688_v28 = vld [vmem:[%s5711_s26 + $0x88] sm:$0xff] }
  0xdc   : > { %1255 = vmatpush1.msra.mxu1 %v759_v15  ;;  %807 = vmatprep.subr.mxu0 %v694_v16  ;;  %v754_v25 = vld [vmem:[%s5711_s26 + $0x298] sm:$0xff]  ;;  %v753_v27 = vld [vmem:[%s5711_s26 + $0x290] sm:$0xff]  ;;  %v752_v29 = vld [vmem:[%s5711_s26 + $0x288] sm:$0xff] }
  0xdd   : > { %1256 = vmatprep.subr.mxu1 %v758_v17  ;;  %808 = vmatpush1.msra.mxu0 %v693_v18  ;;  %v687_v30 = vld [vmem:[%s5711_s26 + $0x80] sm:$0xff]  ;;  %v686_v32 = vld [vmem:[%s5711_s26 + $0x78] sm:$0xff]  ;;  %v685_v34 = vld [vmem:[%s5711_s26 + $0x70] sm:$0xff] }
  0xde   : > { %1257 = vmatpush1.msra.mxu1 %v757_v19  ;;  %809 = vmatprep.subr.mxu0 %v692_v20  ;;  %v751_v31 = vld [vmem:[%s5711_s26 + $0x280] sm:$0xff]  ;;  %v750_v33 = vld [vmem:[%s5711_s26 + $0x278] sm:$0xff]  ;;  %v749_v35 = vld [vmem:[%s5711_s26 + $0x270] sm:$0xff] }
  0xdf   : > { %1258 = vmatprep.subr.mxu1 %v756_v21  ;;  %810 = vmatpush1.msra.mxu0 %v691_v22  ;;  %v684_v36 = vld [vmem:[%s5711_s26 + $0x68] sm:$0xff]  ;;  %v683_v38 = vld [vmem:[%s5711_s26 + $0x60] sm:$0xff]  ;;  %v682_v40 = vld [vmem:[%s5711_s26 + $0x58] sm:$0xff] }
  0xe0   : > { %1259 = vmatpush1.msra.mxu1 %v755_v23  ;;  %811 = vmatprep.subr.mxu0 %v690_v24  ;;  %v748_v37 = vld [vmem:[%s5711_s26 + $0x268] sm:$0xff]  ;;  %v747_v39 = vld [vmem:[%s5711_s26 + $0x260] sm:$0xff]  ;;  %v746_v41 = vld [vmem:[%s5711_s26 + $0x258] sm:$0xff] }
  0xe1   : > { %1260 = vmatprep.subr.mxu1 %v754_v25  ;;  %812 = vmatpush1.msra.mxu0 %v689_v26  ;;  %v681_v42 = vld [vmem:[%s5711_s26 + $0x50] sm:$0xff]  ;;  %v680_v44 = vld [vmem:[%s5711_s26 + $0x48] sm:$0xff]  ;;  %v679_v46 = vld [vmem:[%s5711_s26 + $0x40] sm:$0xff] }
  0xe2   : > { %1261 = vmatpush1.msra.mxu1 %v753_v27  ;;  %813 = vmatprep.subr.mxu0 %v688_v28  ;;  %v745_v43 = vld [vmem:[%s5711_s26 + $0x250] sm:$0xff]  ;;  %v744_v45 = vld [vmem:[%s5711_s26 + $0x248] sm:$0xff]  ;;  %v743_v47 = vld [vmem:[%s5711_s26 + $0x240] sm:$0xff] }
  0xe3   : > { %1262 = vmatprep.subr.mxu1 %v752_v29  ;;  %814 = vmatpush1.msra.mxu0 %v687_v30  ;;  %v678_v48 = vld [vmem:[%s5711_s26 + $0x38] sm:$0xff]  ;;  %v677_v50 = vld [vmem:[%s5711_s26 + $0x30] sm:$0xff]  ;;  %v676_v52 = vld [vmem:[%s5711_s26 + $0x28] sm:$0xff] }
  0xe4   : > { %1263 = vmatpush1.msra.mxu1 %v751_v31  ;;  %815 = vmatprep.subr.mxu0 %v686_v32  ;;  %v742_v49 = vld [vmem:[%s5711_s26 + $0x238] sm:$0xff]  ;;  %v741_v51 = vld [vmem:[%s5711_s26 + $0x230] sm:$0xff]  ;;  %v740_v53 = vld [vmem:[%s5711_s26 + $0x228] sm:$0xff] }
  0xe5   : > { %1264 = vmatprep.subr.mxu1 %v750_v33  ;;  %816 = vmatpush1.msra.mxu0 %v685_v34  ;;  %v675_v54 = vld [vmem:[%s5711_s26 + $0x20] sm:$0xff]  ;;  %v674_v56 = vld [vmem:[%s5711_s26 + $0x18] sm:$0xff]  ;;  %v673_v58 = vld [vmem:[%s5711_s26 + $0x10] sm:$0xff] }
  0xe6   : > { %1265 = vmatpush1.msra.mxu1 %v749_v35  ;;  %817 = vmatprep.subr.mxu0 %v684_v36  ;;  %v739_v55 = vld [vmem:[%s5711_s26 + $0x220] sm:$0xff]  ;;  %v738_v57 = vld [vmem:[%s5711_s26 + $0x218] sm:$0xff]  ;;  %v737_v59 = vld [vmem:[%s5711_s26 + $0x210] sm:$0xff] }
  0xe7   : > { %1266 = vmatprep.subr.mxu1 %v748_v37  ;;  %818 = vmatpush1.msra.mxu0 %v683_v38  ;;  %v672_v60 = vld [vmem:[%s5711_s26 + $0x8] sm:$0xff]  ;;  %v671_v62 = vld [vmem:[%s5711_s26] sm:$0xff]  ;;  %v734_v0 = vld [vmem:[%s5711_s26 + $0x1f8] sm:$0xff] }
  0xe8   : > { %1267 = vmatpush1.msra.mxu1 %v747_v39  ;;  %819 = vmatprep.subr.mxu0 %v682_v40  ;;  %v736_v61 = vld [vmem:[%s5711_s26 + $0x208] sm:$0xff]  ;;  %v735_v63 = vld [vmem:[%s5711_s26 + $0x200] sm:$0xff]  ;;  %v798_v1 = vld [vmem:[%s5711_s26 + $0x3f8] sm:$0xff] }
  0xe9   : > { %1268 = vmatprep.subr.mxu1 %v746_v41  ;;  %820 = vmatpush1.msra.mxu0 %v681_v42  ;;  %v733_v2 = vld [vmem:[%s5711_s26 + $0x1f0] sm:$0xff]  ;;  %v732_v4 = vld [vmem:[%s5711_s26 + $0x1e8] sm:$0xff]  ;;  %v731_v6 = vld [vmem:[%s5711_s26 + $0x1e0] sm:$0xff] }
  0xea   : > { %1269 = vmatpush1.msra.mxu1 %v745_v43  ;;  %821 = vmatprep.subr.mxu0 %v680_v44  ;;  %v797_v3 = vld [vmem:[%s5711_s26 + $0x3f0] sm:$0xff]  ;;  %v796_v5 = vld [vmem:[%s5711_s26 + $0x3e8] sm:$0xff]  ;;  %v795_v7 = vld [vmem:[%s5711_s26 + $0x3e0] sm:$0xff] }
  0xeb   : > { %1270 = vmatprep.subr.mxu1 %v744_v45  ;;  %822 = vmatpush1.msra.mxu0 %v679_v46  ;;  %v730_v8 = vld [vmem:[%s5711_s26 + $0x1d8] sm:$0xff]  ;;  %v729_v10 = vld [vmem:[%s5711_s26 + $0x1d0] sm:$0xff]  ;;  %v728_v12 = vld [vmem:[%s5711_s26 + $0x1c8] sm:$0xff] }
  0xec   : > { %1271 = vmatpush1.msra.mxu1 %v743_v47  ;;  %823 = vmatprep.subr.mxu0 %v678_v48  ;;  %v794_v9 = vld [vmem:[%s5711_s26 + $0x3d8] sm:$0xff]  ;;  %v793_v11 = vld [vmem:[%s5711_s26 + $0x3d0] sm:$0xff]  ;;  %v792_v13 = vld [vmem:[%s5711_s26 + $0x3c8] sm:$0xff] }
  0xed   : > { %1272 = vmatprep.subr.mxu1 %v742_v49  ;;  %824 = vmatpush1.msra.mxu0 %v677_v50  ;;  %v727_v14 = vld [vmem:[%s5711_s26 + $0x1c0] sm:$0xff]  ;;  %v726_v16 = vld [vmem:[%s5711_s26 + $0x1b8] sm:$0xff]  ;;  %v725_v18 = vld [vmem:[%s5711_s26 + $0x1b0] sm:$0xff] }
  0xee   : > { %1273 = vmatpush1.msra.mxu1 %v741_v51  ;;  %825 = vmatprep.subr.mxu0 %v676_v52  ;;  %v791_v15 = vld [vmem:[%s5711_s26 + $0x3c0] sm:$0xff]  ;;  %v790_v17 = vld [vmem:[%s5711_s26 + $0x3b8] sm:$0xff]  ;;  %v789_v19 = vld [vmem:[%s5711_s26 + $0x3b0] sm:$0xff] }
  0xef   : > { %1274 = vmatprep.subr.mxu1 %v740_v53  ;;  %826 = vmatpush1.msra.mxu0 %v675_v54  ;;  %v724_v20 = vld [vmem:[%s5711_s26 + $0x1a8] sm:$0xff]  ;;  %v723_v22 = vld [vmem:[%s5711_s26 + $0x1a0] sm:$0xff]  ;;  %v722_v24 = vld [vmem:[%s5711_s26 + $0x198] sm:$0xff] }
  0xf0   : > { %1275 = vmatpush1.msra.mxu1 %v739_v55  ;;  %827 = vmatprep.subr.mxu0 %v674_v56  ;;  %v788_v21 = vld [vmem:[%s5711_s26 + $0x3a8] sm:$0xff]  ;;  %v787_v23 = vld [vmem:[%s5711_s26 + $0x3a0] sm:$0xff]  ;;  %v786_v25 = vld [vmem:[%s5711_s26 + $0x398] sm:$0xff] }
  0xf1   : > { %1276 = vmatprep.subr.mxu1 %v738_v57  ;;  %828 = vmatpush1.msra.mxu0 %v673_v58  ;;  %v721_v26 = vld [vmem:[%s5711_s26 + $0x190] sm:$0xff]  ;;  %v720_v28 = vld [vmem:[%s5711_s26 + $0x188] sm:$0xff]  ;;  %v719_v30 = vld [vmem:[%s5711_s26 + $0x180] sm:$0xff] }
  0xf2   : > { %1277 = vmatpush1.msra.mxu1 %v737_v59  ;;  %829 = vmatprep.subr.mxu0 %v672_v60  ;;  %v785_v27 = vld [vmem:[%s5711_s26 + $0x390] sm:$0xff]  ;;  %v784_v29 = vld [vmem:[%s5711_s26 + $0x388] sm:$0xff]  ;;  %v783_v31 = vld [vmem:[%s5711_s26 + $0x380] sm:$0xff] }
  0xf3   : > { %1278 = vmatprep.subr.mxu1 %v736_v61  ;;  %830 = vmatpush1.msra.mxu0 %v671_v62  ;;  %v718_v32 = vld [vmem:[%s5711_s26 + $0x178] sm:$0xff]  ;;  %v717_v34 = vld [vmem:[%s5711_s26 + $0x170] sm:$0xff]  ;;  %v716_v36 = vld [vmem:[%s5711_s26 + $0x168] sm:$0xff] }
  0xf4   : > { %1279 = vmatpush1.msra.mxu1 %v735_v63  ;;  %831 = vmatprep.subr.mxu0 %v734_v0  ;;  %v782_v33 = vld [vmem:[%s5711_s26 + $0x378] sm:$0xff]  ;;  %v781_v35 = vld [vmem:[%s5711_s26 + $0x370] sm:$0xff]  ;;  %v780_v37 = vld [vmem:[%s5711_s26 + $0x368] sm:$0xff] }
  0xf5   : > { %1280 = vmatprep.subr.mxu1 %v798_v1  ;;  %832 = vmatpush2.msra.mxu0 %v733_v2  ;;  %v715_v38 = vld [vmem:[%s5711_s26 + $0x160] sm:$0xff]  ;;  %v714_v40 = vld [vmem:[%s5711_s26 + $0x158] sm:$0xff]  ;;  %v713_v42 = vld [vmem:[%s5711_s26 + $0x150] sm:$0xff] }
  0xf6   : > { %1281 = vmatpush2.msra.mxu1 %v797_v3  ;;  %833 = vmatprep.subr.mxu0 %v732_v4  ;;  %v779_v39 = vld [vmem:[%s5711_s26 + $0x360] sm:$0xff]  ;;  %v778_v41 = vld [vmem:[%s5711_s26 + $0x358] sm:$0xff]  ;;  %v777_v43 = vld [vmem:[%s5711_s26 + $0x350] sm:$0xff] }
  0xf7   : > { %1282 = vmatprep.subr.mxu1 %v796_v5  ;;  %834 = vmatpush2.msra.mxu0 %v731_v6  ;;  %v712_v44 = vld [vmem:[%s5711_s26 + $0x148] sm:$0xff]  ;;  %v711_v46 = vld [vmem:[%s5711_s26 + $0x140] sm:$0xff]  ;;  %v710_v48 = vld [vmem:[%s5711_s26 + $0x138] sm:$0xff] }
  0xf8   : > { %1283 = vmatpush2.msra.mxu1 %v795_v7  ;;  %835 = vmatprep.subr.mxu0 %v730_v8  ;;  %v776_v45 = vld [vmem:[%s5711_s26 + $0x348] sm:$0xff]  ;;  %v775_v47 = vld [vmem:[%s5711_s26 + $0x340] sm:$0xff]  ;;  %v774_v49 = vld [vmem:[%s5711_s26 + $0x338] sm:$0xff] }
  0xf9   : > { %1284 = vmatprep.subr.mxu1 %v794_v9  ;;  %836 = vmatpush2.msra.mxu0 %v729_v10  ;;  %v709_v50 = vld [vmem:[%s5711_s26 + $0x130] sm:$0xff]  ;;  %v708_v52 = vld [vmem:[%s5711_s26 + $0x128] sm:$0xff]  ;;  %v707_v54 = vld [vmem:[%s5711_s26 + $0x120] sm:$0xff] }
  0xfa   : > { %1285 = vmatpush2.msra.mxu1 %v793_v11  ;;  %837 = vmatprep.subr.mxu0 %v728_v12  ;;  %v773_v51 = vld [vmem:[%s5711_s26 + $0x330] sm:$0xff]  ;;  %v772_v53 = vld [vmem:[%s5711_s26 + $0x328] sm:$0xff]  ;;  %v771_v55 = vld [vmem:[%s5711_s26 + $0x320] sm:$0xff] }
  0xfb   : > { %1286 = vmatprep.subr.mxu1 %v792_v13  ;;  %838 = vmatpush2.msra.mxu0 %v727_v14  ;;  %v706_v56 = vld [vmem:[%s5711_s26 + $0x118] sm:$0xff]  ;;  %v705_v58 = vld [vmem:[%s5711_s26 + $0x110] sm:$0xff]  ;;  %v704_v60 = vld [vmem:[%s5711_s26 + $0x108] sm:$0xff] }
  0xfc   : > { %1287 = vmatpush2.msra.mxu1 %v791_v15  ;;  %839 = vmatprep.subr.mxu0 %v726_v16  ;;  %v770_v57 = vld [vmem:[%s5711_s26 + $0x318] sm:$0xff]  ;;  %v769_v59 = vld [vmem:[%s5711_s26 + $0x310] sm:$0xff]  ;;  %v768_v61 = vld [vmem:[%s5711_s26 + $0x308] sm:$0xff] }
  0xfd   : > { %1288 = vmatprep.subr.mxu1 %v790_v17  ;;  %840 = vmatpush2.msra.mxu0 %v725_v18  ;;  %v703_v62 = vld [vmem:[%s5711_s26 + $0x100] sm:$0xff]  ;;  %v416_v63 = vld [vmem:[%s5696_s4 + $0x8] sm:$0xff]  ;;  %v418_v1 = vld [vmem:[%s5696_s4 + $0x18] sm:$0xff] }
  0xfe   : > { %1289 = vmatpush2.msra.mxu1 %v789_v19  ;;  %841 = vmatprep.subr.mxu0 %v724_v20  ;;  %v767_v0 = vld [vmem:[%s5711_s26 + $0x300] sm:$0xff]  ;;  %v417_v3 = vld [vmem:[%s5696_s4 + $0x10] sm:$0xff]  ;;  %v420_v4 = vld [vmem:[%s5696_s4 + $0x28] sm:$0xff] }
  0xff   : > { %1290 = vmatprep.subr.mxu1 %v788_v21  ;;  %842 = vmatpush2.msra.mxu0 %v723_v22  ;;  %v415_v2 = vld [vmem:[%s5696_s4] sm:$0xff]  ;;  %v422_v5 = vld [vmem:[%s5696_s4 + $0x38] sm:$0xff]  ;;  %v421_v7 = vld [vmem:[%s5696_s4 + $0x30] sm:$0xff] }
 0x100   : > { %1291 = vmatpush2.msra.mxu1 %v787_v23  ;;  %843 = vmatprep.subr.mxu0 %v722_v24  ;;  %v419_v6 = vld [vmem:[%s5696_s4 + $0x20] sm:$0xff]  ;;  %v424_v8 = vld [vmem:[%s5696_s4 + $0x48] sm:$0xff]  ;;  %v426_v9 = vld [vmem:[%s5696_s4 + $0x58] sm:$0xff] }
 0x101   : > { %1292 = vmatprep.subr.mxu1 %v786_v25  ;;  %844 = vmatpush2.msra.mxu0 %v721_v26  ;;  %v423_v10 = vld [vmem:[%s5696_s4 + $0x40] sm:$0xff]  ;;  %v425_v11 = vld [vmem:[%s5696_s4 + $0x50] sm:$0xff]  ;;  %v428_v12 = vld [vmem:[%s5696_s4 + $0x68] sm:$0xff] }
 0x102   : > { %1293 = vmatpush2.msra.mxu1 %v785_v27  ;;  %845 = vmatprep.subr.mxu0 %v720_v28  ;;  %v430_v13 = vld [vmem:[%s5696_s4 + $0x78] sm:$0xff]  ;;  %v427_v14 = vld [vmem:[%s5696_s4 + $0x60] sm:$0xff]  ;;  %v429_v15 = vld [vmem:[%s5696_s4 + $0x70] sm:$0xff] }
 0x103   : > { %1294 = vmatprep.subr.mxu1 %v784_v29  ;;  %846 = vmatpush2.msra.mxu0 %v719_v30  ;;  %v432_v16 = vld [vmem:[%s5696_s4 + $0x88] sm:$0xff]  ;;  %v434_v17 = vld [vmem:[%s5696_s4 + $0x98] sm:$0xff]  ;;  %v431_v18 = vld [vmem:[%s5696_s4 + $0x80] sm:$0xff] }
 0x104   : > { %1295 = vmatpush2.msra.mxu1 %v783_v31  ;;  %847 = vmatprep.subr.mxu0 %v718_v32  ;;  %v433_v19 = vld [vmem:[%s5696_s4 + $0x90] sm:$0xff]  ;;  %v436_v20 = vld [vmem:[%s5696_s4 + $0xa8] sm:$0xff]  ;;  %v438_v21 = vld [vmem:[%s5696_s4 + $0xb8] sm:$0xff] }
 0x105   : > { %1296 = vmatprep.subr.mxu1 %v782_v33  ;;  %848 = vmatpush2.msra.mxu0 %v717_v34  ;;  %v435_v22 = vld [vmem:[%s5696_s4 + $0xa0] sm:$0xff]  ;;  %v437_v23 = vld [vmem:[%s5696_s4 + $0xb0] sm:$0xff]  ;;  %v440_v24 = vld [vmem:[%s5696_s4 + $0xc8] sm:$0xff] }
 0x106   : > { %1297 = vmatpush2.msra.mxu1 %v781_v35  ;;  %849 = vmatprep.subr.mxu0 %v716_v36  ;;  %v442_v25 = vld [vmem:[%s5696_s4 + $0xd8] sm:$0xff]  ;;  %v439_v26 = vld [vmem:[%s5696_s4 + $0xc0] sm:$0xff]  ;;  %v441_v27 = vld [vmem:[%s5696_s4 + $0xd0] sm:$0xff] }
 0x107   : > { %1298 = vmatprep.subr.mxu1 %v780_v37  ;;  %850 = vmatpush2.msra.mxu0 %v715_v38  ;;  %v444_v28 = vld [vmem:[%s5696_s4 + $0xe8] sm:$0xff]  ;;  %v446_v29 = vld [vmem:[%s5696_s4 + $0xf8] sm:$0xff]  ;;  %v443_v30 = vld [vmem:[%s5696_s4 + $0xe0] sm:$0xff] }
 0x108   : > { %1299 = vmatpush2.msra.mxu1 %v779_v39  ;;  %851 = vmatprep.subr.mxu0 %v714_v40  ;;  %v445_v31 = vld [vmem:[%s5696_s4 + $0xf0] sm:$0xff]  ;;  %v448_v32 = vld [vmem:[%s5696_s4 + $0x108] sm:$0xff]  ;;  %v450_v33 = vld [vmem:[%s5696_s4 + $0x118] sm:$0xff] }
 0x109   : > { %1300 = vmatprep.subr.mxu1 %v778_v41  ;;  %852 = vmatpush2.msra.mxu0 %v713_v42  ;;  %v447_v34 = vld [vmem:[%s5696_s4 + $0x100] sm:$0xff]  ;;  %v449_v35 = vld [vmem:[%s5696_s4 + $0x110] sm:$0xff]  ;;  %v452_v36 = vld [vmem:[%s5696_s4 + $0x128] sm:$0xff] }
 0x10a   : > { %1301 = vmatpush2.msra.mxu1 %v777_v43  ;;  %853 = vmatprep.subr.mxu0 %v712_v44  ;;  %v454_v37 = vld [vmem:[%s5696_s4 + $0x138] sm:$0xff]  ;;  %v451_v38 = vld [vmem:[%s5696_s4 + $0x120] sm:$0xff]  ;;  %v453_v39 = vld [vmem:[%s5696_s4 + $0x130] sm:$0xff] }
 0x10b   : > { %1302 = vmatprep.subr.mxu1 %v776_v45  ;;  %854 = vmatpush2.msra.mxu0 %v711_v46  ;;  %v456_v40 = vld [vmem:[%s5696_s4 + $0x148] sm:$0xff]  ;;  %v458_v41 = vld [vmem:[%s5696_s4 + $0x158] sm:$0xff]  ;;  %v455_v42 = vld [vmem:[%s5696_s4 + $0x140] sm:$0xff] }
 0x10c   : > { %1303 = vmatpush2.msra.mxu1 %v775_v47  ;;  %855 = vmatprep.subr.mxu0 %v710_v48  ;;  %v457_v43 = vld [vmem:[%s5696_s4 + $0x150] sm:$0xff]  ;;  %v460_v44 = vld [vmem:[%s5696_s4 + $0x168] sm:$0xff]  ;;  %v462_v45 = vld [vmem:[%s5696_s4 + $0x178] sm:$0xff] }
 0x10d   : > { %1304 = vmatprep.subr.mxu1 %v774_v49  ;;  %856 = vmatpush2.msra.mxu0 %v709_v50  ;;  %v459_v46 = vld [vmem:[%s5696_s4 + $0x160] sm:$0xff]  ;;  %v461_v47 = vld [vmem:[%s5696_s4 + $0x170] sm:$0xff]  ;;  %v464_v48 = vld [vmem:[%s5696_s4 + $0x188] sm:$0xff] }
 0x10e   : > { %1305 = vmatpush2.msra.mxu1 %v773_v51  ;;  %857 = vmatprep.subr.mxu0 %v708_v52  ;;  %v466_v49 = vld [vmem:[%s5696_s4 + $0x198] sm:$0xff]  ;;  %v463_v50 = vld [vmem:[%s5696_s4 + $0x180] sm:$0xff]  ;;  %v465_v51 = vld [vmem:[%s5696_s4 + $0x190] sm:$0xff] }
 0x10f   : > { %1306 = vmatprep.subr.mxu1 %v772_v53  ;;  %858 = vmatpush2.msra.mxu0 %v707_v54  ;;  %v468_v52 = vld [vmem:[%s5696_s4 + $0x1a8] sm:$0xff]  ;;  %v470_v53 = vld [vmem:[%s5696_s4 + $0x1b8] sm:$0xff]  ;;  %v467_v54 = vld [vmem:[%s5696_s4 + $0x1a0] sm:$0xff] }
 0x110   : > { %1307 = vmatpush2.msra.mxu1 %v771_v55  ;;  %859 = vmatprep.subr.mxu0 %v706_v56  ;;  %v469_v55 = vld [vmem:[%s5696_s4 + $0x1b0] sm:$0xff]  ;;  %v472_v56 = vld [vmem:[%s5696_s4 + $0x1c8] sm:$0xff] }
 0x111   : > { %1308 = vmatprep.subr.mxu1 %v770_v57  ;;  %860 = vmatpush2.msra.mxu0 %v705_v58  ;;  %v474_v57 = vld [vmem:[%s5696_s4 + $0x1d8] sm:$0xff]  ;;  %v471_v58 = vld [vmem:[%s5696_s4 + $0x1c0] sm:$0xff] }
 0x112   : > { %1309 = vmatpush2.msra.mxu1 %v769_v59  ;;  %861 = vmatprep.subr.mxu0 %v704_v60  ;;  %v473_v59 = vld [vmem:[%s5696_s4 + $0x1d0] sm:$0xff]  ;;  %v476_v60 = vld [vmem:[%s5696_s4 + $0x1e8] sm:$0xff] }
 0x113   : > { %1310 = vmatprep.subr.mxu1 %v768_v61  ;;  %862 = vmatpush2.msra.mxu0 %v703_v62  ;;  %v478_v61 = vld [vmem:[%s5696_s4 + $0x1f8] sm:$0xff]  ;;  %v475_v62 = vld [vmem:[%s5696_s4 + $0x1e0] sm:$0xff] }
 0x114   : > { %863 = vmatprep.mubr.f32.mxu0 %v416_v63  ;;  %1311 = vmatpush2.msra.mxu1 %v767_v0  ;;  %v477_v63 = vld [vmem:[%s5696_s4 + $0x1f0] sm:$0xff]  ;;  %v480_v0 = vld [vmem:[%s5696_s4 + $0x208] sm:$0xff] }
 0x115   : > { %1312 = vmatprep.mubr.f32.mxu1 %v418_v1  ;;  %864 = vmatmul.mubr.f32.vlgmr.msra.gmra.mxu0 %v415_v2  ;;  %v482_v1 = vld [vmem:[%s5696_s4 + $0x218] sm:$0xff]  ;;  %v479_v2 = vld [vmem:[%s5696_s4 + $0x200] sm:$0xff] }
 0x116   : > { %1313 = vmatmul.mubr.f32.vlgmr.msra.gmra.mxu1 %v417_v3  ;;  %869 = vmatprep.mubr.f32.mxu0 %v420_v4  ;;  %v481_v3 = vld [vmem:[%s5696_s4 + $0x210] sm:$0xff]  ;;  %v484_v4 = vld [vmem:[%s5696_s4 + $0x228] sm:$0xff] }
 0x117   : > { %1318 = vmatprep.mubr.f32.mxu1 %v422_v5  ;;  %v486_v5 = vld [vmem:[%s5696_s4 + $0x238] sm:$0xff] }
 0x119   : > { %870 = vmatmul.mubr.f32.gmra.mxu0 %v419_v6  ;;  %v483_v6 = vld [vmem:[%s5696_s4 + $0x220] sm:$0xff] }
 0x11a   : > { %1319 = vmatmul.mubr.f32.gmra.mxu1 %v421_v7  ;;  %875 = vmatprep.mubr.f32.mxu0 %v424_v8  ;;  %v485_v7 = vld [vmem:[%s5696_s4 + $0x230] sm:$0xff]  ;;  %v488_v8 = vld [vmem:[%s5696_s4 + $0x248] sm:$0xff] }
 0x11b   : > { %1324 = vmatprep.mubr.f32.mxu1 %v426_v9  ;;  %v490_v9 = vld [vmem:[%s5696_s4 + $0x258] sm:$0xff] }
 0x11d   : > { %876 = vmatmul.mubr.f32.gmra.mxu0 %v423_v10  ;;  %v487_v10 = vld [vmem:[%s5696_s4 + $0x240] sm:$0xff] }
 0x11e   : > { %1325 = vmatmul.mubr.f32.gmra.mxu1 %v425_v11  ;;  %881 = vmatprep.mubr.f32.mxu0 %v428_v12  ;;  %v489_v11 = vld [vmem:[%s5696_s4 + $0x250] sm:$0xff]  ;;  %v492_v12 = vld [vmem:[%s5696_s4 + $0x268] sm:$0xff] }
 0x11f   : > { %1330 = vmatprep.mubr.f32.mxu1 %v430_v13  ;;  %v494_v13 = vld [vmem:[%s5696_s4 + $0x278] sm:$0xff] }
 0x121   : > { %882 = vmatmul.mubr.f32.gmra.mxu0 %v427_v14  ;;  %v491_v14 = vld [vmem:[%s5696_s4 + $0x260] sm:$0xff] }
 0x122   : > { %1331 = vmatmul.mubr.f32.gmra.mxu1 %v429_v15  ;;  %887 = vmatprep.mubr.f32.mxu0 %v432_v16  ;;  %v493_v15 = vld [vmem:[%s5696_s4 + $0x270] sm:$0xff]  ;;  %v496_v16 = vld [vmem:[%s5696_s4 + $0x288] sm:$0xff] }
 0x123   : > { %1336 = vmatprep.mubr.f32.mxu1 %v434_v17  ;;  %v498_v17 = vld [vmem:[%s5696_s4 + $0x298] sm:$0xff] }
 0x125   : > { %888 = vmatmul.mubr.f32.gmra.mxu0 %v431_v18  ;;  %v495_v18 = vld [vmem:[%s5696_s4 + $0x280] sm:$0xff] }
 0x126   : > { %1337 = vmatmul.mubr.f32.gmra.mxu1 %v433_v19  ;;  %893 = vmatprep.mubr.f32.mxu0 %v436_v20  ;;  %v497_v19 = vld [vmem:[%s5696_s4 + $0x290] sm:$0xff]  ;;  %v500_v20 = vld [vmem:[%s5696_s4 + $0x2a8] sm:$0xff] }
 0x127   : > { %1342 = vmatprep.mubr.f32.mxu1 %v438_v21  ;;  %v502_v21 = vld [vmem:[%s5696_s4 + $0x2b8] sm:$0xff] }
 0x129   : > { %894 = vmatmul.mubr.f32.gmra.mxu0 %v435_v22  ;;  %v499_v22 = vld [vmem:[%s5696_s4 + $0x2a0] sm:$0xff] }
 0x12a   : > { %1343 = vmatmul.mubr.f32.gmra.mxu1 %v437_v23  ;;  %899 = vmatprep.mubr.f32.mxu0 %v440_v24  ;;  %v501_v23 = vld [vmem:[%s5696_s4 + $0x2b0] sm:$0xff]  ;;  %v504_v24 = vld [vmem:[%s5696_s4 + $0x2c8] sm:$0xff] }
 0x12b   : > { %1348 = vmatprep.mubr.f32.mxu1 %v442_v25  ;;  %v506_v25 = vld [vmem:[%s5696_s4 + $0x2d8] sm:$0xff] }
 0x12d   : > { %900 = vmatmul.mubr.f32.gmra.mxu0 %v439_v26  ;;  %v503_v26 = vld [vmem:[%s5696_s4 + $0x2c0] sm:$0xff] }
 0x12e   : > { %1349 = vmatmul.mubr.f32.gmra.mxu1 %v441_v27  ;;  %905 = vmatprep.mubr.f32.mxu0 %v444_v28  ;;  %v505_v27 = vld [vmem:[%s5696_s4 + $0x2d0] sm:$0xff]  ;;  %v508_v28 = vld [vmem:[%s5696_s4 + $0x2e8] sm:$0xff] }
 0x12f   : > { %1354 = vmatprep.mubr.f32.mxu1 %v446_v29  ;;  %v510_v29 = vld [vmem:[%s5696_s4 + $0x2f8] sm:$0xff] }
 0x131   : > { %906 = vmatmul.mubr.f32.gmra.mxu0 %v443_v30  ;;  %v507_v30 = vld [vmem:[%s5696_s4 + $0x2e0] sm:$0xff] }
 0x132   : > { %1355 = vmatmul.mubr.f32.gmra.mxu1 %v445_v31  ;;  %911 = vmatprep.mubr.f32.mxu0 %v448_v32  ;;  %v509_v31 = vld [vmem:[%s5696_s4 + $0x2f0] sm:$0xff]  ;;  %v512_v32 = vld [vmem:[%s5696_s4 + $0x308] sm:$0xff] }
 0x133   : > { %1360 = vmatprep.mubr.f32.mxu1 %v450_v33  ;;  %v514_v33 = vld [vmem:[%s5696_s4 + $0x318] sm:$0xff] }
 0x135   : > { %912 = vmatmul.mubr.f32.gmra.mxu0 %v447_v34  ;;  %v511_v34 = vld [vmem:[%s5696_s4 + $0x300] sm:$0xff] }
 0x136   : > { %1361 = vmatmul.mubr.f32.gmra.mxu1 %v449_v35  ;;  %917 = vmatprep.mubr.f32.mxu0 %v452_v36  ;;  %v513_v35 = vld [vmem:[%s5696_s4 + $0x310] sm:$0xff]  ;;  %v516_v36 = vld [vmem:[%s5696_s4 + $0x328] sm:$0xff] }
 0x137   : > { %1366 = vmatprep.mubr.f32.mxu1 %v454_v37  ;;  %v518_v37 = vld [vmem:[%s5696_s4 + $0x338] sm:$0xff] }
 0x139   : > { %918 = vmatmul.mubr.f32.gmra.mxu0 %v451_v38  ;;  %v515_v38 = vld [vmem:[%s5696_s4 + $0x320] sm:$0xff] }
 0x13a   : > { %1367 = vmatmul.mubr.f32.gmra.mxu1 %v453_v39  ;;  %923 = vmatprep.mubr.f32.mxu0 %v456_v40  ;;  %v517_v39 = vld [vmem:[%s5696_s4 + $0x330] sm:$0xff]  ;;  %v520_v40 = vld [vmem:[%s5696_s4 + $0x348] sm:$0xff] }
 0x13b   : > { %1372 = vmatprep.mubr.f32.mxu1 %v458_v41  ;;  %v522_v41 = vld [vmem:[%s5696_s4 + $0x358] sm:$0xff] }
 0x13d   : > { %924 = vmatmul.mubr.f32.gmra.mxu0 %v455_v42  ;;  %v519_v42 = vld [vmem:[%s5696_s4 + $0x340] sm:$0xff] }
 0x13e   : > { %1373 = vmatmul.mubr.f32.gmra.mxu1 %v457_v43  ;;  %929 = vmatprep.mubr.f32.mxu0 %v460_v44  ;;  %v521_v43 = vld [vmem:[%s5696_s4 + $0x350] sm:$0xff]  ;;  %v524_v44 = vld [vmem:[%s5696_s4 + $0x368] sm:$0xff] }
 0x13f   : > { %1378 = vmatprep.mubr.f32.mxu1 %v462_v45  ;;  %v526_v45 = vld [vmem:[%s5696_s4 + $0x378] sm:$0xff] }
 0x141   : > { %930 = vmatmul.mubr.f32.gmra.mxu0 %v459_v46  ;;  %v523_v46 = vld [vmem:[%s5696_s4 + $0x360] sm:$0xff] }
 0x142   : > { %1379 = vmatmul.mubr.f32.gmra.mxu1 %v461_v47  ;;  %935 = vmatprep.mubr.f32.mxu0 %v464_v48  ;;  %v525_v47 = vld [vmem:[%s5696_s4 + $0x370] sm:$0xff]  ;;  %v528_v48 = vld [vmem:[%s5696_s4 + $0x388] sm:$0xff] }
 0x143   : > { %1384 = vmatprep.mubr.f32.mxu1 %v466_v49  ;;  %v530_v49 = vld [vmem:[%s5696_s4 + $0x398] sm:$0xff] }
 0x145   : > { %936 = vmatmul.mubr.f32.gmra.mxu0 %v463_v50  ;;  %v527_v50 = vld [vmem:[%s5696_s4 + $0x380] sm:$0xff] }
 0x146   : > { %1385 = vmatmul.mubr.f32.gmra.mxu1 %v465_v51  ;;  %941 = vmatprep.mubr.f32.mxu0 %v468_v52  ;;  %v529_v51 = vld [vmem:[%s5696_s4 + $0x390] sm:$0xff]  ;;  %v532_v52 = vld [vmem:[%s5696_s4 + $0x3a8] sm:$0xff] }
 0x147   : > { %1390 = vmatprep.mubr.f32.mxu1 %v470_v53  ;;  %v534_v53 = vld [vmem:[%s5696_s4 + $0x3b8] sm:$0xff] }
 0x149   : > { %942 = vmatmul.mubr.f32.gmra.mxu0 %v467_v54  ;;  %v531_v54 = vld [vmem:[%s5696_s4 + $0x3a0] sm:$0xff] }
 0x14a   : > { %1391 = vmatmul.mubr.f32.gmra.mxu1 %v469_v55  ;;  %947 = vmatprep.mubr.f32.mxu0 %v472_v56  ;;  %v533_v55 = vld [vmem:[%s5696_s4 + $0x3b0] sm:$0xff]  ;;  %v536_v56 = vld [vmem:[%s5696_s4 + $0x3c8] sm:$0xff] }
 0x14b   : > { %1396 = vmatprep.mubr.f32.mxu1 %v474_v57  ;;  %v538_v57 = vld [vmem:[%s5696_s4 + $0x3d8] sm:$0xff] }
 0x14d   : > { %948 = vmatmul.mubr.f32.gmra.mxu0 %v471_v58  ;;  %v535_v58 = vld [vmem:[%s5696_s4 + $0x3c0] sm:$0xff] }
 0x14e   : > { %1397 = vmatmul.mubr.f32.gmra.mxu1 %v473_v59  ;;  %953 = vmatprep.mubr.f32.mxu0 %v476_v60  ;;  %v537_v59 = vld [vmem:[%s5696_s4 + $0x3d0] sm:$0xff]  ;;  %v540_v60 = vld [vmem:[%s5696_s4 + $0x3e8] sm:$0xff] }
 0x14f   : > { %1402 = vmatprep.mubr.f32.mxu1 %v478_v61  ;;  %v542_v61 = vld [vmem:[%s5696_s4 + $0x3f8] sm:$0xff] }
 0x151   : > { %954 = vmatmul.mubr.f32.gmra.mxu0 %v475_v62  ;;  %v539_v62 = vld [vmem:[%s5696_s4 + $0x3e0] sm:$0xff] }
 0x152   : > { %1403 = vmatmul.mubr.f32.gmra.mxu1 %v477_v63  ;;  %959 = vmatprep.mubr.f32.mxu0 %v480_v0  ;;  %v541_v63 = vld [vmem:[%s5696_s4 + $0x3f0] sm:$0xff]  ;;  %v544_v0 = vld [vmem:[%s5696_s4 + $0x408] sm:$0xff] }
 0x153   : > { %1408 = vmatprep.mubr.f32.mxu1 %v482_v1  ;;  %v546_v1 = vld [vmem:[%s5696_s4 + $0x418] sm:$0xff] }
 0x155   : > { %960 = vmatmul.mubr.f32.gmra.mxu0 %v479_v2  ;;  %v543_v2 = vld [vmem:[%s5696_s4 + $0x400] sm:$0xff] }
 0x156   : > { %1409 = vmatmul.mubr.f32.gmra.mxu1 %v481_v3  ;;  %965 = vmatprep.mubr.f32.mxu0 %v484_v4  ;;  %v545_v3 = vld [vmem:[%s5696_s4 + $0x410] sm:$0xff]  ;;  %v548_v4 = vld [vmem:[%s5696_s4 + $0x428] sm:$0xff] }
 0x157   : > { %1414 = vmatprep.mubr.f32.mxu1 %v486_v5  ;;  %v550_v5 = vld [vmem:[%s5696_s4 + $0x438] sm:$0xff] }
 0x159   : > { %966 = vmatmul.mubr.f32.gmra.mxu0 %v483_v6  ;;  %v547_v6 = vld [vmem:[%s5696_s4 + $0x420] sm:$0xff] }
 0x15a   : > { %1415 = vmatmul.mubr.f32.gmra.mxu1 %v485_v7  ;;  %971 = vmatprep.mubr.f32.mxu0 %v488_v8  ;;  %v549_v7 = vld [vmem:[%s5696_s4 + $0x430] sm:$0xff]  ;;  %v552_v8 = vld [vmem:[%s5696_s4 + $0x448] sm:$0xff] }
 0x15b   : > { %1420 = vmatprep.mubr.f32.mxu1 %v490_v9  ;;  %v554_v9 = vld [vmem:[%s5696_s4 + $0x458] sm:$0xff] }
 0x15d   : > { %972 = vmatmul.mubr.f32.gmra.mxu0 %v487_v10  ;;  %v551_v10 = vld [vmem:[%s5696_s4 + $0x440] sm:$0xff] }
 0x15e   : > { %1421 = vmatmul.mubr.f32.gmra.mxu1 %v489_v11  ;;  %977 = vmatprep.mubr.f32.mxu0 %v492_v12  ;;  %v553_v11 = vld [vmem:[%s5696_s4 + $0x450] sm:$0xff]  ;;  %v556_v12 = vld [vmem:[%s5696_s4 + $0x468] sm:$0xff] }
 0x15f   : > { %1426 = vmatprep.mubr.f32.mxu1 %v494_v13  ;;  %v558_v13 = vld [vmem:[%s5696_s4 + $0x478] sm:$0xff] }
 0x161   : > { %978 = vmatmul.mubr.f32.gmra.mxu0 %v491_v14  ;;  %v555_v14 = vld [vmem:[%s5696_s4 + $0x460] sm:$0xff] }
 0x162   : > { %1427 = vmatmul.mubr.f32.gmra.mxu1 %v493_v15  ;;  %983 = vmatprep.mubr.f32.mxu0 %v496_v16  ;;  %v557_v15 = vld [vmem:[%s5696_s4 + $0x470] sm:$0xff]  ;;  %v560_v16 = vld [vmem:[%s5696_s4 + $0x488] sm:$0xff] }
 0x163   : > { %1432 = vmatprep.mubr.f32.mxu1 %v498_v17  ;;  %v562_v17 = vld [vmem:[%s5696_s4 + $0x498] sm:$0xff] }
 0x165   : > { %984 = vmatmul.mubr.f32.gmra.mxu0 %v495_v18  ;;  %v559_v18 = vld [vmem:[%s5696_s4 + $0x480] sm:$0xff] }
 0x166   : > { %1433 = vmatmul.mubr.f32.gmra.mxu1 %v497_v19  ;;  %989 = vmatprep.mubr.f32.mxu0 %v500_v20  ;;  %v561_v19 = vld [vmem:[%s5696_s4 + $0x490] sm:$0xff]  ;;  %v564_v20 = vld [vmem:[%s5696_s4 + $0x4a8] sm:$0xff] }
 0x167   : > { %1438 = vmatprep.mubr.f32.mxu1 %v502_v21  ;;  %v566_v21 = vld [vmem:[%s5696_s4 + $0x4b8] sm:$0xff] }
 0x169   : > { %990 = vmatmul.mubr.f32.gmra.mxu0 %v499_v22  ;;  %v563_v22 = vld [vmem:[%s5696_s4 + $0x4a0] sm:$0xff] }
 0x16a   : > { %1439 = vmatmul.mubr.f32.gmra.mxu1 %v501_v23  ;;  %995 = vmatprep.mubr.f32.mxu0 %v504_v24  ;;  %v565_v23 = vld [vmem:[%s5696_s4 + $0x4b0] sm:$0xff]  ;;  %v568_v24 = vld [vmem:[%s5696_s4 + $0x4c8] sm:$0xff] }
 0x16b   : > { %1444 = vmatprep.mubr.f32.mxu1 %v506_v25  ;;  %v570_v25 = vld [vmem:[%s5696_s4 + $0x4d8] sm:$0xff] }
 0x16d   : > { %996 = vmatmul.mubr.f32.gmra.mxu0 %v503_v26  ;;  %v567_v26 = vld [vmem:[%s5696_s4 + $0x4c0] sm:$0xff] }
 0x16e   : > { %1445 = vmatmul.mubr.f32.gmra.mxu1 %v505_v27  ;;  %1001 = vmatprep.mubr.f32.mxu0 %v508_v28  ;;  %v569_v27 = vld [vmem:[%s5696_s4 + $0x4d0] sm:$0xff]  ;;  %v572_v28 = vld [vmem:[%s5696_s4 + $0x4e8] sm:$0xff] }
 0x16f   : > { %1450 = vmatprep.mubr.f32.mxu1 %v510_v29  ;;  %v574_v29 = vld [vmem:[%s5696_s4 + $0x4f8] sm:$0xff] }
 0x171   : > { %1002 = vmatmul.mubr.f32.gmra.mxu0 %v507_v30  ;;  %v571_v30 = vld [vmem:[%s5696_s4 + $0x4e0] sm:$0xff] }
 0x172   : > { %1451 = vmatmul.mubr.f32.gmra.mxu1 %v509_v31  ;;  %1007 = vmatprep.mubr.f32.mxu0 %v512_v32  ;;  %v573_v31 = vld [vmem:[%s5696_s4 + $0x4f0] sm:$0xff]  ;;  %v576_v32 = vld [vmem:[%s5696_s4 + $0x508] sm:$0xff] }
 0x173   : > { %1456 = vmatprep.mubr.f32.mxu1 %v514_v33  ;;  %v578_v33 = vld [vmem:[%s5696_s4 + $0x518] sm:$0xff] }
 0x175   : > { %1008 = vmatmul.mubr.f32.gmra.mxu0 %v511_v34  ;;  %v575_v34 = vld [vmem:[%s5696_s4 + $0x500] sm:$0xff] }
 0x176   : > { %1457 = vmatmul.mubr.f32.gmra.mxu1 %v513_v35  ;;  %1013 = vmatprep.mubr.f32.mxu0 %v516_v36  ;;  %v577_v35 = vld [vmem:[%s5696_s4 + $0x510] sm:$0xff]  ;;  %v580_v36 = vld [vmem:[%s5696_s4 + $0x528] sm:$0xff] }
 0x177   : > { %1462 = vmatprep.mubr.f32.mxu1 %v518_v37  ;;  %v582_v37 = vld [vmem:[%s5696_s4 + $0x538] sm:$0xff] }
 0x179   : > { %1014 = vmatmul.mubr.f32.gmra.mxu0 %v515_v38  ;;  %v579_v38 = vld [vmem:[%s5696_s4 + $0x520] sm:$0xff] }
 0x17a   : > { %1463 = vmatmul.mubr.f32.gmra.mxu1 %v517_v39  ;;  %1019 = vmatprep.mubr.f32.mxu0 %v520_v40  ;;  %v581_v39 = vld [vmem:[%s5696_s4 + $0x530] sm:$0xff]  ;;  %v584_v40 = vld [vmem:[%s5696_s4 + $0x548] sm:$0xff] }
 0x17b   : > { %1468 = vmatprep.mubr.f32.mxu1 %v522_v41  ;;  %v586_v41 = vld [vmem:[%s5696_s4 + $0x558] sm:$0xff] }
 0x17d   : > { %1020 = vmatmul.mubr.f32.gmra.mxu0 %v519_v42  ;;  %v583_v42 = vld [vmem:[%s5696_s4 + $0x540] sm:$0xff] }
 0x17e   : > { %1469 = vmatmul.mubr.f32.gmra.mxu1 %v521_v43  ;;  %1025 = vmatprep.mubr.f32.mxu0 %v524_v44  ;;  %v585_v43 = vld [vmem:[%s5696_s4 + $0x550] sm:$0xff]  ;;  %v588_v44 = vld [vmem:[%s5696_s4 + $0x568] sm:$0xff] }
 0x17f   : > { %1474 = vmatprep.mubr.f32.mxu1 %v526_v45  ;;  %v590_v45 = vld [vmem:[%s5696_s4 + $0x578] sm:$0xff] }
 0x181   : > { %1026 = vmatmul.mubr.f32.gmra.mxu0 %v523_v46  ;;  %v587_v46 = vld [vmem:[%s5696_s4 + $0x560] sm:$0xff] }
 0x182   : > { %1475 = vmatmul.mubr.f32.gmra.mxu1 %v525_v47  ;;  %1031 = vmatprep.mubr.f32.mxu0 %v528_v48  ;;  %v589_v47 = vld [vmem:[%s5696_s4 + $0x570] sm:$0xff]  ;;  %v592_v48 = vld [vmem:[%s5696_s4 + $0x588] sm:$0xff] }
 0x183   : > { %1480 = vmatprep.mubr.f32.mxu1 %v530_v49  ;;  %v594_v49 = vld [vmem:[%s5696_s4 + $0x598] sm:$0xff] }
 0x185   : > { %1032 = vmatmul.mubr.f32.gmra.mxu0 %v527_v50  ;;  %v591_v50 = vld [vmem:[%s5696_s4 + $0x580] sm:$0xff] }
 0x186   : > { %1481 = vmatmul.mubr.f32.gmra.mxu1 %v529_v51  ;;  %1037 = vmatprep.mubr.f32.mxu0 %v532_v52  ;;  %v593_v51 = vld [vmem:[%s5696_s4 + $0x590] sm:$0xff]  ;;  %v596_v52 = vld [vmem:[%s5696_s4 + $0x5a8] sm:$0xff] }
 0x187   : > { %1486 = vmatprep.mubr.f32.mxu1 %v534_v53  ;;  %v598_v53 = vld [vmem:[%s5696_s4 + $0x5b8] sm:$0xff] }
 0x189   : > { %1038 = vmatmul.mubr.f32.gmra.mxu0 %v531_v54  ;;  %v595_v54 = vld [vmem:[%s5696_s4 + $0x5a0] sm:$0xff] }
 0x18a   : > { %1487 = vmatmul.mubr.f32.gmra.mxu1 %v533_v55  ;;  %1043 = vmatprep.mubr.f32.mxu0 %v536_v56  ;;  %v597_v55 = vld [vmem:[%s5696_s4 + $0x5b0] sm:$0xff]  ;;  %v600_v56 = vld [vmem:[%s5696_s4 + $0x5c8] sm:$0xff] }
 0x18b   : > { %1492 = vmatprep.mubr.f32.mxu1 %v538_v57  ;;  %v602_v57 = vld [vmem:[%s5696_s4 + $0x5d8] sm:$0xff] }
 0x18d   : > { %1044 = vmatmul.mubr.f32.gmra.mxu0 %v535_v58  ;;  %v599_v58 = vld [vmem:[%s5696_s4 + $0x5c0] sm:$0xff] }
 0x18e   : > { %1493 = vmatmul.mubr.f32.gmra.mxu1 %v537_v59  ;;  %1049 = vmatprep.mubr.f32.mxu0 %v540_v60  ;;  %v601_v59 = vld [vmem:[%s5696_s4 + $0x5d0] sm:$0xff]  ;;  %v604_v60 = vld [vmem:[%s5696_s4 + $0x5e8] sm:$0xff] }
 0x18f   : > { %1498 = vmatprep.mubr.f32.mxu1 %v542_v61  ;;  %v606_v61 = vld [vmem:[%s5696_s4 + $0x5f8] sm:$0xff] }
 0x191   : > { %1050 = vmatmul.mubr.f32.gmra.mxu0 %v539_v62  ;;  %v603_v62 = vld [vmem:[%s5696_s4 + $0x5e0] sm:$0xff] }
 0x192   : > { %1499 = vmatmul.mubr.f32.gmra.mxu1 %v541_v63  ;;  %1055 = vmatprep.mubr.f32.mxu0 %v544_v0  ;;  %v605_v63 = vld [vmem:[%s5696_s4 + $0x5f0] sm:$0xff]  ;;  %v608_v0 = vld [vmem:[%s5696_s4 + $0x608] sm:$0xff] }
 0x193   : > { %1504 = vmatprep.mubr.f32.mxu1 %v546_v1  ;;  %v610_v1 = vld [vmem:[%s5696_s4 + $0x618] sm:$0xff] }
 0x195   : > { %1056 = vmatmul.mubr.f32.gmra.mxu0 %v543_v2  ;;  %v607_v2 = vld [vmem:[%s5696_s4 + $0x600] sm:$0xff] }
 0x196   : > { %1505 = vmatmul.mubr.f32.gmra.mxu1 %v545_v3  ;;  %1061 = vmatprep.mubr.f32.mxu0 %v548_v4  ;;  %v609_v3 = vld [vmem:[%s5696_s4 + $0x610] sm:$0xff]  ;;  %v612_v4 = vld [vmem:[%s5696_s4 + $0x628] sm:$0xff] }
 0x197   : > { %1510 = vmatprep.mubr.f32.mxu1 %v550_v5  ;;  %v614_v5 = vld [vmem:[%s5696_s4 + $0x638] sm:$0xff] }
 0x199   : > { %1062 = vmatmul.mubr.f32.gmra.mxu0 %v547_v6 }
 0x19a   : > { %1511 = vmatmul.mubr.f32.gmra.mxu1 %v549_v7  ;;  %1067 = vmatprep.mubr.f32.mxu0 %v552_v8 }
 0x19b   : > { %1516 = vmatprep.mubr.f32.mxu1 %v554_v9  ;;  %v611_v9 = vld [vmem:[%s5696_s4 + $0x620] sm:$0xff] }
 0x19d   : > { %1068 = vmatmul.mubr.f32.gmra.mxu0 %v551_v10  ;;  %v613_v10 = vld [vmem:[%s5696_s4 + $0x630] sm:$0xff] }
 0x19e   : > { %1517 = vmatmul.mubr.f32.gmra.mxu1 %v553_v11  ;;  %1073 = vmatprep.mubr.f32.mxu0 %v556_v12 }
 0x19f   : > { %1522 = vmatprep.mubr.f32.mxu1 %v558_v13  ;;  %v616_v13 = vld [vmem:[%s5696_s4 + $0x648] sm:$0xff] }
 0x1a1   : > { %1074 = vmatmul.mubr.f32.gmra.mxu0 %v555_v14  ;;  %v618_v14 = vld [vmem:[%s5696_s4 + $0x658] sm:$0xff] }
 0x1a2   : > { %1523 = vmatmul.mubr.f32.gmra.mxu1 %v557_v15  ;;  %1079 = vmatprep.mubr.f32.mxu0 %v560_v16 }
 0x1a3   : > { %1528 = vmatprep.mubr.f32.mxu1 %v562_v17 }
 0x1a5   : > { %1080 = vmatmul.mubr.f32.gmra.mxu0 %v559_v18 }
 0x1a6   : > { %1529 = vmatmul.mubr.f32.gmra.mxu1 %v561_v19  ;;  %1085 = vmatprep.mubr.f32.mxu0 %v564_v20  ;;  %v615_v19 = vld [vmem:[%s5696_s4 + $0x640] sm:$0xff]  ;;  %v617_v20 = vld [vmem:[%s5696_s4 + $0x650] sm:$0xff] }
 0x1a7   : > { %1534 = vmatprep.mubr.f32.mxu1 %v566_v21 }
 0x1a9   : > { %1086 = vmatmul.mubr.f32.gmra.mxu0 %v563_v22 }
 0x1aa   : > { %1535 = vmatmul.mubr.f32.gmra.mxu1 %v565_v23  ;;  %1091 = vmatprep.mubr.f32.mxu0 %v568_v24  ;;  %v620_v23 = vld [vmem:[%s5696_s4 + $0x668] sm:$0xff]  ;;  %v622_v24 = vld [vmem:[%s5696_s4 + $0x678] sm:$0xff] }
 0x1ab   : > { %1540 = vmatprep.mubr.f32.mxu1 %v570_v25 }
 0x1ad   : > { %1092 = vmatmul.mubr.f32.gmra.mxu0 %v567_v26 }
 0x1ae   : > { %1541 = vmatmul.mubr.f32.gmra.mxu1 %v569_v27  ;;  %1097 = vmatprep.mubr.f32.mxu0 %v572_v28 }
 0x1af   : > { %1546 = vmatprep.mubr.f32.mxu1 %v574_v29  ;;  %v619_v29 = vld [vmem:[%s5696_s4 + $0x660] sm:$0xff] }
 0x1b1   : > { %1098 = vmatmul.mubr.f32.gmra.mxu0 %v571_v30  ;;  %v621_v30 = vld [vmem:[%s5696_s4 + $0x670] sm:$0xff] }
 0x1b2   : > { %1547 = vmatmul.mubr.f32.gmra.mxu1 %v573_v31  ;;  %1103 = vmatprep.mubr.f32.mxu0 %v576_v32 }
 0x1b3   : > { %1552 = vmatprep.mubr.f32.mxu1 %v578_v33  ;;  %v624_v33 = vld [vmem:[%s5696_s4 + $0x688] sm:$0xff] }
 0x1b5   : > { %1104 = vmatmul.mubr.f32.gmra.mxu0 %v575_v34  ;;  %v626_v34 = vld [vmem:[%s5696_s4 + $0x698] sm:$0xff] }
 0x1b6   : > { %1553 = vmatmul.mubr.f32.gmra.mxu1 %v577_v35  ;;  %1109 = vmatprep.mubr.f32.mxu0 %v580_v36 }
 0x1b7   : > { %1558 = vmatprep.mubr.f32.mxu1 %v582_v37 }
 0x1b9   : > { %1110 = vmatmul.mubr.f32.gmra.mxu0 %v579_v38 }
 0x1ba   : > { %1559 = vmatmul.mubr.f32.gmra.mxu1 %v581_v39  ;;  %1115 = vmatprep.mubr.f32.mxu0 %v584_v40  ;;  %v623_v39 = vld [vmem:[%s5696_s4 + $0x680] sm:$0xff]  ;;  %v625_v40 = vld [vmem:[%s5696_s4 + $0x690] sm:$0xff] }
 0x1bb   : > { %1564 = vmatprep.mubr.f32.mxu1 %v586_v41 }
 0x1bd   : > { %1116 = vmatmul.mubr.f32.gmra.mxu0 %v583_v42 }
 0x1be   : > { %1565 = vmatmul.mubr.f32.gmra.mxu1 %v585_v43  ;;  %1121 = vmatprep.mubr.f32.mxu0 %v588_v44  ;;  %v628_v43 = vld [vmem:[%s5696_s4 + $0x6a8] sm:$0xff]  ;;  %v630_v44 = vld [vmem:[%s5696_s4 + $0x6b8] sm:$0xff] }
 0x1bf   : > { %1570 = vmatprep.mubr.f32.mxu1 %v590_v45 }
 0x1c1   : > { %1122 = vmatmul.mubr.f32.gmra.mxu0 %v587_v46 }
 0x1c2   : > { %1571 = vmatmul.mubr.f32.gmra.mxu1 %v589_v47  ;;  %1127 = vmatprep.mubr.f32.mxu0 %v592_v48 }
 0x1c3   : > { %1576 = vmatprep.mubr.f32.mxu1 %v594_v49  ;;  %v627_v49 = vld [vmem:[%s5696_s4 + $0x6a0] sm:$0xff] }
 0x1c5   : > { %1128 = vmatmul.mubr.f32.gmra.mxu0 %v591_v50  ;;  %v629_v50 = vld [vmem:[%s5696_s4 + $0x6b0] sm:$0xff] }
 0x1c6   : > { %1577 = vmatmul.mubr.f32.gmra.mxu1 %v593_v51  ;;  %1133 = vmatprep.mubr.f32.mxu0 %v596_v52 }
 0x1c7   : > { %1582 = vmatprep.mubr.f32.mxu1 %v598_v53  ;;  %v632_v53 = vld [vmem:[%s5696_s4 + $0x6c8] sm:$0xff] }
 0x1c9   : > { %1134 = vmatmul.mubr.f32.gmra.mxu0 %v595_v54  ;;  %v634_v54 = vld [vmem:[%s5696_s4 + $0x6d8] sm:$0xff] }
 0x1ca   : > { %1583 = vmatmul.mubr.f32.gmra.mxu1 %v597_v55  ;;  %1139 = vmatprep.mubr.f32.mxu0 %v600_v56 }
 0x1cb   : > { %1588 = vmatprep.mubr.f32.mxu1 %v602_v57 }
 0x1cd   : > { %1140 = vmatmul.mubr.f32.gmra.mxu0 %v599_v58 }
 0x1ce   : > { %1589 = vmatmul.mubr.f32.gmra.mxu1 %v601_v59  ;;  %1145 = vmatprep.mubr.f32.mxu0 %v604_v60  ;;  %v631_v59 = vld [vmem:[%s5696_s4 + $0x6c0] sm:$0xff]  ;;  %v633_v60 = vld [vmem:[%s5696_s4 + $0x6d0] sm:$0xff] }
 0x1cf   : > { %1594 = vmatprep.mubr.f32.mxu1 %v606_v61 }
 0x1d1   : > { %1146 = vmatmul.mubr.f32.gmra.mxu0 %v603_v62 }
 0x1d2   : > { %1595 = vmatmul.mubr.f32.gmra.mxu1 %v605_v63  ;;  %1151 = vmatprep.mubr.f32.mxu0 %v608_v0  ;;  %v636_v63 = vld [vmem:[%s5696_s4 + $0x6e8] sm:$0xff]  ;;  %v638_v0 = vld [vmem:[%s5696_s4 + $0x6f8] sm:$0xff] }
 0x1d3   : > { %1600 = vmatprep.mubr.f32.mxu1 %v610_v1 }
 0x1d5   : > { %v865_v6 = vpop.f32.mrf.mxu0  ;;  %1152 = vmatmul.mubr.f32.gmra.mxu0 %v607_v2 }
 0x1d6   : > { %v1314_v7 = vpop.f32.mrf.mxu1  ;;  %1601 = vmatmul.mubr.f32.gmra.mxu1 %v609_v3  ;;  %1157 = vmatprep.mubr.f32.mxu0 %v612_v4 }
 0x1d7   : > { %v1315_v8 = vadd.f32 %v1314_v7, %v865_v6  ;;  %1606 = vmatprep.mubr.f32.mxu1 %v614_v5  ;;  %v867_v11 = vpop.f32.mrf.mxu0  ;;  %v635_v5 = vld [vmem:[%s5696_s4 + $0x6e0] sm:$0xff]  ;;  %v637_v6 = vld [vmem:[%s5696_s4 + $0x6f0] sm:$0xff] }
 0x1d8   : > { %v1316_v12 = vpop.f32.mrf.mxu1 }
 0x1d9   : > { %1697 = vst [vmem:[%s5724_s18] sm:$0xff] %v1315_v8  ;;  %v1317_v15 = vadd.f32 %v1316_v12, %v867_v11  ;;  %v871_v16 = vpop.f32.mrf.mxu0  ;;  %1158 = vmatmul.mubr.f32.gmra.mxu0 %v611_v9  ;;  %v640_v9 = vld [vmem:[%s5696_s4 + $0x708] sm:$0xff] }
 0x1da   : > { %v1320_v17 = vpop.f32.mrf.mxu1  ;;  %1607 = vmatmul.mubr.f32.gmra.mxu1 %v613_v10  ;;  %1163 = vmatprep.mubr.f32.mxu0 %v616_v13  ;;  %v642_v10 = vld [vmem:[%s5696_s4 + $0x718] sm:$0xff] }
 0x1db   : > { %1698 = vst [vmem:[%s5724_s18 + $0x8] sm:$0xff] %v1317_v15  ;;  %v1321_v18 = vadd.f32 %v1320_v17, %v871_v16  ;;  %1612 = vmatprep.mubr.f32.mxu1 %v618_v14  ;;  %v873_v21 = vpop.f32.mrf.mxu0  ;;  %v639_v15 = vld [vmem:[%s5696_s4 + $0x700] sm:$0xff]  ;;  %v641_v16 = vld [vmem:[%s5696_s4 + $0x710] sm:$0xff] }
 0x1dc   : > { %v1322_v22 = vpop.f32.mrf.mxu1 }
 0x1dd   : > { %1699 = vst [vmem:[%s5724_s18 + $0x10] sm:$0xff] %v1321_v18  ;;  %v1323_v25 = vadd.f32 %v1322_v22, %v873_v21  ;;  %v877_v26 = vpop.f32.mrf.mxu0  ;;  %1164 = vmatmul.mubr.f32.gmra.mxu0 %v615_v19  ;;  %v644_v19 = vld [vmem:[%s5696_s4 + $0x728] sm:$0xff] }
 0x1de   : > { %v1326_v27 = vpop.f32.mrf.mxu1  ;;  %1613 = vmatmul.mubr.f32.gmra.mxu1 %v617_v20  ;;  %1169 = vmatprep.mubr.f32.mxu0 %v620_v23  ;;  %v646_v20 = vld [vmem:[%s5696_s4 + $0x738] sm:$0xff] }
 0x1df   : > { %1700 = vst [vmem:[%s5724_s18 + $0x18] sm:$0xff] %v1323_v25  ;;  %v1327_v28 = vadd.f32 %v1326_v27, %v877_v26  ;;  %1618 = vmatprep.mubr.f32.mxu1 %v622_v24  ;;  %v879_v31 = vpop.f32.mrf.mxu0  ;;  %v643_v25 = vld [vmem:[%s5696_s4 + $0x720] sm:$0xff]  ;;  %v645_v26 = vld [vmem:[%s5696_s4 + $0x730] sm:$0xff] }
 0x1e0   : > { %v1328_v32 = vpop.f32.mrf.mxu1 }
 0x1e1   : > { %1701 = vst [vmem:[%s5724_s18 + $0x20] sm:$0xff] %v1327_v28  ;;  %v1329_v35 = vadd.f32 %v1328_v32, %v879_v31  ;;  %v883_v36 = vpop.f32.mrf.mxu0  ;;  %1170 = vmatmul.mubr.f32.gmra.mxu0 %v619_v29  ;;  %v648_v29 = vld [vmem:[%s5696_s4 + $0x748] sm:$0xff] }
 0x1e2   : > { %v1332_v37 = vpop.f32.mrf.mxu1  ;;  %1619 = vmatmul.mubr.f32.gmra.mxu1 %v621_v30  ;;  %1175 = vmatprep.mubr.f32.mxu0 %v624_v33  ;;  %v650_v30 = vld [vmem:[%s5696_s4 + $0x758] sm:$0xff] }
 0x1e3   : > { %1702 = vst [vmem:[%s5724_s18 + $0x28] sm:$0xff] %v1329_v35  ;;  %v1333_v38 = vadd.f32 %v1332_v37, %v883_v36  ;;  %1624 = vmatprep.mubr.f32.mxu1 %v626_v34  ;;  %v885_v41 = vpop.f32.mrf.mxu0  ;;  %v647_v35 = vld [vmem:[%s5696_s4 + $0x740] sm:$0xff]  ;;  %v649_v36 = vld [vmem:[%s5696_s4 + $0x750] sm:$0xff] }
 0x1e4   : > { %v1334_v42 = vpop.f32.mrf.mxu1 }
 0x1e5   : > { %1703 = vst [vmem:[%s5724_s18 + $0x30] sm:$0xff] %v1333_v38  ;;  %v1335_v45 = vadd.f32 %v1334_v42, %v885_v41  ;;  %v889_v46 = vpop.f32.mrf.mxu0  ;;  %1176 = vmatmul.mubr.f32.gmra.mxu0 %v623_v39  ;;  %v652_v39 = vld [vmem:[%s5696_s4 + $0x768] sm:$0xff] }
 0x1e6   : > { %v1338_v47 = vpop.f32.mrf.mxu1  ;;  %1625 = vmatmul.mubr.f32.gmra.mxu1 %v625_v40  ;;  %1181 = vmatprep.mubr.f32.mxu0 %v628_v43  ;;  %v654_v40 = vld [vmem:[%s5696_s4 + $0x778] sm:$0xff] }
 0x1e7   : > { %1704 = vst [vmem:[%s5724_s18 + $0x38] sm:$0xff] %v1335_v45  ;;  %v1339_v48 = vadd.f32 %v1338_v47, %v889_v46  ;;  %1630 = vmatprep.mubr.f32.mxu1 %v630_v44  ;;  %v891_v51 = vpop.f32.mrf.mxu0  ;;  %v651_v45 = vld [vmem:[%s5696_s4 + $0x760] sm:$0xff]  ;;  %v653_v46 = vld [vmem:[%s5696_s4 + $0x770] sm:$0xff] }
 0x1e8   : > { %v1340_v52 = vpop.f32.mrf.mxu1 }
 0x1e9   : > { %1705 = vst [vmem:[%s5724_s18 + $0x40] sm:$0xff] %v1339_v48  ;;  %v1341_v55 = vadd.f32 %v1340_v52, %v891_v51  ;;  %v895_v56 = vpop.f32.mrf.mxu0  ;;  %1182 = vmatmul.mubr.f32.gmra.mxu0 %v627_v49  ;;  %v656_v49 = vld [vmem:[%s5696_s4 + $0x788] sm:$0xff] }
 0x1ea   : > { %v1344_v57 = vpop.f32.mrf.mxu1  ;;  %1631 = vmatmul.mubr.f32.gmra.mxu1 %v629_v50  ;;  %1187 = vmatprep.mubr.f32.mxu0 %v632_v53  ;;  %v658_v50 = vld [vmem:[%s5696_s4 + $0x798] sm:$0xff] }
 0x1eb   : > { %1706 = vst [vmem:[%s5724_s18 + $0x48] sm:$0xff] %v1341_v55  ;;  %v1345_v58 = vadd.f32 %v1344_v57, %v895_v56  ;;  %1636 = vmatprep.mubr.f32.mxu1 %v634_v54  ;;  %v897_v61 = vpop.f32.mrf.mxu0  ;;  %v655_v55 = vld [vmem:[%s5696_s4 + $0x780] sm:$0xff]  ;;  %v657_v56 = vld [vmem:[%s5696_s4 + $0x790] sm:$0xff] }
 0x1ec   : > { %v1346_v62 = vpop.f32.mrf.mxu1 }
 0x1ed   : > { %1707 = vst [vmem:[%s5724_s18 + $0x50] sm:$0xff] %v1345_v58  ;;  %v1347_v1 = vadd.f32 %v1346_v62, %v897_v61  ;;  %v901_v2 = vpop.f32.mrf.mxu0  ;;  %1188 = vmatmul.mubr.f32.gmra.mxu0 %v631_v59  ;;  %v660_v59 = vld [vmem:[%s5696_s4 + $0x7a8] sm:$0xff] }
 0x1ee   : > { %v1350_v3 = vpop.f32.mrf.mxu1  ;;  %1637 = vmatmul.mubr.f32.gmra.mxu1 %v633_v60  ;;  %1193 = vmatprep.mubr.f32.mxu0 %v636_v63  ;;  %v662_v60 = vld [vmem:[%s5696_s4 + $0x7b8] sm:$0xff] }
 0x1ef   : > { %1708 = vst [vmem:[%s5724_s18 + $0x58] sm:$0xff] %v1347_v1  ;;  %v1351_v4 = vadd.f32 %v1350_v3, %v901_v2  ;;  %1642 = vmatprep.mubr.f32.mxu1 %v638_v0  ;;  %v903_v7 = vpop.f32.mrf.mxu0  ;;  %v659_v1 = vld [vmem:[%s5696_s4 + $0x7a0] sm:$0xff]  ;;  %v661_v2 = vld [vmem:[%s5696_s4 + $0x7b0] sm:$0xff] }
 0x1f0   : > { %v1352_v8 = vpop.f32.mrf.mxu1 }
 0x1f1   : > { %1709 = vst [vmem:[%s5724_s18 + $0x60] sm:$0xff] %v1351_v4  ;;  %v1353_v11 = vadd.f32 %v1352_v8, %v903_v7  ;;  %v907_v12 = vpop.f32.mrf.mxu0  ;;  %1194 = vmatmul.mubr.f32.gmra.mxu0 %v635_v5  ;;  %v664_v5 = vld [vmem:[%s5696_s4 + $0x7c8] sm:$0xff] }
 0x1f2   : > { %v1356_v13 = vpop.f32.mrf.mxu1  ;;  %1643 = vmatmul.mubr.f32.gmra.mxu1 %v637_v6  ;;  %1199 = vmatprep.mubr.f32.mxu0 %v640_v9  ;;  %v666_v6 = vld [vmem:[%s5696_s4 + $0x7d8] sm:$0xff] }
 0x1f3   : > { %1710 = vst [vmem:[%s5724_s18 + $0x68] sm:$0xff] %v1353_v11  ;;  %v1357_v14 = vadd.f32 %v1356_v13, %v907_v12  ;;  %1648 = vmatprep.mubr.f32.mxu1 %v642_v10  ;;  %v909_v17 = vpop.f32.mrf.mxu0  ;;  %v663_v11 = vld [vmem:[%s5696_s4 + $0x7c0] sm:$0xff]  ;;  %v665_v12 = vld [vmem:[%s5696_s4 + $0x7d0] sm:$0xff] }
 0x1f4   : > { %v1358_v18 = vpop.f32.mrf.mxu1 }
 0x1f5   : > { %1711 = vst [vmem:[%s5724_s18 + $0x70] sm:$0xff] %v1357_v14  ;;  %v1359_v21 = vadd.f32 %v1358_v18, %v909_v17  ;;  %v913_v22 = vpop.f32.mrf.mxu0  ;;  %1200 = vmatmul.mubr.f32.gmra.mxu0 %v639_v15  ;;  %v668_v15 = vld [vmem:[%s5696_s4 + $0x7e8] sm:$0xff] }
 0x1f6   : > { %v1362_v23 = vpop.f32.mrf.mxu1  ;;  %1649 = vmatmul.mubr.f32.gmra.mxu1 %v641_v16  ;;  %1205 = vmatprep.mubr.f32.mxu0 %v644_v19  ;;  %v670_v16 = vld [vmem:[%s5696_s4 + $0x7f8] sm:$0xff] }
 0x1f7   : > { %1712 = vst [vmem:[%s5724_s18 + $0x78] sm:$0xff] %v1359_v21  ;;  %v1363_v24 = vadd.f32 %v1362_v23, %v913_v22  ;;  %1654 = vmatprep.mubr.f32.mxu1 %v646_v20  ;;  %v915_v27 = vpop.f32.mrf.mxu0  ;;  %v667_v21 = vld [vmem:[%s5696_s4 + $0x7e0] sm:$0xff]  ;;  %v669_v22 = vld [vmem:[%s5696_s4 + $0x7f0] sm:$0xff] }
 0x1f8   : > { %v1364_v28 = vpop.f32.mrf.mxu1 }
 0x1f9   : > { %1713 = vst [vmem:[%s5724_s18 + $0x80] sm:$0xff] %v1363_v24  ;;  %v1365_v31 = vadd.f32 %v1364_v28, %v915_v27  ;;  %v919_v32 = vpop.f32.mrf.mxu0  ;;  %1206 = vmatmul.mubr.f32.gmra.mxu0 %v643_v25 }
 0x1fa   : > { %v1368_v33 = vpop.f32.mrf.mxu1  ;;  %1655 = vmatmul.mubr.f32.gmra.mxu1 %v645_v26  ;;  %1211 = vmatprep.mubr.f32.mxu0 %v648_v29 }
 0x1fb   : > { %1714 = vst [vmem:[%s5724_s18 + $0x88] sm:$0xff] %v1365_v31  ;;  %v1369_v34 = vadd.f32 %v1368_v33, %v919_v32  ;;  %1660 = vmatprep.mubr.f32.mxu1 %v650_v30  ;;  %v921_v37 = vpop.f32.mrf.mxu0 }
 0x1fc   : > { %v1370_v38 = vpop.f32.mrf.mxu1 }
 0x1fd   : > { %1715 = vst [vmem:[%s5724_s18 + $0x90] sm:$0xff] %v1369_v34  ;;  %v1371_v41 = vadd.f32 %v1370_v38, %v921_v37  ;;  %v925_v42 = vpop.f32.mrf.mxu0  ;;  %1212 = vmatmul.mubr.f32.gmra.mxu0 %v647_v35 }
 0x1fe   : > { %v1374_v43 = vpop.f32.mrf.mxu1  ;;  %1661 = vmatmul.mubr.f32.gmra.mxu1 %v649_v36  ;;  %1217 = vmatprep.mubr.f32.mxu0 %v652_v39 }
 0x1ff   : > { %1716 = vst [vmem:[%s5724_s18 + $0x98] sm:$0xff] %v1371_v41  ;;  %v1375_v44 = vadd.f32 %v1374_v43, %v925_v42  ;;  %1666 = vmatprep.mubr.f32.mxu1 %v654_v40  ;;  %v927_v47 = vpop.f32.mrf.mxu0 }
 0x200   : > { %v1376_v48 = vpop.f32.mrf.mxu1 }
 0x201   : > { %1717 = vst [vmem:[%s5724_s18 + $0xa0] sm:$0xff] %v1375_v44  ;;  %v1377_v51 = vadd.f32 %v1376_v48, %v927_v47  ;;  %v931_v52 = vpop.f32.mrf.mxu0  ;;  %1218 = vmatmul.mubr.f32.gmra.mxu0 %v651_v45 }
 0x202   : > { %v1380_v53 = vpop.f32.mrf.mxu1  ;;  %1667 = vmatmul.mubr.f32.gmra.mxu1 %v653_v46  ;;  %1223 = vmatprep.mubr.f32.mxu0 %v656_v49 }
 0x203   : > { %1718 = vst [vmem:[%s5724_s18 + $0xa8] sm:$0xff] %v1377_v51  ;;  %v1381_v54 = vadd.f32 %v1380_v53, %v931_v52  ;;  %1672 = vmatprep.mubr.f32.mxu1 %v658_v50  ;;  %v933_v57 = vpop.f32.mrf.mxu0 }
 0x204   : > { %v1382_v58 = vpop.f32.mrf.mxu1 }
 0x205   : > { %1719 = vst [vmem:[%s5724_s18 + $0xb0] sm:$0xff] %v1381_v54  ;;  %v1383_v61 = vadd.f32 %v1382_v58, %v933_v57  ;;  %v937_v62 = vpop.f32.mrf.mxu0  ;;  %1224 = vmatmul.mubr.f32.gmra.mxu0 %v655_v55 }
 0x206   : > { %v1386_v63 = vpop.f32.mrf.mxu1  ;;  %1673 = vmatmul.mubr.f32.gmra.mxu1 %v657_v56  ;;  %1229 = vmatprep.mubr.f32.mxu0 %v660_v59 }
 0x207   : > { %1720 = vst [vmem:[%s5724_s18 + $0xb8] sm:$0xff] %v1383_v61  ;;  %v1387_v0 = vadd.f32 %v1386_v63, %v937_v62  ;;  %1678 = vmatprep.mubr.f32.mxu1 %v662_v60  ;;  %v939_v3 = vpop.f32.mrf.mxu0 }
 0x208   : > { %v1388_v4 = vpop.f32.mrf.mxu1 }
 0x209   : > { %1721 = vst [vmem:[%s5724_s18 + $0xc0] sm:$0xff] %v1387_v0  ;;  %v1389_v7 = vadd.f32 %v1388_v4, %v939_v3  ;;  %v943_v8 = vpop.f32.mrf.mxu0  ;;  %1230 = vmatmul.mubr.f32.gmra.mxu0 %v659_v1 }
 0x20a   : > { %v1392_v9 = vpop.f32.mrf.mxu1  ;;  %1679 = vmatmul.mubr.f32.gmra.mxu1 %v661_v2  ;;  %1235 = vmatprep.mubr.f32.mxu0 %v664_v5 }
 0x20b   : > { %1722 = vst [vmem:[%s5724_s18 + $0xc8] sm:$0xff] %v1389_v7  ;;  %v1393_v10 = vadd.f32 %v1392_v9, %v943_v8  ;;  %1684 = vmatprep.mubr.f32.mxu1 %v666_v6  ;;  %v945_v13 = vpop.f32.mrf.mxu0 }
 0x20c   : > { %v1394_v14 = vpop.f32.mrf.mxu1 }
 0x20d   : > { %1723 = vst [vmem:[%s5724_s18 + $0xd0] sm:$0xff] %v1393_v10  ;;  %v1395_v17 = vadd.f32 %v1394_v14, %v945_v13  ;;  %v949_v18 = vpop.f32.mrf.mxu0  ;;  %1236 = vmatmul.mubr.f32.gmra.mxu0 %v663_v11 }
 0x20e   : > { %v1398_v19 = vpop.f32.mrf.mxu1  ;;  %1685 = vmatmul.mubr.f32.gmra.mxu1 %v665_v12  ;;  %1241 = vmatprep.mubr.f32.mxu0 %v668_v15 }
 0x20f   : > { %1724 = vst [vmem:[%s5724_s18 + $0xd8] sm:$0xff] %v1395_v17  ;;  %v1399_v20 = vadd.f32 %v1398_v19, %v949_v18  ;;  %1690 = vmatprep.mubr.f32.mxu1 %v670_v16  ;;  %v951_v23 = vpop.f32.mrf.mxu0 }
 0x210   : > { %v1400_v24 = vpop.f32.mrf.mxu1 }
 0x211   : > { %1725 = vst [vmem:[%s5724_s18 + $0xe0] sm:$0xff] %v1399_v20  ;;  %v1401_v25 = vadd.f32 %v1400_v24, %v951_v23  ;;  %v955_v26 = vpop.f32.mrf.mxu0  ;;  %1242 = vmatmul.mubr.f32.gmra.mxu0 %v667_v21 }
 0x212   : > { %v1404_v27 = vpop.f32.mrf.mxu1  ;;  %1691 = vmatmul.mubr.f32.gmra.mxu1 %v669_v22 }
 0x213   : > { %1726 = vst [vmem:[%s5724_s18 + $0xe8] sm:$0xff] %v1401_v25  ;;  %v1405_v28 = vadd.f32 %v1404_v27, %v955_v26  ;;  %v957_v29 = vpop.f32.mrf.mxu0 }
 0x214   : > { %v1406_v30 = vpop.f32.mrf.mxu1 }
 0x215   : > { %1727 = vst [vmem:[%s5724_s18 + $0xf0] sm:$0xff] %v1405_v28  ;;  %v1407_v31 = vadd.f32 %v1406_v30, %v957_v29  ;;  %v961_v32 = vpop.f32.mrf.mxu0 }
 0x216   : > { %v1410_v33 = vpop.f32.mrf.mxu1 }
 0x217   : > { %1728 = vst [vmem:[%s5724_s18 + $0xf8] sm:$0xff] %v1407_v31  ;;  %v1411_v34 = vadd.f32 %v1410_v33, %v961_v32  ;;  %v963_v35 = vpop.f32.mrf.mxu0 }
 0x218   : > { %v1412_v36 = vpop.f32.mrf.mxu1 }
 0x219   : > { %1729 = vst [vmem:[%s5724_s18 + $0x100] sm:$0xff] %v1411_v34  ;;  %v1413_v37 = vadd.f32 %v1412_v36, %v963_v35  ;;  %v967_v38 = vpop.f32.mrf.mxu0 }
 0x21a   : > { %v1416_v39 = vpop.f32.mrf.mxu1 }
 0x21b   : > { %1730 = vst [vmem:[%s5724_s18 + $0x108] sm:$0xff] %v1413_v37  ;;  %v1417_v40 = vadd.f32 %v1416_v39, %v967_v38  ;;  %v969_v41 = vpop.f32.mrf.mxu0 }
 0x21c   : > { %v1418_v42 = vpop.f32.mrf.mxu1 }
 0x21d   : > { %1731 = vst [vmem:[%s5724_s18 + $0x110] sm:$0xff] %v1417_v40  ;;  %v1419_v43 = vadd.f32 %v1418_v42, %v969_v41  ;;  %v973_v44 = vpop.f32.mrf.mxu0 }
 0x21e   : > { %v1422_v45 = vpop.f32.mrf.mxu1 }
 0x21f   : > { %1732 = vst [vmem:[%s5724_s18 + $0x118] sm:$0xff] %v1419_v43  ;;  %v1423_v46 = vadd.f32 %v1422_v45, %v973_v44  ;;  %v975_v47 = vpop.f32.mrf.mxu0 }
 0x220   : > { %v1424_v48 = vpop.f32.mrf.mxu1 }
 0x221   : > { %1733 = vst [vmem:[%s5724_s18 + $0x120] sm:$0xff] %v1423_v46  ;;  %v1425_v49 = vadd.f32 %v1424_v48, %v975_v47  ;;  %v979_v50 = vpop.f32.mrf.mxu0 }
 0x222   : > { %v1428_v51 = vpop.f32.mrf.mxu1 }
 0x223   : > { %1734 = vst [vmem:[%s5724_s18 + $0x128] sm:$0xff] %v1425_v49  ;;  %v1429_v52 = vadd.f32 %v1428_v51, %v979_v50  ;;  %v981_v53 = vpop.f32.mrf.mxu0 }
 0x224   : > { %v1430_v54 = vpop.f32.mrf.mxu1 }
 0x225   : > { %1735 = vst [vmem:[%s5724_s18 + $0x130] sm:$0xff] %v1429_v52  ;;  %v1431_v55 = vadd.f32 %v1430_v54, %v981_v53  ;;  %v985_v56 = vpop.f32.mrf.mxu0 }
 0x226   : > { %v1434_v57 = vpop.f32.mrf.mxu1 }
 0x227   : > { %1736 = vst [vmem:[%s5724_s18 + $0x138] sm:$0xff] %v1431_v55  ;;  %v1435_v58 = vadd.f32 %v1434_v57, %v985_v56  ;;  %v987_v59 = vpop.f32.mrf.mxu0 }
 0x228   : > { %v1436_v60 = vpop.f32.mrf.mxu1 }
 0x229   : > { %1737 = vst [vmem:[%s5724_s18 + $0x140] sm:$0xff] %v1435_v58  ;;  %v1437_v61 = vadd.f32 %v1436_v60, %v987_v59  ;;  %v991_v62 = vpop.f32.mrf.mxu0 }
 0x22a   : > { %v1440_v63 = vpop.f32.mrf.mxu1 }
 0x22b   : > { %1738 = vst [vmem:[%s5724_s18 + $0x148] sm:$0xff] %v1437_v61  ;;  %v1441_v0 = vadd.f32 %v1440_v63, %v991_v62  ;;  %v993_v1 = vpop.f32.mrf.mxu0 }
 0x22c   : > { %v1442_v2 = vpop.f32.mrf.mxu1 }
 0x22d   : > { %1739 = vst [vmem:[%s5724_s18 + $0x150] sm:$0xff] %v1441_v0  ;;  %v1443_v3 = vadd.f32 %v1442_v2, %v993_v1  ;;  %v997_v4 = vpop.f32.mrf.mxu0 }
 0x22e   : > { %v1446_v5 = vpop.f32.mrf.mxu1 }
 0x22f   : > { %1740 = vst [vmem:[%s5724_s18 + $0x158] sm:$0xff] %v1443_v3  ;;  %v1447_v6 = vadd.f32 %v1446_v5, %v997_v4  ;;  %v999_v7 = vpop.f32.mrf.mxu0 }
 0x230   : > { %v1448_v8 = vpop.f32.mrf.mxu1 }
 0x231   : > { %1741 = vst [vmem:[%s5724_s18 + $0x160] sm:$0xff] %v1447_v6  ;;  %v1449_v9 = vadd.f32 %v1448_v8, %v999_v7  ;;  %v1003_v10 = vpop.f32.mrf.mxu0 }
 0x232   : > { %v1452_v11 = vpop.f32.mrf.mxu1 }
 0x233   : > { %1742 = vst [vmem:[%s5724_s18 + $0x168] sm:$0xff] %v1449_v9  ;;  %v1453_v12 = vadd.f32 %v1452_v11, %v1003_v10  ;;  %v1005_v13 = vpop.f32.mrf.mxu0 }
 0x234   : > { %v1454_v14 = vpop.f32.mrf.mxu1 }
 0x235   : > { %1743 = vst [vmem:[%s5724_s18 + $0x170] sm:$0xff] %v1453_v12  ;;  %v1455_v15 = vadd.f32 %v1454_v14, %v1005_v13  ;;  %v1009_v16 = vpop.f32.mrf.mxu0 }
 0x236   : > { %v1458_v17 = vpop.f32.mrf.mxu1 }
 0x237   : > { %1744 = vst [vmem:[%s5724_s18 + $0x178] sm:$0xff] %v1455_v15  ;;  %v1459_v18 = vadd.f32 %v1458_v17, %v1009_v16  ;;  %v1011_v19 = vpop.f32.mrf.mxu0 }
 0x238   : > { %v1460_v20 = vpop.f32.mrf.mxu1 }
 0x239   : > { %1745 = vst [vmem:[%s5724_s18 + $0x180] sm:$0xff] %v1459_v18  ;;  %v1461_v21 = vadd.f32 %v1460_v20, %v1011_v19  ;;  %v1015_v22 = vpop.f32.mrf.mxu0 }
 0x23a   : > { %v1464_v23 = vpop.f32.mrf.mxu1 }
 0x23b   : > { %1746 = vst [vmem:[%s5724_s18 + $0x188] sm:$0xff] %v1461_v21  ;;  %v1465_v24 = vadd.f32 %v1464_v23, %v1015_v22  ;;  %v1017_v25 = vpop.f32.mrf.mxu0 }
 0x23c   : > { %v1466_v26 = vpop.f32.mrf.mxu1 }
 0x23d   : > { %1747 = vst [vmem:[%s5724_s18 + $0x190] sm:$0xff] %v1465_v24  ;;  %v1467_v27 = vadd.f32 %v1466_v26, %v1017_v25  ;;  %v1021_v28 = vpop.f32.mrf.mxu0 }
 0x23e   : > { %v1470_v29 = vpop.f32.mrf.mxu1 }
 0x23f   : > { %1748 = vst [vmem:[%s5724_s18 + $0x198] sm:$0xff] %v1467_v27  ;;  %v1471_v30 = vadd.f32 %v1470_v29, %v1021_v28  ;;  %v1023_v31 = vpop.f32.mrf.mxu0 }
 0x240   : > { %v1472_v32 = vpop.f32.mrf.mxu1 }
 0x241   : > { %1749 = vst [vmem:[%s5724_s18 + $0x1a0] sm:$0xff] %v1471_v30  ;;  %v1473_v33 = vadd.f32 %v1472_v32, %v1023_v31  ;;  %v1027_v34 = vpop.f32.mrf.mxu0 }
 0x242   : > { %v1476_v35 = vpop.f32.mrf.mxu1 }
 0x243   : > { %1750 = vst [vmem:[%s5724_s18 + $0x1a8] sm:$0xff] %v1473_v33  ;;  %v1477_v36 = vadd.f32 %v1476_v35, %v1027_v34  ;;  %v1029_v37 = vpop.f32.mrf.mxu0 }
 0x244   : > { %v1478_v38 = vpop.f32.mrf.mxu1 }
 0x245   : > { %1751 = vst [vmem:[%s5724_s18 + $0x1b0] sm:$0xff] %v1477_v36  ;;  %v1479_v39 = vadd.f32 %v1478_v38, %v1029_v37  ;;  %v1033_v40 = vpop.f32.mrf.mxu0 }
 0x246   : > { %v1482_v41 = vpop.f32.mrf.mxu1 }
 0x247   : > { %1752 = vst [vmem:[%s5724_s18 + $0x1b8] sm:$0xff] %v1479_v39  ;;  %v1483_v42 = vadd.f32 %v1482_v41, %v1033_v40  ;;  %v1035_v43 = vpop.f32.mrf.mxu0 }
 0x248   : > { %v1484_v44 = vpop.f32.mrf.mxu1 }
 0x249   : > { %1753 = vst [vmem:[%s5724_s18 + $0x1c0] sm:$0xff] %v1483_v42  ;;  %v1485_v45 = vadd.f32 %v1484_v44, %v1035_v43  ;;  %v1039_v46 = vpop.f32.mrf.mxu0 }
 0x24a   : > { %v1488_v47 = vpop.f32.mrf.mxu1 }
 0x24b   : > { %1754 = vst [vmem:[%s5724_s18 + $0x1c8] sm:$0xff] %v1485_v45  ;;  %v1489_v48 = vadd.f32 %v1488_v47, %v1039_v46  ;;  %v1041_v49 = vpop.f32.mrf.mxu0 }
 0x24c   : > { %v1490_v50 = vpop.f32.mrf.mxu1 }
 0x24d   : > { %1755 = vst [vmem:[%s5724_s18 + $0x1d0] sm:$0xff] %v1489_v48  ;;  %v1491_v51 = vadd.f32 %v1490_v50, %v1041_v49  ;;  %v1045_v52 = vpop.f32.mrf.mxu0 }
 0x24e   : > { %v1494_v53 = vpop.f32.mrf.mxu1 }
 0x24f   : > { %1756 = vst [vmem:[%s5724_s18 + $0x1d8] sm:$0xff] %v1491_v51  ;;  %v1495_v54 = vadd.f32 %v1494_v53, %v1045_v52  ;;  %v1047_v55 = vpop.f32.mrf.mxu0 }
 0x250   : > { %v1496_v56 = vpop.f32.mrf.mxu1 }
 0x251   : > { %1757 = vst [vmem:[%s5724_s18 + $0x1e0] sm:$0xff] %v1495_v54  ;;  %v1497_v57 = vadd.f32 %v1496_v56, %v1047_v55  ;;  %v1051_v58 = vpop.f32.mrf.mxu0 }
 0x252   : > { %v1500_v59 = vpop.f32.mrf.mxu1 }
 0x253   : > { %1758 = vst [vmem:[%s5724_s18 + $0x1e8] sm:$0xff] %v1497_v57  ;;  %v1501_v60 = vadd.f32 %v1500_v59, %v1051_v58  ;;  %v1053_v61 = vpop.f32.mrf.mxu0 }
 0x254   : > { %v1502_v62 = vpop.f32.mrf.mxu1 }
 0x255   : > { %1759 = vst [vmem:[%s5724_s18 + $0x1f0] sm:$0xff] %v1501_v60  ;;  %v1503_v63 = vadd.f32 %v1502_v62, %v1053_v61  ;;  %v1057_v0 = vpop.f32.mrf.mxu0 }
 0x256   : > { %v1506_v1 = vpop.f32.mrf.mxu1 }
 0x257   : > { %1760 = vst [vmem:[%s5724_s18 + $0x1f8] sm:$0xff] %v1503_v63  ;;  %v1507_v2 = vadd.f32 %v1506_v1, %v1057_v0  ;;  %v1059_v3 = vpop.f32.mrf.mxu0 }
 0x258   : > { %v1508_v4 = vpop.f32.mrf.mxu1 }
 0x259   : > { %1761 = vst [vmem:[%s5724_s18 + $0x200] sm:$0xff] %v1507_v2  ;;  %v1509_v5 = vadd.f32 %v1508_v4, %v1059_v3  ;;  %v1063_v6 = vpop.f32.mrf.mxu0 }
 0x25a   : > { %v1512_v7 = vpop.f32.mrf.mxu1 }
 0x25b   : > { %1762 = vst [vmem:[%s5724_s18 + $0x208] sm:$0xff] %v1509_v5  ;;  %v1513_v8 = vadd.f32 %v1512_v7, %v1063_v6  ;;  %v1065_v9 = vpop.f32.mrf.mxu0 }
 0x25c   : > { %v1514_v10 = vpop.f32.mrf.mxu1 }
 0x25d   : > { %1763 = vst [vmem:[%s5724_s18 + $0x210] sm:$0xff] %v1513_v8  ;;  %v1515_v11 = vadd.f32 %v1514_v10, %v1065_v9  ;;  %v1069_v12 = vpop.f32.mrf.mxu0 }
 0x25e   : > { %v1518_v13 = vpop.f32.mrf.mxu1 }
 0x25f   : > { %1764 = vst [vmem:[%s5724_s18 + $0x218] sm:$0xff] %v1515_v11  ;;  %v1519_v14 = vadd.f32 %v1518_v13, %v1069_v12  ;;  %v1071_v15 = vpop.f32.mrf.mxu0 }
 0x260   : > { %v1520_v16 = vpop.f32.mrf.mxu1 }
 0x261   : > { %1765 = vst [vmem:[%s5724_s18 + $0x220] sm:$0xff] %v1519_v14  ;;  %v1521_v17 = vadd.f32 %v1520_v16, %v1071_v15  ;;  %v1075_v18 = vpop.f32.mrf.mxu0 }
 0x262   : > { %v1524_v19 = vpop.f32.mrf.mxu1 }
 0x263   : > { %1766 = vst [vmem:[%s5724_s18 + $0x228] sm:$0xff] %v1521_v17  ;;  %v1525_v20 = vadd.f32 %v1524_v19, %v1075_v18  ;;  %v1077_v21 = vpop.f32.mrf.mxu0 }
 0x264   : > { %v1526_v22 = vpop.f32.mrf.mxu1 }
 0x265   : > { %1767 = vst [vmem:[%s5724_s18 + $0x230] sm:$0xff] %v1525_v20  ;;  %v1527_v23 = vadd.f32 %v1526_v22, %v1077_v21  ;;  %v1081_v24 = vpop.f32.mrf.mxu0 }
 0x266   : > { %v1530_v25 = vpop.f32.mrf.mxu1 }
 0x267   : > { %1768 = vst [vmem:[%s5724_s18 + $0x238] sm:$0xff] %v1527_v23  ;;  %v1531_v26 = vadd.f32 %v1530_v25, %v1081_v24  ;;  %v1083_v27 = vpop.f32.mrf.mxu0 }
 0x268   : > { %v1532_v28 = vpop.f32.mrf.mxu1 }
 0x269   : > { %1769 = vst [vmem:[%s5724_s18 + $0x240] sm:$0xff] %v1531_v26  ;;  %v1533_v29 = vadd.f32 %v1532_v28, %v1083_v27  ;;  %v1087_v30 = vpop.f32.mrf.mxu0 }
 0x26a   : > { %v1536_v31 = vpop.f32.mrf.mxu1 }
 0x26b   : > { %1770 = vst [vmem:[%s5724_s18 + $0x248] sm:$0xff] %v1533_v29  ;;  %v1537_v32 = vadd.f32 %v1536_v31, %v1087_v30  ;;  %v1089_v33 = vpop.f32.mrf.mxu0 }
 0x26c   : > { %v1538_v34 = vpop.f32.mrf.mxu1 }
 0x26d   : > { %1771 = vst [vmem:[%s5724_s18 + $0x250] sm:$0xff] %v1537_v32  ;;  %v1539_v35 = vadd.f32 %v1538_v34, %v1089_v33  ;;  %v1093_v36 = vpop.f32.mrf.mxu0 }
 0x26e   : > { %v1542_v37 = vpop.f32.mrf.mxu1 }
 0x26f   : > { %1772 = vst [vmem:[%s5724_s18 + $0x258] sm:$0xff] %v1539_v35  ;;  %v1543_v38 = vadd.f32 %v1542_v37, %v1093_v36  ;;  %v1095_v39 = vpop.f32.mrf.mxu0 }
 0x270   : > { %v1544_v40 = vpop.f32.mrf.mxu1 }
 0x271   : > { %1773 = vst [vmem:[%s5724_s18 + $0x260] sm:$0xff] %v1543_v38  ;;  %v1545_v41 = vadd.f32 %v1544_v40, %v1095_v39  ;;  %v1099_v42 = vpop.f32.mrf.mxu0 }
 0x272   : > { %v1548_v43 = vpop.f32.mrf.mxu1 }
 0x273   : > { %1774 = vst [vmem:[%s5724_s18 + $0x268] sm:$0xff] %v1545_v41  ;;  %v1549_v44 = vadd.f32 %v1548_v43, %v1099_v42  ;;  %v1101_v45 = vpop.f32.mrf.mxu0 }
 0x274   : > { %v1550_v46 = vpop.f32.mrf.mxu1 }
 0x275   : > { %1775 = vst [vmem:[%s5724_s18 + $0x270] sm:$0xff] %v1549_v44  ;;  %v1551_v47 = vadd.f32 %v1550_v46, %v1101_v45  ;;  %v1105_v48 = vpop.f32.mrf.mxu0 }
 0x276   : > { %v1554_v49 = vpop.f32.mrf.mxu1 }
 0x277   : > { %1776 = vst [vmem:[%s5724_s18 + $0x278] sm:$0xff] %v1551_v47  ;;  %v1555_v50 = vadd.f32 %v1554_v49, %v1105_v48  ;;  %v1107_v51 = vpop.f32.mrf.mxu0 }
 0x278   : > { %v1556_v52 = vpop.f32.mrf.mxu1 }
 0x279   : > { %1777 = vst [vmem:[%s5724_s18 + $0x280] sm:$0xff] %v1555_v50  ;;  %v1557_v53 = vadd.f32 %v1556_v52, %v1107_v51  ;;  %v1111_v54 = vpop.f32.mrf.mxu0 }
 0x27a   : > { %v1560_v55 = vpop.f32.mrf.mxu1 }
 0x27b   : > { %1778 = vst [vmem:[%s5724_s18 + $0x288] sm:$0xff] %v1557_v53  ;;  %v1561_v56 = vadd.f32 %v1560_v55, %v1111_v54  ;;  %v1113_v57 = vpop.f32.mrf.mxu0 }
 0x27c   : > { %v1562_v58 = vpop.f32.mrf.mxu1 }
 0x27d   : > { %1779 = vst [vmem:[%s5724_s18 + $0x290] sm:$0xff] %v1561_v56  ;;  %v1563_v59 = vadd.f32 %v1562_v58, %v1113_v57  ;;  %v1117_v60 = vpop.f32.mrf.mxu0 }
 0x27e   : > { %v1566_v61 = vpop.f32.mrf.mxu1 }
 0x27f   : > { %1780 = vst [vmem:[%s5724_s18 + $0x298] sm:$0xff] %v1563_v59  ;;  %v1567_v62 = vadd.f32 %v1566_v61, %v1117_v60  ;;  %v1119_v63 = vpop.f32.mrf.mxu0 }
 0x280   : > { %v1568_v0 = vpop.f32.mrf.mxu1 }
 0x281   : > { %1781 = vst [vmem:[%s5724_s18 + $0x2a0] sm:$0xff] %v1567_v62  ;;  %v1569_v1 = vadd.f32 %v1568_v0, %v1119_v63  ;;  %v1123_v2 = vpop.f32.mrf.mxu0 }
 0x282   : > { %v1572_v3 = vpop.f32.mrf.mxu1 }
 0x283   : > { %1782 = vst [vmem:[%s5724_s18 + $0x2a8] sm:$0xff] %v1569_v1  ;;  %v1573_v4 = vadd.f32 %v1572_v3, %v1123_v2  ;;  %v1125_v5 = vpop.f32.mrf.mxu0 }
 0x284   : > { %v1574_v6 = vpop.f32.mrf.mxu1 }
 0x285   : > { %1783 = vst [vmem:[%s5724_s18 + $0x2b0] sm:$0xff] %v1573_v4  ;;  %v1575_v7 = vadd.f32 %v1574_v6, %v1125_v5  ;;  %v1129_v8 = vpop.f32.mrf.mxu0 }
 0x286   : > { %v1578_v9 = vpop.f32.mrf.mxu1 }
 0x287   : > { %1784 = vst [vmem:[%s5724_s18 + $0x2b8] sm:$0xff] %v1575_v7  ;;  %v1579_v10 = vadd.f32 %v1578_v9, %v1129_v8  ;;  %v1131_v11 = vpop.f32.mrf.mxu0 }
 0x288   : > { %v1580_v12 = vpop.f32.mrf.mxu1 }
 0x289   : > { %1785 = vst [vmem:[%s5724_s18 + $0x2c0] sm:$0xff] %v1579_v10  ;;  %v1581_v13 = vadd.f32 %v1580_v12, %v1131_v11  ;;  %v1135_v14 = vpop.f32.mrf.mxu0 }
 0x28a   : > { %v1584_v15 = vpop.f32.mrf.mxu1 }
 0x28b   : > { %1786 = vst [vmem:[%s5724_s18 + $0x2c8] sm:$0xff] %v1581_v13  ;;  %v1585_v16 = vadd.f32 %v1584_v15, %v1135_v14  ;;  %v1137_v17 = vpop.f32.mrf.mxu0 }
 0x28c   : > { %v1586_v18 = vpop.f32.mrf.mxu1 }
 0x28d   : > { %1787 = vst [vmem:[%s5724_s18 + $0x2d0] sm:$0xff] %v1585_v16  ;;  %v1587_v19 = vadd.f32 %v1586_v18, %v1137_v17  ;;  %v1141_v20 = vpop.f32.mrf.mxu0 }
 0x28e   : > { %v1590_v21 = vpop.f32.mrf.mxu1 }
 0x28f   : > { %1788 = vst [vmem:[%s5724_s18 + $0x2d8] sm:$0xff] %v1587_v19  ;;  %v1591_v22 = vadd.f32 %v1590_v21, %v1141_v20  ;;  %v1143_v23 = vpop.f32.mrf.mxu0 }
 0x290   : > { %v1592_v24 = vpop.f32.mrf.mxu1 }
 0x291   : > { %1789 = vst [vmem:[%s5724_s18 + $0x2e0] sm:$0xff] %v1591_v22  ;;  %v1593_v25 = vadd.f32 %v1592_v24, %v1143_v23  ;;  %v1147_v26 = vpop.f32.mrf.mxu0 }
 0x292   : > { %v1596_v27 = vpop.f32.mrf.mxu1 }
 0x293   : > { %1790 = vst [vmem:[%s5724_s18 + $0x2e8] sm:$0xff] %v1593_v25  ;;  %v1597_v28 = vadd.f32 %v1596_v27, %v1147_v26  ;;  %v1149_v29 = vpop.f32.mrf.mxu0 }
 0x294   : > { %v1598_v30 = vpop.f32.mrf.mxu1 }
 0x295   : > { %1791 = vst [vmem:[%s5724_s18 + $0x2f0] sm:$0xff] %v1597_v28  ;;  %v1599_v31 = vadd.f32 %v1598_v30, %v1149_v29  ;;  %v1153_v32 = vpop.f32.mrf.mxu0 }
 0x296   : > { %v1602_v33 = vpop.f32.mrf.mxu1 }
 0x297   : > { %1792 = vst [vmem:[%s5724_s18 + $0x2f8] sm:$0xff] %v1599_v31  ;;  %v1603_v34 = vadd.f32 %v1602_v33, %v1153_v32  ;;  %v1155_v35 = vpop.f32.mrf.mxu0 }
 0x298   : > { %v1604_v36 = vpop.f32.mrf.mxu1 }
 0x299   : > { %1793 = vst [vmem:[%s5724_s18 + $0x300] sm:$0xff] %v1603_v34  ;;  %v1605_v37 = vadd.f32 %v1604_v36, %v1155_v35  ;;  %v1159_v38 = vpop.f32.mrf.mxu0 }
 0x29a   : > { %v1608_v39 = vpop.f32.mrf.mxu1 }
 0x29b   : > { %1794 = vst [vmem:[%s5724_s18 + $0x308] sm:$0xff] %v1605_v37  ;;  %v1609_v40 = vadd.f32 %v1608_v39, %v1159_v38  ;;  %v1161_v41 = vpop.f32.mrf.mxu0 }
 0x29c   : > { %v1610_v42 = vpop.f32.mrf.mxu1 }
 0x29d   : > { %1795 = vst [vmem:[%s5724_s18 + $0x310] sm:$0xff] %v1609_v40  ;;  %v1611_v43 = vadd.f32 %v1610_v42, %v1161_v41  ;;  %v1165_v44 = vpop.f32.mrf.mxu0 }
 0x29e   : > { %v1614_v45 = vpop.f32.mrf.mxu1 }
 0x29f   : > { %1796 = vst [vmem:[%s5724_s18 + $0x318] sm:$0xff] %v1611_v43  ;;  %v1615_v46 = vadd.f32 %v1614_v45, %v1165_v44  ;;  %v1167_v47 = vpop.f32.mrf.mxu0 }
 0x2a0   : > { %v1616_v48 = vpop.f32.mrf.mxu1 }
 0x2a1   : > { %1797 = vst [vmem:[%s5724_s18 + $0x320] sm:$0xff] %v1615_v46  ;;  %v1617_v49 = vadd.f32 %v1616_v48, %v1167_v47  ;;  %v1171_v50 = vpop.f32.mrf.mxu0 }
 0x2a2   : > { %v1620_v51 = vpop.f32.mrf.mxu1 }
 0x2a3   : > { %1798 = vst [vmem:[%s5724_s18 + $0x328] sm:$0xff] %v1617_v49  ;;  %v1621_v52 = vadd.f32 %v1620_v51, %v1171_v50  ;;  %v1173_v53 = vpop.f32.mrf.mxu0 }
 0x2a4   : > { %v1622_v54 = vpop.f32.mrf.mxu1 }
 0x2a5   : > { %1799 = vst [vmem:[%s5724_s18 + $0x330] sm:$0xff] %v1621_v52  ;;  %v1623_v55 = vadd.f32 %v1622_v54, %v1173_v53  ;;  %v1177_v56 = vpop.f32.mrf.mxu0 }
 0x2a6   : > { %v1626_v57 = vpop.f32.mrf.mxu1 }
 0x2a7   : > { %1800 = vst [vmem:[%s5724_s18 + $0x338] sm:$0xff] %v1623_v55  ;;  %v1627_v58 = vadd.f32 %v1626_v57, %v1177_v56  ;;  %v1179_v59 = vpop.f32.mrf.mxu0 }
 0x2a8   : > { %v1628_v60 = vpop.f32.mrf.mxu1 }
 0x2a9   : > { %1801 = vst [vmem:[%s5724_s18 + $0x340] sm:$0xff] %v1627_v58  ;;  %v1629_v61 = vadd.f32 %v1628_v60, %v1179_v59  ;;  %v1183_v62 = vpop.f32.mrf.mxu0 }
 0x2aa   : > { %v1632_v63 = vpop.f32.mrf.mxu1 }
 0x2ab   : > { %1802 = vst [vmem:[%s5724_s18 + $0x348] sm:$0xff] %v1629_v61  ;;  %v1633_v0 = vadd.f32 %v1632_v63, %v1183_v62  ;;  %v1185_v1 = vpop.f32.mrf.mxu0 }
 0x2ac   : > { %v1634_v2 = vpop.f32.mrf.mxu1 }
 0x2ad   : > { %1803 = vst [vmem:[%s5724_s18 + $0x350] sm:$0xff] %v1633_v0  ;;  %v1635_v3 = vadd.f32 %v1634_v2, %v1185_v1  ;;  %v1189_v4 = vpop.f32.mrf.mxu0 }
 0x2ae   : > { %v1638_v5 = vpop.f32.mrf.mxu1 }
 0x2af   : > { %1804 = vst [vmem:[%s5724_s18 + $0x358] sm:$0xff] %v1635_v3  ;;  %v1639_v6 = vadd.f32 %v1638_v5, %v1189_v4  ;;  %v1191_v7 = vpop.f32.mrf.mxu0 }
 0x2b0   : > { %v1640_v8 = vpop.f32.mrf.mxu1 }
 0x2b1   : > { %1805 = vst [vmem:[%s5724_s18 + $0x360] sm:$0xff] %v1639_v6  ;;  %v1641_v9 = vadd.f32 %v1640_v8, %v1191_v7  ;;  %v1195_v10 = vpop.f32.mrf.mxu0 }
 0x2b2   : > { %v1644_v11 = vpop.f32.mrf.mxu1 }
 0x2b3   : > { %1806 = vst [vmem:[%s5724_s18 + $0x368] sm:$0xff] %v1641_v9  ;;  %v1645_v12 = vadd.f32 %v1644_v11, %v1195_v10  ;;  %v1197_v13 = vpop.f32.mrf.mxu0 }
 0x2b4   : > { %v1646_v14 = vpop.f32.mrf.mxu1 }
 0x2b5   : > { %1807 = vst [vmem:[%s5724_s18 + $0x370] sm:$0xff] %v1645_v12  ;;  %v1647_v15 = vadd.f32 %v1646_v14, %v1197_v13  ;;  %v1201_v16 = vpop.f32.mrf.mxu0 }
 0x2b6   : > { %v1650_v17 = vpop.f32.mrf.mxu1 }
 0x2b7   : > { %1808 = vst [vmem:[%s5724_s18 + $0x378] sm:$0xff] %v1647_v15  ;;  %v1651_v18 = vadd.f32 %v1650_v17, %v1201_v16  ;;  %v1203_v19 = vpop.f32.mrf.mxu0 }
 0x2b8   : > { %v1652_v20 = vpop.f32.mrf.mxu1 }
 0x2b9   : > { %1809 = vst [vmem:[%s5724_s18 + $0x380] sm:$0xff] %v1651_v18  ;;  %v1653_v21 = vadd.f32 %v1652_v20, %v1203_v19  ;;  %v1207_v22 = vpop.f32.mrf.mxu0 }
 0x2ba   : > { %v1656_v23 = vpop.f32.mrf.mxu1 }
 0x2bb   : > { %1810 = vst [vmem:[%s5724_s18 + $0x388] sm:$0xff] %v1653_v21  ;;  %v1657_v24 = vadd.f32 %v1656_v23, %v1207_v22  ;;  %v1209_v25 = vpop.f32.mrf.mxu0 }
 0x2bc   : > { %v1658_v26 = vpop.f32.mrf.mxu1 }
 0x2bd   : > { %1811 = vst [vmem:[%s5724_s18 + $0x390] sm:$0xff] %v1657_v24  ;;  %v1659_v27 = vadd.f32 %v1658_v26, %v1209_v25  ;;  %v1213_v28 = vpop.f32.mrf.mxu0 }
 0x2be   : > { %v1662_v29 = vpop.f32.mrf.mxu1 }
 0x2bf   : > { %1812 = vst [vmem:[%s5724_s18 + $0x398] sm:$0xff] %v1659_v27  ;;  %v1663_v30 = vadd.f32 %v1662_v29, %v1213_v28  ;;  %v1215_v31 = vpop.f32.mrf.mxu0 }
 0x2c0   : > { %v1664_v32 = vpop.f32.mrf.mxu1 }
 0x2c1   : > { %1813 = vst [vmem:[%s5724_s18 + $0x3a0] sm:$0xff] %v1663_v30  ;;  %v1665_v33 = vadd.f32 %v1664_v32, %v1215_v31  ;;  %v1219_v34 = vpop.f32.mrf.mxu0 }
 0x2c2   : > { %v1668_v35 = vpop.f32.mrf.mxu1 }
 0x2c3   : > { %1814 = vst [vmem:[%s5724_s18 + $0x3a8] sm:$0xff] %v1665_v33  ;;  %v1669_v36 = vadd.f32 %v1668_v35, %v1219_v34  ;;  %v1221_v37 = vpop.f32.mrf.mxu0 }
 0x2c4   : > { %v1670_v38 = vpop.f32.mrf.mxu1 }
 0x2c5   : > { %1815 = vst [vmem:[%s5724_s18 + $0x3b0] sm:$0xff] %v1669_v36  ;;  %v1671_v39 = vadd.f32 %v1670_v38, %v1221_v37  ;;  %v1225_v40 = vpop.f32.mrf.mxu0 }
 0x2c6   : > { %v1674_v41 = vpop.f32.mrf.mxu1 }
 0x2c7   : > { %1816 = vst [vmem:[%s5724_s18 + $0x3b8] sm:$0xff] %v1671_v39  ;;  %v1675_v42 = vadd.f32 %v1674_v41, %v1225_v40  ;;  %v1227_v43 = vpop.f32.mrf.mxu0 }
 0x2c8   : > { %v1676_v44 = vpop.f32.mrf.mxu1 }
 0x2c9   : > { %1817 = vst [vmem:[%s5724_s18 + $0x3c0] sm:$0xff] %v1675_v42  ;;  %v1677_v45 = vadd.f32 %v1676_v44, %v1227_v43  ;;  %v1231_v46 = vpop.f32.mrf.mxu0 }
 0x2ca   : > { %v1680_v47 = vpop.f32.mrf.mxu1 }
 0x2cb   : > { %1818 = vst [vmem:[%s5724_s18 + $0x3c8] sm:$0xff] %v1677_v45  ;;  %v1681_v48 = vadd.f32 %v1680_v47, %v1231_v46  ;;  %v1233_v49 = vpop.f32.mrf.mxu0 }
 0x2cc   : > { %v1682_v50 = vpop.f32.mrf.mxu1 }
 0x2cd   : > { %1819 = vst [vmem:[%s5724_s18 + $0x3d0] sm:$0xff] %v1681_v48  ;;  %v1683_v51 = vadd.f32 %v1682_v50, %v1233_v49  ;;  %v1237_v52 = vpop.f32.mrf.mxu0 }
 0x2ce   : > { %v1686_v53 = vpop.f32.mrf.mxu1 }
 0x2cf   : > { %1820 = vst [vmem:[%s5724_s18 + $0x3d8] sm:$0xff] %v1683_v51  ;;  %v1687_v54 = vadd.f32 %v1686_v53, %v1237_v52  ;;  %v1239_v55 = vpop.f32.mrf.mxu0 }
 0x2d0   : > { %v1688_v56 = vpop.f32.mrf.mxu1 }
 0x2d1   : > { %1821 = vst [vmem:[%s5724_s18 + $0x3e0] sm:$0xff] %v1687_v54  ;;  %v1689_v57 = vadd.f32 %v1688_v56, %v1239_v55  ;;  %v1243_v58 = vpop.f32.mrf.mxu0 }
 0x2d2   : > { %v1692_v59 = vpop.f32.mrf.mxu1 }
 0x2d3   : > { %1822 = vst [vmem:[%s5724_s18 + $0x3e8] sm:$0xff] %v1689_v57  ;;  %v1693_v60 = vadd.f32 %v1692_v59, %v1243_v58  ;;  %v1245_v61 = vpop.f32.mrf.mxu0 }
 0x2d4   : > { %v1694_v62 = vpop.f32.mrf.mxu1 }
 0x2d5   : > { %1823 = vst [vmem:[%s5724_s18 + $0x3f0] sm:$0xff] %v1693_v60  ;;  %v1695_v63 = vadd.f32 %v1694_v62, %v1245_v61 }
 0x2d7   : > { %1824 = vst [vmem:[%s5724_s18 + $0x3f8] sm:$0xff] %v1695_v63 }
 0x2d8 PF: > { %s7513_s7 = sld [smem:[#allocation26_spill]] }
 0x2de   : > { %p1825_p13 = scmp.gt.s32.totalorder %s7513_s7, 0  ;;  %p1826_p10 = scmp.lt.s32.totalorder %s7513_s7, 1 }
 0x2e0   : > { %p1827_p1 = pnand %p1826_p10, %p1825_p13 }
 0x2e2   : > { %1830 = sbr.rel (%p1827_p1) target bundleno = 1262 (0x4ee), region = 60 }
 0x2e7   : > { %v2246_v0 = vld [vmem:[%s5711_s26 + $0xf8] sm:$0xff]  ;;  %v2245_v2 = vld [vmem:[%s5711_s26 + $0xf0] sm:$0xff]  ;;  %v2244_v4 = vld [vmem:[%s5711_s26 + $0xe8] sm:$0xff] }
 0x2e8   : > { %v2310_v1 = vld [vmem:[%s5711_s26 + $0x2f8] sm:$0xff]  ;;  %2343 = vmatprep.subr.mxu0 %v2246_v0  ;;  %v2309_v3 = vld [vmem:[%s5711_s26 + $0x2f0] sm:$0xff]  ;;  %v2308_v5 = vld [vmem:[%s5711_s26 + $0x2e8] sm:$0xff] }
 0x2e9   : > { %2792 = vmatprep.subr.mxu1 %v2310_v1  ;;  %2344 = vmatpush1.msra.mxu0 %v2245_v2  ;;  %v2243_v6 = vld [vmem:[%s5711_s26 + $0xe0] sm:$0xff]  ;;  %v2242_v8 = vld [vmem:[%s5711_s26 + $0xd8] sm:$0xff]  ;;  %v2241_v10 = vld [vmem:[%s5711_s26 + $0xd0] sm:$0xff] }
 0x2ea   : > { %2793 = vmatpush1.msra.mxu1 %v2309_v3  ;;  %v2307_v7 = vld [vmem:[%s5711_s26 + $0x2e0] sm:$0xff]  ;;  %2345 = vmatprep.subr.mxu0 %v2244_v4  ;;  %v2306_v9 = vld [vmem:[%s5711_s26 + $0x2d8] sm:$0xff]  ;;  %v2305_v11 = vld [vmem:[%s5711_s26 + $0x2d0] sm:$0xff] }
 0x2eb   : > { %2794 = vmatprep.subr.mxu1 %v2308_v5  ;;  %2346 = vmatpush1.msra.mxu0 %v2243_v6  ;;  %v2240_v12 = vld [vmem:[%s5711_s26 + $0xc8] sm:$0xff]  ;;  %v2239_v14 = vld [vmem:[%s5711_s26 + $0xc0] sm:$0xff]  ;;  %v2238_v16 = vld [vmem:[%s5711_s26 + $0xb8] sm:$0xff] }
 0x2ec   : > { %2795 = vmatpush1.msra.mxu1 %v2307_v7  ;;  %v2304_v13 = vld [vmem:[%s5711_s26 + $0x2c8] sm:$0xff]  ;;  %2347 = vmatprep.subr.mxu0 %v2242_v8  ;;  %v2303_v15 = vld [vmem:[%s5711_s26 + $0x2c0] sm:$0xff]  ;;  %v2302_v17 = vld [vmem:[%s5711_s26 + $0x2b8] sm:$0xff] }
 0x2ed   : > { %2796 = vmatprep.subr.mxu1 %v2306_v9  ;;  %2348 = vmatpush1.msra.mxu0 %v2241_v10  ;;  %v2237_v18 = vld [vmem:[%s5711_s26 + $0xb0] sm:$0xff]  ;;  %v2236_v20 = vld [vmem:[%s5711_s26 + $0xa8] sm:$0xff]  ;;  %v2235_v22 = vld [vmem:[%s5711_s26 + $0xa0] sm:$0xff] }
 0x2ee   : > { %2797 = vmatpush1.msra.mxu1 %v2305_v11  ;;  %2349 = vmatprep.subr.mxu0 %v2240_v12  ;;  %v2301_v19 = vld [vmem:[%s5711_s26 + $0x2b0] sm:$0xff]  ;;  %v2300_v21 = vld [vmem:[%s5711_s26 + $0x2a8] sm:$0xff]  ;;  %v2299_v23 = vld [vmem:[%s5711_s26 + $0x2a0] sm:$0xff] }
 0x2ef   : > { %2798 = vmatprep.subr.mxu1 %v2304_v13  ;;  %2350 = vmatpush1.msra.mxu0 %v2239_v14  ;;  %v2234_v24 = vld [vmem:[%s5711_s26 + $0x98] sm:$0xff]  ;;  %v2233_v26 = vld [vmem:[%s5711_s26 + $0x90] sm:$0xff]  ;;  %v2232_v28 = vld [vmem:[%s5711_s26 + $0x88] sm:$0xff] }
 0x2f0   : > { %2799 = vmatpush1.msra.mxu1 %v2303_v15  ;;  %2351 = vmatprep.subr.mxu0 %v2238_v16  ;;  %v2298_v25 = vld [vmem:[%s5711_s26 + $0x298] sm:$0xff]  ;;  %v2297_v27 = vld [vmem:[%s5711_s26 + $0x290] sm:$0xff]  ;;  %v2296_v29 = vld [vmem:[%s5711_s26 + $0x288] sm:$0xff] }
 0x2f1   : > { %2800 = vmatprep.subr.mxu1 %v2302_v17  ;;  %2352 = vmatpush1.msra.mxu0 %v2237_v18  ;;  %v2231_v30 = vld [vmem:[%s5711_s26 + $0x80] sm:$0xff]  ;;  %v2230_v32 = vld [vmem:[%s5711_s26 + $0x78] sm:$0xff]  ;;  %v2229_v34 = vld [vmem:[%s5711_s26 + $0x70] sm:$0xff] }
 0x2f2   : > { %2801 = vmatpush1.msra.mxu1 %v2301_v19  ;;  %2353 = vmatprep.subr.mxu0 %v2236_v20  ;;  %v2295_v31 = vld [vmem:[%s5711_s26 + $0x280] sm:$0xff]  ;;  %v2294_v33 = vld [vmem:[%s5711_s26 + $0x278] sm:$0xff]  ;;  %v2293_v35 = vld [vmem:[%s5711_s26 + $0x270] sm:$0xff] }
 0x2f3   : > { %2802 = vmatprep.subr.mxu1 %v2300_v21  ;;  %2354 = vmatpush1.msra.mxu0 %v2235_v22  ;;  %v2228_v36 = vld [vmem:[%s5711_s26 + $0x68] sm:$0xff]  ;;  %v2227_v38 = vld [vmem:[%s5711_s26 + $0x60] sm:$0xff]  ;;  %v2226_v40 = vld [vmem:[%s5711_s26 + $0x58] sm:$0xff] }
 0x2f4   : > { %2803 = vmatpush1.msra.mxu1 %v2299_v23  ;;  %2355 = vmatprep.subr.mxu0 %v2234_v24  ;;  %v2292_v37 = vld [vmem:[%s5711_s26 + $0x268] sm:$0xff]  ;;  %v2291_v39 = vld [vmem:[%s5711_s26 + $0x260] sm:$0xff]  ;;  %v2290_v41 = vld [vmem:[%s5711_s26 + $0x258] sm:$0xff] }
 0x2f5   : > { %2804 = vmatprep.subr.mxu1 %v2298_v25  ;;  %2356 = vmatpush1.msra.mxu0 %v2233_v26  ;;  %v2225_v42 = vld [vmem:[%s5711_s26 + $0x50] sm:$0xff]  ;;  %v2224_v44 = vld [vmem:[%s5711_s26 + $0x48] sm:$0xff]  ;;  %v2223_v46 = vld [vmem:[%s5711_s26 + $0x40] sm:$0xff] }
 0x2f6   : > { %2805 = vmatpush1.msra.mxu1 %v2297_v27  ;;  %2357 = vmatprep.subr.mxu0 %v2232_v28  ;;  %v2289_v43 = vld [vmem:[%s5711_s26 + $0x250] sm:$0xff]  ;;  %v2288_v45 = vld [vmem:[%s5711_s26 + $0x248] sm:$0xff]  ;;  %v2287_v47 = vld [vmem:[%s5711_s26 + $0x240] sm:$0xff] }
 0x2f7   : > { %2806 = vmatprep.subr.mxu1 %v2296_v29  ;;  %2358 = vmatpush1.msra.mxu0 %v2231_v30  ;;  %v2222_v48 = vld [vmem:[%s5711_s26 + $0x38] sm:$0xff]  ;;  %v2221_v50 = vld [vmem:[%s5711_s26 + $0x30] sm:$0xff]  ;;  %v2220_v52 = vld [vmem:[%s5711_s26 + $0x28] sm:$0xff] }
 0x2f8   : > { %2807 = vmatpush1.msra.mxu1 %v2295_v31  ;;  %2359 = vmatprep.subr.mxu0 %v2230_v32  ;;  %v2286_v49 = vld [vmem:[%s5711_s26 + $0x238] sm:$0xff]  ;;  %v2285_v51 = vld [vmem:[%s5711_s26 + $0x230] sm:$0xff]  ;;  %v2284_v53 = vld [vmem:[%s5711_s26 + $0x228] sm:$0xff] }
 0x2f9   : > { %2808 = vmatprep.subr.mxu1 %v2294_v33  ;;  %2360 = vmatpush1.msra.mxu0 %v2229_v34  ;;  %v2219_v54 = vld [vmem:[%s5711_s26 + $0x20] sm:$0xff]  ;;  %v2218_v56 = vld [vmem:[%s5711_s26 + $0x18] sm:$0xff]  ;;  %v2217_v58 = vld [vmem:[%s5711_s26 + $0x10] sm:$0xff] }
 0x2fa   : > { %2809 = vmatpush1.msra.mxu1 %v2293_v35  ;;  %2361 = vmatprep.subr.mxu0 %v2228_v36  ;;  %v2283_v55 = vld [vmem:[%s5711_s26 + $0x220] sm:$0xff]  ;;  %v2282_v57 = vld [vmem:[%s5711_s26 + $0x218] sm:$0xff]  ;;  %v2281_v59 = vld [vmem:[%s5711_s26 + $0x210] sm:$0xff] }
 0x2fb   : > { %2810 = vmatprep.subr.mxu1 %v2292_v37  ;;  %2362 = vmatpush1.msra.mxu0 %v2227_v38  ;;  %v2216_v60 = vld [vmem:[%s5711_s26 + $0x8] sm:$0xff]  ;;  %v2215_v62 = vld [vmem:[%s5711_s26] sm:$0xff]  ;;  %v2278_v0 = vld [vmem:[%s5711_s26 + $0x1f8] sm:$0xff] }
 0x2fc   : > { %2811 = vmatpush1.msra.mxu1 %v2291_v39  ;;  %2363 = vmatprep.subr.mxu0 %v2226_v40  ;;  %v2280_v61 = vld [vmem:[%s5711_s26 + $0x208] sm:$0xff]  ;;  %v2279_v63 = vld [vmem:[%s5711_s26 + $0x200] sm:$0xff]  ;;  %v2342_v1 = vld [vmem:[%s5711_s26 + $0x3f8] sm:$0xff] }
 0x2fd   : > { %2812 = vmatprep.subr.mxu1 %v2290_v41  ;;  %2364 = vmatpush1.msra.mxu0 %v2225_v42  ;;  %v2277_v2 = vld [vmem:[%s5711_s26 + $0x1f0] sm:$0xff]  ;;  %v2276_v4 = vld [vmem:[%s5711_s26 + $0x1e8] sm:$0xff]  ;;  %v2275_v6 = vld [vmem:[%s5711_s26 + $0x1e0] sm:$0xff] }
 0x2fe   : > { %2813 = vmatpush1.msra.mxu1 %v2289_v43  ;;  %2365 = vmatprep.subr.mxu0 %v2224_v44  ;;  %v2341_v3 = vld [vmem:[%s5711_s26 + $0x3f0] sm:$0xff]  ;;  %v2340_v5 = vld [vmem:[%s5711_s26 + $0x3e8] sm:$0xff]  ;;  %v2339_v7 = vld [vmem:[%s5711_s26 + $0x3e0] sm:$0xff] }
 0x2ff   : > { %2814 = vmatprep.subr.mxu1 %v2288_v45  ;;  %2366 = vmatpush1.msra.mxu0 %v2223_v46  ;;  %v2274_v8 = vld [vmem:[%s5711_s26 + $0x1d8] sm:$0xff]  ;;  %v2273_v10 = vld [vmem:[%s5711_s26 + $0x1d0] sm:$0xff]  ;;  %v2272_v12 = vld [vmem:[%s5711_s26 + $0x1c8] sm:$0xff] }
 0x300   : > { %2815 = vmatpush1.msra.mxu1 %v2287_v47  ;;  %2367 = vmatprep.subr.mxu0 %v2222_v48  ;;  %v2338_v9 = vld [vmem:[%s5711_s26 + $0x3d8] sm:$0xff]  ;;  %v2337_v11 = vld [vmem:[%s5711_s26 + $0x3d0] sm:$0xff]  ;;  %v2336_v13 = vld [vmem:[%s5711_s26 + $0x3c8] sm:$0xff] }
 0x301   : > { %2816 = vmatprep.subr.mxu1 %v2286_v49  ;;  %2368 = vmatpush1.msra.mxu0 %v2221_v50  ;;  %v2271_v14 = vld [vmem:[%s5711_s26 + $0x1c0] sm:$0xff]  ;;  %v2270_v16 = vld [vmem:[%s5711_s26 + $0x1b8] sm:$0xff]  ;;  %v2269_v18 = vld [vmem:[%s5711_s26 + $0x1b0] sm:$0xff] }
 0x302   : > { %2817 = vmatpush1.msra.mxu1 %v2285_v51  ;;  %2369 = vmatprep.subr.mxu0 %v2220_v52  ;;  %v2335_v15 = vld [vmem:[%s5711_s26 + $0x3c0] sm:$0xff]  ;;  %v2334_v17 = vld [vmem:[%s5711_s26 + $0x3b8] sm:$0xff]  ;;  %v2333_v19 = vld [vmem:[%s5711_s26 + $0x3b0] sm:$0xff] }
 0x303   : > { %2818 = vmatprep.subr.mxu1 %v2284_v53  ;;  %2370 = vmatpush1.msra.mxu0 %v2219_v54  ;;  %v2268_v20 = vld [vmem:[%s5711_s26 + $0x1a8] sm:$0xff]  ;;  %v2267_v22 = vld [vmem:[%s5711_s26 + $0x1a0] sm:$0xff]  ;;  %v2266_v24 = vld [vmem:[%s5711_s26 + $0x198] sm:$0xff] }
 0x304   : > { %2819 = vmatpush1.msra.mxu1 %v2283_v55  ;;  %2371 = vmatprep.subr.mxu0 %v2218_v56  ;;  %v2332_v21 = vld [vmem:[%s5711_s26 + $0x3a8] sm:$0xff]  ;;  %v2331_v23 = vld [vmem:[%s5711_s26 + $0x3a0] sm:$0xff]  ;;  %v2330_v25 = vld [vmem:[%s5711_s26 + $0x398] sm:$0xff] }
 0x305   : > { %2820 = vmatprep.subr.mxu1 %v2282_v57  ;;  %2372 = vmatpush1.msra.mxu0 %v2217_v58  ;;  %v2265_v26 = vld [vmem:[%s5711_s26 + $0x190] sm:$0xff]  ;;  %v2264_v28 = vld [vmem:[%s5711_s26 + $0x188] sm:$0xff]  ;;  %v2263_v30 = vld [vmem:[%s5711_s26 + $0x180] sm:$0xff] }
 0x306   : > { %2821 = vmatpush1.msra.mxu1 %v2281_v59  ;;  %2373 = vmatprep.subr.mxu0 %v2216_v60  ;;  %v2329_v27 = vld [vmem:[%s5711_s26 + $0x390] sm:$0xff]  ;;  %v2328_v29 = vld [vmem:[%s5711_s26 + $0x388] sm:$0xff]  ;;  %v2327_v31 = vld [vmem:[%s5711_s26 + $0x380] sm:$0xff] }
 0x307   : > { %2822 = vmatprep.subr.mxu1 %v2280_v61  ;;  %2374 = vmatpush1.msra.mxu0 %v2215_v62  ;;  %v2262_v32 = vld [vmem:[%s5711_s26 + $0x178] sm:$0xff]  ;;  %v2261_v34 = vld [vmem:[%s5711_s26 + $0x170] sm:$0xff]  ;;  %v2260_v36 = vld [vmem:[%s5711_s26 + $0x168] sm:$0xff] }
 0x308   : > { %2823 = vmatpush1.msra.mxu1 %v2279_v63  ;;  %2375 = vmatprep.subr.mxu0 %v2278_v0  ;;  %v2326_v33 = vld [vmem:[%s5711_s26 + $0x378] sm:$0xff]  ;;  %v2325_v35 = vld [vmem:[%s5711_s26 + $0x370] sm:$0xff]  ;;  %v2324_v37 = vld [vmem:[%s5711_s26 + $0x368] sm:$0xff] }
 0x309   : > { %2824 = vmatprep.subr.mxu1 %v2342_v1  ;;  %2376 = vmatpush2.msra.mxu0 %v2277_v2  ;;  %v2259_v38 = vld [vmem:[%s5711_s26 + $0x160] sm:$0xff]  ;;  %v2258_v40 = vld [vmem:[%s5711_s26 + $0x158] sm:$0xff]  ;;  %v2257_v42 = vld [vmem:[%s5711_s26 + $0x150] sm:$0xff] }
 0x30a   : > { %2825 = vmatpush2.msra.mxu1 %v2341_v3  ;;  %2377 = vmatprep.subr.mxu0 %v2276_v4  ;;  %v2323_v39 = vld [vmem:[%s5711_s26 + $0x360] sm:$0xff]  ;;  %v2322_v41 = vld [vmem:[%s5711_s26 + $0x358] sm:$0xff]  ;;  %v2321_v43 = vld [vmem:[%s5711_s26 + $0x350] sm:$0xff] }
 0x30b   : > { %2826 = vmatprep.subr.mxu1 %v2340_v5  ;;  %2378 = vmatpush2.msra.mxu0 %v2275_v6  ;;  %v2256_v44 = vld [vmem:[%s5711_s26 + $0x148] sm:$0xff]  ;;  %v2255_v46 = vld [vmem:[%s5711_s26 + $0x140] sm:$0xff]  ;;  %v2254_v48 = vld [vmem:[%s5711_s26 + $0x138] sm:$0xff] }
 0x30c   : > { %2827 = vmatpush2.msra.mxu1 %v2339_v7  ;;  %2379 = vmatprep.subr.mxu0 %v2274_v8  ;;  %v2320_v45 = vld [vmem:[%s5711_s26 + $0x348] sm:$0xff]  ;;  %v2319_v47 = vld [vmem:[%s5711_s26 + $0x340] sm:$0xff]  ;;  %v2318_v49 = vld [vmem:[%s5711_s26 + $0x338] sm:$0xff] }
 0x30d   : > { %2828 = vmatprep.subr.mxu1 %v2338_v9  ;;  %2380 = vmatpush2.msra.mxu0 %v2273_v10  ;;  %v2253_v50 = vld [vmem:[%s5711_s26 + $0x130] sm:$0xff]  ;;  %v2252_v52 = vld [vmem:[%s5711_s26 + $0x128] sm:$0xff]  ;;  %v2251_v54 = vld [vmem:[%s5711_s26 + $0x120] sm:$0xff] }
 0x30e   : > { %2829 = vmatpush2.msra.mxu1 %v2337_v11  ;;  %2381 = vmatprep.subr.mxu0 %v2272_v12  ;;  %v2317_v51 = vld [vmem:[%s5711_s26 + $0x330] sm:$0xff]  ;;  %v2316_v53 = vld [vmem:[%s5711_s26 + $0x328] sm:$0xff]  ;;  %v2315_v55 = vld [vmem:[%s5711_s26 + $0x320] sm:$0xff] }
 0x30f   : > { %2830 = vmatprep.subr.mxu1 %v2336_v13  ;;  %2382 = vmatpush2.msra.mxu0 %v2271_v14  ;;  %v2250_v56 = vld [vmem:[%s5711_s26 + $0x118] sm:$0xff]  ;;  %v2249_v58 = vld [vmem:[%s5711_s26 + $0x110] sm:$0xff]  ;;  %v2248_v60 = vld [vmem:[%s5711_s26 + $0x108] sm:$0xff] }
 0x310   : > { %2831 = vmatpush2.msra.mxu1 %v2335_v15  ;;  %2383 = vmatprep.subr.mxu0 %v2270_v16  ;;  %v2314_v57 = vld [vmem:[%s5711_s26 + $0x318] sm:$0xff]  ;;  %v2313_v59 = vld [vmem:[%s5711_s26 + $0x310] sm:$0xff]  ;;  %v2312_v61 = vld [vmem:[%s5711_s26 + $0x308] sm:$0xff] }
 0x311   : > { %2832 = vmatprep.subr.mxu1 %v2334_v17  ;;  %2384 = vmatpush2.msra.mxu0 %v2269_v18  ;;  %v2247_v62 = vld [vmem:[%s5711_s26 + $0x100] sm:$0xff]  ;;  %v1960_v63 = vld [vmem:[%s5696_s4 + $0x8] sm:$0xff]  ;;  %v1962_v1 = vld [vmem:[%s5696_s4 + $0x18] sm:$0xff] }
 0x312   : > { %2833 = vmatpush2.msra.mxu1 %v2333_v19  ;;  %2385 = vmatprep.subr.mxu0 %v2268_v20  ;;  %v2311_v0 = vld [vmem:[%s5711_s26 + $0x300] sm:$0xff]  ;;  %v1961_v3 = vld [vmem:[%s5696_s4 + $0x10] sm:$0xff]  ;;  %v1964_v4 = vld [vmem:[%s5696_s4 + $0x28] sm:$0xff] }
 0x313   : > { %2834 = vmatprep.subr.mxu1 %v2332_v21  ;;  %2386 = vmatpush2.msra.mxu0 %v2267_v22  ;;  %v1959_v2 = vld [vmem:[%s5696_s4] sm:$0xff]  ;;  %v1966_v5 = vld [vmem:[%s5696_s4 + $0x38] sm:$0xff]  ;;  %v1965_v7 = vld [vmem:[%s5696_s4 + $0x30] sm:$0xff] }
 0x314   : > { %2835 = vmatpush2.msra.mxu1 %v2331_v23  ;;  %2387 = vmatprep.subr.mxu0 %v2266_v24  ;;  %v1963_v6 = vld [vmem:[%s5696_s4 + $0x20] sm:$0xff]  ;;  %v1968_v8 = vld [vmem:[%s5696_s4 + $0x48] sm:$0xff]  ;;  %v1970_v9 = vld [vmem:[%s5696_s4 + $0x58] sm:$0xff] }
 0x315   : > { %2836 = vmatprep.subr.mxu1 %v2330_v25  ;;  %2388 = vmatpush2.msra.mxu0 %v2265_v26  ;;  %v1967_v10 = vld [vmem:[%s5696_s4 + $0x40] sm:$0xff]  ;;  %v1969_v11 = vld [vmem:[%s5696_s4 + $0x50] sm:$0xff]  ;;  %v1972_v12 = vld [vmem:[%s5696_s4 + $0x68] sm:$0xff] }
 0x316   : > { %2837 = vmatpush2.msra.mxu1 %v2329_v27  ;;  %2389 = vmatprep.subr.mxu0 %v2264_v28  ;;  %v1974_v13 = vld [vmem:[%s5696_s4 + $0x78] sm:$0xff]  ;;  %v1971_v14 = vld [vmem:[%s5696_s4 + $0x60] sm:$0xff]  ;;  %v1973_v15 = vld [vmem:[%s5696_s4 + $0x70] sm:$0xff] }
 0x317   : > { %2838 = vmatprep.subr.mxu1 %v2328_v29  ;;  %2390 = vmatpush2.msra.mxu0 %v2263_v30  ;;  %v1976_v16 = vld [vmem:[%s5696_s4 + $0x88] sm:$0xff]  ;;  %v1978_v17 = vld [vmem:[%s5696_s4 + $0x98] sm:$0xff]  ;;  %v1975_v18 = vld [vmem:[%s5696_s4 + $0x80] sm:$0xff] }
 0x318   : > { %2839 = vmatpush2.msra.mxu1 %v2327_v31  ;;  %2391 = vmatprep.subr.mxu0 %v2262_v32  ;;  %v1977_v19 = vld [vmem:[%s5696_s4 + $0x90] sm:$0xff]  ;;  %v1980_v20 = vld [vmem:[%s5696_s4 + $0xa8] sm:$0xff]  ;;  %v1982_v21 = vld [vmem:[%s5696_s4 + $0xb8] sm:$0xff] }
 0x319   : > { %2840 = vmatprep.subr.mxu1 %v2326_v33  ;;  %2392 = vmatpush2.msra.mxu0 %v2261_v34  ;;  %v1979_v22 = vld [vmem:[%s5696_s4 + $0xa0] sm:$0xff]  ;;  %v1981_v23 = vld [vmem:[%s5696_s4 + $0xb0] sm:$0xff]  ;;  %v1984_v24 = vld [vmem:[%s5696_s4 + $0xc8] sm:$0xff] }
 0x31a   : > { %2841 = vmatpush2.msra.mxu1 %v2325_v35  ;;  %2393 = vmatprep.subr.mxu0 %v2260_v36  ;;  %v1986_v25 = vld [vmem:[%s5696_s4 + $0xd8] sm:$0xff]  ;;  %v1983_v26 = vld [vmem:[%s5696_s4 + $0xc0] sm:$0xff]  ;;  %v1985_v27 = vld [vmem:[%s5696_s4 + $0xd0] sm:$0xff] }
 0x31b   : > { %2842 = vmatprep.subr.mxu1 %v2324_v37  ;;  %2394 = vmatpush2.msra.mxu0 %v2259_v38  ;;  %v1988_v28 = vld [vmem:[%s5696_s4 + $0xe8] sm:$0xff]  ;;  %v1990_v29 = vld [vmem:[%s5696_s4 + $0xf8] sm:$0xff]  ;;  %v1987_v30 = vld [vmem:[%s5696_s4 + $0xe0] sm:$0xff] }
 0x31c   : > { %2843 = vmatpush2.msra.mxu1 %v2323_v39  ;;  %2395 = vmatprep.subr.mxu0 %v2258_v40  ;;  %v1989_v31 = vld [vmem:[%s5696_s4 + $0xf0] sm:$0xff]  ;;  %v1992_v32 = vld [vmem:[%s5696_s4 + $0x108] sm:$0xff]  ;;  %v1994_v33 = vld [vmem:[%s5696_s4 + $0x118] sm:$0xff] }
 0x31d   : > { %2844 = vmatprep.subr.mxu1 %v2322_v41  ;;  %2396 = vmatpush2.msra.mxu0 %v2257_v42  ;;  %v1991_v34 = vld [vmem:[%s5696_s4 + $0x100] sm:$0xff]  ;;  %v1993_v35 = vld [vmem:[%s5696_s4 + $0x110] sm:$0xff]  ;;  %v1996_v36 = vld [vmem:[%s5696_s4 + $0x128] sm:$0xff] }
 0x31e   : > { %2845 = vmatpush2.msra.mxu1 %v2321_v43  ;;  %2397 = vmatprep.subr.mxu0 %v2256_v44  ;;  %v1998_v37 = vld [vmem:[%s5696_s4 + $0x138] sm:$0xff]  ;;  %v1995_v38 = vld [vmem:[%s5696_s4 + $0x120] sm:$0xff]  ;;  %v1997_v39 = vld [vmem:[%s5696_s4 + $0x130] sm:$0xff] }
 0x31f   : > { %2846 = vmatprep.subr.mxu1 %v2320_v45  ;;  %2398 = vmatpush2.msra.mxu0 %v2255_v46  ;;  %v2000_v40 = vld [vmem:[%s5696_s4 + $0x148] sm:$0xff]  ;;  %v2002_v41 = vld [vmem:[%s5696_s4 + $0x158] sm:$0xff]  ;;  %v1999_v42 = vld [vmem:[%s5696_s4 + $0x140] sm:$0xff] }
 0x320   : > { %2847 = vmatpush2.msra.mxu1 %v2319_v47  ;;  %2399 = vmatprep.subr.mxu0 %v2254_v48  ;;  %v2001_v43 = vld [vmem:[%s5696_s4 + $0x150] sm:$0xff]  ;;  %v2004_v44 = vld [vmem:[%s5696_s4 + $0x168] sm:$0xff]  ;;  %v2006_v45 = vld [vmem:[%s5696_s4 + $0x178] sm:$0xff] }
 0x321   : > { %2848 = vmatprep.subr.mxu1 %v2318_v49  ;;  %2400 = vmatpush2.msra.mxu0 %v2253_v50  ;;  %v2003_v46 = vld [vmem:[%s5696_s4 + $0x160] sm:$0xff]  ;;  %v2005_v47 = vld [vmem:[%s5696_s4 + $0x170] sm:$0xff]  ;;  %v2008_v48 = vld [vmem:[%s5696_s4 + $0x188] sm:$0xff] }
 0x322   : > { %2849 = vmatpush2.msra.mxu1 %v2317_v51  ;;  %2401 = vmatprep.subr.mxu0 %v2252_v52  ;;  %v2010_v49 = vld [vmem:[%s5696_s4 + $0x198] sm:$0xff]  ;;  %v2007_v50 = vld [vmem:[%s5696_s4 + $0x180] sm:$0xff]  ;;  %v2009_v51 = vld [vmem:[%s5696_s4 + $0x190] sm:$0xff] }
 0x323   : > { %2850 = vmatprep.subr.mxu1 %v2316_v53  ;;  %2402 = vmatpush2.msra.mxu0 %v2251_v54  ;;  %v2012_v52 = vld [vmem:[%s5696_s4 + $0x1a8] sm:$0xff]  ;;  %v2014_v53 = vld [vmem:[%s5696_s4 + $0x1b8] sm:$0xff]  ;;  %v2011_v54 = vld [vmem:[%s5696_s4 + $0x1a0] sm:$0xff] }
 0x324   : > { %2851 = vmatpush2.msra.mxu1 %v2315_v55  ;;  %2403 = vmatprep.subr.mxu0 %v2250_v56  ;;  %v2013_v55 = vld [vmem:[%s5696_s4 + $0x1b0] sm:$0xff]  ;;  %v2016_v56 = vld [vmem:[%s5696_s4 + $0x1c8] sm:$0xff] }
 0x325   : > { %2852 = vmatprep.subr.mxu1 %v2314_v57  ;;  %2404 = vmatpush2.msra.mxu0 %v2249_v58  ;;  %v2018_v57 = vld [vmem:[%s5696_s4 + $0x1d8] sm:$0xff]  ;;  %v2015_v58 = vld [vmem:[%s5696_s4 + $0x1c0] sm:$0xff] }
 0x326   : > { %2853 = vmatpush2.msra.mxu1 %v2313_v59  ;;  %2405 = vmatprep.subr.mxu0 %v2248_v60  ;;  %v2017_v59 = vld [vmem:[%s5696_s4 + $0x1d0] sm:$0xff]  ;;  %v2020_v60 = vld [vmem:[%s5696_s4 + $0x1e8] sm:$0xff] }
 0x327   : > { %2854 = vmatprep.subr.mxu1 %v2312_v61  ;;  %2406 = vmatpush2.msra.mxu0 %v2247_v62  ;;  %v2022_v61 = vld [vmem:[%s5696_s4 + $0x1f8] sm:$0xff]  ;;  %v2019_v62 = vld [vmem:[%s5696_s4 + $0x1e0] sm:$0xff] }
 0x328   : > { %2407 = vmatprep.mubr.f32.mxu0 %v1960_v63  ;;  %2855 = vmatpush2.msra.mxu1 %v2311_v0  ;;  %v2021_v63 = vld [vmem:[%s5696_s4 + $0x1f0] sm:$0xff]  ;;  %v2024_v0 = vld [vmem:[%s5696_s4 + $0x208] sm:$0xff] }
 0x329   : > { %2856 = vmatprep.mubr.f32.mxu1 %v1962_v1  ;;  %2408 = vmatmul.mubr.f32.vlgmr.msra.gmra.mxu0 %v1959_v2  ;;  %v2026_v1 = vld [vmem:[%s5696_s4 + $0x218] sm:$0xff]  ;;  %v2023_v2 = vld [vmem:[%s5696_s4 + $0x200] sm:$0xff] }
 0x32a   : > { %2857 = vmatmul.mubr.f32.vlgmr.msra.gmra.mxu1 %v1961_v3  ;;  %2413 = vmatprep.mubr.f32.mxu0 %v1964_v4  ;;  %v2025_v3 = vld [vmem:[%s5696_s4 + $0x210] sm:$0xff]  ;;  %v2028_v4 = vld [vmem:[%s5696_s4 + $0x228] sm:$0xff] }
 0x32b   : > { %2862 = vmatprep.mubr.f32.mxu1 %v1966_v5  ;;  %v2030_v5 = vld [vmem:[%s5696_s4 + $0x238] sm:$0xff] }
 0x32d   : > { %2414 = vmatmul.mubr.f32.gmra.mxu0 %v1963_v6  ;;  %v2027_v6 = vld [vmem:[%s5696_s4 + $0x220] sm:$0xff] }
 0x32e   : > { %2863 = vmatmul.mubr.f32.gmra.mxu1 %v1965_v7  ;;  %2419 = vmatprep.mubr.f32.mxu0 %v1968_v8  ;;  %v2029_v7 = vld [vmem:[%s5696_s4 + $0x230] sm:$0xff]  ;;  %v2032_v8 = vld [vmem:[%s5696_s4 + $0x248] sm:$0xff] }
 0x32f   : > { %2868 = vmatprep.mubr.f32.mxu1 %v1970_v9  ;;  %v2034_v9 = vld [vmem:[%s5696_s4 + $0x258] sm:$0xff] }
 0x331   : > { %2420 = vmatmul.mubr.f32.gmra.mxu0 %v1967_v10  ;;  %v2031_v10 = vld [vmem:[%s5696_s4 + $0x240] sm:$0xff] }
 0x332   : > { %2869 = vmatmul.mubr.f32.gmra.mxu1 %v1969_v11  ;;  %2425 = vmatprep.mubr.f32.mxu0 %v1972_v12  ;;  %v2033_v11 = vld [vmem:[%s5696_s4 + $0x250] sm:$0xff]  ;;  %v2036_v12 = vld [vmem:[%s5696_s4 + $0x268] sm:$0xff] }
 0x333   : > { %2874 = vmatprep.mubr.f32.mxu1 %v1974_v13  ;;  %v2038_v13 = vld [vmem:[%s5696_s4 + $0x278] sm:$0xff] }
 0x335   : > { %2426 = vmatmul.mubr.f32.gmra.mxu0 %v1971_v14  ;;  %v2035_v14 = vld [vmem:[%s5696_s4 + $0x260] sm:$0xff] }
 0x336   : > { %2875 = vmatmul.mubr.f32.gmra.mxu1 %v1973_v15  ;;  %2431 = vmatprep.mubr.f32.mxu0 %v1976_v16  ;;  %v2037_v15 = vld [vmem:[%s5696_s4 + $0x270] sm:$0xff]  ;;  %v2040_v16 = vld [vmem:[%s5696_s4 + $0x288] sm:$0xff] }
 0x337   : > { %2880 = vmatprep.mubr.f32.mxu1 %v1978_v17  ;;  %v2042_v17 = vld [vmem:[%s5696_s4 + $0x298] sm:$0xff] }
 0x339   : > { %2432 = vmatmul.mubr.f32.gmra.mxu0 %v1975_v18  ;;  %v2039_v18 = vld [vmem:[%s5696_s4 + $0x280] sm:$0xff] }
 0x33a   : > { %2881 = vmatmul.mubr.f32.gmra.mxu1 %v1977_v19  ;;  %2437 = vmatprep.mubr.f32.mxu0 %v1980_v20  ;;  %v2041_v19 = vld [vmem:[%s5696_s4 + $0x290] sm:$0xff]  ;;  %v2044_v20 = vld [vmem:[%s5696_s4 + $0x2a8] sm:$0xff] }
 0x33b   : > { %2886 = vmatprep.mubr.f32.mxu1 %v1982_v21  ;;  %v2046_v21 = vld [vmem:[%s5696_s4 + $0x2b8] sm:$0xff] }
 0x33d   : > { %2438 = vmatmul.mubr.f32.gmra.mxu0 %v1979_v22  ;;  %v2043_v22 = vld [vmem:[%s5696_s4 + $0x2a0] sm:$0xff] }
 0x33e   : > { %2887 = vmatmul.mubr.f32.gmra.mxu1 %v1981_v23  ;;  %2443 = vmatprep.mubr.f32.mxu0 %v1984_v24  ;;  %v2045_v23 = vld [vmem:[%s5696_s4 + $0x2b0] sm:$0xff]  ;;  %v2048_v24 = vld [vmem:[%s5696_s4 + $0x2c8] sm:$0xff] }
 0x33f   : > { %2892 = vmatprep.mubr.f32.mxu1 %v1986_v25  ;;  %v2050_v25 = vld [vmem:[%s5696_s4 + $0x2d8] sm:$0xff] }
 0x341   : > { %2444 = vmatmul.mubr.f32.gmra.mxu0 %v1983_v26  ;;  %v2047_v26 = vld [vmem:[%s5696_s4 + $0x2c0] sm:$0xff] }
 0x342   : > { %2893 = vmatmul.mubr.f32.gmra.mxu1 %v1985_v27  ;;  %2449 = vmatprep.mubr.f32.mxu0 %v1988_v28  ;;  %v2049_v27 = vld [vmem:[%s5696_s4 + $0x2d0] sm:$0xff]  ;;  %v2052_v28 = vld [vmem:[%s5696_s4 + $0x2e8] sm:$0xff] }
 0x343   : > { %2898 = vmatprep.mubr.f32.mxu1 %v1990_v29  ;;  %v2054_v29 = vld [vmem:[%s5696_s4 + $0x2f8] sm:$0xff] }
 0x345   : > { %2450 = vmatmul.mubr.f32.gmra.mxu0 %v1987_v30  ;;  %v2051_v30 = vld [vmem:[%s5696_s4 + $0x2e0] sm:$0xff] }
 0x346   : > { %2899 = vmatmul.mubr.f32.gmra.mxu1 %v1989_v31  ;;  %2455 = vmatprep.mubr.f32.mxu0 %v1992_v32  ;;  %v2053_v31 = vld [vmem:[%s5696_s4 + $0x2f0] sm:$0xff]  ;;  %v2056_v32 = vld [vmem:[%s5696_s4 + $0x308] sm:$0xff] }
 0x347   : > { %2904 = vmatprep.mubr.f32.mxu1 %v1994_v33  ;;  %v2058_v33 = vld [vmem:[%s5696_s4 + $0x318] sm:$0xff] }
 0x349   : > { %2456 = vmatmul.mubr.f32.gmra.mxu0 %v1991_v34  ;;  %v2055_v34 = vld [vmem:[%s5696_s4 + $0x300] sm:$0xff] }
 0x34a   : > { %2905 = vmatmul.mubr.f32.gmra.mxu1 %v1993_v35  ;;  %2461 = vmatprep.mubr.f32.mxu0 %v1996_v36  ;;  %v2057_v35 = vld [vmem:[%s5696_s4 + $0x310] sm:$0xff]  ;;  %v2060_v36 = vld [vmem:[%s5696_s4 + $0x328] sm:$0xff] }
 0x34b   : > { %2910 = vmatprep.mubr.f32.mxu1 %v1998_v37  ;;  %v2062_v37 = vld [vmem:[%s5696_s4 + $0x338] sm:$0xff] }
 0x34d   : > { %2462 = vmatmul.mubr.f32.gmra.mxu0 %v1995_v38  ;;  %v2059_v38 = vld [vmem:[%s5696_s4 + $0x320] sm:$0xff] }
 0x34e   : > { %2911 = vmatmul.mubr.f32.gmra.mxu1 %v1997_v39  ;;  %2467 = vmatprep.mubr.f32.mxu0 %v2000_v40  ;;  %v2061_v39 = vld [vmem:[%s5696_s4 + $0x330] sm:$0xff]  ;;  %v2064_v40 = vld [vmem:[%s5696_s4 + $0x348] sm:$0xff] }
 0x34f   : > { %2916 = vmatprep.mubr.f32.mxu1 %v2002_v41  ;;  %v2066_v41 = vld [vmem:[%s5696_s4 + $0x358] sm:$0xff] }
 0x351   : > { %2468 = vmatmul.mubr.f32.gmra.mxu0 %v1999_v42  ;;  %v2063_v42 = vld [vmem:[%s5696_s4 + $0x340] sm:$0xff] }
 0x352   : > { %2917 = vmatmul.mubr.f32.gmra.mxu1 %v2001_v43  ;;  %2473 = vmatprep.mubr.f32.mxu0 %v2004_v44  ;;  %v2065_v43 = vld [vmem:[%s5696_s4 + $0x350] sm:$0xff]  ;;  %v2068_v44 = vld [vmem:[%s5696_s4 + $0x368] sm:$0xff] }
 0x353   : > { %2922 = vmatprep.mubr.f32.mxu1 %v2006_v45  ;;  %v2070_v45 = vld [vmem:[%s5696_s4 + $0x378] sm:$0xff] }
 0x355   : > { %2474 = vmatmul.mubr.f32.gmra.mxu0 %v2003_v46  ;;  %v2067_v46 = vld [vmem:[%s5696_s4 + $0x360] sm:$0xff] }
 0x356   : > { %2923 = vmatmul.mubr.f32.gmra.mxu1 %v2005_v47  ;;  %2479 = vmatprep.mubr.f32.mxu0 %v2008_v48  ;;  %v2069_v47 = vld [vmem:[%s5696_s4 + $0x370] sm:$0xff]  ;;  %v2072_v48 = vld [vmem:[%s5696_s4 + $0x388] sm:$0xff] }
 0x357   : > { %2928 = vmatprep.mubr.f32.mxu1 %v2010_v49  ;;  %v2074_v49 = vld [vmem:[%s5696_s4 + $0x398] sm:$0xff] }
 0x359   : > { %2480 = vmatmul.mubr.f32.gmra.mxu0 %v2007_v50  ;;  %v2071_v50 = vld [vmem:[%s5696_s4 + $0x380] sm:$0xff] }
 0x35a   : > { %2929 = vmatmul.mubr.f32.gmra.mxu1 %v2009_v51  ;;  %2485 = vmatprep.mubr.f32.mxu0 %v2012_v52  ;;  %v2073_v51 = vld [vmem:[%s5696_s4 + $0x390] sm:$0xff]  ;;  %v2076_v52 = vld [vmem:[%s5696_s4 + $0x3a8] sm:$0xff] }
 0x35b   : > { %2934 = vmatprep.mubr.f32.mxu1 %v2014_v53  ;;  %v2078_v53 = vld [vmem:[%s5696_s4 + $0x3b8] sm:$0xff] }
 0x35d   : > { %2486 = vmatmul.mubr.f32.gmra.mxu0 %v2011_v54  ;;  %v2075_v54 = vld [vmem:[%s5696_s4 + $0x3a0] sm:$0xff] }
 0x35e   : > { %2935 = vmatmul.mubr.f32.gmra.mxu1 %v2013_v55  ;;  %2491 = vmatprep.mubr.f32.mxu0 %v2016_v56  ;;  %v2077_v55 = vld [vmem:[%s5696_s4 + $0x3b0] sm:$0xff]  ;;  %v2080_v56 = vld [vmem:[%s5696_s4 + $0x3c8] sm:$0xff] }
 0x35f   : > { %2940 = vmatprep.mubr.f32.mxu1 %v2018_v57  ;;  %v2082_v57 = vld [vmem:[%s5696_s4 + $0x3d8] sm:$0xff] }
 0x361   : > { %2492 = vmatmul.mubr.f32.gmra.mxu0 %v2015_v58  ;;  %v2079_v58 = vld [vmem:[%s5696_s4 + $0x3c0] sm:$0xff] }
 0x362   : > { %2941 = vmatmul.mubr.f32.gmra.mxu1 %v2017_v59  ;;  %2497 = vmatprep.mubr.f32.mxu0 %v2020_v60  ;;  %v2081_v59 = vld [vmem:[%s5696_s4 + $0x3d0] sm:$0xff]  ;;  %v2084_v60 = vld [vmem:[%s5696_s4 + $0x3e8] sm:$0xff] }
 0x363   : > { %2946 = vmatprep.mubr.f32.mxu1 %v2022_v61  ;;  %v2086_v61 = vld [vmem:[%s5696_s4 + $0x3f8] sm:$0xff] }
 0x365   : > { %2498 = vmatmul.mubr.f32.gmra.mxu0 %v2019_v62  ;;  %v2083_v62 = vld [vmem:[%s5696_s4 + $0x3e0] sm:$0xff] }
 0x366   : > { %2947 = vmatmul.mubr.f32.gmra.mxu1 %v2021_v63  ;;  %2503 = vmatprep.mubr.f32.mxu0 %v2024_v0  ;;  %v2085_v63 = vld [vmem:[%s5696_s4 + $0x3f0] sm:$0xff]  ;;  %v2088_v0 = vld [vmem:[%s5696_s4 + $0x408] sm:$0xff] }
 0x367   : > { %2952 = vmatprep.mubr.f32.mxu1 %v2026_v1  ;;  %v2090_v1 = vld [vmem:[%s5696_s4 + $0x418] sm:$0xff] }
 0x369   : > { %2504 = vmatmul.mubr.f32.gmra.mxu0 %v2023_v2  ;;  %v2087_v2 = vld [vmem:[%s5696_s4 + $0x400] sm:$0xff] }
 0x36a   : > { %2953 = vmatmul.mubr.f32.gmra.mxu1 %v2025_v3  ;;  %2509 = vmatprep.mubr.f32.mxu0 %v2028_v4  ;;  %v2089_v3 = vld [vmem:[%s5696_s4 + $0x410] sm:$0xff]  ;;  %v2092_v4 = vld [vmem:[%s5696_s4 + $0x428] sm:$0xff] }
 0x36b   : > { %2958 = vmatprep.mubr.f32.mxu1 %v2030_v5  ;;  %v2094_v5 = vld [vmem:[%s5696_s4 + $0x438] sm:$0xff] }
 0x36d   : > { %2510 = vmatmul.mubr.f32.gmra.mxu0 %v2027_v6  ;;  %v2091_v6 = vld [vmem:[%s5696_s4 + $0x420] sm:$0xff] }
 0x36e   : > { %2959 = vmatmul.mubr.f32.gmra.mxu1 %v2029_v7  ;;  %2515 = vmatprep.mubr.f32.mxu0 %v2032_v8  ;;  %v2093_v7 = vld [vmem:[%s5696_s4 + $0x430] sm:$0xff]  ;;  %v2096_v8 = vld [vmem:[%s5696_s4 + $0x448] sm:$0xff] }
 0x36f   : > { %2964 = vmatprep.mubr.f32.mxu1 %v2034_v9  ;;  %v2098_v9 = vld [vmem:[%s5696_s4 + $0x458] sm:$0xff] }
 0x371   : > { %2516 = vmatmul.mubr.f32.gmra.mxu0 %v2031_v10  ;;  %v2095_v10 = vld [vmem:[%s5696_s4 + $0x440] sm:$0xff] }
 0x372   : > { %2965 = vmatmul.mubr.f32.gmra.mxu1 %v2033_v11  ;;  %2521 = vmatprep.mubr.f32.mxu0 %v2036_v12  ;;  %v2097_v11 = vld [vmem:[%s5696_s4 + $0x450] sm:$0xff]  ;;  %v2100_v12 = vld [vmem:[%s5696_s4 + $0x468] sm:$0xff] }
 0x373   : > { %2970 = vmatprep.mubr.f32.mxu1 %v2038_v13  ;;  %v2102_v13 = vld [vmem:[%s5696_s4 + $0x478] sm:$0xff] }
 0x375   : > { %2522 = vmatmul.mubr.f32.gmra.mxu0 %v2035_v14  ;;  %v2099_v14 = vld [vmem:[%s5696_s4 + $0x460] sm:$0xff] }
 0x376   : > { %2971 = vmatmul.mubr.f32.gmra.mxu1 %v2037_v15  ;;  %2527 = vmatprep.mubr.f32.mxu0 %v2040_v16  ;;  %v2101_v15 = vld [vmem:[%s5696_s4 + $0x470] sm:$0xff]  ;;  %v2104_v16 = vld [vmem:[%s5696_s4 + $0x488] sm:$0xff] }
 0x377   : > { %2976 = vmatprep.mubr.f32.mxu1 %v2042_v17  ;;  %v2106_v17 = vld [vmem:[%s5696_s4 + $0x498] sm:$0xff] }
 0x379   : > { %2528 = vmatmul.mubr.f32.gmra.mxu0 %v2039_v18  ;;  %v2103_v18 = vld [vmem:[%s5696_s4 + $0x480] sm:$0xff] }
 0x37a   : > { %2977 = vmatmul.mubr.f32.gmra.mxu1 %v2041_v19  ;;  %2533 = vmatprep.mubr.f32.mxu0 %v2044_v20  ;;  %v2105_v19 = vld [vmem:[%s5696_s4 + $0x490] sm:$0xff]  ;;  %v2108_v20 = vld [vmem:[%s5696_s4 + $0x4a8] sm:$0xff] }
 0x37b   : > { %2982 = vmatprep.mubr.f32.mxu1 %v2046_v21  ;;  %v2110_v21 = vld [vmem:[%s5696_s4 + $0x4b8] sm:$0xff] }
 0x37d   : > { %2534 = vmatmul.mubr.f32.gmra.mxu0 %v2043_v22  ;;  %v2107_v22 = vld [vmem:[%s5696_s4 + $0x4a0] sm:$0xff] }
 0x37e   : > { %2983 = vmatmul.mubr.f32.gmra.mxu1 %v2045_v23  ;;  %2539 = vmatprep.mubr.f32.mxu0 %v2048_v24  ;;  %v2109_v23 = vld [vmem:[%s5696_s4 + $0x4b0] sm:$0xff]  ;;  %v2112_v24 = vld [vmem:[%s5696_s4 + $0x4c8] sm:$0xff] }
 0x37f   : > { %2988 = vmatprep.mubr.f32.mxu1 %v2050_v25  ;;  %v2114_v25 = vld [vmem:[%s5696_s4 + $0x4d8] sm:$0xff] }
 0x381   : > { %2540 = vmatmul.mubr.f32.gmra.mxu0 %v2047_v26  ;;  %v2111_v26 = vld [vmem:[%s5696_s4 + $0x4c0] sm:$0xff] }
 0x382   : > { %2989 = vmatmul.mubr.f32.gmra.mxu1 %v2049_v27  ;;  %2545 = vmatprep.mubr.f32.mxu0 %v2052_v28  ;;  %v2113_v27 = vld [vmem:[%s5696_s4 + $0x4d0] sm:$0xff]  ;;  %v2116_v28 = vld [vmem:[%s5696_s4 + $0x4e8] sm:$0xff] }
 0x383   : > { %2994 = vmatprep.mubr.f32.mxu1 %v2054_v29  ;;  %v2118_v29 = vld [vmem:[%s5696_s4 + $0x4f8] sm:$0xff] }
 0x385   : > { %2546 = vmatmul.mubr.f32.gmra.mxu0 %v2051_v30  ;;  %v2115_v30 = vld [vmem:[%s5696_s4 + $0x4e0] sm:$0xff] }
 0x386   : > { %2995 = vmatmul.mubr.f32.gmra.mxu1 %v2053_v31  ;;  %2551 = vmatprep.mubr.f32.mxu0 %v2056_v32  ;;  %v2117_v31 = vld [vmem:[%s5696_s4 + $0x4f0] sm:$0xff]  ;;  %v2120_v32 = vld [vmem:[%s5696_s4 + $0x508] sm:$0xff] }
 0x387   : > { %3000 = vmatprep.mubr.f32.mxu1 %v2058_v33  ;;  %v2122_v33 = vld [vmem:[%s5696_s4 + $0x518] sm:$0xff] }
 0x389   : > { %2552 = vmatmul.mubr.f32.gmra.mxu0 %v2055_v34  ;;  %v2119_v34 = vld [vmem:[%s5696_s4 + $0x500] sm:$0xff] }
 0x38a   : > { %3001 = vmatmul.mubr.f32.gmra.mxu1 %v2057_v35  ;;  %2557 = vmatprep.mubr.f32.mxu0 %v2060_v36  ;;  %v2121_v35 = vld [vmem:[%s5696_s4 + $0x510] sm:$0xff]  ;;  %v2124_v36 = vld [vmem:[%s5696_s4 + $0x528] sm:$0xff] }
 0x38b   : > { %3006 = vmatprep.mubr.f32.mxu1 %v2062_v37  ;;  %v2126_v37 = vld [vmem:[%s5696_s4 + $0x538] sm:$0xff] }
 0x38d   : > { %2558 = vmatmul.mubr.f32.gmra.mxu0 %v2059_v38  ;;  %v2123_v38 = vld [vmem:[%s5696_s4 + $0x520] sm:$0xff] }
 0x38e   : > { %3007 = vmatmul.mubr.f32.gmra.mxu1 %v2061_v39  ;;  %2563 = vmatprep.mubr.f32.mxu0 %v2064_v40  ;;  %v2125_v39 = vld [vmem:[%s5696_s4 + $0x530] sm:$0xff]  ;;  %v2128_v40 = vld [vmem:[%s5696_s4 + $0x548] sm:$0xff] }
 0x38f   : > { %3012 = vmatprep.mubr.f32.mxu1 %v2066_v41  ;;  %v2130_v41 = vld [vmem:[%s5696_s4 + $0x558] sm:$0xff] }
 0x391   : > { %2564 = vmatmul.mubr.f32.gmra.mxu0 %v2063_v42  ;;  %v2127_v42 = vld [vmem:[%s5696_s4 + $0x540] sm:$0xff] }
 0x392   : > { %3013 = vmatmul.mubr.f32.gmra.mxu1 %v2065_v43  ;;  %2569 = vmatprep.mubr.f32.mxu0 %v2068_v44  ;;  %v2129_v43 = vld [vmem:[%s5696_s4 + $0x550] sm:$0xff]  ;;  %v2132_v44 = vld [vmem:[%s5696_s4 + $0x568] sm:$0xff] }
 0x393   : > { %3018 = vmatprep.mubr.f32.mxu1 %v2070_v45  ;;  %v2134_v45 = vld [vmem:[%s5696_s4 + $0x578] sm:$0xff] }
 0x395   : > { %2570 = vmatmul.mubr.f32.gmra.mxu0 %v2067_v46  ;;  %v2131_v46 = vld [vmem:[%s5696_s4 + $0x560] sm:$0xff] }
 0x396   : > { %3019 = vmatmul.mubr.f32.gmra.mxu1 %v2069_v47  ;;  %2575 = vmatprep.mubr.f32.mxu0 %v2072_v48  ;;  %v2133_v47 = vld [vmem:[%s5696_s4 + $0x570] sm:$0xff]  ;;  %v2136_v48 = vld [vmem:[%s5696_s4 + $0x588] sm:$0xff] }
 0x397   : > { %3024 = vmatprep.mubr.f32.mxu1 %v2074_v49  ;;  %v2138_v49 = vld [vmem:[%s5696_s4 + $0x598] sm:$0xff] }
 0x399   : > { %2576 = vmatmul.mubr.f32.gmra.mxu0 %v2071_v50  ;;  %v2135_v50 = vld [vmem:[%s5696_s4 + $0x580] sm:$0xff] }
 0x39a   : > { %3025 = vmatmul.mubr.f32.gmra.mxu1 %v2073_v51  ;;  %2581 = vmatprep.mubr.f32.mxu0 %v2076_v52  ;;  %v2137_v51 = vld [vmem:[%s5696_s4 + $0x590] sm:$0xff]  ;;  %v2140_v52 = vld [vmem:[%s5696_s4 + $0x5a8] sm:$0xff] }
 0x39b   : > { %3030 = vmatprep.mubr.f32.mxu1 %v2078_v53  ;;  %v2142_v53 = vld [vmem:[%s5696_s4 + $0x5b8] sm:$0xff] }
 0x39d   : > { %2582 = vmatmul.mubr.f32.gmra.mxu0 %v2075_v54  ;;  %v2139_v54 = vld [vmem:[%s5696_s4 + $0x5a0] sm:$0xff] }
 0x39e   : > { %3031 = vmatmul.mubr.f32.gmra.mxu1 %v2077_v55  ;;  %2587 = vmatprep.mubr.f32.mxu0 %v2080_v56  ;;  %v2141_v55 = vld [vmem:[%s5696_s4 + $0x5b0] sm:$0xff]  ;;  %v2144_v56 = vld [vmem:[%s5696_s4 + $0x5c8] sm:$0xff] }
 0x39f   : > { %3036 = vmatprep.mubr.f32.mxu1 %v2082_v57  ;;  %v2146_v57 = vld [vmem:[%s5696_s4 + $0x5d8] sm:$0xff] }
 0x3a1   : > { %2588 = vmatmul.mubr.f32.gmra.mxu0 %v2079_v58  ;;  %v2143_v58 = vld [vmem:[%s5696_s4 + $0x5c0] sm:$0xff] }
 0x3a2   : > { %3037 = vmatmul.mubr.f32.gmra.mxu1 %v2081_v59  ;;  %2593 = vmatprep.mubr.f32.mxu0 %v2084_v60  ;;  %v2145_v59 = vld [vmem:[%s5696_s4 + $0x5d0] sm:$0xff]  ;;  %v2148_v60 = vld [vmem:[%s5696_s4 + $0x5e8] sm:$0xff] }
 0x3a3   : > { %3042 = vmatprep.mubr.f32.mxu1 %v2086_v61  ;;  %v2150_v61 = vld [vmem:[%s5696_s4 + $0x5f8] sm:$0xff] }
 0x3a5   : > { %2594 = vmatmul.mubr.f32.gmra.mxu0 %v2083_v62  ;;  %v2147_v62 = vld [vmem:[%s5696_s4 + $0x5e0] sm:$0xff] }
 0x3a6   : > { %3043 = vmatmul.mubr.f32.gmra.mxu1 %v2085_v63  ;;  %2599 = vmatprep.mubr.f32.mxu0 %v2088_v0  ;;  %v2149_v63 = vld [vmem:[%s5696_s4 + $0x5f0] sm:$0xff]  ;;  %v2152_v0 = vld [vmem:[%s5696_s4 + $0x608] sm:$0xff] }
 0x3a7   : > { %3048 = vmatprep.mubr.f32.mxu1 %v2090_v1  ;;  %v2154_v1 = vld [vmem:[%s5696_s4 + $0x618] sm:$0xff] }
 0x3a9   : > { %2600 = vmatmul.mubr.f32.gmra.mxu0 %v2087_v2  ;;  %v2151_v2 = vld [vmem:[%s5696_s4 + $0x600] sm:$0xff] }
 0x3aa   : > { %3049 = vmatmul.mubr.f32.gmra.mxu1 %v2089_v3  ;;  %2605 = vmatprep.mubr.f32.mxu0 %v2092_v4  ;;  %v2153_v3 = vld [vmem:[%s5696_s4 + $0x610] sm:$0xff]  ;;  %v2156_v4 = vld [vmem:[%s5696_s4 + $0x628] sm:$0xff] }
 0x3ab   : > { %3054 = vmatprep.mubr.f32.mxu1 %v2094_v5  ;;  %v2158_v5 = vld [vmem:[%s5696_s4 + $0x638] sm:$0xff] }
 0x3ad   : > { %2606 = vmatmul.mubr.f32.gmra.mxu0 %v2091_v6 }
 0x3ae   : > { %3055 = vmatmul.mubr.f32.gmra.mxu1 %v2093_v7  ;;  %2611 = vmatprep.mubr.f32.mxu0 %v2096_v8  ;;  %v1831_v7 = vld [vmem:[%s5724_s18] sm:$0xff] }
 0x3af   : > { %3060 = vmatprep.mubr.f32.mxu1 %v2098_v9 }
 0x3b1   : > { %2612 = vmatmul.mubr.f32.gmra.mxu0 %v2095_v10  ;;  %v2155_v10 = vld [vmem:[%s5696_s4 + $0x620] sm:$0xff] }
 0x3b2   : > { %3061 = vmatmul.mubr.f32.gmra.mxu1 %v2097_v11  ;;  %2617 = vmatprep.mubr.f32.mxu0 %v2100_v12  ;;  %v2157_v11 = vld [vmem:[%s5696_s4 + $0x630] sm:$0xff] }
 0x3b3   : > { %3066 = vmatprep.mubr.f32.mxu1 %v2102_v13  ;;  %v1832_v13 = vld [vmem:[%s5724_s18 + $0x8] sm:$0xff] }
 0x3b5   : > { %2618 = vmatmul.mubr.f32.gmra.mxu0 %v2099_v14 }
 0x3b6   : > { %3067 = vmatmul.mubr.f32.gmra.mxu1 %v2101_v15  ;;  %2623 = vmatprep.mubr.f32.mxu0 %v2104_v16  ;;  %v2160_v15 = vld [vmem:[%s5696_s4 + $0x648] sm:$0xff]  ;;  %v2162_v16 = vld [vmem:[%s5696_s4 + $0x658] sm:$0xff] }
 0x3b7   : > { %3072 = vmatprep.mubr.f32.mxu1 %v2106_v17 }
 0x3b9   : > { %2624 = vmatmul.mubr.f32.gmra.mxu0 %v2103_v18 }
 0x3ba   : > { %3073 = vmatmul.mubr.f32.gmra.mxu1 %v2105_v19  ;;  %2629 = vmatprep.mubr.f32.mxu0 %v2108_v20  ;;  %v1833_v20 = vld [vmem:[%s5724_s18 + $0x10] sm:$0xff] }
 0x3bb   : > { %3078 = vmatprep.mubr.f32.mxu1 %v2110_v21 }
 0x3bd   : > { %2630 = vmatmul.mubr.f32.gmra.mxu0 %v2107_v22 }
 0x3be   : > { %3079 = vmatmul.mubr.f32.gmra.mxu1 %v2109_v23  ;;  %2635 = vmatprep.mubr.f32.mxu0 %v2112_v24  ;;  %v2159_v24 = vld [vmem:[%s5696_s4 + $0x640] sm:$0xff] }
 0x3bf   : > { %3084 = vmatprep.mubr.f32.mxu1 %v2114_v25  ;;  %v2161_v25 = vld [vmem:[%s5696_s4 + $0x650] sm:$0xff] }
 0x3c1   : > { %2636 = vmatmul.mubr.f32.gmra.mxu0 %v2111_v26 }
 0x3c2   : > { %3085 = vmatmul.mubr.f32.gmra.mxu1 %v2113_v27  ;;  %2641 = vmatprep.mubr.f32.mxu0 %v2116_v28  ;;  %v1834_v27 = vld [vmem:[%s5724_s18 + $0x18] sm:$0xff] }
 0x3c3   : > { %3090 = vmatprep.mubr.f32.mxu1 %v2118_v29  ;;  %v2164_v29 = vld [vmem:[%s5696_s4 + $0x668] sm:$0xff] }
 0x3c5   : > { %2642 = vmatmul.mubr.f32.gmra.mxu0 %v2115_v30  ;;  %v2166_v30 = vld [vmem:[%s5696_s4 + $0x678] sm:$0xff] }
 0x3c6   : > { %3091 = vmatmul.mubr.f32.gmra.mxu1 %v2117_v31  ;;  %2647 = vmatprep.mubr.f32.mxu0 %v2120_v32 }
 0x3c7   : > { %3096 = vmatprep.mubr.f32.mxu1 %v2122_v33 }
 0x3c9   : > { %2648 = vmatmul.mubr.f32.gmra.mxu0 %v2119_v34  ;;  %v1835_v34 = vld [vmem:[%s5724_s18 + $0x20] sm:$0xff] }
 0x3ca   : > { %3097 = vmatmul.mubr.f32.gmra.mxu1 %v2121_v35  ;;  %2653 = vmatprep.mubr.f32.mxu0 %v2124_v36 }
 0x3cb   : > { %3102 = vmatprep.mubr.f32.mxu1 %v2126_v37 }
 0x3cd   : > { %2654 = vmatmul.mubr.f32.gmra.mxu0 %v2123_v38  ;;  %v2163_v38 = vld [vmem:[%s5696_s4 + $0x660] sm:$0xff] }
 0x3ce   : > { %3103 = vmatmul.mubr.f32.gmra.mxu1 %v2125_v39  ;;  %2659 = vmatprep.mubr.f32.mxu0 %v2128_v40  ;;  %v2165_v39 = vld [vmem:[%s5696_s4 + $0x670] sm:$0xff] }
 0x3cf   : > { %3108 = vmatprep.mubr.f32.mxu1 %v2130_v41  ;;  %v1836_v41 = vld [vmem:[%s5724_s18 + $0x28] sm:$0xff] }
 0x3d1   : > { %2660 = vmatmul.mubr.f32.gmra.mxu0 %v2127_v42 }
 0x3d2   : > { %3109 = vmatmul.mubr.f32.gmra.mxu1 %v2129_v43  ;;  %2665 = vmatprep.mubr.f32.mxu0 %v2132_v44  ;;  %v2168_v43 = vld [vmem:[%s5696_s4 + $0x688] sm:$0xff]  ;;  %v2170_v44 = vld [vmem:[%s5696_s4 + $0x698] sm:$0xff] }
 0x3d3   : > { %3114 = vmatprep.mubr.f32.mxu1 %v2134_v45 }
 0x3d5   : > { %2666 = vmatmul.mubr.f32.gmra.mxu0 %v2131_v46 }
 0x3d6   : > { %3115 = vmatmul.mubr.f32.gmra.mxu1 %v2133_v47  ;;  %2671 = vmatprep.mubr.f32.mxu0 %v2136_v48  ;;  %v1837_v48 = vld [vmem:[%s5724_s18 + $0x30] sm:$0xff] }
 0x3d7   : > { %3120 = vmatprep.mubr.f32.mxu1 %v2138_v49 }
 0x3d9   : > { %2672 = vmatmul.mubr.f32.gmra.mxu0 %v2135_v50 }
 0x3da   : > { %3121 = vmatmul.mubr.f32.gmra.mxu1 %v2137_v51  ;;  %2677 = vmatprep.mubr.f32.mxu0 %v2140_v52  ;;  %v2167_v52 = vld [vmem:[%s5696_s4 + $0x680] sm:$0xff] }
 0x3db   : > { %3126 = vmatprep.mubr.f32.mxu1 %v2142_v53  ;;  %v2169_v53 = vld [vmem:[%s5696_s4 + $0x690] sm:$0xff] }
 0x3dd   : > { %2678 = vmatmul.mubr.f32.gmra.mxu0 %v2139_v54 }
 0x3de   : > { %3127 = vmatmul.mubr.f32.gmra.mxu1 %v2141_v55  ;;  %2683 = vmatprep.mubr.f32.mxu0 %v2144_v56  ;;  %v1838_v55 = vld [vmem:[%s5724_s18 + $0x38] sm:$0xff] }
 0x3df   : > { %3132 = vmatprep.mubr.f32.mxu1 %v2146_v57  ;;  %v2172_v57 = vld [vmem:[%s5696_s4 + $0x6a8] sm:$0xff] }
 0x3e1   : > { %2684 = vmatmul.mubr.f32.gmra.mxu0 %v2143_v58  ;;  %v2174_v58 = vld [vmem:[%s5696_s4 + $0x6b8] sm:$0xff] }
 0x3e2   : > { %3133 = vmatmul.mubr.f32.gmra.mxu1 %v2145_v59  ;;  %2689 = vmatprep.mubr.f32.mxu0 %v2148_v60 }
 0x3e3   : > { %3138 = vmatprep.mubr.f32.mxu1 %v2150_v61 }
 0x3e5   : > { %2690 = vmatmul.mubr.f32.gmra.mxu0 %v2147_v62  ;;  %v1839_v62 = vld [vmem:[%s5724_s18 + $0x40] sm:$0xff] }
 0x3e6   : > { %3139 = vmatmul.mubr.f32.gmra.mxu1 %v2149_v63  ;;  %2695 = vmatprep.mubr.f32.mxu0 %v2152_v0 }
 0x3e7   : > { %3144 = vmatprep.mubr.f32.mxu1 %v2154_v1 }
 0x3e9   : > { %v2409_v6 = vpop.f32.mrf.mxu0  ;;  %2696 = vmatmul.mubr.f32.gmra.mxu0 %v2151_v2  ;;  %v2171_v2 = vld [vmem:[%s5696_s4 + $0x6a0] sm:$0xff] }
 0x3ea   : > { %v2858_v8 = vpop.f32.mrf.mxu1  ;;  %3145 = vmatmul.mubr.f32.gmra.mxu1 %v2153_v3  ;;  %2701 = vmatprep.mubr.f32.mxu0 %v2156_v4  ;;  %v2173_v3 = vld [vmem:[%s5696_s4 + $0x6b0] sm:$0xff] }
 0x3eb   : > { %v2859_v9 = vadd.f32 %v2858_v8, %v2409_v6  ;;  %3150 = vmatprep.mubr.f32.mxu1 %v2158_v5  ;;  %v2411_v12 = vpop.f32.mrf.mxu0  ;;  %v1840_v5 = vld [vmem:[%s5724_s18 + $0x48] sm:$0xff]  ;;  %v2178_v8 = vld [vmem:[%s5696_s4 + $0x6d8] sm:$0xff] }
 0x3ec   : > { %v2860_v14 = vpop.f32.mrf.mxu1 }
 0x3ed   : > { %v3241_v17 = vadd.f32 %v2859_v9, %v1831_v7  ;;  %v2861_v18 = vadd.f32 %v2860_v14, %v2411_v12  ;;  %v2415_v19 = vpop.f32.mrf.mxu0  ;;  %2702 = vmatmul.mubr.f32.gmra.mxu0 %v2155_v10  ;;  %v2176_v7 = vld [vmem:[%s5696_s4 + $0x6c8] sm:$0xff]  ;;  %v1841_v12 = vld [vmem:[%s5724_s18 + $0x50] sm:$0xff] }
 0x3ee   : > { %v2864_v21 = vpop.f32.mrf.mxu1  ;;  %3151 = vmatmul.mubr.f32.gmra.mxu1 %v2157_v11  ;;  %2707 = vmatprep.mubr.f32.mxu0 %v2160_v15 }
 0x3ef   : > { %3369 = vst [vmem:[%s5724_s18] sm:$0xff] %v3241_v17  ;;  %v3242_v22 = vadd.f32 %v2861_v18, %v1832_v13  ;;  %v2865_v23 = vadd.f32 %v2864_v21, %v2415_v19  ;;  %3156 = vmatprep.mubr.f32.mxu1 %v2162_v16  ;;  %v2417_v26 = vpop.f32.mrf.mxu0  ;;  %v2175_v16 = vld [vmem:[%s5696_s4 + $0x6c0] sm:$0xff]  ;;  %v2177_v17 = vld [vmem:[%s5696_s4 + $0x6d0] sm:$0xff]  ;;  %v1842_v19 = vld [vmem:[%s5724_s18 + $0x58] sm:$0xff] }
 0x3f0   : > { %v2866_v28 = vpop.f32.mrf.mxu1  ;;  %v2180_v21 = vld [vmem:[%s5696_s4 + $0x6e8] sm:$0xff] }
 0x3f1   : > { %3370 = vst [vmem:[%s5724_s18 + $0x8] sm:$0xff] %v3242_v22  ;;  %v3243_v31 = vadd.f32 %v2865_v23, %v1833_v20  ;;  %v2867_v32 = vadd.f32 %v2866_v28, %v2417_v26  ;;  %v2421_v33 = vpop.f32.mrf.mxu0  ;;  %2708 = vmatmul.mubr.f32.gmra.mxu0 %v2159_v24  ;;  %v2182_v22 = vld [vmem:[%s5696_s4 + $0x6f8] sm:$0xff]  ;;  %v1843_v26 = vld [vmem:[%s5724_s18 + $0x60] sm:$0xff] }
 0x3f2   : > { %v2870_v35 = vpop.f32.mrf.mxu1  ;;  %3157 = vmatmul.mubr.f32.gmra.mxu1 %v2161_v25  ;;  %2713 = vmatprep.mubr.f32.mxu0 %v2164_v29 }
 0x3f3   : > { %3371 = vst [vmem:[%s5724_s18 + $0x10] sm:$0xff] %v3243_v31  ;;  %v3244_v36 = vadd.f32 %v2867_v32, %v1834_v27  ;;  %v2871_v37 = vadd.f32 %v2870_v35, %v2421_v33  ;;  %3162 = vmatprep.mubr.f32.mxu1 %v2166_v30  ;;  %v2423_v40 = vpop.f32.mrf.mxu0  ;;  %v2179_v30 = vld [vmem:[%s5696_s4 + $0x6e0] sm:$0xff]  ;;  %v2181_v31 = vld [vmem:[%s5696_s4 + $0x6f0] sm:$0xff]  ;;  %v1844_v33 = vld [vmem:[%s5724_s18 + $0x68] sm:$0xff] }
 0x3f4   : > { %v2872_v42 = vpop.f32.mrf.mxu1  ;;  %v2184_v35 = vld [vmem:[%s5696_s4 + $0x708] sm:$0xff] }
 0x3f5   : > { %3372 = vst [vmem:[%s5724_s18 + $0x18] sm:$0xff] %v3244_v36  ;;  %v3245_v45 = vadd.f32 %v2871_v37, %v1835_v34  ;;  %v2873_v46 = vadd.f32 %v2872_v42, %v2423_v40  ;;  %v2427_v47 = vpop.f32.mrf.mxu0  ;;  %2714 = vmatmul.mubr.f32.gmra.mxu0 %v2163_v38  ;;  %v2186_v36 = vld [vmem:[%s5696_s4 + $0x718] sm:$0xff]  ;;  %v1845_v40 = vld [vmem:[%s5724_s18 + $0x70] sm:$0xff] }
 0x3f6   : > { %v2876_v49 = vpop.f32.mrf.mxu1  ;;  %3163 = vmatmul.mubr.f32.gmra.mxu1 %v2165_v39  ;;  %2719 = vmatprep.mubr.f32.mxu0 %v2168_v43 }
 0x3f7   : > { %3373 = vst [vmem:[%s5724_s18 + $0x20] sm:$0xff] %v3245_v45  ;;  %v3246_v50 = vadd.f32 %v2873_v46, %v1836_v41  ;;  %v2877_v51 = vadd.f32 %v2876_v49, %v2427_v47  ;;  %3168 = vmatprep.mubr.f32.mxu1 %v2170_v44  ;;  %v2429_v54 = vpop.f32.mrf.mxu0  ;;  %v2183_v44 = vld [vmem:[%s5696_s4 + $0x700] sm:$0xff]  ;;  %v2185_v45 = vld [vmem:[%s5696_s4 + $0x710] sm:$0xff]  ;;  %v1846_v47 = vld [vmem:[%s5724_s18 + $0x78] sm:$0xff] }
 0x3f8   : > { %v2878_v56 = vpop.f32.mrf.mxu1  ;;  %v2188_v49 = vld [vmem:[%s5696_s4 + $0x728] sm:$0xff] }
 0x3f9   : > { %3374 = vst [vmem:[%s5724_s18 + $0x28] sm:$0xff] %v3246_v50  ;;  %v3247_v59 = vadd.f32 %v2877_v51, %v1837_v48  ;;  %v2879_v60 = vadd.f32 %v2878_v56, %v2429_v54  ;;  %v2433_v61 = vpop.f32.mrf.mxu0  ;;  %2720 = vmatmul.mubr.f32.gmra.mxu0 %v2167_v52  ;;  %v2190_v50 = vld [vmem:[%s5696_s4 + $0x738] sm:$0xff]  ;;  %v1847_v54 = vld [vmem:[%s5724_s18 + $0x80] sm:$0xff] }
 0x3fa   : > { %v2882_v63 = vpop.f32.mrf.mxu1  ;;  %3169 = vmatmul.mubr.f32.gmra.mxu1 %v2169_v53  ;;  %2725 = vmatprep.mubr.f32.mxu0 %v2172_v57 }
 0x3fb   : > { %3375 = vst [vmem:[%s5724_s18 + $0x30] sm:$0xff] %v3247_v59  ;;  %v3248_v0 = vadd.f32 %v2879_v60, %v1838_v55  ;;  %v2883_v1 = vadd.f32 %v2882_v63, %v2433_v61  ;;  %3174 = vmatprep.mubr.f32.mxu1 %v2174_v58  ;;  %v2435_v4 = vpop.f32.mrf.mxu0  ;;  %v2187_v58 = vld [vmem:[%s5696_s4 + $0x720] sm:$0xff]  ;;  %v2189_v59 = vld [vmem:[%s5696_s4 + $0x730] sm:$0xff]  ;;  %v1848_v61 = vld [vmem:[%s5724_s18 + $0x88] sm:$0xff] }
 0x3fc   : > { %v2884_v6 = vpop.f32.mrf.mxu1  ;;  %v2192_v63 = vld [vmem:[%s5696_s4 + $0x748] sm:$0xff] }
 0x3fd   : > { %3376 = vst [vmem:[%s5724_s18 + $0x38] sm:$0xff] %v3248_v0  ;;  %v3249_v9 = vadd.f32 %v2883_v1, %v1839_v62  ;;  %v2885_v10 = vadd.f32 %v2884_v6, %v2435_v4  ;;  %v2439_v11 = vpop.f32.mrf.mxu0  ;;  %2726 = vmatmul.mubr.f32.gmra.mxu0 %v2171_v2  ;;  %v2194_v0 = vld [vmem:[%s5696_s4 + $0x758] sm:$0xff]  ;;  %v1849_v4 = vld [vmem:[%s5724_s18 + $0x90] sm:$0xff] }
 0x3fe   : > { %v2888_v13 = vpop.f32.mrf.mxu1  ;;  %3175 = vmatmul.mubr.f32.gmra.mxu1 %v2173_v3  ;;  %2731 = vmatprep.mubr.f32.mxu0 %v2176_v7 }
 0x3ff   : > { %3377 = vst [vmem:[%s5724_s18 + $0x40] sm:$0xff] %v3249_v9  ;;  %v3250_v14 = vadd.f32 %v2885_v10, %v1840_v5  ;;  %v2889_v15 = vadd.f32 %v2888_v13, %v2439_v11  ;;  %3180 = vmatprep.mubr.f32.mxu1 %v2178_v8  ;;  %v2441_v18 = vpop.f32.mrf.mxu0  ;;  %v2191_v8 = vld [vmem:[%s5696_s4 + $0x740] sm:$0xff]  ;;  %v2193_v9 = vld [vmem:[%s5696_s4 + $0x750] sm:$0xff]  ;;  %v1850_v11 = vld [vmem:[%s5724_s18 + $0x98] sm:$0xff] }
 0x400   : > { %v2890_v20 = vpop.f32.mrf.mxu1  ;;  %v2196_v13 = vld [vmem:[%s5696_s4 + $0x768] sm:$0xff] }
 0x401   : > { %3378 = vst [vmem:[%s5724_s18 + $0x48] sm:$0xff] %v3250_v14  ;;  %v3251_v23 = vadd.f32 %v2889_v15, %v1841_v12  ;;  %v2891_v24 = vadd.f32 %v2890_v20, %v2441_v18  ;;  %v2445_v25 = vpop.f32.mrf.mxu0  ;;  %2732 = vmatmul.mubr.f32.gmra.mxu0 %v2175_v16  ;;  %v2198_v14 = vld [vmem:[%s5696_s4 + $0x778] sm:$0xff]  ;;  %v1851_v18 = vld [vmem:[%s5724_s18 + $0xa0] sm:$0xff] }
 0x402   : > { %v2894_v27 = vpop.f32.mrf.mxu1  ;;  %3181 = vmatmul.mubr.f32.gmra.mxu1 %v2177_v17  ;;  %2737 = vmatprep.mubr.f32.mxu0 %v2180_v21 }
 0x403   : > { %3379 = vst [vmem:[%s5724_s18 + $0x50] sm:$0xff] %v3251_v23  ;;  %v3252_v28 = vadd.f32 %v2891_v24, %v1842_v19  ;;  %v2895_v29 = vadd.f32 %v2894_v27, %v2445_v25  ;;  %3186 = vmatprep.mubr.f32.mxu1 %v2182_v22  ;;  %v2447_v32 = vpop.f32.mrf.mxu0  ;;  %v2195_v22 = vld [vmem:[%s5696_s4 + $0x760] sm:$0xff]  ;;  %v2197_v23 = vld [vmem:[%s5696_s4 + $0x770] sm:$0xff]  ;;  %v1852_v25 = vld [vmem:[%s5724_s18 + $0xa8] sm:$0xff] }
 0x404   : > { %v2896_v34 = vpop.f32.mrf.mxu1  ;;  %v2200_v27 = vld [vmem:[%s5696_s4 + $0x788] sm:$0xff] }
 0x405   : > { %3380 = vst [vmem:[%s5724_s18 + $0x58] sm:$0xff] %v3252_v28  ;;  %v3253_v37 = vadd.f32 %v2895_v29, %v1843_v26  ;;  %v2897_v38 = vadd.f32 %v2896_v34, %v2447_v32  ;;  %v2451_v39 = vpop.f32.mrf.mxu0  ;;  %2738 = vmatmul.mubr.f32.gmra.mxu0 %v2179_v30  ;;  %v2202_v28 = vld [vmem:[%s5696_s4 + $0x798] sm:$0xff]  ;;  %v1853_v32 = vld [vmem:[%s5724_s18 + $0xb0] sm:$0xff] }
 0x406   : > { %v2900_v41 = vpop.f32.mrf.mxu1  ;;  %3187 = vmatmul.mubr.f32.gmra.mxu1 %v2181_v31  ;;  %2743 = vmatprep.mubr.f32.mxu0 %v2184_v35 }
 0x407   : > { %3381 = vst [vmem:[%s5724_s18 + $0x60] sm:$0xff] %v3253_v37  ;;  %v3254_v42 = vadd.f32 %v2897_v38, %v1844_v33  ;;  %v2901_v43 = vadd.f32 %v2900_v41, %v2451_v39  ;;  %3192 = vmatprep.mubr.f32.mxu1 %v2186_v36  ;;  %v2453_v46 = vpop.f32.mrf.mxu0  ;;  %v2199_v36 = vld [vmem:[%s5696_s4 + $0x780] sm:$0xff]  ;;  %v2201_v37 = vld [vmem:[%s5696_s4 + $0x790] sm:$0xff]  ;;  %v1854_v39 = vld [vmem:[%s5724_s18 + $0xb8] sm:$0xff] }
 0x408   : > { %v2902_v48 = vpop.f32.mrf.mxu1  ;;  %v2204_v41 = vld [vmem:[%s5696_s4 + $0x7a8] sm:$0xff] }
 0x409   : > { %3382 = vst [vmem:[%s5724_s18 + $0x68] sm:$0xff] %v3254_v42  ;;  %v3255_v51 = vadd.f32 %v2901_v43, %v1845_v40  ;;  %v2903_v52 = vadd.f32 %v2902_v48, %v2453_v46  ;;  %v2457_v53 = vpop.f32.mrf.mxu0  ;;  %2744 = vmatmul.mubr.f32.gmra.mxu0 %v2183_v44  ;;  %v2206_v42 = vld [vmem:[%s5696_s4 + $0x7b8] sm:$0xff]  ;;  %v1855_v46 = vld [vmem:[%s5724_s18 + $0xc0] sm:$0xff] }
 0x40a   : > { %v2906_v55 = vpop.f32.mrf.mxu1  ;;  %3193 = vmatmul.mubr.f32.gmra.mxu1 %v2185_v45  ;;  %2749 = vmatprep.mubr.f32.mxu0 %v2188_v49 }
 0x40b   : > { %3383 = vst [vmem:[%s5724_s18 + $0x70] sm:$0xff] %v3255_v51  ;;  %v3256_v56 = vadd.f32 %v2903_v52, %v1846_v47  ;;  %v2907_v57 = vadd.f32 %v2906_v55, %v2457_v53  ;;  %3198 = vmatprep.mubr.f32.mxu1 %v2190_v50  ;;  %v2459_v60 = vpop.f32.mrf.mxu0  ;;  %v2203_v50 = vld [vmem:[%s5696_s4 + $0x7a0] sm:$0xff]  ;;  %v2205_v51 = vld [vmem:[%s5696_s4 + $0x7b0] sm:$0xff]  ;;  %v1856_v53 = vld [vmem:[%s5724_s18 + $0xc8] sm:$0xff] }
 0x40c   : > { %v2908_v62 = vpop.f32.mrf.mxu1  ;;  %v2208_v55 = vld [vmem:[%s5696_s4 + $0x7c8] sm:$0xff] }
 0x40d   : > { %3384 = vst [vmem:[%s5724_s18 + $0x78] sm:$0xff] %v3256_v56  ;;  %v3257_v1 = vadd.f32 %v2907_v57, %v1847_v54  ;;  %v2909_v2 = vadd.f32 %v2908_v62, %v2459_v60  ;;  %v2463_v3 = vpop.f32.mrf.mxu0  ;;  %2750 = vmatmul.mubr.f32.gmra.mxu0 %v2187_v58  ;;  %v2210_v56 = vld [vmem:[%s5696_s4 + $0x7d8] sm:$0xff]  ;;  %v1857_v60 = vld [vmem:[%s5724_s18 + $0xd0] sm:$0xff] }
 0x40e   : > { %v2912_v5 = vpop.f32.mrf.mxu1  ;;  %3199 = vmatmul.mubr.f32.gmra.mxu1 %v2189_v59  ;;  %2755 = vmatprep.mubr.f32.mxu0 %v2192_v63 }
 0x40f   : > { %3385 = vst [vmem:[%s5724_s18 + $0x80] sm:$0xff] %v3257_v1  ;;  %v3258_v6 = vadd.f32 %v2909_v2, %v1848_v61  ;;  %v2913_v7 = vadd.f32 %v2912_v5, %v2463_v3  ;;  %3204 = vmatprep.mubr.f32.mxu1 %v2194_v0  ;;  %v2465_v10 = vpop.f32.mrf.mxu0  ;;  %v2207_v0 = vld [vmem:[%s5696_s4 + $0x7c0] sm:$0xff]  ;;  %v2209_v1 = vld [vmem:[%s5696_s4 + $0x7d0] sm:$0xff]  ;;  %v1858_v3 = vld [vmem:[%s5724_s18 + $0xd8] sm:$0xff] }
 0x410   : > { %v2914_v12 = vpop.f32.mrf.mxu1  ;;  %v2212_v5 = vld [vmem:[%s5696_s4 + $0x7e8] sm:$0xff] }
 0x411   : > { %3386 = vst [vmem:[%s5724_s18 + $0x88] sm:$0xff] %v3258_v6  ;;  %v3259_v15 = vadd.f32 %v2913_v7, %v1849_v4  ;;  %v2915_v16 = vadd.f32 %v2914_v12, %v2465_v10  ;;  %v2469_v17 = vpop.f32.mrf.mxu0  ;;  %2756 = vmatmul.mubr.f32.gmra.mxu0 %v2191_v8  ;;  %v2214_v6 = vld [vmem:[%s5696_s4 + $0x7f8] sm:$0xff]  ;;  %v1859_v10 = vld [vmem:[%s5724_s18 + $0xe0] sm:$0xff] }
 0x412   : > { %v2918_v19 = vpop.f32.mrf.mxu1  ;;  %3205 = vmatmul.mubr.f32.gmra.mxu1 %v2193_v9  ;;  %2761 = vmatprep.mubr.f32.mxu0 %v2196_v13 }
 0x413   : > { %3387 = vst [vmem:[%s5724_s18 + $0x90] sm:$0xff] %v3259_v15  ;;  %v3260_v20 = vadd.f32 %v2915_v16, %v1850_v11  ;;  %v2919_v21 = vadd.f32 %v2918_v19, %v2469_v17  ;;  %3210 = vmatprep.mubr.f32.mxu1 %v2198_v14  ;;  %v2471_v24 = vpop.f32.mrf.mxu0  ;;  %v2211_v14 = vld [vmem:[%s5696_s4 + $0x7e0] sm:$0xff]  ;;  %v2213_v15 = vld [vmem:[%s5696_s4 + $0x7f0] sm:$0xff]  ;;  %v1860_v17 = vld [vmem:[%s5724_s18 + $0xe8] sm:$0xff] }
 0x414   : > { %v2920_v26 = vpop.f32.mrf.mxu1 }
 0x415   : > { %3388 = vst [vmem:[%s5724_s18 + $0x98] sm:$0xff] %v3260_v20  ;;  %v3261_v29 = vadd.f32 %v2919_v21, %v1851_v18  ;;  %v2921_v30 = vadd.f32 %v2920_v26, %v2471_v24  ;;  %v2475_v31 = vpop.f32.mrf.mxu0  ;;  %2762 = vmatmul.mubr.f32.gmra.mxu0 %v2195_v22  ;;  %v1861_v22 = vld [vmem:[%s5724_s18 + $0xf0] sm:$0xff] }
 0x416   : > { %v2924_v33 = vpop.f32.mrf.mxu1  ;;  %3211 = vmatmul.mubr.f32.gmra.mxu1 %v2197_v23  ;;  %2767 = vmatprep.mubr.f32.mxu0 %v2200_v27  ;;  %v1862_v27 = vld [vmem:[%s5724_s18 + $0xf8] sm:$0xff] }
 0x417   : > { %3389 = vst [vmem:[%s5724_s18 + $0xa0] sm:$0xff] %v3261_v29  ;;  %v3262_v34 = vadd.f32 %v2921_v30, %v1852_v25  ;;  %v2925_v35 = vadd.f32 %v2924_v33, %v2475_v31  ;;  %3216 = vmatprep.mubr.f32.mxu1 %v2202_v28  ;;  %v2477_v38 = vpop.f32.mrf.mxu0 }
 0x418   : > { %v2926_v40 = vpop.f32.mrf.mxu1 }
 0x419   : > { %3390 = vst [vmem:[%s5724_s18 + $0xa8] sm:$0xff] %v3262_v34  ;;  %v3263_v43 = vadd.f32 %v2925_v35, %v1853_v32  ;;  %v2927_v44 = vadd.f32 %v2926_v40, %v2477_v38  ;;  %v2481_v45 = vpop.f32.mrf.mxu0  ;;  %2768 = vmatmul.mubr.f32.gmra.mxu0 %v2199_v36  ;;  %v1863_v32 = vld [vmem:[%s5724_s18 + $0x100] sm:$0xff] }
 0x41a   : > { %v2930_v47 = vpop.f32.mrf.mxu1  ;;  %3217 = vmatmul.mubr.f32.gmra.mxu1 %v2201_v37  ;;  %2773 = vmatprep.mubr.f32.mxu0 %v2204_v41  ;;  %v1864_v37 = vld [vmem:[%s5724_s18 + $0x108] sm:$0xff] }
 0x41b   : > { %3391 = vst [vmem:[%s5724_s18 + $0xb0] sm:$0xff] %v3263_v43  ;;  %v3264_v48 = vadd.f32 %v2927_v44, %v1854_v39  ;;  %v2931_v49 = vadd.f32 %v2930_v47, %v2481_v45  ;;  %3222 = vmatprep.mubr.f32.mxu1 %v2206_v42  ;;  %v2483_v52 = vpop.f32.mrf.mxu0  ;;  %v1865_v42 = vld [vmem:[%s5724_s18 + $0x110] sm:$0xff]  ;;  %v1866_v47 = vld [vmem:[%s5724_s18 + $0x118] sm:$0xff] }
 0x41c   : > { %v2932_v54 = vpop.f32.mrf.mxu1 }
 0x41d   : > { %3392 = vst [vmem:[%s5724_s18 + $0xb8] sm:$0xff] %v3264_v48  ;;  %v3265_v57 = vadd.f32 %v2931_v49, %v1855_v46  ;;  %v2933_v58 = vadd.f32 %v2932_v54, %v2483_v52  ;;  %v2487_v59 = vpop.f32.mrf.mxu0  ;;  %2774 = vmatmul.mubr.f32.gmra.mxu0 %v2203_v50  ;;  %v1867_v52 = vld [vmem:[%s5724_s18 + $0x120] sm:$0xff] }
 0x41e   : > { %v2936_v61 = vpop.f32.mrf.mxu1  ;;  %3223 = vmatmul.mubr.f32.gmra.mxu1 %v2205_v51  ;;  %2779 = vmatprep.mubr.f32.mxu0 %v2208_v55 }
 0x41f   : > { %3393 = vst [vmem:[%s5724_s18 + $0xc0] sm:$0xff] %v3265_v57  ;;  %v3266_v62 = vadd.f32 %v2933_v58, %v1856_v53  ;;  %v2937_v63 = vadd.f32 %v2936_v61, %v2487_v59  ;;  %3228 = vmatprep.mubr.f32.mxu1 %v2210_v56  ;;  %v2489_v2 = vpop.f32.mrf.mxu0  ;;  %v1868_v57 = vld [vmem:[%s5724_s18 + $0x128] sm:$0xff] }
 0x420   : > { %v2938_v4 = vpop.f32.mrf.mxu1 }
 0x421   : > { %3394 = vst [vmem:[%s5724_s18 + $0xc8] sm:$0xff] %v3266_v62  ;;  %v3267_v7 = vadd.f32 %v2937_v63, %v1857_v60  ;;  %v2939_v8 = vadd.f32 %v2938_v4, %v2489_v2  ;;  %v2493_v9 = vpop.f32.mrf.mxu0  ;;  %2780 = vmatmul.mubr.f32.gmra.mxu0 %v2207_v0  ;;  %v1869_v62 = vld [vmem:[%s5724_s18 + $0x130] sm:$0xff] }
 0x422   : > { %v2942_v11 = vpop.f32.mrf.mxu1  ;;  %3229 = vmatmul.mubr.f32.gmra.mxu1 %v2209_v1  ;;  %2785 = vmatprep.mubr.f32.mxu0 %v2212_v5 }
 0x423   : > { %3395 = vst [vmem:[%s5724_s18 + $0xd0] sm:$0xff] %v3267_v7  ;;  %v3268_v12 = vadd.f32 %v2939_v8, %v1858_v3  ;;  %v2943_v13 = vadd.f32 %v2942_v11, %v2493_v9  ;;  %3234 = vmatprep.mubr.f32.mxu1 %v2214_v6  ;;  %v2495_v16 = vpop.f32.mrf.mxu0  ;;  %v1870_v3 = vld [vmem:[%s5724_s18 + $0x138] sm:$0xff]  ;;  %v1871_v8 = vld [vmem:[%s5724_s18 + $0x140] sm:$0xff] }
 0x424   : > { %v2944_v18 = vpop.f32.mrf.mxu1 }
 0x425   : > { %3396 = vst [vmem:[%s5724_s18 + $0xd8] sm:$0xff] %v3268_v12  ;;  %v3269_v19 = vadd.f32 %v2943_v13, %v1859_v10  ;;  %v2945_v20 = vadd.f32 %v2944_v18, %v2495_v16  ;;  %v2499_v21 = vpop.f32.mrf.mxu0  ;;  %2786 = vmatmul.mubr.f32.gmra.mxu0 %v2211_v14  ;;  %v1872_v13 = vld [vmem:[%s5724_s18 + $0x148] sm:$0xff]  ;;  %v1873_v18 = vld [vmem:[%s5724_s18 + $0x150] sm:$0xff] }
 0x426   : > { %v2948_v23 = vpop.f32.mrf.mxu1  ;;  %3235 = vmatmul.mubr.f32.gmra.mxu1 %v2213_v15 }
 0x427   : > { %3397 = vst [vmem:[%s5724_s18 + $0xe0] sm:$0xff] %v3269_v19  ;;  %v3270_v24 = vadd.f32 %v2945_v20, %v1860_v17  ;;  %v2949_v25 = vadd.f32 %v2948_v23, %v2499_v21  ;;  %v2501_v26 = vpop.f32.mrf.mxu0  ;;  %v1874_v23 = vld [vmem:[%s5724_s18 + $0x158] sm:$0xff] }
 0x428   : > { %v2950_v28 = vpop.f32.mrf.mxu1 }
 0x429   : > { %3398 = vst [vmem:[%s5724_s18 + $0xe8] sm:$0xff] %v3270_v24  ;;  %v3271_v29 = vadd.f32 %v2949_v25, %v1861_v22  ;;  %v2951_v30 = vadd.f32 %v2950_v28, %v2501_v26  ;;  %v2505_v31 = vpop.f32.mrf.mxu0  ;;  %v1875_v28 = vld [vmem:[%s5724_s18 + $0x160] sm:$0xff] }
 0x42a   : > { %v2954_v33 = vpop.f32.mrf.mxu1 }
 0x42b   : > { %3399 = vst [vmem:[%s5724_s18 + $0xf0] sm:$0xff] %v3271_v29  ;;  %v3272_v34 = vadd.f32 %v2951_v30, %v1862_v27  ;;  %v2955_v35 = vadd.f32 %v2954_v33, %v2505_v31  ;;  %v2507_v36 = vpop.f32.mrf.mxu0  ;;  %v1876_v33 = vld [vmem:[%s5724_s18 + $0x168] sm:$0xff] }
 0x42c   : > { %v2956_v38 = vpop.f32.mrf.mxu1 }
 0x42d   : > { %3400 = vst [vmem:[%s5724_s18 + $0xf8] sm:$0xff] %v3272_v34  ;;  %v3273_v39 = vadd.f32 %v2955_v35, %v1863_v32  ;;  %v2957_v40 = vadd.f32 %v2956_v38, %v2507_v36  ;;  %v2511_v41 = vpop.f32.mrf.mxu0  ;;  %v1877_v38 = vld [vmem:[%s5724_s18 + $0x170] sm:$0xff] }
 0x42e   : > { %v2960_v43 = vpop.f32.mrf.mxu1 }
 0x42f   : > { %3401 = vst [vmem:[%s5724_s18 + $0x100] sm:$0xff] %v3273_v39  ;;  %v3274_v44 = vadd.f32 %v2957_v40, %v1864_v37  ;;  %v2961_v45 = vadd.f32 %v2960_v43, %v2511_v41  ;;  %v2513_v46 = vpop.f32.mrf.mxu0  ;;  %v1878_v43 = vld [vmem:[%s5724_s18 + $0x178] sm:$0xff] }
 0x430   : > { %v2962_v48 = vpop.f32.mrf.mxu1 }
 0x431   : > { %3402 = vst [vmem:[%s5724_s18 + $0x108] sm:$0xff] %v3274_v44  ;;  %v3275_v49 = vadd.f32 %v2961_v45, %v1865_v42  ;;  %v2963_v50 = vadd.f32 %v2962_v48, %v2513_v46  ;;  %v2517_v51 = vpop.f32.mrf.mxu0  ;;  %v1879_v48 = vld [vmem:[%s5724_s18 + $0x180] sm:$0xff] }
 0x432   : > { %v2966_v53 = vpop.f32.mrf.mxu1 }
 0x433   : > { %3403 = vst [vmem:[%s5724_s18 + $0x110] sm:$0xff] %v3275_v49  ;;  %v3276_v54 = vadd.f32 %v2963_v50, %v1866_v47  ;;  %v2967_v55 = vadd.f32 %v2966_v53, %v2517_v51  ;;  %v2519_v56 = vpop.f32.mrf.mxu0  ;;  %v1880_v53 = vld [vmem:[%s5724_s18 + $0x188] sm:$0xff] }
 0x434   : > { %v2968_v58 = vpop.f32.mrf.mxu1 }
 0x435   : > { %3404 = vst [vmem:[%s5724_s18 + $0x118] sm:$0xff] %v3276_v54  ;;  %v3277_v59 = vadd.f32 %v2967_v55, %v1867_v52  ;;  %v2969_v60 = vadd.f32 %v2968_v58, %v2519_v56  ;;  %v2523_v61 = vpop.f32.mrf.mxu0  ;;  %v1881_v58 = vld [vmem:[%s5724_s18 + $0x190] sm:$0xff] }
 0x436   : > { %v2972_v63 = vpop.f32.mrf.mxu1 }
 0x437   : > { %3405 = vst [vmem:[%s5724_s18 + $0x120] sm:$0xff] %v3277_v59  ;;  %v3278_v0 = vadd.f32 %v2969_v60, %v1868_v57  ;;  %v2973_v1 = vadd.f32 %v2972_v63, %v2523_v61  ;;  %v2525_v2 = vpop.f32.mrf.mxu0  ;;  %v1882_v63 = vld [vmem:[%s5724_s18 + $0x198] sm:$0xff] }
 0x438   : > { %v2974_v4 = vpop.f32.mrf.mxu1 }
 0x439   : > { %3406 = vst [vmem:[%s5724_s18 + $0x128] sm:$0xff] %v3278_v0  ;;  %v3279_v5 = vadd.f32 %v2973_v1, %v1869_v62  ;;  %v2975_v6 = vadd.f32 %v2974_v4, %v2525_v2  ;;  %v2529_v7 = vpop.f32.mrf.mxu0  ;;  %v1883_v4 = vld [vmem:[%s5724_s18 + $0x1a0] sm:$0xff] }
 0x43a   : > { %v2978_v9 = vpop.f32.mrf.mxu1 }
 0x43b   : > { %3407 = vst [vmem:[%s5724_s18 + $0x130] sm:$0xff] %v3279_v5  ;;  %v3280_v10 = vadd.f32 %v2975_v6, %v1870_v3  ;;  %v2979_v11 = vadd.f32 %v2978_v9, %v2529_v7  ;;  %v2531_v12 = vpop.f32.mrf.mxu0  ;;  %v1884_v9 = vld [vmem:[%s5724_s18 + $0x1a8] sm:$0xff] }
 0x43c   : > { %v2980_v14 = vpop.f32.mrf.mxu1 }
 0x43d   : > { %3408 = vst [vmem:[%s5724_s18 + $0x138] sm:$0xff] %v3280_v10  ;;  %v3281_v15 = vadd.f32 %v2979_v11, %v1871_v8  ;;  %v2981_v16 = vadd.f32 %v2980_v14, %v2531_v12  ;;  %v2535_v17 = vpop.f32.mrf.mxu0  ;;  %v1885_v14 = vld [vmem:[%s5724_s18 + $0x1b0] sm:$0xff] }
 0x43e   : > { %v2984_v19 = vpop.f32.mrf.mxu1 }
 0x43f   : > { %3409 = vst [vmem:[%s5724_s18 + $0x140] sm:$0xff] %v3281_v15  ;;  %v3282_v20 = vadd.f32 %v2981_v16, %v1872_v13  ;;  %v2985_v21 = vadd.f32 %v2984_v19, %v2535_v17  ;;  %v2537_v22 = vpop.f32.mrf.mxu0  ;;  %v1886_v19 = vld [vmem:[%s5724_s18 + $0x1b8] sm:$0xff] }
 0x440   : > { %v2986_v24 = vpop.f32.mrf.mxu1 }
 0x441   : > { %3410 = vst [vmem:[%s5724_s18 + $0x148] sm:$0xff] %v3282_v20  ;;  %v3283_v25 = vadd.f32 %v2985_v21, %v1873_v18  ;;  %v2987_v26 = vadd.f32 %v2986_v24, %v2537_v22  ;;  %v2541_v27 = vpop.f32.mrf.mxu0  ;;  %v1887_v24 = vld [vmem:[%s5724_s18 + $0x1c0] sm:$0xff] }
 0x442   : > { %v2990_v29 = vpop.f32.mrf.mxu1 }
 0x443   : > { %3411 = vst [vmem:[%s5724_s18 + $0x150] sm:$0xff] %v3283_v25  ;;  %v3284_v30 = vadd.f32 %v2987_v26, %v1874_v23  ;;  %v2991_v31 = vadd.f32 %v2990_v29, %v2541_v27  ;;  %v2543_v32 = vpop.f32.mrf.mxu0  ;;  %v1888_v29 = vld [vmem:[%s5724_s18 + $0x1c8] sm:$0xff] }
 0x444   : > { %v2992_v34 = vpop.f32.mrf.mxu1 }
 0x445   : > { %3412 = vst [vmem:[%s5724_s18 + $0x158] sm:$0xff] %v3284_v30  ;;  %v3285_v35 = vadd.f32 %v2991_v31, %v1875_v28  ;;  %v2993_v36 = vadd.f32 %v2992_v34, %v2543_v32  ;;  %v2547_v37 = vpop.f32.mrf.mxu0  ;;  %v1889_v34 = vld [vmem:[%s5724_s18 + $0x1d0] sm:$0xff] }
 0x446   : > { %v2996_v39 = vpop.f32.mrf.mxu1 }
 0x447   : > { %3413 = vst [vmem:[%s5724_s18 + $0x160] sm:$0xff] %v3285_v35  ;;  %v3286_v40 = vadd.f32 %v2993_v36, %v1876_v33  ;;  %v2997_v41 = vadd.f32 %v2996_v39, %v2547_v37  ;;  %v2549_v42 = vpop.f32.mrf.mxu0  ;;  %v1890_v39 = vld [vmem:[%s5724_s18 + $0x1d8] sm:$0xff] }
 0x448   : > { %v2998_v44 = vpop.f32.mrf.mxu1 }
 0x449   : > { %3414 = vst [vmem:[%s5724_s18 + $0x168] sm:$0xff] %v3286_v40  ;;  %v3287_v45 = vadd.f32 %v2997_v41, %v1877_v38  ;;  %v2999_v46 = vadd.f32 %v2998_v44, %v2549_v42  ;;  %v2553_v47 = vpop.f32.mrf.mxu0  ;;  %v1891_v44 = vld [vmem:[%s5724_s18 + $0x1e0] sm:$0xff] }
 0x44a   : > { %v3002_v49 = vpop.f32.mrf.mxu1 }
 0x44b   : > { %3415 = vst [vmem:[%s5724_s18 + $0x170] sm:$0xff] %v3287_v45  ;;  %v3288_v50 = vadd.f32 %v2999_v46, %v1878_v43  ;;  %v3003_v51 = vadd.f32 %v3002_v49, %v2553_v47  ;;  %v2555_v52 = vpop.f32.mrf.mxu0  ;;  %v1892_v49 = vld [vmem:[%s5724_s18 + $0x1e8] sm:$0xff] }
 0x44c   : > { %v3004_v54 = vpop.f32.mrf.mxu1 }
 0x44d   : > { %3416 = vst [vmem:[%s5724_s18 + $0x178] sm:$0xff] %v3288_v50  ;;  %v3289_v55 = vadd.f32 %v3003_v51, %v1879_v48  ;;  %v3005_v56 = vadd.f32 %v3004_v54, %v2555_v52  ;;  %v2559_v57 = vpop.f32.mrf.mxu0  ;;  %v1893_v54 = vld [vmem:[%s5724_s18 + $0x1f0] sm:$0xff] }
 0x44e   : > { %v3008_v59 = vpop.f32.mrf.mxu1 }
 0x44f   : > { %3417 = vst [vmem:[%s5724_s18 + $0x180] sm:$0xff] %v3289_v55  ;;  %v3290_v60 = vadd.f32 %v3005_v56, %v1880_v53  ;;  %v3009_v61 = vadd.f32 %v3008_v59, %v2559_v57  ;;  %v2561_v62 = vpop.f32.mrf.mxu0  ;;  %v1894_v59 = vld [vmem:[%s5724_s18 + $0x1f8] sm:$0xff] }
 0x450   : > { %v3010_v0 = vpop.f32.mrf.mxu1 }
 0x451   : > { %3418 = vst [vmem:[%s5724_s18 + $0x188] sm:$0xff] %v3290_v60  ;;  %v3291_v1 = vadd.f32 %v3009_v61, %v1881_v58  ;;  %v3011_v2 = vadd.f32 %v3010_v0, %v2561_v62  ;;  %v2565_v3 = vpop.f32.mrf.mxu0  ;;  %v1895_v0 = vld [vmem:[%s5724_s18 + $0x200] sm:$0xff] }
 0x452   : > { %v3014_v5 = vpop.f32.mrf.mxu1 }
 0x453   : > { %3419 = vst [vmem:[%s5724_s18 + $0x190] sm:$0xff] %v3291_v1  ;;  %v3292_v6 = vadd.f32 %v3011_v2, %v1882_v63  ;;  %v3015_v7 = vadd.f32 %v3014_v5, %v2565_v3  ;;  %v2567_v8 = vpop.f32.mrf.mxu0  ;;  %v1896_v5 = vld [vmem:[%s5724_s18 + $0x208] sm:$0xff] }
 0x454   : > { %v3016_v10 = vpop.f32.mrf.mxu1 }
 0x455   : > { %3420 = vst [vmem:[%s5724_s18 + $0x198] sm:$0xff] %v3292_v6  ;;  %v3293_v11 = vadd.f32 %v3015_v7, %v1883_v4  ;;  %v3017_v12 = vadd.f32 %v3016_v10, %v2567_v8  ;;  %v2571_v13 = vpop.f32.mrf.mxu0  ;;  %v1897_v10 = vld [vmem:[%s5724_s18 + $0x210] sm:$0xff] }
 0x456   : > { %v3020_v15 = vpop.f32.mrf.mxu1 }
 0x457   : > { %3421 = vst [vmem:[%s5724_s18 + $0x1a0] sm:$0xff] %v3293_v11  ;;  %v3294_v16 = vadd.f32 %v3017_v12, %v1884_v9  ;;  %v3021_v17 = vadd.f32 %v3020_v15, %v2571_v13  ;;  %v2573_v18 = vpop.f32.mrf.mxu0  ;;  %v1898_v15 = vld [vmem:[%s5724_s18 + $0x218] sm:$0xff] }
 0x458   : > { %v3022_v20 = vpop.f32.mrf.mxu1 }
 0x459   : > { %3422 = vst [vmem:[%s5724_s18 + $0x1a8] sm:$0xff] %v3294_v16  ;;  %v3295_v21 = vadd.f32 %v3021_v17, %v1885_v14  ;;  %v3023_v22 = vadd.f32 %v3022_v20, %v2573_v18  ;;  %v2577_v23 = vpop.f32.mrf.mxu0  ;;  %v1899_v20 = vld [vmem:[%s5724_s18 + $0x220] sm:$0xff] }
 0x45a   : > { %v3026_v25 = vpop.f32.mrf.mxu1 }
 0x45b   : > { %3423 = vst [vmem:[%s5724_s18 + $0x1b0] sm:$0xff] %v3295_v21  ;;  %v3296_v26 = vadd.f32 %v3023_v22, %v1886_v19  ;;  %v3027_v27 = vadd.f32 %v3026_v25, %v2577_v23  ;;  %v2579_v28 = vpop.f32.mrf.mxu0  ;;  %v1900_v25 = vld [vmem:[%s5724_s18 + $0x228] sm:$0xff] }
 0x45c   : > { %v3028_v30 = vpop.f32.mrf.mxu1 }
 0x45d   : > { %3424 = vst [vmem:[%s5724_s18 + $0x1b8] sm:$0xff] %v3296_v26  ;;  %v3297_v31 = vadd.f32 %v3027_v27, %v1887_v24  ;;  %v3029_v32 = vadd.f32 %v3028_v30, %v2579_v28  ;;  %v2583_v33 = vpop.f32.mrf.mxu0  ;;  %v1901_v30 = vld [vmem:[%s5724_s18 + $0x230] sm:$0xff] }
 0x45e   : > { %v3032_v35 = vpop.f32.mrf.mxu1 }
 0x45f   : > { %3425 = vst [vmem:[%s5724_s18 + $0x1c0] sm:$0xff] %v3297_v31  ;;  %v3298_v36 = vadd.f32 %v3029_v32, %v1888_v29  ;;  %v3033_v37 = vadd.f32 %v3032_v35, %v2583_v33  ;;  %v2585_v38 = vpop.f32.mrf.mxu0  ;;  %v1902_v35 = vld [vmem:[%s5724_s18 + $0x238] sm:$0xff] }
 0x460   : > { %v3034_v40 = vpop.f32.mrf.mxu1 }
 0x461   : > { %3426 = vst [vmem:[%s5724_s18 + $0x1c8] sm:$0xff] %v3298_v36  ;;  %v3299_v41 = vadd.f32 %v3033_v37, %v1889_v34  ;;  %v3035_v42 = vadd.f32 %v3034_v40, %v2585_v38  ;;  %v2589_v43 = vpop.f32.mrf.mxu0  ;;  %v1903_v40 = vld [vmem:[%s5724_s18 + $0x240] sm:$0xff] }
 0x462   : > { %v3038_v45 = vpop.f32.mrf.mxu1 }
 0x463   : > { %3427 = vst [vmem:[%s5724_s18 + $0x1d0] sm:$0xff] %v3299_v41  ;;  %v3300_v46 = vadd.f32 %v3035_v42, %v1890_v39  ;;  %v3039_v47 = vadd.f32 %v3038_v45, %v2589_v43  ;;  %v2591_v48 = vpop.f32.mrf.mxu0  ;;  %v1904_v45 = vld [vmem:[%s5724_s18 + $0x248] sm:$0xff] }
 0x464   : > { %v3040_v50 = vpop.f32.mrf.mxu1 }
 0x465   : > { %3428 = vst [vmem:[%s5724_s18 + $0x1d8] sm:$0xff] %v3300_v46  ;;  %v3301_v51 = vadd.f32 %v3039_v47, %v1891_v44  ;;  %v3041_v52 = vadd.f32 %v3040_v50, %v2591_v48  ;;  %v2595_v53 = vpop.f32.mrf.mxu0  ;;  %v1905_v50 = vld [vmem:[%s5724_s18 + $0x250] sm:$0xff] }
 0x466   : > { %v3044_v55 = vpop.f32.mrf.mxu1 }
 0x467   : > { %3429 = vst [vmem:[%s5724_s18 + $0x1e0] sm:$0xff] %v3301_v51  ;;  %v3302_v56 = vadd.f32 %v3041_v52, %v1892_v49  ;;  %v3045_v57 = vadd.f32 %v3044_v55, %v2595_v53  ;;  %v2597_v58 = vpop.f32.mrf.mxu0  ;;  %v1906_v55 = vld [vmem:[%s5724_s18 + $0x258] sm:$0xff] }
 0x468   : > { %v3046_v60 = vpop.f32.mrf.mxu1 }
 0x469   : > { %3430 = vst [vmem:[%s5724_s18 + $0x1e8] sm:$0xff] %v3302_v56  ;;  %v3303_v61 = vadd.f32 %v3045_v57, %v1893_v54  ;;  %v3047_v62 = vadd.f32 %v3046_v60, %v2597_v58  ;;  %v2601_v63 = vpop.f32.mrf.mxu0  ;;  %v1907_v60 = vld [vmem:[%s5724_s18 + $0x260] sm:$0xff] }
 0x46a   : > { %v3050_v1 = vpop.f32.mrf.mxu1 }
 0x46b   : > { %3431 = vst [vmem:[%s5724_s18 + $0x1f0] sm:$0xff] %v3303_v61  ;;  %v3304_v2 = vadd.f32 %v3047_v62, %v1894_v59  ;;  %v3051_v3 = vadd.f32 %v3050_v1, %v2601_v63  ;;  %v2603_v4 = vpop.f32.mrf.mxu0  ;;  %v1908_v1 = vld [vmem:[%s5724_s18 + $0x268] sm:$0xff] }
 0x46c   : > { %v3052_v6 = vpop.f32.mrf.mxu1 }
 0x46d   : > { %3432 = vst [vmem:[%s5724_s18 + $0x1f8] sm:$0xff] %v3304_v2  ;;  %v3305_v7 = vadd.f32 %v3051_v3, %v1895_v0  ;;  %v3053_v8 = vadd.f32 %v3052_v6, %v2603_v4  ;;  %v2607_v9 = vpop.f32.mrf.mxu0  ;;  %v1909_v6 = vld [vmem:[%s5724_s18 + $0x270] sm:$0xff] }
 0x46e   : > { %v3056_v11 = vpop.f32.mrf.mxu1 }
 0x46f   : > { %3433 = vst [vmem:[%s5724_s18 + $0x200] sm:$0xff] %v3305_v7  ;;  %v3306_v12 = vadd.f32 %v3053_v8, %v1896_v5  ;;  %v3057_v13 = vadd.f32 %v3056_v11, %v2607_v9  ;;  %v2609_v14 = vpop.f32.mrf.mxu0  ;;  %v1910_v11 = vld [vmem:[%s5724_s18 + $0x278] sm:$0xff] }
 0x470   : > { %v3058_v16 = vpop.f32.mrf.mxu1 }
 0x471   : > { %3434 = vst [vmem:[%s5724_s18 + $0x208] sm:$0xff] %v3306_v12  ;;  %v3307_v17 = vadd.f32 %v3057_v13, %v1897_v10  ;;  %v3059_v18 = vadd.f32 %v3058_v16, %v2609_v14  ;;  %v2613_v19 = vpop.f32.mrf.mxu0  ;;  %v1911_v16 = vld [vmem:[%s5724_s18 + $0x280] sm:$0xff] }
 0x472   : > { %v3062_v21 = vpop.f32.mrf.mxu1 }
 0x473   : > { %3435 = vst [vmem:[%s5724_s18 + $0x210] sm:$0xff] %v3307_v17  ;;  %v3308_v22 = vadd.f32 %v3059_v18, %v1898_v15  ;;  %v3063_v23 = vadd.f32 %v3062_v21, %v2613_v19  ;;  %v2615_v24 = vpop.f32.mrf.mxu0  ;;  %v1912_v21 = vld [vmem:[%s5724_s18 + $0x288] sm:$0xff] }
 0x474   : > { %v3064_v26 = vpop.f32.mrf.mxu1 }
 0x475   : > { %3436 = vst [vmem:[%s5724_s18 + $0x218] sm:$0xff] %v3308_v22  ;;  %v3309_v27 = vadd.f32 %v3063_v23, %v1899_v20  ;;  %v3065_v28 = vadd.f32 %v3064_v26, %v2615_v24  ;;  %v2619_v29 = vpop.f32.mrf.mxu0  ;;  %v1913_v26 = vld [vmem:[%s5724_s18 + $0x290] sm:$0xff] }
 0x476   : > { %v3068_v31 = vpop.f32.mrf.mxu1 }
 0x477   : > { %3437 = vst [vmem:[%s5724_s18 + $0x220] sm:$0xff] %v3309_v27  ;;  %v3310_v32 = vadd.f32 %v3065_v28, %v1900_v25  ;;  %v3069_v33 = vadd.f32 %v3068_v31, %v2619_v29  ;;  %v2621_v34 = vpop.f32.mrf.mxu0  ;;  %v1914_v31 = vld [vmem:[%s5724_s18 + $0x298] sm:$0xff] }
 0x478   : > { %v3070_v36 = vpop.f32.mrf.mxu1 }
 0x479   : > { %3438 = vst [vmem:[%s5724_s18 + $0x228] sm:$0xff] %v3310_v32  ;;  %v3311_v37 = vadd.f32 %v3069_v33, %v1901_v30  ;;  %v3071_v38 = vadd.f32 %v3070_v36, %v2621_v34  ;;  %v2625_v39 = vpop.f32.mrf.mxu0  ;;  %v1915_v36 = vld [vmem:[%s5724_s18 + $0x2a0] sm:$0xff] }
 0x47a   : > { %v3074_v41 = vpop.f32.mrf.mxu1 }
 0x47b   : > { %3439 = vst [vmem:[%s5724_s18 + $0x230] sm:$0xff] %v3311_v37  ;;  %v3312_v42 = vadd.f32 %v3071_v38, %v1902_v35  ;;  %v3075_v43 = vadd.f32 %v3074_v41, %v2625_v39  ;;  %v2627_v44 = vpop.f32.mrf.mxu0  ;;  %v1916_v41 = vld [vmem:[%s5724_s18 + $0x2a8] sm:$0xff] }
 0x47c   : > { %v3076_v46 = vpop.f32.mrf.mxu1 }
 0x47d   : > { %3440 = vst [vmem:[%s5724_s18 + $0x238] sm:$0xff] %v3312_v42  ;;  %v3313_v47 = vadd.f32 %v3075_v43, %v1903_v40  ;;  %v3077_v48 = vadd.f32 %v3076_v46, %v2627_v44  ;;  %v2631_v49 = vpop.f32.mrf.mxu0  ;;  %v1917_v46 = vld [vmem:[%s5724_s18 + $0x2b0] sm:$0xff] }
 0x47e   : > { %v3080_v51 = vpop.f32.mrf.mxu1 }
 0x47f   : > { %3441 = vst [vmem:[%s5724_s18 + $0x240] sm:$0xff] %v3313_v47  ;;  %v3314_v52 = vadd.f32 %v3077_v48, %v1904_v45  ;;  %v3081_v53 = vadd.f32 %v3080_v51, %v2631_v49  ;;  %v2633_v54 = vpop.f32.mrf.mxu0  ;;  %v1918_v51 = vld [vmem:[%s5724_s18 + $0x2b8] sm:$0xff] }
 0x480   : > { %v3082_v56 = vpop.f32.mrf.mxu1 }
 0x481   : > { %3442 = vst [vmem:[%s5724_s18 + $0x248] sm:$0xff] %v3314_v52  ;;  %v3315_v57 = vadd.f32 %v3081_v53, %v1905_v50  ;;  %v3083_v58 = vadd.f32 %v3082_v56, %v2633_v54  ;;  %v2637_v59 = vpop.f32.mrf.mxu0  ;;  %v1919_v56 = vld [vmem:[%s5724_s18 + $0x2c0] sm:$0xff] }
 0x482   : > { %v3086_v61 = vpop.f32.mrf.mxu1 }
 0x483   : > { %3443 = vst [vmem:[%s5724_s18 + $0x250] sm:$0xff] %v3315_v57  ;;  %v3316_v62 = vadd.f32 %v3083_v58, %v1906_v55  ;;  %v3087_v63 = vadd.f32 %v3086_v61, %v2637_v59  ;;  %v2639_v0 = vpop.f32.mrf.mxu0  ;;  %v1920_v61 = vld [vmem:[%s5724_s18 + $0x2c8] sm:$0xff] }
 0x484   : > { %v3088_v2 = vpop.f32.mrf.mxu1 }
 0x485   : > { %3444 = vst [vmem:[%s5724_s18 + $0x258] sm:$0xff] %v3316_v62  ;;  %v3317_v3 = vadd.f32 %v3087_v63, %v1907_v60  ;;  %v3089_v4 = vadd.f32 %v3088_v2, %v2639_v0  ;;  %v2643_v5 = vpop.f32.mrf.mxu0  ;;  %v1921_v2 = vld [vmem:[%s5724_s18 + $0x2d0] sm:$0xff] }
 0x486   : > { %v3092_v7 = vpop.f32.mrf.mxu1 }
 0x487   : > { %3445 = vst [vmem:[%s5724_s18 + $0x260] sm:$0xff] %v3317_v3  ;;  %v3318_v8 = vadd.f32 %v3089_v4, %v1908_v1  ;;  %v3093_v9 = vadd.f32 %v3092_v7, %v2643_v5  ;;  %v2645_v10 = vpop.f32.mrf.mxu0  ;;  %v1922_v7 = vld [vmem:[%s5724_s18 + $0x2d8] sm:$0xff] }
 0x488   : > { %v3094_v12 = vpop.f32.mrf.mxu1 }
 0x489   : > { %3446 = vst [vmem:[%s5724_s18 + $0x268] sm:$0xff] %v3318_v8  ;;  %v3319_v13 = vadd.f32 %v3093_v9, %v1909_v6  ;;  %v3095_v14 = vadd.f32 %v3094_v12, %v2645_v10  ;;  %v2649_v15 = vpop.f32.mrf.mxu0  ;;  %v1923_v12 = vld [vmem:[%s5724_s18 + $0x2e0] sm:$0xff] }
 0x48a   : > { %v3098_v17 = vpop.f32.mrf.mxu1 }
 0x48b   : > { %3447 = vst [vmem:[%s5724_s18 + $0x270] sm:$0xff] %v3319_v13  ;;  %v3320_v18 = vadd.f32 %v3095_v14, %v1910_v11  ;;  %v3099_v19 = vadd.f32 %v3098_v17, %v2649_v15  ;;  %v2651_v20 = vpop.f32.mrf.mxu0  ;;  %v1924_v17 = vld [vmem:[%s5724_s18 + $0x2e8] sm:$0xff] }
 0x48c   : > { %v3100_v22 = vpop.f32.mrf.mxu1 }
 0x48d   : > { %3448 = vst [vmem:[%s5724_s18 + $0x278] sm:$0xff] %v3320_v18  ;;  %v3321_v23 = vadd.f32 %v3099_v19, %v1911_v16  ;;  %v3101_v24 = vadd.f32 %v3100_v22, %v2651_v20  ;;  %v2655_v25 = vpop.f32.mrf.mxu0  ;;  %v1925_v22 = vld [vmem:[%s5724_s18 + $0x2f0] sm:$0xff] }
 0x48e   : > { %v3104_v27 = vpop.f32.mrf.mxu1 }
 0x48f   : > { %3449 = vst [vmem:[%s5724_s18 + $0x280] sm:$0xff] %v3321_v23  ;;  %v3322_v28 = vadd.f32 %v3101_v24, %v1912_v21  ;;  %v3105_v29 = vadd.f32 %v3104_v27, %v2655_v25  ;;  %v2657_v30 = vpop.f32.mrf.mxu0  ;;  %v1926_v27 = vld [vmem:[%s5724_s18 + $0x2f8] sm:$0xff] }
 0x490   : > { %v3106_v32 = vpop.f32.mrf.mxu1 }
 0x491   : > { %3450 = vst [vmem:[%s5724_s18 + $0x288] sm:$0xff] %v3322_v28  ;;  %v3323_v33 = vadd.f32 %v3105_v29, %v1913_v26  ;;  %v3107_v34 = vadd.f32 %v3106_v32, %v2657_v30  ;;  %v2661_v35 = vpop.f32.mrf.mxu0  ;;  %v1927_v32 = vld [vmem:[%s5724_s18 + $0x300] sm:$0xff] }
 0x492   : > { %v3110_v37 = vpop.f32.mrf.mxu1 }
 0x493   : > { %3451 = vst [vmem:[%s5724_s18 + $0x290] sm:$0xff] %v3323_v33  ;;  %v3324_v38 = vadd.f32 %v3107_v34, %v1914_v31  ;;  %v3111_v39 = vadd.f32 %v3110_v37, %v2661_v35  ;;  %v2663_v40 = vpop.f32.mrf.mxu0  ;;  %v1928_v37 = vld [vmem:[%s5724_s18 + $0x308] sm:$0xff] }
 0x494   : > { %v3112_v42 = vpop.f32.mrf.mxu1 }
 0x495   : > { %3452 = vst [vmem:[%s5724_s18 + $0x298] sm:$0xff] %v3324_v38  ;;  %v3325_v43 = vadd.f32 %v3111_v39, %v1915_v36  ;;  %v3113_v44 = vadd.f32 %v3112_v42, %v2663_v40  ;;  %v2667_v45 = vpop.f32.mrf.mxu0  ;;  %v1929_v42 = vld [vmem:[%s5724_s18 + $0x310] sm:$0xff] }
 0x496   : > { %v3116_v47 = vpop.f32.mrf.mxu1 }
 0x497   : > { %3453 = vst [vmem:[%s5724_s18 + $0x2a0] sm:$0xff] %v3325_v43  ;;  %v3326_v48 = vadd.f32 %v3113_v44, %v1916_v41  ;;  %v3117_v49 = vadd.f32 %v3116_v47, %v2667_v45  ;;  %v2669_v50 = vpop.f32.mrf.mxu0  ;;  %v1930_v47 = vld [vmem:[%s5724_s18 + $0x318] sm:$0xff] }
 0x498   : > { %v3118_v52 = vpop.f32.mrf.mxu1 }
 0x499   : > { %3454 = vst [vmem:[%s5724_s18 + $0x2a8] sm:$0xff] %v3326_v48  ;;  %v3327_v53 = vadd.f32 %v3117_v49, %v1917_v46  ;;  %v3119_v54 = vadd.f32 %v3118_v52, %v2669_v50  ;;  %v2673_v55 = vpop.f32.mrf.mxu0  ;;  %v1931_v52 = vld [vmem:[%s5724_s18 + $0x320] sm:$0xff] }
 0x49a   : > { %v3122_v57 = vpop.f32.mrf.mxu1 }
 0x49b   : > { %3455 = vst [vmem:[%s5724_s18 + $0x2b0] sm:$0xff] %v3327_v53  ;;  %v3328_v58 = vadd.f32 %v3119_v54, %v1918_v51  ;;  %v3123_v59 = vadd.f32 %v3122_v57, %v2673_v55  ;;  %v2675_v60 = vpop.f32.mrf.mxu0  ;;  %v1932_v57 = vld [vmem:[%s5724_s18 + $0x328] sm:$0xff] }
 0x49c   : > { %v3124_v62 = vpop.f32.mrf.mxu1 }
 0x49d   : > { %3456 = vst [vmem:[%s5724_s18 + $0x2b8] sm:$0xff] %v3328_v58  ;;  %v3329_v63 = vadd.f32 %v3123_v59, %v1919_v56  ;;  %v3125_v0 = vadd.f32 %v3124_v62, %v2675_v60  ;;  %v2679_v1 = vpop.f32.mrf.mxu0  ;;  %v1933_v62 = vld [vmem:[%s5724_s18 + $0x330] sm:$0xff] }
 0x49e   : > { %v3128_v3 = vpop.f32.mrf.mxu1 }
 0x49f   : > { %3457 = vst [vmem:[%s5724_s18 + $0x2c0] sm:$0xff] %v3329_v63  ;;  %v3330_v4 = vadd.f32 %v3125_v0, %v1920_v61  ;;  %v3129_v5 = vadd.f32 %v3128_v3, %v2679_v1  ;;  %v2681_v6 = vpop.f32.mrf.mxu0  ;;  %v1934_v3 = vld [vmem:[%s5724_s18 + $0x338] sm:$0xff] }
 0x4a0   : > { %v3130_v8 = vpop.f32.mrf.mxu1 }
 0x4a1   : > { %3458 = vst [vmem:[%s5724_s18 + $0x2c8] sm:$0xff] %v3330_v4  ;;  %v3331_v9 = vadd.f32 %v3129_v5, %v1921_v2  ;;  %v3131_v10 = vadd.f32 %v3130_v8, %v2681_v6  ;;  %v2685_v11 = vpop.f32.mrf.mxu0  ;;  %v1935_v8 = vld [vmem:[%s5724_s18 + $0x340] sm:$0xff] }
 0x4a2   : > { %v3134_v13 = vpop.f32.mrf.mxu1 }
 0x4a3   : > { %3459 = vst [vmem:[%s5724_s18 + $0x2d0] sm:$0xff] %v3331_v9  ;;  %v3332_v14 = vadd.f32 %v3131_v10, %v1922_v7  ;;  %v3135_v15 = vadd.f32 %v3134_v13, %v2685_v11  ;;  %v2687_v16 = vpop.f32.mrf.mxu0  ;;  %v1936_v13 = vld [vmem:[%s5724_s18 + $0x348] sm:$0xff] }
 0x4a4   : > { %v3136_v18 = vpop.f32.mrf.mxu1 }
 0x4a5   : > { %3460 = vst [vmem:[%s5724_s18 + $0x2d8] sm:$0xff] %v3332_v14  ;;  %v3333_v19 = vadd.f32 %v3135_v15, %v1923_v12  ;;  %v3137_v20 = vadd.f32 %v3136_v18, %v2687_v16  ;;  %v2691_v21 = vpop.f32.mrf.mxu0  ;;  %v1937_v18 = vld [vmem:[%s5724_s18 + $0x350] sm:$0xff] }
 0x4a6   : > { %v3140_v23 = vpop.f32.mrf.mxu1 }
 0x4a7   : > { %3461 = vst [vmem:[%s5724_s18 + $0x2e0] sm:$0xff] %v3333_v19  ;;  %v3334_v24 = vadd.f32 %v3137_v20, %v1924_v17  ;;  %v3141_v25 = vadd.f32 %v3140_v23, %v2691_v21  ;;  %v2693_v26 = vpop.f32.mrf.mxu0  ;;  %v1938_v23 = vld [vmem:[%s5724_s18 + $0x358] sm:$0xff] }
 0x4a8   : > { %v3142_v28 = vpop.f32.mrf.mxu1 }
 0x4a9   : > { %3462 = vst [vmem:[%s5724_s18 + $0x2e8] sm:$0xff] %v3334_v24  ;;  %v3335_v29 = vadd.f32 %v3141_v25, %v1925_v22  ;;  %v3143_v30 = vadd.f32 %v3142_v28, %v2693_v26  ;;  %v2697_v31 = vpop.f32.mrf.mxu0  ;;  %v1939_v28 = vld [vmem:[%s5724_s18 + $0x360] sm:$0xff] }
 0x4aa   : > { %v3146_v33 = vpop.f32.mrf.mxu1 }
 0x4ab   : > { %3463 = vst [vmem:[%s5724_s18 + $0x2f0] sm:$0xff] %v3335_v29  ;;  %v3336_v34 = vadd.f32 %v3143_v30, %v1926_v27  ;;  %v3147_v35 = vadd.f32 %v3146_v33, %v2697_v31  ;;  %v2699_v36 = vpop.f32.mrf.mxu0  ;;  %v1940_v33 = vld [vmem:[%s5724_s18 + $0x368] sm:$0xff] }
 0x4ac   : > { %v3148_v38 = vpop.f32.mrf.mxu1 }
 0x4ad   : > { %3464 = vst [vmem:[%s5724_s18 + $0x2f8] sm:$0xff] %v3336_v34  ;;  %v3337_v39 = vadd.f32 %v3147_v35, %v1927_v32  ;;  %v3149_v40 = vadd.f32 %v3148_v38, %v2699_v36  ;;  %v2703_v41 = vpop.f32.mrf.mxu0  ;;  %v1941_v38 = vld [vmem:[%s5724_s18 + $0x370] sm:$0xff] }
 0x4ae   : > { %v3152_v43 = vpop.f32.mrf.mxu1 }
 0x4af   : > { %3465 = vst [vmem:[%s5724_s18 + $0x300] sm:$0xff] %v3337_v39  ;;  %v3338_v44 = vadd.f32 %v3149_v40, %v1928_v37  ;;  %v3153_v45 = vadd.f32 %v3152_v43, %v2703_v41  ;;  %v2705_v46 = vpop.f32.mrf.mxu0  ;;  %v1942_v43 = vld [vmem:[%s5724_s18 + $0x378] sm:$0xff] }
 0x4b0   : > { %v3154_v48 = vpop.f32.mrf.mxu1 }
 0x4b1   : > { %3466 = vst [vmem:[%s5724_s18 + $0x308] sm:$0xff] %v3338_v44  ;;  %v3339_v49 = vadd.f32 %v3153_v45, %v1929_v42  ;;  %v3155_v50 = vadd.f32 %v3154_v48, %v2705_v46  ;;  %v2709_v51 = vpop.f32.mrf.mxu0  ;;  %v1943_v48 = vld [vmem:[%s5724_s18 + $0x380] sm:$0xff] }
 0x4b2   : > { %v3158_v53 = vpop.f32.mrf.mxu1 }
 0x4b3   : > { %3467 = vst [vmem:[%s5724_s18 + $0x310] sm:$0xff] %v3339_v49  ;;  %v3340_v54 = vadd.f32 %v3155_v50, %v1930_v47  ;;  %v3159_v55 = vadd.f32 %v3158_v53, %v2709_v51  ;;  %v2711_v56 = vpop.f32.mrf.mxu0  ;;  %v1944_v53 = vld [vmem:[%s5724_s18 + $0x388] sm:$0xff] }
 0x4b4   : > { %v3160_v58 = vpop.f32.mrf.mxu1 }
 0x4b5   : > { %3468 = vst [vmem:[%s5724_s18 + $0x318] sm:$0xff] %v3340_v54  ;;  %v3341_v59 = vadd.f32 %v3159_v55, %v1931_v52  ;;  %v3161_v60 = vadd.f32 %v3160_v58, %v2711_v56  ;;  %v2715_v61 = vpop.f32.mrf.mxu0  ;;  %v1945_v58 = vld [vmem:[%s5724_s18 + $0x390] sm:$0xff] }
 0x4b6   : > { %v3164_v63 = vpop.f32.mrf.mxu1 }
 0x4b7   : > { %3469 = vst [vmem:[%s5724_s18 + $0x320] sm:$0xff] %v3341_v59  ;;  %v3342_v0 = vadd.f32 %v3161_v60, %v1932_v57  ;;  %v3165_v1 = vadd.f32 %v3164_v63, %v2715_v61  ;;  %v2717_v2 = vpop.f32.mrf.mxu0  ;;  %v1946_v63 = vld [vmem:[%s5724_s18 + $0x398] sm:$0xff] }
 0x4b8   : > { %v3166_v4 = vpop.f32.mrf.mxu1 }
 0x4b9   : > { %3470 = vst [vmem:[%s5724_s18 + $0x328] sm:$0xff] %v3342_v0  ;;  %v3343_v5 = vadd.f32 %v3165_v1, %v1933_v62  ;;  %v3167_v6 = vadd.f32 %v3166_v4, %v2717_v2  ;;  %v2721_v7 = vpop.f32.mrf.mxu0  ;;  %v1947_v4 = vld [vmem:[%s5724_s18 + $0x3a0] sm:$0xff] }
 0x4ba   : > { %v3170_v9 = vpop.f32.mrf.mxu1 }
 0x4bb   : > { %3471 = vst [vmem:[%s5724_s18 + $0x330] sm:$0xff] %v3343_v5  ;;  %v3344_v10 = vadd.f32 %v3167_v6, %v1934_v3  ;;  %v3171_v11 = vadd.f32 %v3170_v9, %v2721_v7  ;;  %v2723_v12 = vpop.f32.mrf.mxu0  ;;  %v1948_v9 = vld [vmem:[%s5724_s18 + $0x3a8] sm:$0xff] }
 0x4bc   : > { %v3172_v14 = vpop.f32.mrf.mxu1 }
 0x4bd   : > { %3472 = vst [vmem:[%s5724_s18 + $0x338] sm:$0xff] %v3344_v10  ;;  %v3345_v15 = vadd.f32 %v3171_v11, %v1935_v8  ;;  %v3173_v16 = vadd.f32 %v3172_v14, %v2723_v12  ;;  %v2727_v17 = vpop.f32.mrf.mxu0  ;;  %v1949_v14 = vld [vmem:[%s5724_s18 + $0x3b0] sm:$0xff] }
 0x4be   : > { %v3176_v19 = vpop.f32.mrf.mxu1 }
 0x4bf   : > { %3473 = vst [vmem:[%s5724_s18 + $0x340] sm:$0xff] %v3345_v15  ;;  %v3346_v20 = vadd.f32 %v3173_v16, %v1936_v13  ;;  %v3177_v21 = vadd.f32 %v3176_v19, %v2727_v17  ;;  %v2729_v22 = vpop.f32.mrf.mxu0  ;;  %v1950_v19 = vld [vmem:[%s5724_s18 + $0x3b8] sm:$0xff] }
 0x4c0   : > { %v3178_v24 = vpop.f32.mrf.mxu1 }
 0x4c1   : > { %3474 = vst [vmem:[%s5724_s18 + $0x348] sm:$0xff] %v3346_v20  ;;  %v3347_v25 = vadd.f32 %v3177_v21, %v1937_v18  ;;  %v3179_v26 = vadd.f32 %v3178_v24, %v2729_v22  ;;  %v2733_v27 = vpop.f32.mrf.mxu0  ;;  %v1951_v24 = vld [vmem:[%s5724_s18 + $0x3c0] sm:$0xff] }
 0x4c2   : > { %v3182_v29 = vpop.f32.mrf.mxu1 }
 0x4c3   : > { %3475 = vst [vmem:[%s5724_s18 + $0x350] sm:$0xff] %v3347_v25  ;;  %v3348_v30 = vadd.f32 %v3179_v26, %v1938_v23  ;;  %v3183_v31 = vadd.f32 %v3182_v29, %v2733_v27  ;;  %v2735_v32 = vpop.f32.mrf.mxu0  ;;  %v1952_v29 = vld [vmem:[%s5724_s18 + $0x3c8] sm:$0xff] }
 0x4c4   : > { %v3184_v34 = vpop.f32.mrf.mxu1 }
 0x4c5   : > { %3476 = vst [vmem:[%s5724_s18 + $0x358] sm:$0xff] %v3348_v30  ;;  %v3349_v35 = vadd.f32 %v3183_v31, %v1939_v28  ;;  %v3185_v36 = vadd.f32 %v3184_v34, %v2735_v32  ;;  %v2739_v37 = vpop.f32.mrf.mxu0  ;;  %v1953_v34 = vld [vmem:[%s5724_s18 + $0x3d0] sm:$0xff] }
 0x4c6   : > { %v3188_v39 = vpop.f32.mrf.mxu1 }
 0x4c7   : > { %3477 = vst [vmem:[%s5724_s18 + $0x360] sm:$0xff] %v3349_v35  ;;  %v3350_v40 = vadd.f32 %v3185_v36, %v1940_v33  ;;  %v3189_v41 = vadd.f32 %v3188_v39, %v2739_v37  ;;  %v2741_v42 = vpop.f32.mrf.mxu0  ;;  %v1954_v39 = vld [vmem:[%s5724_s18 + $0x3d8] sm:$0xff] }
 0x4c8   : > { %v3190_v44 = vpop.f32.mrf.mxu1 }
 0x4c9   : > { %3478 = vst [vmem:[%s5724_s18 + $0x368] sm:$0xff] %v3350_v40  ;;  %v3351_v45 = vadd.f32 %v3189_v41, %v1941_v38  ;;  %v3191_v46 = vadd.f32 %v3190_v44, %v2741_v42  ;;  %v2745_v47 = vpop.f32.mrf.mxu0  ;;  %v1955_v44 = vld [vmem:[%s5724_s18 + $0x3e0] sm:$0xff] }
 0x4ca   : > { %v3194_v49 = vpop.f32.mrf.mxu1 }
 0x4cb   : > { %3479 = vst [vmem:[%s5724_s18 + $0x370] sm:$0xff] %v3351_v45  ;;  %v3352_v50 = vadd.f32 %v3191_v46, %v1942_v43  ;;  %v3195_v51 = vadd.f32 %v3194_v49, %v2745_v47  ;;  %v2747_v52 = vpop.f32.mrf.mxu0  ;;  %v1956_v49 = vld [vmem:[%s5724_s18 + $0x3e8] sm:$0xff] }
 0x4cc   : > { %v3196_v54 = vpop.f32.mrf.mxu1 }
 0x4cd   : > { %3480 = vst [vmem:[%s5724_s18 + $0x378] sm:$0xff] %v3352_v50  ;;  %v3353_v55 = vadd.f32 %v3195_v51, %v1943_v48  ;;  %v3197_v56 = vadd.f32 %v3196_v54, %v2747_v52  ;;  %v2751_v57 = vpop.f32.mrf.mxu0  ;;  %v1957_v54 = vld [vmem:[%s5724_s18 + $0x3f0] sm:$0xff] }
 0x4ce   : > { %v3200_v59 = vpop.f32.mrf.mxu1 }
 0x4cf   : > { %3481 = vst [vmem:[%s5724_s18 + $0x380] sm:$0xff] %v3353_v55  ;;  %v3354_v60 = vadd.f32 %v3197_v56, %v1944_v53  ;;  %v3201_v61 = vadd.f32 %v3200_v59, %v2751_v57  ;;  %v2753_v62 = vpop.f32.mrf.mxu0  ;;  %v1958_v59 = vld [vmem:[%s5724_s18 + $0x3f8] sm:$0xff] }
 0x4d0   : > { %v3202_v0 = vpop.f32.mrf.mxu1 }
 0x4d1   : > { %3482 = vst [vmem:[%s5724_s18 + $0x388] sm:$0xff] %v3354_v60  ;;  %v3355_v1 = vadd.f32 %v3201_v61, %v1945_v58  ;;  %v3203_v2 = vadd.f32 %v3202_v0, %v2753_v62  ;;  %v2757_v3 = vpop.f32.mrf.mxu0 }
 0x4d2   : > { %v3206_v5 = vpop.f32.mrf.mxu1 }
 0x4d3   : > { %3483 = vst [vmem:[%s5724_s18 + $0x390] sm:$0xff] %v3355_v1  ;;  %v3356_v6 = vadd.f32 %v3203_v2, %v1946_v63  ;;  %v3207_v7 = vadd.f32 %v3206_v5, %v2757_v3  ;;  %v2759_v8 = vpop.f32.mrf.mxu0 }
 0x4d4   : > { %v3208_v10 = vpop.f32.mrf.mxu1 }
 0x4d5   : > { %3484 = vst [vmem:[%s5724_s18 + $0x398] sm:$0xff] %v3356_v6  ;;  %v3357_v11 = vadd.f32 %v3207_v7, %v1947_v4  ;;  %v3209_v12 = vadd.f32 %v3208_v10, %v2759_v8  ;;  %v2763_v13 = vpop.f32.mrf.mxu0 }
 0x4d6   : > { %v3212_v15 = vpop.f32.mrf.mxu1 }
 0x4d7   : > { %3485 = vst [vmem:[%s5724_s18 + $0x3a0] sm:$0xff] %v3357_v11  ;;  %v3358_v16 = vadd.f32 %v3209_v12, %v1948_v9  ;;  %v3213_v17 = vadd.f32 %v3212_v15, %v2763_v13  ;;  %v2765_v18 = vpop.f32.mrf.mxu0 }
 0x4d8   : > { %v3214_v20 = vpop.f32.mrf.mxu1 }
 0x4d9   : > { %3486 = vst [vmem:[%s5724_s18 + $0x3a8] sm:$0xff] %v3358_v16  ;;  %v3359_v21 = vadd.f32 %v3213_v17, %v1949_v14  ;;  %v3215_v22 = vadd.f32 %v3214_v20, %v2765_v18  ;;  %v2769_v23 = vpop.f32.mrf.mxu0 }
 0x4da   : > { %v3218_v25 = vpop.f32.mrf.mxu1 }
 0x4db   : > { %3487 = vst [vmem:[%s5724_s18 + $0x3b0] sm:$0xff] %v3359_v21  ;;  %v3360_v26 = vadd.f32 %v3215_v22, %v1950_v19  ;;  %v3219_v27 = vadd.f32 %v3218_v25, %v2769_v23  ;;  %v2771_v28 = vpop.f32.mrf.mxu0 }
 0x4dc   : > { %v3220_v30 = vpop.f32.mrf.mxu1 }
 0x4dd   : > { %3488 = vst [vmem:[%s5724_s18 + $0x3b8] sm:$0xff] %v3360_v26  ;;  %v3361_v31 = vadd.f32 %v3219_v27, %v1951_v24  ;;  %v3221_v32 = vadd.f32 %v3220_v30, %v2771_v28  ;;  %v2775_v33 = vpop.f32.mrf.mxu0 }
 0x4de   : > { %v3224_v35 = vpop.f32.mrf.mxu1 }
 0x4df   : > { %3489 = vst [vmem:[%s5724_s18 + $0x3c0] sm:$0xff] %v3361_v31  ;;  %v3362_v36 = vadd.f32 %v3221_v32, %v1952_v29  ;;  %v3225_v37 = vadd.f32 %v3224_v35, %v2775_v33  ;;  %v2777_v38 = vpop.f32.mrf.mxu0 }
 0x4e0   : > { %v3226_v40 = vpop.f32.mrf.mxu1 }
 0x4e1   : > { %3490 = vst [vmem:[%s5724_s18 + $0x3c8] sm:$0xff] %v3362_v36  ;;  %v3363_v41 = vadd.f32 %v3225_v37, %v1953_v34  ;;  %v3227_v42 = vadd.f32 %v3226_v40, %v2777_v38  ;;  %v2781_v43 = vpop.f32.mrf.mxu0 }
 0x4e2   : > { %v3230_v45 = vpop.f32.mrf.mxu1 }
 0x4e3   : > { %3491 = vst [vmem:[%s5724_s18 + $0x3d0] sm:$0xff] %v3363_v41  ;;  %v3364_v46 = vadd.f32 %v3227_v42, %v1954_v39  ;;  %v3231_v47 = vadd.f32 %v3230_v45, %v2781_v43  ;;  %v2783_v48 = vpop.f32.mrf.mxu0 }
 0x4e4   : > { %v3232_v50 = vpop.f32.mrf.mxu1 }
 0x4e5   : > { %3492 = vst [vmem:[%s5724_s18 + $0x3d8] sm:$0xff] %v3364_v46  ;;  %v3365_v51 = vadd.f32 %v3231_v47, %v1955_v44  ;;  %v3233_v52 = vadd.f32 %v3232_v50, %v2783_v48  ;;  %v2787_v53 = vpop.f32.mrf.mxu0 }
 0x4e6   : > { %v3236_v55 = vpop.f32.mrf.mxu1 }
 0x4e7   : > { %3493 = vst [vmem:[%s5724_s18 + $0x3e0] sm:$0xff] %v3365_v51  ;;  %v3366_v56 = vadd.f32 %v3233_v52, %v1956_v49  ;;  %v3237_v57 = vadd.f32 %v3236_v55, %v2787_v53  ;;  %v2789_v58 = vpop.f32.mrf.mxu0 }
 0x4e8   : > { %v3238_v60 = vpop.f32.mrf.mxu1 }
 0x4e9   : > { %3494 = vst [vmem:[%s5724_s18 + $0x3e8] sm:$0xff] %v3366_v56  ;;  %v3367_v61 = vadd.f32 %v3237_v57, %v1957_v54  ;;  %v3239_v62 = vadd.f32 %v3238_v60, %v2789_v58 }
 0x4eb   : > { %3495 = vst [vmem:[%s5724_s18 + $0x3f0] sm:$0xff] %v3367_v61  ;;  %v3368_v63 = vadd.f32 %v3239_v62, %v1958_v59 }
 0x4ed   : > { %3496 = vst [vmem:[%s5724_s18 + $0x3f8] sm:$0xff] %v3368_v63 }
 0x4ee PF: > { %3500 = sbr.rel (%p1826_p10) target bundleno = 1679 (0x68f), region = 64  ;;  %s7515_s9 = sld [smem:[#allocation26_spill]] (!%p1826_p10) }
 0x4ef   : > { %s7516_s25 = sld [smem:[#allocation27_spill]] (!%p1826_p10) }
 0x4f4   : > { %s4754_s27 = sadd.s32 4294967295, %s7515_s9 }
 0x4f5   : > { %s3502_s23 = sld [smem:[#allocation3 + %s7516_s25]] }
 0x4fb   : > { %p4755_p4 = scmp.ge.s32.totalorder %s4754_s27, %s3502_s23 }
 0x4fc   : > { %s7517_s15 = sld [smem:[#allocation27_spill]] (!%p4755_p4) }
 0x4fd   : > { %3506 = sbr.rel (%p4755_p4) target bundleno = 1679 (0x68f), region = 68 }
 0x502   : > { %s4756_s4 = sshll.u32 %s7517_s15, 1  ;;  %v3639_v0 = vld [vmem:[%s5704_s30 + $0x8] sm:$0xff] }
 0x503   : > { %v3703_v1 = vld [vmem:[%s5704_s30 + $0x208] sm:$0xff]  ;;  %s3508_s21 = sadd.s32 %s4756_s4, %s4754_s27  ;;  %3897 = vmatprep.mubr.f32.mxu0 %v3639_v0 }
 0x504   : > { %4089 = vmatprep.mubr.f32.mxu1 %v3703_v1  ;;  %s3509_s1 = sld [smem:[#allocation5 + %s3508_s21]] }
 0x50a   : > { %s4772_s5 = sshll.u32 %s3509_s1, 9 }
 0x50b   : > { %s6890_s13 = scalar_lea.vmem [#allocation12], %s4772_s5 }
 0x50c   : > { %v3800_v2 = vld [vmem:[%s6890_s13 + $0xf8] sm:$0xff]  ;;  %v3799_v3 = vld [vmem:[%s6890_s13 + $0xf0] sm:$0xff]  ;;  %v3798_v4 = vld [vmem:[%s6890_s13 + $0xe8] sm:$0xff] }
 0x50d   : > { %3833 = vmatprep.subr.mxu0 %v3800_v2  ;;  %4774 = vmatprep.subr.mxu1 %v3800_v2  ;;  %v3797_v5 = vld [vmem:[%s6890_s13 + $0xe0] sm:$0xff]  ;;  %v3796_v6 = vld [vmem:[%s6890_s13 + $0xd8] sm:$0xff]  ;;  %v3795_v7 = vld [vmem:[%s6890_s13 + $0xd0] sm:$0xff] }
 0x50e   : > { %3834 = vmatpush1.msra.mxu0 %v3799_v3  ;;  %4806 = vmatpush1.msra.mxu1 %v3799_v3  ;;  %v3794_v8 = vld [vmem:[%s6890_s13 + $0xc8] sm:$0xff]  ;;  %v3793_v9 = vld [vmem:[%s6890_s13 + $0xc0] sm:$0xff]  ;;  %v3792_v10 = vld [vmem:[%s6890_s13 + $0xb8] sm:$0xff] }
 0x50f   : > { %3835 = vmatprep.subr.mxu0 %v3798_v4  ;;  %4775 = vmatprep.subr.mxu1 %v3798_v4  ;;  %v3791_v11 = vld [vmem:[%s6890_s13 + $0xb0] sm:$0xff]  ;;  %v3790_v12 = vld [vmem:[%s6890_s13 + $0xa8] sm:$0xff]  ;;  %v3789_v13 = vld [vmem:[%s6890_s13 + $0xa0] sm:$0xff] }
 0x510   : > { %3836 = vmatpush1.msra.mxu0 %v3797_v5  ;;  %4807 = vmatpush1.msra.mxu1 %v3797_v5  ;;  %v3788_v14 = vld [vmem:[%s6890_s13 + $0x98] sm:$0xff]  ;;  %v3787_v15 = vld [vmem:[%s6890_s13 + $0x90] sm:$0xff]  ;;  %v3786_v16 = vld [vmem:[%s6890_s13 + $0x88] sm:$0xff] }
 0x511   : > { %3837 = vmatprep.subr.mxu0 %v3796_v6  ;;  %4776 = vmatprep.subr.mxu1 %v3796_v6  ;;  %v3785_v17 = vld [vmem:[%s6890_s13 + $0x80] sm:$0xff]  ;;  %v3784_v18 = vld [vmem:[%s6890_s13 + $0x78] sm:$0xff]  ;;  %v3783_v19 = vld [vmem:[%s6890_s13 + $0x70] sm:$0xff] }
 0x512   : > { %3838 = vmatpush1.msra.mxu0 %v3795_v7  ;;  %4808 = vmatpush1.msra.mxu1 %v3795_v7  ;;  %v3782_v20 = vld [vmem:[%s6890_s13 + $0x68] sm:$0xff]  ;;  %v3781_v21 = vld [vmem:[%s6890_s13 + $0x60] sm:$0xff]  ;;  %v3780_v22 = vld [vmem:[%s6890_s13 + $0x58] sm:$0xff] }
 0x513   : > { %3839 = vmatprep.subr.mxu0 %v3794_v8  ;;  %4777 = vmatprep.subr.mxu1 %v3794_v8  ;;  %v3779_v23 = vld [vmem:[%s6890_s13 + $0x50] sm:$0xff]  ;;  %v3778_v24 = vld [vmem:[%s6890_s13 + $0x48] sm:$0xff]  ;;  %v3777_v25 = vld [vmem:[%s6890_s13 + $0x40] sm:$0xff] }
 0x514   : > { %3840 = vmatpush1.msra.mxu0 %v3793_v9  ;;  %4809 = vmatpush1.msra.mxu1 %v3793_v9  ;;  %v3776_v26 = vld [vmem:[%s6890_s13 + $0x38] sm:$0xff]  ;;  %v3775_v27 = vld [vmem:[%s6890_s13 + $0x30] sm:$0xff]  ;;  %v3774_v28 = vld [vmem:[%s6890_s13 + $0x28] sm:$0xff] }
 0x515   : > { %3841 = vmatprep.subr.mxu0 %v3792_v10  ;;  %4778 = vmatprep.subr.mxu1 %v3792_v10  ;;  %v3773_v29 = vld [vmem:[%s6890_s13 + $0x20] sm:$0xff]  ;;  %v3772_v30 = vld [vmem:[%s6890_s13 + $0x18] sm:$0xff]  ;;  %v3771_v31 = vld [vmem:[%s6890_s13 + $0x10] sm:$0xff] }
 0x516   : > { %3842 = vmatpush1.msra.mxu0 %v3791_v11  ;;  %4810 = vmatpush1.msra.mxu1 %v3791_v11  ;;  %v3770_v32 = vld [vmem:[%s6890_s13 + $0x8] sm:$0xff]  ;;  %v3769_v33 = vld [vmem:[%s6890_s13] sm:$0xff]  ;;  %v3832_v34 = vld [vmem:[%s6890_s13 + $0x1f8] sm:$0xff] }
 0x517   : > { %3843 = vmatprep.subr.mxu0 %v3790_v12  ;;  %4779 = vmatprep.subr.mxu1 %v3790_v12  ;;  %v3831_v35 = vld [vmem:[%s6890_s13 + $0x1f0] sm:$0xff]  ;;  %v3830_v36 = vld [vmem:[%s6890_s13 + $0x1e8] sm:$0xff]  ;;  %v3829_v37 = vld [vmem:[%s6890_s13 + $0x1e0] sm:$0xff] }
 0x518   : > { %3844 = vmatpush1.msra.mxu0 %v3789_v13  ;;  %4811 = vmatpush1.msra.mxu1 %v3789_v13  ;;  %v3828_v38 = vld [vmem:[%s6890_s13 + $0x1d8] sm:$0xff]  ;;  %v3827_v39 = vld [vmem:[%s6890_s13 + $0x1d0] sm:$0xff]  ;;  %v3826_v40 = vld [vmem:[%s6890_s13 + $0x1c8] sm:$0xff] }
 0x519   : > { %3845 = vmatprep.subr.mxu0 %v3788_v14  ;;  %4780 = vmatprep.subr.mxu1 %v3788_v14  ;;  %v3825_v41 = vld [vmem:[%s6890_s13 + $0x1c0] sm:$0xff]  ;;  %v3824_v42 = vld [vmem:[%s6890_s13 + $0x1b8] sm:$0xff]  ;;  %v3823_v43 = vld [vmem:[%s6890_s13 + $0x1b0] sm:$0xff] }
 0x51a   : > { %3846 = vmatpush1.msra.mxu0 %v3787_v15  ;;  %4812 = vmatpush1.msra.mxu1 %v3787_v15  ;;  %v3822_v44 = vld [vmem:[%s6890_s13 + $0x1a8] sm:$0xff]  ;;  %v3821_v45 = vld [vmem:[%s6890_s13 + $0x1a0] sm:$0xff]  ;;  %v3820_v46 = vld [vmem:[%s6890_s13 + $0x198] sm:$0xff] }
 0x51b   : > { %3847 = vmatprep.subr.mxu0 %v3786_v16  ;;  %4781 = vmatprep.subr.mxu1 %v3786_v16  ;;  %v3819_v47 = vld [vmem:[%s6890_s13 + $0x190] sm:$0xff]  ;;  %v3818_v48 = vld [vmem:[%s6890_s13 + $0x188] sm:$0xff]  ;;  %v3817_v49 = vld [vmem:[%s6890_s13 + $0x180] sm:$0xff] }
 0x51c   : > { %3848 = vmatpush1.msra.mxu0 %v3785_v17  ;;  %4813 = vmatpush1.msra.mxu1 %v3785_v17  ;;  %v3816_v50 = vld [vmem:[%s6890_s13 + $0x178] sm:$0xff]  ;;  %v3815_v51 = vld [vmem:[%s6890_s13 + $0x170] sm:$0xff]  ;;  %v3814_v52 = vld [vmem:[%s6890_s13 + $0x168] sm:$0xff] }
 0x51d   : > { %3849 = vmatprep.subr.mxu0 %v3784_v18  ;;  %4782 = vmatprep.subr.mxu1 %v3784_v18  ;;  %v3813_v53 = vld [vmem:[%s6890_s13 + $0x160] sm:$0xff]  ;;  %v3812_v54 = vld [vmem:[%s6890_s13 + $0x158] sm:$0xff]  ;;  %v3811_v55 = vld [vmem:[%s6890_s13 + $0x150] sm:$0xff] }
 0x51e   : > { %3850 = vmatpush1.msra.mxu0 %v3783_v19  ;;  %4814 = vmatpush1.msra.mxu1 %v3783_v19  ;;  %v3810_v56 = vld [vmem:[%s6890_s13 + $0x148] sm:$0xff]  ;;  %v3809_v57 = vld [vmem:[%s6890_s13 + $0x140] sm:$0xff]  ;;  %v3808_v58 = vld [vmem:[%s6890_s13 + $0x138] sm:$0xff] }
 0x51f   : > { %3851 = vmatprep.subr.mxu0 %v3782_v20  ;;  %4783 = vmatprep.subr.mxu1 %v3782_v20  ;;  %v3807_v59 = vld [vmem:[%s6890_s13 + $0x130] sm:$0xff]  ;;  %v3806_v60 = vld [vmem:[%s6890_s13 + $0x128] sm:$0xff]  ;;  %v3805_v61 = vld [vmem:[%s6890_s13 + $0x120] sm:$0xff] }
 0x520   : > { %3852 = vmatpush1.msra.mxu0 %v3781_v21  ;;  %4815 = vmatpush1.msra.mxu1 %v3781_v21  ;;  %v3804_v62 = vld [vmem:[%s6890_s13 + $0x118] sm:$0xff]  ;;  %v3803_v63 = vld [vmem:[%s6890_s13 + $0x110] sm:$0xff]  ;;  %v3802_v0 = vld [vmem:[%s6890_s13 + $0x108] sm:$0xff] }
 0x521   : > { %3853 = vmatprep.subr.mxu0 %v3780_v22  ;;  %4784 = vmatprep.subr.mxu1 %v3780_v22  ;;  %v3801_v1 = vld [vmem:[%s6890_s13 + $0x100] sm:$0xff]  ;;  %v3641_v4 = vld [vmem:[%s5704_s30 + $0x18] sm:$0xff]  ;;  %v3640_v6 = vld [vmem:[%s5704_s30 + $0x10] sm:$0xff] }
 0x522   : > { %3854 = vmatpush1.msra.mxu0 %v3779_v23  ;;  %4816 = vmatpush1.msra.mxu1 %v3779_v23  ;;  %v3638_v2 = vld [vmem:[%s5704_s30] sm:$0xff]  ;;  %v3705_v5 = vld [vmem:[%s5704_s30 + $0x218] sm:$0xff]  ;;  %v3704_v7 = vld [vmem:[%s5704_s30 + $0x210] sm:$0xff] }
 0x523   : > { %3855 = vmatprep.subr.mxu0 %v3778_v24  ;;  %4785 = vmatprep.subr.mxu1 %v3778_v24  ;;  %v3702_v3 = vld [vmem:[%s5704_s30 + $0x200] sm:$0xff]  ;;  %v3643_v8 = vld [vmem:[%s5704_s30 + $0x28] sm:$0xff]  ;;  %v3645_v12 = vld [vmem:[%s5704_s30 + $0x38] sm:$0xff] }
 0x524   : > { %3856 = vmatpush1.msra.mxu0 %v3777_v25  ;;  %4817 = vmatpush1.msra.mxu1 %v3777_v25  ;;  %v3707_v9 = vld [vmem:[%s5704_s30 + $0x228] sm:$0xff]  ;;  %v3642_v10 = vld [vmem:[%s5704_s30 + $0x20] sm:$0xff]  ;;  %v3709_v13 = vld [vmem:[%s5704_s30 + $0x238] sm:$0xff] }
 0x525   : > { %3857 = vmatprep.subr.mxu0 %v3776_v26  ;;  %4786 = vmatprep.subr.mxu1 %v3776_v26  ;;  %v3706_v11 = vld [vmem:[%s5704_s30 + $0x220] sm:$0xff]  ;;  %v3644_v14 = vld [vmem:[%s5704_s30 + $0x30] sm:$0xff]  ;;  %v3647_v16 = vld [vmem:[%s5704_s30 + $0x48] sm:$0xff] }
 0x526   : > { %3858 = vmatpush1.msra.mxu0 %v3775_v27  ;;  %4818 = vmatpush1.msra.mxu1 %v3775_v27  ;;  %v3708_v15 = vld [vmem:[%s5704_s30 + $0x230] sm:$0xff]  ;;  %v3711_v17 = vld [vmem:[%s5704_s30 + $0x248] sm:$0xff]  ;;  %v3646_v18 = vld [vmem:[%s5704_s30 + $0x40] sm:$0xff] }
 0x527   : > { %3859 = vmatprep.subr.mxu0 %v3774_v28  ;;  %4787 = vmatprep.subr.mxu1 %v3774_v28  ;;  %v3710_v19 = vld [vmem:[%s5704_s30 + $0x240] sm:$0xff]  ;;  %v3649_v20 = vld [vmem:[%s5704_s30 + $0x58] sm:$0xff]  ;;  %v3648_v22 = vld [vmem:[%s5704_s30 + $0x50] sm:$0xff] }
 0x528   : > { %3860 = vmatpush1.msra.mxu0 %v3773_v29  ;;  %4819 = vmatpush1.msra.mxu1 %v3773_v29  ;;  %v3713_v21 = vld [vmem:[%s5704_s30 + $0x258] sm:$0xff]  ;;  %v3712_v23 = vld [vmem:[%s5704_s30 + $0x250] sm:$0xff]  ;;  %v3651_v24 = vld [vmem:[%s5704_s30 + $0x68] sm:$0xff] }
 0x529   : > { %3861 = vmatprep.subr.mxu0 %v3772_v30  ;;  %4788 = vmatprep.subr.mxu1 %v3772_v30  ;;  %v3715_v25 = vld [vmem:[%s5704_s30 + $0x268] sm:$0xff]  ;;  %v3650_v26 = vld [vmem:[%s5704_s30 + $0x60] sm:$0xff]  ;;  %v3653_v28 = vld [vmem:[%s5704_s30 + $0x78] sm:$0xff] }
 0x52a   : > { %3862 = vmatpush1.msra.mxu0 %v3771_v31  ;;  %4820 = vmatpush1.msra.mxu1 %v3771_v31  ;;  %v3714_v27 = vld [vmem:[%s5704_s30 + $0x260] sm:$0xff]  ;;  %v3717_v29 = vld [vmem:[%s5704_s30 + $0x278] sm:$0xff]  ;;  %v3652_v30 = vld [vmem:[%s5704_s30 + $0x70] sm:$0xff] }
 0x52b   : > { %3863 = vmatprep.subr.mxu0 %v3770_v32  ;;  %4789 = vmatprep.subr.mxu1 %v3770_v32  ;;  %v3716_v31 = vld [vmem:[%s5704_s30 + $0x270] sm:$0xff]  ;;  %v3655_v32 = vld [vmem:[%s5704_s30 + $0x88] sm:$0xff] }
 0x52c   : > { %3864 = vmatpush1.msra.mxu0 %v3769_v33  ;;  %4821 = vmatpush1.msra.mxu1 %v3769_v33  ;;  %v3719_v33 = vld [vmem:[%s5704_s30 + $0x288] sm:$0xff] }
 0x52d   : > { %3865 = vmatprep.subr.mxu0 %v3832_v34  ;;  %4790 = vmatprep.subr.mxu1 %v3832_v34  ;;  %v3654_v34 = vld [vmem:[%s5704_s30 + $0x80] sm:$0xff] }
 0x52e   : > { %3866 = vmatpush2.msra.mxu0 %v3831_v35  ;;  %4822 = vmatpush2.msra.mxu1 %v3831_v35  ;;  %v3718_v35 = vld [vmem:[%s5704_s30 + $0x280] sm:$0xff] }
 0x52f   : > { %3867 = vmatprep.subr.mxu0 %v3830_v36  ;;  %4791 = vmatprep.subr.mxu1 %v3830_v36  ;;  %v3657_v36 = vld [vmem:[%s5704_s30 + $0x98] sm:$0xff] }
 0x530   : > { %3868 = vmatpush2.msra.mxu0 %v3829_v37  ;;  %4823 = vmatpush2.msra.mxu1 %v3829_v37  ;;  %v3721_v37 = vld [vmem:[%s5704_s30 + $0x298] sm:$0xff] }
 0x531   : > { %3869 = vmatprep.subr.mxu0 %v3828_v38  ;;  %4792 = vmatprep.subr.mxu1 %v3828_v38  ;;  %v3656_v38 = vld [vmem:[%s5704_s30 + $0x90] sm:$0xff] }
 0x532   : > { %3870 = vmatpush2.msra.mxu0 %v3827_v39  ;;  %4824 = vmatpush2.msra.mxu1 %v3827_v39  ;;  %v3720_v39 = vld [vmem:[%s5704_s30 + $0x290] sm:$0xff] }
 0x533   : > { %3871 = vmatprep.subr.mxu0 %v3826_v40  ;;  %4793 = vmatprep.subr.mxu1 %v3826_v40  ;;  %v3659_v40 = vld [vmem:[%s5704_s30 + $0xa8] sm:$0xff] }
 0x534   : > { %3872 = vmatpush2.msra.mxu0 %v3825_v41  ;;  %4825 = vmatpush2.msra.mxu1 %v3825_v41  ;;  %v3723_v41 = vld [vmem:[%s5704_s30 + $0x2a8] sm:$0xff] }
 0x535   : > { %3873 = vmatprep.subr.mxu0 %v3824_v42  ;;  %4794 = vmatprep.subr.mxu1 %v3824_v42  ;;  %v3658_v42 = vld [vmem:[%s5704_s30 + $0xa0] sm:$0xff] }
 0x536   : > { %3874 = vmatpush2.msra.mxu0 %v3823_v43  ;;  %4826 = vmatpush2.msra.mxu1 %v3823_v43  ;;  %v3722_v43 = vld [vmem:[%s5704_s30 + $0x2a0] sm:$0xff] }
 0x537   : > { %3875 = vmatprep.subr.mxu0 %v3822_v44  ;;  %4795 = vmatprep.subr.mxu1 %v3822_v44  ;;  %v3661_v44 = vld [vmem:[%s5704_s30 + $0xb8] sm:$0xff] }
 0x538   : > { %3876 = vmatpush2.msra.mxu0 %v3821_v45  ;;  %4827 = vmatpush2.msra.mxu1 %v3821_v45  ;;  %v3725_v45 = vld [vmem:[%s5704_s30 + $0x2b8] sm:$0xff] }
 0x539   : > { %3877 = vmatprep.subr.mxu0 %v3820_v46  ;;  %4796 = vmatprep.subr.mxu1 %v3820_v46  ;;  %v3660_v46 = vld [vmem:[%s5704_s30 + $0xb0] sm:$0xff] }
 0x53a   : > { %3878 = vmatpush2.msra.mxu0 %v3819_v47  ;;  %4828 = vmatpush2.msra.mxu1 %v3819_v47  ;;  %v3724_v47 = vld [vmem:[%s5704_s30 + $0x2b0] sm:$0xff] }
 0x53b   : > { %3879 = vmatprep.subr.mxu0 %v3818_v48  ;;  %4797 = vmatprep.subr.mxu1 %v3818_v48  ;;  %v3663_v48 = vld [vmem:[%s5704_s30 + $0xc8] sm:$0xff] }
 0x53c   : > { %3880 = vmatpush2.msra.mxu0 %v3817_v49  ;;  %4829 = vmatpush2.msra.mxu1 %v3817_v49  ;;  %v3727_v49 = vld [vmem:[%s5704_s30 + $0x2c8] sm:$0xff] }
 0x53d   : > { %3881 = vmatprep.subr.mxu0 %v3816_v50  ;;  %4798 = vmatprep.subr.mxu1 %v3816_v50  ;;  %v3662_v50 = vld [vmem:[%s5704_s30 + $0xc0] sm:$0xff] }
 0x53e   : > { %3882 = vmatpush2.msra.mxu0 %v3815_v51  ;;  %4830 = vmatpush2.msra.mxu1 %v3815_v51  ;;  %v3726_v51 = vld [vmem:[%s5704_s30 + $0x2c0] sm:$0xff] }
 0x53f   : > { %3883 = vmatprep.subr.mxu0 %v3814_v52  ;;  %4799 = vmatprep.subr.mxu1 %v3814_v52  ;;  %v3665_v52 = vld [vmem:[%s5704_s30 + $0xd8] sm:$0xff] }
 0x540   : > { %3884 = vmatpush2.msra.mxu0 %v3813_v53  ;;  %4831 = vmatpush2.msra.mxu1 %v3813_v53  ;;  %v3729_v53 = vld [vmem:[%s5704_s30 + $0x2d8] sm:$0xff] }
 0x541   : > { %3885 = vmatprep.subr.mxu0 %v3812_v54  ;;  %4800 = vmatprep.subr.mxu1 %v3812_v54  ;;  %v3664_v54 = vld [vmem:[%s5704_s30 + $0xd0] sm:$0xff] }
 0x542   : > { %3886 = vmatpush2.msra.mxu0 %v3811_v55  ;;  %4832 = vmatpush2.msra.mxu1 %v3811_v55  ;;  %v3728_v55 = vld [vmem:[%s5704_s30 + $0x2d0] sm:$0xff] }
 0x543   : > { %3887 = vmatprep.subr.mxu0 %v3810_v56  ;;  %4801 = vmatprep.subr.mxu1 %v3810_v56  ;;  %v3667_v56 = vld [vmem:[%s5704_s30 + $0xe8] sm:$0xff] }
 0x544   : > { %3888 = vmatpush2.msra.mxu0 %v3809_v57  ;;  %4833 = vmatpush2.msra.mxu1 %v3809_v57  ;;  %v3731_v57 = vld [vmem:[%s5704_s30 + $0x2e8] sm:$0xff] }
 0x545   : > { %3889 = vmatprep.subr.mxu0 %v3808_v58  ;;  %4802 = vmatprep.subr.mxu1 %v3808_v58  ;;  %v3666_v58 = vld [vmem:[%s5704_s30 + $0xe0] sm:$0xff] }
 0x546   : > { %3890 = vmatpush2.msra.mxu0 %v3807_v59  ;;  %4834 = vmatpush2.msra.mxu1 %v3807_v59  ;;  %v3730_v59 = vld [vmem:[%s5704_s30 + $0x2e0] sm:$0xff] }
 0x547   : > { %3891 = vmatprep.subr.mxu0 %v3806_v60  ;;  %4803 = vmatprep.subr.mxu1 %v3806_v60  ;;  %v3669_v60 = vld [vmem:[%s5704_s30 + $0xf8] sm:$0xff] }
 0x548   : > { %3892 = vmatpush2.msra.mxu0 %v3805_v61  ;;  %4835 = vmatpush2.msra.mxu1 %v3805_v61  ;;  %v3733_v61 = vld [vmem:[%s5704_s30 + $0x2f8] sm:$0xff] }
 0x549   : > { %3893 = vmatprep.subr.mxu0 %v3804_v62  ;;  %4804 = vmatprep.subr.mxu1 %v3804_v62  ;;  %v3668_v62 = vld [vmem:[%s5704_s30 + $0xf0] sm:$0xff] }
 0x54a   : > { %3894 = vmatpush2.msra.mxu0 %v3803_v63  ;;  %4836 = vmatpush2.msra.mxu1 %v3803_v63  ;;  %v3732_v63 = vld [vmem:[%s5704_s30 + $0x2f0] sm:$0xff] }
 0x54b   : > { %3895 = vmatprep.subr.mxu0 %v3802_v0  ;;  %4805 = vmatprep.subr.mxu1 %v3802_v0  ;;  %v3671_v0 = vld [vmem:[%s5704_s30 + $0x108] sm:$0xff] }
 0x54c   : > { %3896 = vmatpush2.msra.mxu0 %v3801_v1  ;;  %4837 = vmatpush2.msra.mxu1 %v3801_v1  ;;  %v3735_v1 = vld [vmem:[%s5704_s30 + $0x308] sm:$0xff] }
 0x54d   : > { %3898 = vmatmul.mubr.f32.vlgmr.msra.gmra.mxu0 %v3638_v2  ;;  %4090 = vmatmul.mubr.f32.vlgmr.msra.gmra.mxu1 %v3702_v3  ;;  %v3670_v2 = vld [vmem:[%s5704_s30 + $0x100] sm:$0xff] }
 0x54e   : > { %3903 = vmatprep.mubr.f32.mxu0 %v3641_v4  ;;  %4095 = vmatprep.mubr.f32.mxu1 %v3705_v5  ;;  %v3734_v3 = vld [vmem:[%s5704_s30 + $0x300] sm:$0xff]  ;;  %v3673_v4 = vld [vmem:[%s5704_s30 + $0x118] sm:$0xff] }
 0x54f   : > { %v3737_v5 = vld [vmem:[%s5704_s30 + $0x318] sm:$0xff] }
 0x551   : > { %3904 = vmatmul.mubr.f32.gmra.mxu0 %v3640_v6  ;;  %4096 = vmatmul.mubr.f32.gmra.mxu1 %v3704_v7  ;;  %v3672_v6 = vld [vmem:[%s5704_s30 + $0x110] sm:$0xff] }
 0x552   : > { %3909 = vmatprep.mubr.f32.mxu0 %v3643_v8  ;;  %4101 = vmatprep.mubr.f32.mxu1 %v3707_v9  ;;  %v3736_v7 = vld [vmem:[%s5704_s30 + $0x310] sm:$0xff]  ;;  %v3675_v8 = vld [vmem:[%s5704_s30 + $0x128] sm:$0xff] }
 0x553   : > { %v3739_v9 = vld [vmem:[%s5704_s30 + $0x328] sm:$0xff] }
 0x555   : > { %3910 = vmatmul.mubr.f32.gmra.mxu0 %v3642_v10  ;;  %4102 = vmatmul.mubr.f32.gmra.mxu1 %v3706_v11  ;;  %v3674_v10 = vld [vmem:[%s5704_s30 + $0x120] sm:$0xff] }
 0x556   : > { %3915 = vmatprep.mubr.f32.mxu0 %v3645_v12  ;;  %4107 = vmatprep.mubr.f32.mxu1 %v3709_v13  ;;  %v3738_v11 = vld [vmem:[%s5704_s30 + $0x320] sm:$0xff]  ;;  %v3677_v12 = vld [vmem:[%s5704_s30 + $0x138] sm:$0xff] }
 0x557   : > { %v3741_v13 = vld [vmem:[%s5704_s30 + $0x338] sm:$0xff] }
 0x559   : > { %3916 = vmatmul.mubr.f32.gmra.mxu0 %v3644_v14  ;;  %4108 = vmatmul.mubr.f32.gmra.mxu1 %v3708_v15  ;;  %v3676_v14 = vld [vmem:[%s5704_s30 + $0x130] sm:$0xff] }
 0x55a   : > { %3921 = vmatprep.mubr.f32.mxu0 %v3647_v16  ;;  %4113 = vmatprep.mubr.f32.mxu1 %v3711_v17  ;;  %v3740_v15 = vld [vmem:[%s5704_s30 + $0x330] sm:$0xff]  ;;  %v3679_v16 = vld [vmem:[%s5704_s30 + $0x148] sm:$0xff] }
 0x55b   : > { %v3743_v17 = vld [vmem:[%s5704_s30 + $0x348] sm:$0xff] }
 0x55d   : > { %3922 = vmatmul.mubr.f32.gmra.mxu0 %v3646_v18  ;;  %4114 = vmatmul.mubr.f32.gmra.mxu1 %v3710_v19  ;;  %v3678_v18 = vld [vmem:[%s5704_s30 + $0x140] sm:$0xff] }
 0x55e   : > { %3927 = vmatprep.mubr.f32.mxu0 %v3649_v20  ;;  %4119 = vmatprep.mubr.f32.mxu1 %v3713_v21  ;;  %v3742_v19 = vld [vmem:[%s5704_s30 + $0x340] sm:$0xff]  ;;  %v3681_v20 = vld [vmem:[%s5704_s30 + $0x158] sm:$0xff] }
 0x55f   : > { %v3745_v21 = vld [vmem:[%s5704_s30 + $0x358] sm:$0xff] }
 0x561   : > { %3928 = vmatmul.mubr.f32.gmra.mxu0 %v3648_v22  ;;  %4120 = vmatmul.mubr.f32.gmra.mxu1 %v3712_v23  ;;  %v3680_v22 = vld [vmem:[%s5704_s30 + $0x150] sm:$0xff] }
 0x562   : > { %3933 = vmatprep.mubr.f32.mxu0 %v3651_v24  ;;  %4125 = vmatprep.mubr.f32.mxu1 %v3715_v25  ;;  %v3744_v23 = vld [vmem:[%s5704_s30 + $0x350] sm:$0xff]  ;;  %v3683_v24 = vld [vmem:[%s5704_s30 + $0x168] sm:$0xff] }
 0x563   : > { %v3747_v25 = vld [vmem:[%s5704_s30 + $0x368] sm:$0xff] }
 0x565   : > { %3934 = vmatmul.mubr.f32.gmra.mxu0 %v3650_v26  ;;  %4126 = vmatmul.mubr.f32.gmra.mxu1 %v3714_v27  ;;  %v3682_v26 = vld [vmem:[%s5704_s30 + $0x160] sm:$0xff] }
 0x566   : > { %3939 = vmatprep.mubr.f32.mxu0 %v3653_v28  ;;  %4131 = vmatprep.mubr.f32.mxu1 %v3717_v29  ;;  %v3746_v27 = vld [vmem:[%s5704_s30 + $0x360] sm:$0xff]  ;;  %v3685_v28 = vld [vmem:[%s5704_s30 + $0x178] sm:$0xff] }
 0x567   : > { %v3749_v29 = vld [vmem:[%s5704_s30 + $0x378] sm:$0xff] }
 0x569   : > { %3940 = vmatmul.mubr.f32.gmra.mxu0 %v3652_v30  ;;  %4132 = vmatmul.mubr.f32.gmra.mxu1 %v3716_v31  ;;  %v3684_v30 = vld [vmem:[%s5704_s30 + $0x170] sm:$0xff] }
 0x56a   : > { %3945 = vmatprep.mubr.f32.mxu0 %v3655_v32  ;;  %4137 = vmatprep.mubr.f32.mxu1 %v3719_v33  ;;  %v3748_v31 = vld [vmem:[%s5704_s30 + $0x370] sm:$0xff]  ;;  %v3687_v32 = vld [vmem:[%s5704_s30 + $0x188] sm:$0xff] }
 0x56b   : > { %v3751_v33 = vld [vmem:[%s5704_s30 + $0x388] sm:$0xff] }
 0x56d   : > { %3946 = vmatmul.mubr.f32.gmra.mxu0 %v3654_v34  ;;  %4138 = vmatmul.mubr.f32.gmra.mxu1 %v3718_v35  ;;  %v3686_v34 = vld [vmem:[%s5704_s30 + $0x180] sm:$0xff] }
 0x56e   : > { %3951 = vmatprep.mubr.f32.mxu0 %v3657_v36  ;;  %4143 = vmatprep.mubr.f32.mxu1 %v3721_v37  ;;  %v3750_v35 = vld [vmem:[%s5704_s30 + $0x380] sm:$0xff]  ;;  %v3689_v36 = vld [vmem:[%s5704_s30 + $0x198] sm:$0xff] }
 0x56f   : > { %v3753_v37 = vld [vmem:[%s5704_s30 + $0x398] sm:$0xff] }
 0x571   : > { %3952 = vmatmul.mubr.f32.gmra.mxu0 %v3656_v38  ;;  %4144 = vmatmul.mubr.f32.gmra.mxu1 %v3720_v39  ;;  %v3688_v38 = vld [vmem:[%s5704_s30 + $0x190] sm:$0xff] }
 0x572   : > { %3957 = vmatprep.mubr.f32.mxu0 %v3659_v40  ;;  %4149 = vmatprep.mubr.f32.mxu1 %v3723_v41  ;;  %v3752_v39 = vld [vmem:[%s5704_s30 + $0x390] sm:$0xff]  ;;  %v3691_v40 = vld [vmem:[%s5704_s30 + $0x1a8] sm:$0xff] }
 0x573   : > { %v3755_v41 = vld [vmem:[%s5704_s30 + $0x3a8] sm:$0xff] }
 0x575   : > { %3958 = vmatmul.mubr.f32.gmra.mxu0 %v3658_v42  ;;  %4150 = vmatmul.mubr.f32.gmra.mxu1 %v3722_v43  ;;  %v3690_v42 = vld [vmem:[%s5704_s30 + $0x1a0] sm:$0xff] }
 0x576   : > { %3963 = vmatprep.mubr.f32.mxu0 %v3661_v44  ;;  %4155 = vmatprep.mubr.f32.mxu1 %v3725_v45  ;;  %v3754_v43 = vld [vmem:[%s5704_s30 + $0x3a0] sm:$0xff]  ;;  %v3693_v44 = vld [vmem:[%s5704_s30 + $0x1b8] sm:$0xff] }
 0x577   : > { %v3757_v45 = vld [vmem:[%s5704_s30 + $0x3b8] sm:$0xff] }
 0x579   : > { %3964 = vmatmul.mubr.f32.gmra.mxu0 %v3660_v46  ;;  %4156 = vmatmul.mubr.f32.gmra.mxu1 %v3724_v47  ;;  %v3692_v46 = vld [vmem:[%s5704_s30 + $0x1b0] sm:$0xff] }
 0x57a   : > { %3969 = vmatprep.mubr.f32.mxu0 %v3663_v48  ;;  %4161 = vmatprep.mubr.f32.mxu1 %v3727_v49  ;;  %v3756_v47 = vld [vmem:[%s5704_s30 + $0x3b0] sm:$0xff]  ;;  %v3695_v48 = vld [vmem:[%s5704_s30 + $0x1c8] sm:$0xff] }
 0x57b   : > { %v3759_v49 = vld [vmem:[%s5704_s30 + $0x3c8] sm:$0xff] }
 0x57d   : > { %3970 = vmatmul.mubr.f32.gmra.mxu0 %v3662_v50  ;;  %4162 = vmatmul.mubr.f32.gmra.mxu1 %v3726_v51  ;;  %v3694_v50 = vld [vmem:[%s5704_s30 + $0x1c0] sm:$0xff] }
 0x57e   : > { %3975 = vmatprep.mubr.f32.mxu0 %v3665_v52  ;;  %4167 = vmatprep.mubr.f32.mxu1 %v3729_v53  ;;  %v3758_v51 = vld [vmem:[%s5704_s30 + $0x3c0] sm:$0xff]  ;;  %v3697_v52 = vld [vmem:[%s5704_s30 + $0x1d8] sm:$0xff] }
 0x57f   : > { %v3761_v53 = vld [vmem:[%s5704_s30 + $0x3d8] sm:$0xff] }
 0x581   : > { %3976 = vmatmul.mubr.f32.gmra.mxu0 %v3664_v54  ;;  %4168 = vmatmul.mubr.f32.gmra.mxu1 %v3728_v55  ;;  %v3696_v54 = vld [vmem:[%s5704_s30 + $0x1d0] sm:$0xff] }
 0x582   : > { %3981 = vmatprep.mubr.f32.mxu0 %v3667_v56  ;;  %4173 = vmatprep.mubr.f32.mxu1 %v3731_v57  ;;  %v3760_v55 = vld [vmem:[%s5704_s30 + $0x3d0] sm:$0xff]  ;;  %v3699_v56 = vld [vmem:[%s5704_s30 + $0x1e8] sm:$0xff] }
 0x583   : > { %v3763_v57 = vld [vmem:[%s5704_s30 + $0x3e8] sm:$0xff] }
 0x585   : > { %3982 = vmatmul.mubr.f32.gmra.mxu0 %v3666_v58  ;;  %4174 = vmatmul.mubr.f32.gmra.mxu1 %v3730_v59  ;;  %v3698_v58 = vld [vmem:[%s5704_s30 + $0x1e0] sm:$0xff] }
 0x586   : > { %3987 = vmatprep.mubr.f32.mxu0 %v3669_v60  ;;  %4179 = vmatprep.mubr.f32.mxu1 %v3733_v61  ;;  %v3762_v59 = vld [vmem:[%s5704_s30 + $0x3e0] sm:$0xff]  ;;  %v3701_v60 = vld [vmem:[%s5704_s30 + $0x1f8] sm:$0xff] }
 0x587   : > { %v3765_v61 = vld [vmem:[%s5704_s30 + $0x3f8] sm:$0xff] }
 0x589   : > { %3988 = vmatmul.mubr.f32.gmra.mxu0 %v3668_v62  ;;  %4180 = vmatmul.mubr.f32.gmra.mxu1 %v3732_v63  ;;  %v3700_v62 = vld [vmem:[%s5704_s30 + $0x1f0] sm:$0xff] }
 0x58a   : > { %3993 = vmatprep.mubr.f32.mxu0 %v3671_v0  ;;  %4185 = vmatprep.mubr.f32.mxu1 %v3735_v1  ;;  %v3764_v63 = vld [vmem:[%s5704_s30 + $0x3f0] sm:$0xff]  ;;  %v3510_v0 = vld [vmem:[%s5724_s18] sm:$0xff] }
 0x58b   : > { %v3574_v1 = vld [vmem:[%s5724_s18 + $0x200] sm:$0xff] }
 0x58d   : > { %3994 = vmatmul.mubr.f32.gmra.mxu0 %v3670_v2  ;;  %4186 = vmatmul.mubr.f32.gmra.mxu1 %v3734_v3 }
 0x58e   : > { %3999 = vmatprep.mubr.f32.mxu0 %v3673_v4  ;;  %4191 = vmatprep.mubr.f32.mxu1 %v3737_v5  ;;  %v3511_v4 = vld [vmem:[%s5724_s18 + $0x8] sm:$0xff] }
 0x58f   : > { %v3575_v5 = vld [vmem:[%s5724_s18 + $0x208] sm:$0xff] }
 0x591   : > { %4000 = vmatmul.mubr.f32.gmra.mxu0 %v3672_v6  ;;  %4192 = vmatmul.mubr.f32.gmra.mxu1 %v3736_v7 }
 0x592   : > { %4005 = vmatprep.mubr.f32.mxu0 %v3675_v8  ;;  %4197 = vmatprep.mubr.f32.mxu1 %v3739_v9 }
 0x595   : > { %4006 = vmatmul.mubr.f32.gmra.mxu0 %v3674_v10  ;;  %4198 = vmatmul.mubr.f32.gmra.mxu1 %v3738_v11  ;;  %v3512_v10 = vld [vmem:[%s5724_s18 + $0x10] sm:$0xff] }
 0x596   : > { %4011 = vmatprep.mubr.f32.mxu0 %v3677_v12  ;;  %4203 = vmatprep.mubr.f32.mxu1 %v3741_v13  ;;  %v3576_v11 = vld [vmem:[%s5724_s18 + $0x210] sm:$0xff] }
 0x599   : > { %4012 = vmatmul.mubr.f32.gmra.mxu0 %v3676_v14  ;;  %4204 = vmatmul.mubr.f32.gmra.mxu1 %v3740_v15 }
 0x59a   : > { %4017 = vmatprep.mubr.f32.mxu0 %v3679_v16  ;;  %4209 = vmatprep.mubr.f32.mxu1 %v3743_v17  ;;  %v3513_v16 = vld [vmem:[%s5724_s18 + $0x18] sm:$0xff] }
 0x59b   : > { %v3577_v17 = vld [vmem:[%s5724_s18 + $0x218] sm:$0xff] }
 0x59d   : > { %4018 = vmatmul.mubr.f32.gmra.mxu0 %v3678_v18  ;;  %4210 = vmatmul.mubr.f32.gmra.mxu1 %v3742_v19 }
 0x59e   : > { %4023 = vmatprep.mubr.f32.mxu0 %v3681_v20  ;;  %4215 = vmatprep.mubr.f32.mxu1 %v3745_v21 }
 0x5a1   : > { %4024 = vmatmul.mubr.f32.gmra.mxu0 %v3680_v22  ;;  %4216 = vmatmul.mubr.f32.gmra.mxu1 %v3744_v23  ;;  %v3514_v22 = vld [vmem:[%s5724_s18 + $0x20] sm:$0xff] }
 0x5a2   : > { %4029 = vmatprep.mubr.f32.mxu0 %v3683_v24  ;;  %4221 = vmatprep.mubr.f32.mxu1 %v3747_v25  ;;  %v3578_v23 = vld [vmem:[%s5724_s18 + $0x220] sm:$0xff] }
 0x5a5   : > { %4030 = vmatmul.mubr.f32.gmra.mxu0 %v3682_v26  ;;  %4222 = vmatmul.mubr.f32.gmra.mxu1 %v3746_v27 }
 0x5a6   : > { %4035 = vmatprep.mubr.f32.mxu0 %v3685_v28  ;;  %4227 = vmatprep.mubr.f32.mxu1 %v3749_v29  ;;  %v3515_v28 = vld [vmem:[%s5724_s18 + $0x28] sm:$0xff] }
 0x5a7   : > { %v3579_v29 = vld [vmem:[%s5724_s18 + $0x228] sm:$0xff] }
 0x5a9   : > { %4036 = vmatmul.mubr.f32.gmra.mxu0 %v3684_v30  ;;  %4228 = vmatmul.mubr.f32.gmra.mxu1 %v3748_v31 }
 0x5aa   : > { %4041 = vmatprep.mubr.f32.mxu0 %v3687_v32  ;;  %4233 = vmatprep.mubr.f32.mxu1 %v3751_v33 }
 0x5ad   : > { %4042 = vmatmul.mubr.f32.gmra.mxu0 %v3686_v34  ;;  %4234 = vmatmul.mubr.f32.gmra.mxu1 %v3750_v35  ;;  %v3516_v34 = vld [vmem:[%s5724_s18 + $0x30] sm:$0xff] }
 0x5ae   : > { %4047 = vmatprep.mubr.f32.mxu0 %v3689_v36  ;;  %4239 = vmatprep.mubr.f32.mxu1 %v3753_v37  ;;  %v3580_v35 = vld [vmem:[%s5724_s18 + $0x230] sm:$0xff] }
 0x5b1   : > { %4048 = vmatmul.mubr.f32.gmra.mxu0 %v3688_v38  ;;  %4240 = vmatmul.mubr.f32.gmra.mxu1 %v3752_v39 }
 0x5b2   : > { %4053 = vmatprep.mubr.f32.mxu0 %v3691_v40  ;;  %4245 = vmatprep.mubr.f32.mxu1 %v3755_v41  ;;  %v3517_v40 = vld [vmem:[%s5724_s18 + $0x38] sm:$0xff] }
 0x5b3   : > { %v3581_v41 = vld [vmem:[%s5724_s18 + $0x238] sm:$0xff] }
 0x5b5   : > { %4054 = vmatmul.mubr.f32.gmra.mxu0 %v3690_v42  ;;  %4246 = vmatmul.mubr.f32.gmra.mxu1 %v3754_v43 }
 0x5b6   : > { %4059 = vmatprep.mubr.f32.mxu0 %v3693_v44  ;;  %4251 = vmatprep.mubr.f32.mxu1 %v3757_v45 }
 0x5b9   : > { %4060 = vmatmul.mubr.f32.gmra.mxu0 %v3692_v46  ;;  %4252 = vmatmul.mubr.f32.gmra.mxu1 %v3756_v47  ;;  %v3518_v46 = vld [vmem:[%s5724_s18 + $0x40] sm:$0xff] }
 0x5ba   : > { %4065 = vmatprep.mubr.f32.mxu0 %v3695_v48  ;;  %4257 = vmatprep.mubr.f32.mxu1 %v3759_v49  ;;  %v3582_v47 = vld [vmem:[%s5724_s18 + $0x240] sm:$0xff] }
 0x5bd   : > { %4066 = vmatmul.mubr.f32.gmra.mxu0 %v3694_v50  ;;  %4258 = vmatmul.mubr.f32.gmra.mxu1 %v3758_v51 }
 0x5be   : > { %4071 = vmatprep.mubr.f32.mxu0 %v3697_v52  ;;  %4263 = vmatprep.mubr.f32.mxu1 %v3761_v53  ;;  %v3519_v52 = vld [vmem:[%s5724_s18 + $0x48] sm:$0xff] }
 0x5bf   : > { %v3583_v53 = vld [vmem:[%s5724_s18 + $0x248] sm:$0xff] }
 0x5c1   : > { %4072 = vmatmul.mubr.f32.gmra.mxu0 %v3696_v54  ;;  %4264 = vmatmul.mubr.f32.gmra.mxu1 %v3760_v55 }
 0x5c2   : > { %4077 = vmatprep.mubr.f32.mxu0 %v3699_v56  ;;  %4269 = vmatprep.mubr.f32.mxu1 %v3763_v57 }
 0x5c5   : > { %4078 = vmatmul.mubr.f32.gmra.mxu0 %v3698_v58  ;;  %4270 = vmatmul.mubr.f32.gmra.mxu1 %v3762_v59  ;;  %v3520_v58 = vld [vmem:[%s5724_s18 + $0x50] sm:$0xff] }
 0x5c6   : > { %4083 = vmatprep.mubr.f32.mxu0 %v3701_v60  ;;  %4275 = vmatprep.mubr.f32.mxu1 %v3765_v61  ;;  %v3584_v59 = vld [vmem:[%s5724_s18 + $0x250] sm:$0xff] }
 0x5c9   : > { %4084 = vmatmul.mubr.f32.gmra.mxu0 %v3700_v62  ;;  %4276 = vmatmul.mubr.f32.gmra.mxu1 %v3764_v63 }
 0x60d   : > { %v3899_v2 = vpop.f32.mrf.mxu0  ;;  %v4091_v3 = vpop.f32.mrf.mxu1 }
 0x60e   : > { %v4282_v6 = vadd.f32 %v3899_v2, %v3510_v0  ;;  %v4346_v7 = vadd.f32 %v4091_v3, %v3574_v1  ;;  %v3521_v0 = vld [vmem:[%s5724_s18 + $0x58] sm:$0xff] }
 0x60f   : > { %v3901_v8 = vpop.f32.mrf.mxu0  ;;  %v4093_v9 = vpop.f32.mrf.mxu1  ;;  %v3585_v1 = vld [vmem:[%s5724_s18 + $0x258] sm:$0xff] }
 0x610   : > { %4410 = vst [vmem:[%s5724_s18] sm:$0xff] %v4282_v6  ;;  %4474 = vst [vmem:[%s5724_s18 + $0x200] sm:$0xff] %v4346_v7  ;;  %v4283_v12 = vadd.f32 %v3901_v8, %v3511_v4  ;;  %v4347_v13 = vadd.f32 %v4093_v9, %v3575_v5  ;;  %v3522_v6 = vld [vmem:[%s5724_s18 + $0x60] sm:$0xff] }
 0x611   : > { %v3905_v14 = vpop.f32.mrf.mxu0  ;;  %v4097_v15 = vpop.f32.mrf.mxu1  ;;  %v3586_v7 = vld [vmem:[%s5724_s18 + $0x260] sm:$0xff] }
 0x612   : > { %4411 = vst [vmem:[%s5724_s18 + $0x8] sm:$0xff] %v4283_v12  ;;  %4475 = vst [vmem:[%s5724_s18 + $0x208] sm:$0xff] %v4347_v13  ;;  %v4284_v18 = vadd.f32 %v3905_v14, %v3512_v10  ;;  %v4348_v19 = vadd.f32 %v4097_v15, %v3576_v11  ;;  %v3523_v12 = vld [vmem:[%s5724_s18 + $0x68] sm:$0xff] }
 0x613   : > { %v3907_v20 = vpop.f32.mrf.mxu0  ;;  %v4099_v21 = vpop.f32.mrf.mxu1  ;;  %v3587_v13 = vld [vmem:[%s5724_s18 + $0x268] sm:$0xff] }
 0x614   : > { %4412 = vst [vmem:[%s5724_s18 + $0x10] sm:$0xff] %v4284_v18  ;;  %4476 = vst [vmem:[%s5724_s18 + $0x210] sm:$0xff] %v4348_v19  ;;  %v4285_v24 = vadd.f32 %v3907_v20, %v3513_v16  ;;  %v4349_v25 = vadd.f32 %v4099_v21, %v3577_v17  ;;  %v3524_v18 = vld [vmem:[%s5724_s18 + $0x70] sm:$0xff] }
 0x615   : > { %v3911_v26 = vpop.f32.mrf.mxu0  ;;  %v4103_v27 = vpop.f32.mrf.mxu1  ;;  %v3588_v19 = vld [vmem:[%s5724_s18 + $0x270] sm:$0xff] }
 0x616   : > { %4413 = vst [vmem:[%s5724_s18 + $0x18] sm:$0xff] %v4285_v24  ;;  %4477 = vst [vmem:[%s5724_s18 + $0x218] sm:$0xff] %v4349_v25  ;;  %v4286_v30 = vadd.f32 %v3911_v26, %v3514_v22  ;;  %v4350_v31 = vadd.f32 %v4103_v27, %v3578_v23  ;;  %v3525_v24 = vld [vmem:[%s5724_s18 + $0x78] sm:$0xff] }
 0x617   : > { %v3913_v32 = vpop.f32.mrf.mxu0  ;;  %v4105_v33 = vpop.f32.mrf.mxu1  ;;  %v3589_v25 = vld [vmem:[%s5724_s18 + $0x278] sm:$0xff] }
 0x618   : > { %4414 = vst [vmem:[%s5724_s18 + $0x20] sm:$0xff] %v4286_v30  ;;  %4478 = vst [vmem:[%s5724_s18 + $0x220] sm:$0xff] %v4350_v31  ;;  %v4287_v36 = vadd.f32 %v3913_v32, %v3515_v28  ;;  %v4351_v37 = vadd.f32 %v4105_v33, %v3579_v29  ;;  %v3526_v30 = vld [vmem:[%s5724_s18 + $0x80] sm:$0xff] }
 0x619   : > { %v3917_v38 = vpop.f32.mrf.mxu0  ;;  %v4109_v39 = vpop.f32.mrf.mxu1  ;;  %v3590_v31 = vld [vmem:[%s5724_s18 + $0x280] sm:$0xff] }
 0x61a   : > { %4415 = vst [vmem:[%s5724_s18 + $0x28] sm:$0xff] %v4287_v36  ;;  %4479 = vst [vmem:[%s5724_s18 + $0x228] sm:$0xff] %v4351_v37  ;;  %v4288_v42 = vadd.f32 %v3917_v38, %v3516_v34  ;;  %v4352_v43 = vadd.f32 %v4109_v39, %v3580_v35  ;;  %v3527_v36 = vld [vmem:[%s5724_s18 + $0x88] sm:$0xff] }
 0x61b   : > { %v3919_v44 = vpop.f32.mrf.mxu0  ;;  %v4111_v45 = vpop.f32.mrf.mxu1  ;;  %v3591_v37 = vld [vmem:[%s5724_s18 + $0x288] sm:$0xff] }
 0x61c   : > { %4416 = vst [vmem:[%s5724_s18 + $0x30] sm:$0xff] %v4288_v42  ;;  %4480 = vst [vmem:[%s5724_s18 + $0x230] sm:$0xff] %v4352_v43  ;;  %v4289_v48 = vadd.f32 %v3919_v44, %v3517_v40  ;;  %v4353_v49 = vadd.f32 %v4111_v45, %v3581_v41  ;;  %v3528_v42 = vld [vmem:[%s5724_s18 + $0x90] sm:$0xff] }
 0x61d   : > { %v3923_v50 = vpop.f32.mrf.mxu0  ;;  %v4115_v51 = vpop.f32.mrf.mxu1  ;;  %v3592_v43 = vld [vmem:[%s5724_s18 + $0x290] sm:$0xff] }
 0x61e   : > { %4417 = vst [vmem:[%s5724_s18 + $0x38] sm:$0xff] %v4289_v48  ;;  %4481 = vst [vmem:[%s5724_s18 + $0x238] sm:$0xff] %v4353_v49  ;;  %v4290_v54 = vadd.f32 %v3923_v50, %v3518_v46  ;;  %v4354_v55 = vadd.f32 %v4115_v51, %v3582_v47  ;;  %v3529_v48 = vld [vmem:[%s5724_s18 + $0x98] sm:$0xff] }
 0x61f   : > { %v3925_v56 = vpop.f32.mrf.mxu0  ;;  %v4117_v57 = vpop.f32.mrf.mxu1  ;;  %v3593_v49 = vld [vmem:[%s5724_s18 + $0x298] sm:$0xff] }
 0x620   : > { %4418 = vst [vmem:[%s5724_s18 + $0x40] sm:$0xff] %v4290_v54  ;;  %4482 = vst [vmem:[%s5724_s18 + $0x240] sm:$0xff] %v4354_v55  ;;  %v4291_v60 = vadd.f32 %v3925_v56, %v3519_v52  ;;  %v4355_v61 = vadd.f32 %v4117_v57, %v3583_v53  ;;  %v3530_v54 = vld [vmem:[%s5724_s18 + $0xa0] sm:$0xff] }
 0x621   : > { %v3929_v62 = vpop.f32.mrf.mxu0  ;;  %v4121_v63 = vpop.f32.mrf.mxu1  ;;  %v3594_v55 = vld [vmem:[%s5724_s18 + $0x2a0] sm:$0xff] }
 0x622   : > { %4419 = vst [vmem:[%s5724_s18 + $0x48] sm:$0xff] %v4291_v60  ;;  %4483 = vst [vmem:[%s5724_s18 + $0x248] sm:$0xff] %v4355_v61  ;;  %v4292_v2 = vadd.f32 %v3929_v62, %v3520_v58  ;;  %v4356_v3 = vadd.f32 %v4121_v63, %v3584_v59  ;;  %v3531_v60 = vld [vmem:[%s5724_s18 + $0xa8] sm:$0xff] }
 0x623   : > { %v3931_v4 = vpop.f32.mrf.mxu0  ;;  %v4123_v5 = vpop.f32.mrf.mxu1  ;;  %v3595_v61 = vld [vmem:[%s5724_s18 + $0x2a8] sm:$0xff] }
 0x624   : > { %4420 = vst [vmem:[%s5724_s18 + $0x50] sm:$0xff] %v4292_v2  ;;  %4484 = vst [vmem:[%s5724_s18 + $0x250] sm:$0xff] %v4356_v3  ;;  %v4293_v8 = vadd.f32 %v3931_v4, %v3521_v0  ;;  %v4357_v9 = vadd.f32 %v4123_v5, %v3585_v1  ;;  %v3532_v2 = vld [vmem:[%s5724_s18 + $0xb0] sm:$0xff] }
 0x625   : > { %v3935_v10 = vpop.f32.mrf.mxu0  ;;  %v4127_v11 = vpop.f32.mrf.mxu1  ;;  %v3596_v3 = vld [vmem:[%s5724_s18 + $0x2b0] sm:$0xff] }
 0x626   : > { %4421 = vst [vmem:[%s5724_s18 + $0x58] sm:$0xff] %v4293_v8  ;;  %4485 = vst [vmem:[%s5724_s18 + $0x258] sm:$0xff] %v4357_v9  ;;  %v4294_v14 = vadd.f32 %v3935_v10, %v3522_v6  ;;  %v4358_v15 = vadd.f32 %v4127_v11, %v3586_v7  ;;  %v3533_v8 = vld [vmem:[%s5724_s18 + $0xb8] sm:$0xff] }
 0x627   : > { %v3937_v16 = vpop.f32.mrf.mxu0  ;;  %v4129_v17 = vpop.f32.mrf.mxu1  ;;  %v3597_v9 = vld [vmem:[%s5724_s18 + $0x2b8] sm:$0xff] }
 0x628   : > { %4422 = vst [vmem:[%s5724_s18 + $0x60] sm:$0xff] %v4294_v14  ;;  %4486 = vst [vmem:[%s5724_s18 + $0x260] sm:$0xff] %v4358_v15  ;;  %v4295_v20 = vadd.f32 %v3937_v16, %v3523_v12  ;;  %v4359_v21 = vadd.f32 %v4129_v17, %v3587_v13  ;;  %v3534_v14 = vld [vmem:[%s5724_s18 + $0xc0] sm:$0xff] }
 0x629   : > { %v3941_v22 = vpop.f32.mrf.mxu0  ;;  %v4133_v23 = vpop.f32.mrf.mxu1  ;;  %v3598_v15 = vld [vmem:[%s5724_s18 + $0x2c0] sm:$0xff] }
 0x62a   : > { %4423 = vst [vmem:[%s5724_s18 + $0x68] sm:$0xff] %v4295_v20  ;;  %4487 = vst [vmem:[%s5724_s18 + $0x268] sm:$0xff] %v4359_v21  ;;  %v4296_v26 = vadd.f32 %v3941_v22, %v3524_v18  ;;  %v4360_v27 = vadd.f32 %v4133_v23, %v3588_v19  ;;  %v3535_v20 = vld [vmem:[%s5724_s18 + $0xc8] sm:$0xff] }
 0x62b   : > { %v3943_v28 = vpop.f32.mrf.mxu0  ;;  %v4135_v29 = vpop.f32.mrf.mxu1  ;;  %v3599_v21 = vld [vmem:[%s5724_s18 + $0x2c8] sm:$0xff] }
 0x62c   : > { %4424 = vst [vmem:[%s5724_s18 + $0x70] sm:$0xff] %v4296_v26  ;;  %4488 = vst [vmem:[%s5724_s18 + $0x270] sm:$0xff] %v4360_v27  ;;  %v4297_v32 = vadd.f32 %v3943_v28, %v3525_v24  ;;  %v4361_v33 = vadd.f32 %v4135_v29, %v3589_v25  ;;  %v3536_v26 = vld [vmem:[%s5724_s18 + $0xd0] sm:$0xff] }
 0x62d   : > { %v3947_v34 = vpop.f32.mrf.mxu0  ;;  %v4139_v35 = vpop.f32.mrf.mxu1  ;;  %v3600_v27 = vld [vmem:[%s5724_s18 + $0x2d0] sm:$0xff] }
 0x62e   : > { %4425 = vst [vmem:[%s5724_s18 + $0x78] sm:$0xff] %v4297_v32  ;;  %4489 = vst [vmem:[%s5724_s18 + $0x278] sm:$0xff] %v4361_v33  ;;  %v4298_v38 = vadd.f32 %v3947_v34, %v3526_v30  ;;  %v4362_v39 = vadd.f32 %v4139_v35, %v3590_v31  ;;  %v3537_v32 = vld [vmem:[%s5724_s18 + $0xd8] sm:$0xff] }
 0x62f   : > { %v3949_v40 = vpop.f32.mrf.mxu0  ;;  %v4141_v41 = vpop.f32.mrf.mxu1  ;;  %v3601_v33 = vld [vmem:[%s5724_s18 + $0x2d8] sm:$0xff] }
 0x630   : > { %4426 = vst [vmem:[%s5724_s18 + $0x80] sm:$0xff] %v4298_v38  ;;  %4490 = vst [vmem:[%s5724_s18 + $0x280] sm:$0xff] %v4362_v39  ;;  %v4299_v44 = vadd.f32 %v3949_v40, %v3527_v36  ;;  %v4363_v45 = vadd.f32 %v4141_v41, %v3591_v37  ;;  %v3538_v38 = vld [vmem:[%s5724_s18 + $0xe0] sm:$0xff] }
 0x631   : > { %v3953_v46 = vpop.f32.mrf.mxu0  ;;  %v4145_v47 = vpop.f32.mrf.mxu1  ;;  %v3602_v39 = vld [vmem:[%s5724_s18 + $0x2e0] sm:$0xff] }
 0x632   : > { %4427 = vst [vmem:[%s5724_s18 + $0x88] sm:$0xff] %v4299_v44  ;;  %4491 = vst [vmem:[%s5724_s18 + $0x288] sm:$0xff] %v4363_v45  ;;  %v4300_v50 = vadd.f32 %v3953_v46, %v3528_v42  ;;  %v4364_v51 = vadd.f32 %v4145_v47, %v3592_v43  ;;  %v3539_v44 = vld [vmem:[%s5724_s18 + $0xe8] sm:$0xff] }
 0x633   : > { %v3955_v52 = vpop.f32.mrf.mxu0  ;;  %v4147_v53 = vpop.f32.mrf.mxu1  ;;  %v3603_v45 = vld [vmem:[%s5724_s18 + $0x2e8] sm:$0xff] }
 0x634   : > { %4428 = vst [vmem:[%s5724_s18 + $0x90] sm:$0xff] %v4300_v50  ;;  %4492 = vst [vmem:[%s5724_s18 + $0x290] sm:$0xff] %v4364_v51  ;;  %v4301_v56 = vadd.f32 %v3955_v52, %v3529_v48  ;;  %v4365_v57 = vadd.f32 %v4147_v53, %v3593_v49  ;;  %v3540_v50 = vld [vmem:[%s5724_s18 + $0xf0] sm:$0xff] }
 0x635   : > { %v3959_v58 = vpop.f32.mrf.mxu0  ;;  %v4151_v59 = vpop.f32.mrf.mxu1  ;;  %v3604_v51 = vld [vmem:[%s5724_s18 + $0x2f0] sm:$0xff] }
 0x636   : > { %4429 = vst [vmem:[%s5724_s18 + $0x98] sm:$0xff] %v4301_v56  ;;  %4493 = vst [vmem:[%s5724_s18 + $0x298] sm:$0xff] %v4365_v57  ;;  %v4302_v62 = vadd.f32 %v3959_v58, %v3530_v54  ;;  %v4366_v63 = vadd.f32 %v4151_v59, %v3594_v55  ;;  %v3541_v56 = vld [vmem:[%s5724_s18 + $0xf8] sm:$0xff] }
 0x637   : > { %v3961_v0 = vpop.f32.mrf.mxu0  ;;  %v4153_v1 = vpop.f32.mrf.mxu1  ;;  %v3605_v57 = vld [vmem:[%s5724_s18 + $0x2f8] sm:$0xff] }
 0x638   : > { %4430 = vst [vmem:[%s5724_s18 + $0xa0] sm:$0xff] %v4302_v62  ;;  %4494 = vst [vmem:[%s5724_s18 + $0x2a0] sm:$0xff] %v4366_v63  ;;  %v4303_v4 = vadd.f32 %v3961_v0, %v3531_v60  ;;  %v4367_v5 = vadd.f32 %v4153_v1, %v3595_v61  ;;  %v3542_v62 = vld [vmem:[%s5724_s18 + $0x100] sm:$0xff] }
 0x639   : > { %v3965_v6 = vpop.f32.mrf.mxu0  ;;  %v4157_v7 = vpop.f32.mrf.mxu1  ;;  %v3606_v63 = vld [vmem:[%s5724_s18 + $0x300] sm:$0xff] }
 0x63a   : > { %4431 = vst [vmem:[%s5724_s18 + $0xa8] sm:$0xff] %v4303_v4  ;;  %4495 = vst [vmem:[%s5724_s18 + $0x2a8] sm:$0xff] %v4367_v5  ;;  %v4304_v10 = vadd.f32 %v3965_v6, %v3532_v2  ;;  %v4368_v11 = vadd.f32 %v4157_v7, %v3596_v3  ;;  %v3543_v4 = vld [vmem:[%s5724_s18 + $0x108] sm:$0xff] }
 0x63b   : > { %v3967_v12 = vpop.f32.mrf.mxu0  ;;  %v4159_v13 = vpop.f32.mrf.mxu1  ;;  %v3607_v5 = vld [vmem:[%s5724_s18 + $0x308] sm:$0xff] }
 0x63c   : > { %4432 = vst [vmem:[%s5724_s18 + $0xb0] sm:$0xff] %v4304_v10  ;;  %4496 = vst [vmem:[%s5724_s18 + $0x2b0] sm:$0xff] %v4368_v11  ;;  %v4305_v16 = vadd.f32 %v3967_v12, %v3533_v8  ;;  %v4369_v17 = vadd.f32 %v4159_v13, %v3597_v9  ;;  %v3544_v10 = vld [vmem:[%s5724_s18 + $0x110] sm:$0xff] }
 0x63d   : > { %v3971_v18 = vpop.f32.mrf.mxu0  ;;  %v4163_v19 = vpop.f32.mrf.mxu1  ;;  %v3608_v11 = vld [vmem:[%s5724_s18 + $0x310] sm:$0xff] }
 0x63e   : > { %4433 = vst [vmem:[%s5724_s18 + $0xb8] sm:$0xff] %v4305_v16  ;;  %4497 = vst [vmem:[%s5724_s18 + $0x2b8] sm:$0xff] %v4369_v17  ;;  %v4306_v22 = vadd.f32 %v3971_v18, %v3534_v14  ;;  %v4370_v23 = vadd.f32 %v4163_v19, %v3598_v15  ;;  %v3545_v16 = vld [vmem:[%s5724_s18 + $0x118] sm:$0xff] }
 0x63f   : > { %v3973_v24 = vpop.f32.mrf.mxu0  ;;  %v4165_v25 = vpop.f32.mrf.mxu1  ;;  %v3609_v17 = vld [vmem:[%s5724_s18 + $0x318] sm:$0xff] }
 0x640   : > { %4434 = vst [vmem:[%s5724_s18 + $0xc0] sm:$0xff] %v4306_v22  ;;  %4498 = vst [vmem:[%s5724_s18 + $0x2c0] sm:$0xff] %v4370_v23  ;;  %v4307_v28 = vadd.f32 %v3973_v24, %v3535_v20  ;;  %v4371_v29 = vadd.f32 %v4165_v25, %v3599_v21  ;;  %v3546_v22 = vld [vmem:[%s5724_s18 + $0x120] sm:$0xff] }
 0x641   : > { %v3977_v30 = vpop.f32.mrf.mxu0  ;;  %v4169_v31 = vpop.f32.mrf.mxu1  ;;  %v3610_v23 = vld [vmem:[%s5724_s18 + $0x320] sm:$0xff] }
 0x642   : > { %4435 = vst [vmem:[%s5724_s18 + $0xc8] sm:$0xff] %v4307_v28  ;;  %4499 = vst [vmem:[%s5724_s18 + $0x2c8] sm:$0xff] %v4371_v29  ;;  %v4308_v34 = vadd.f32 %v3977_v30, %v3536_v26  ;;  %v4372_v35 = vadd.f32 %v4169_v31, %v3600_v27  ;;  %v3547_v28 = vld [vmem:[%s5724_s18 + $0x128] sm:$0xff] }
 0x643   : > { %v3979_v36 = vpop.f32.mrf.mxu0  ;;  %v4171_v37 = vpop.f32.mrf.mxu1  ;;  %v3611_v29 = vld [vmem:[%s5724_s18 + $0x328] sm:$0xff] }
 0x644   : > { %4436 = vst [vmem:[%s5724_s18 + $0xd0] sm:$0xff] %v4308_v34  ;;  %4500 = vst [vmem:[%s5724_s18 + $0x2d0] sm:$0xff] %v4372_v35  ;;  %v4309_v40 = vadd.f32 %v3979_v36, %v3537_v32  ;;  %v4373_v41 = vadd.f32 %v4171_v37, %v3601_v33  ;;  %v3548_v34 = vld [vmem:[%s5724_s18 + $0x130] sm:$0xff] }
 0x645   : > { %v3983_v42 = vpop.f32.mrf.mxu0  ;;  %v4175_v43 = vpop.f32.mrf.mxu1  ;;  %v3612_v35 = vld [vmem:[%s5724_s18 + $0x330] sm:$0xff] }
 0x646   : > { %4437 = vst [vmem:[%s5724_s18 + $0xd8] sm:$0xff] %v4309_v40  ;;  %4501 = vst [vmem:[%s5724_s18 + $0x2d8] sm:$0xff] %v4373_v41  ;;  %v4310_v46 = vadd.f32 %v3983_v42, %v3538_v38  ;;  %v4374_v47 = vadd.f32 %v4175_v43, %v3602_v39  ;;  %v3549_v40 = vld [vmem:[%s5724_s18 + $0x138] sm:$0xff] }
 0x647   : > { %v3985_v48 = vpop.f32.mrf.mxu0  ;;  %v4177_v49 = vpop.f32.mrf.mxu1  ;;  %v3613_v41 = vld [vmem:[%s5724_s18 + $0x338] sm:$0xff] }
 0x648   : > { %4438 = vst [vmem:[%s5724_s18 + $0xe0] sm:$0xff] %v4310_v46  ;;  %4502 = vst [vmem:[%s5724_s18 + $0x2e0] sm:$0xff] %v4374_v47  ;;  %v4311_v52 = vadd.f32 %v3985_v48, %v3539_v44  ;;  %v4375_v53 = vadd.f32 %v4177_v49, %v3603_v45  ;;  %v3550_v46 = vld [vmem:[%s5724_s18 + $0x140] sm:$0xff] }
 0x649   : > { %v3989_v54 = vpop.f32.mrf.mxu0  ;;  %v4181_v55 = vpop.f32.mrf.mxu1  ;;  %v3614_v47 = vld [vmem:[%s5724_s18 + $0x340] sm:$0xff] }
 0x64a   : > { %4439 = vst [vmem:[%s5724_s18 + $0xe8] sm:$0xff] %v4311_v52  ;;  %4503 = vst [vmem:[%s5724_s18 + $0x2e8] sm:$0xff] %v4375_v53  ;;  %v4312_v58 = vadd.f32 %v3989_v54, %v3540_v50  ;;  %v4376_v59 = vadd.f32 %v4181_v55, %v3604_v51  ;;  %v3551_v52 = vld [vmem:[%s5724_s18 + $0x148] sm:$0xff] }
 0x64b   : > { %v3991_v60 = vpop.f32.mrf.mxu0  ;;  %v4183_v61 = vpop.f32.mrf.mxu1  ;;  %v3615_v53 = vld [vmem:[%s5724_s18 + $0x348] sm:$0xff] }
 0x64c   : > { %4440 = vst [vmem:[%s5724_s18 + $0xf0] sm:$0xff] %v4312_v58  ;;  %4504 = vst [vmem:[%s5724_s18 + $0x2f0] sm:$0xff] %v4376_v59  ;;  %v4313_v0 = vadd.f32 %v3991_v60, %v3541_v56  ;;  %v4377_v1 = vadd.f32 %v4183_v61, %v3605_v57  ;;  %v3552_v58 = vld [vmem:[%s5724_s18 + $0x150] sm:$0xff] }
 0x64d   : > { %v3995_v2 = vpop.f32.mrf.mxu0  ;;  %v4187_v3 = vpop.f32.mrf.mxu1  ;;  %v3616_v59 = vld [vmem:[%s5724_s18 + $0x350] sm:$0xff] }
 0x64e   : > { %4441 = vst [vmem:[%s5724_s18 + $0xf8] sm:$0xff] %v4313_v0  ;;  %4505 = vst [vmem:[%s5724_s18 + $0x2f8] sm:$0xff] %v4377_v1  ;;  %v4314_v6 = vadd.f32 %v3995_v2, %v3542_v62  ;;  %v4378_v7 = vadd.f32 %v4187_v3, %v3606_v63  ;;  %v3553_v0 = vld [vmem:[%s5724_s18 + $0x158] sm:$0xff] }
 0x64f   : > { %v3997_v8 = vpop.f32.mrf.mxu0  ;;  %v4189_v9 = vpop.f32.mrf.mxu1  ;;  %v3617_v1 = vld [vmem:[%s5724_s18 + $0x358] sm:$0xff] }
 0x650   : > { %4442 = vst [vmem:[%s5724_s18 + $0x100] sm:$0xff] %v4314_v6  ;;  %4506 = vst [vmem:[%s5724_s18 + $0x300] sm:$0xff] %v4378_v7  ;;  %v4315_v12 = vadd.f32 %v3997_v8, %v3543_v4  ;;  %v4379_v13 = vadd.f32 %v4189_v9, %v3607_v5  ;;  %v3554_v6 = vld [vmem:[%s5724_s18 + $0x160] sm:$0xff] }
 0x651   : > { %v4001_v14 = vpop.f32.mrf.mxu0  ;;  %v4193_v15 = vpop.f32.mrf.mxu1  ;;  %v3618_v7 = vld [vmem:[%s5724_s18 + $0x360] sm:$0xff] }
 0x652   : > { %4443 = vst [vmem:[%s5724_s18 + $0x108] sm:$0xff] %v4315_v12  ;;  %4507 = vst [vmem:[%s5724_s18 + $0x308] sm:$0xff] %v4379_v13  ;;  %v4316_v18 = vadd.f32 %v4001_v14, %v3544_v10  ;;  %v4380_v19 = vadd.f32 %v4193_v15, %v3608_v11  ;;  %v3555_v12 = vld [vmem:[%s5724_s18 + $0x168] sm:$0xff] }
 0x653   : > { %v4003_v20 = vpop.f32.mrf.mxu0  ;;  %v4195_v21 = vpop.f32.mrf.mxu1  ;;  %v3619_v13 = vld [vmem:[%s5724_s18 + $0x368] sm:$0xff] }
 0x654   : > { %4444 = vst [vmem:[%s5724_s18 + $0x110] sm:$0xff] %v4316_v18  ;;  %4508 = vst [vmem:[%s5724_s18 + $0x310] sm:$0xff] %v4380_v19  ;;  %v4317_v24 = vadd.f32 %v4003_v20, %v3545_v16  ;;  %v4381_v25 = vadd.f32 %v4195_v21, %v3609_v17  ;;  %v3556_v18 = vld [vmem:[%s5724_s18 + $0x170] sm:$0xff] }
 0x655   : > { %v4007_v26 = vpop.f32.mrf.mxu0  ;;  %v4199_v27 = vpop.f32.mrf.mxu1  ;;  %v3620_v19 = vld [vmem:[%s5724_s18 + $0x370] sm:$0xff] }
 0x656   : > { %4445 = vst [vmem:[%s5724_s18 + $0x118] sm:$0xff] %v4317_v24  ;;  %4509 = vst [vmem:[%s5724_s18 + $0x318] sm:$0xff] %v4381_v25  ;;  %v4318_v30 = vadd.f32 %v4007_v26, %v3546_v22  ;;  %v4382_v31 = vadd.f32 %v4199_v27, %v3610_v23  ;;  %v3557_v24 = vld [vmem:[%s5724_s18 + $0x178] sm:$0xff] }
 0x657   : > { %v4009_v32 = vpop.f32.mrf.mxu0  ;;  %v4201_v33 = vpop.f32.mrf.mxu1  ;;  %v3621_v25 = vld [vmem:[%s5724_s18 + $0x378] sm:$0xff] }
 0x658   : > { %4446 = vst [vmem:[%s5724_s18 + $0x120] sm:$0xff] %v4318_v30  ;;  %4510 = vst [vmem:[%s5724_s18 + $0x320] sm:$0xff] %v4382_v31  ;;  %v4319_v36 = vadd.f32 %v4009_v32, %v3547_v28  ;;  %v4383_v37 = vadd.f32 %v4201_v33, %v3611_v29  ;;  %v3558_v30 = vld [vmem:[%s5724_s18 + $0x180] sm:$0xff] }
 0x659   : > { %v4013_v38 = vpop.f32.mrf.mxu0  ;;  %v4205_v39 = vpop.f32.mrf.mxu1  ;;  %v3622_v31 = vld [vmem:[%s5724_s18 + $0x380] sm:$0xff] }
 0x65a   : > { %4447 = vst [vmem:[%s5724_s18 + $0x128] sm:$0xff] %v4319_v36  ;;  %4511 = vst [vmem:[%s5724_s18 + $0x328] sm:$0xff] %v4383_v37  ;;  %v4320_v42 = vadd.f32 %v4013_v38, %v3548_v34  ;;  %v4384_v43 = vadd.f32 %v4205_v39, %v3612_v35  ;;  %v3559_v36 = vld [vmem:[%s5724_s18 + $0x188] sm:$0xff] }
 0x65b   : > { %v4015_v44 = vpop.f32.mrf.mxu0  ;;  %v4207_v45 = vpop.f32.mrf.mxu1  ;;  %v3623_v37 = vld [vmem:[%s5724_s18 + $0x388] sm:$0xff] }
 0x65c   : > { %4448 = vst [vmem:[%s5724_s18 + $0x130] sm:$0xff] %v4320_v42  ;;  %4512 = vst [vmem:[%s5724_s18 + $0x330] sm:$0xff] %v4384_v43  ;;  %v4321_v48 = vadd.f32 %v4015_v44, %v3549_v40  ;;  %v4385_v49 = vadd.f32 %v4207_v45, %v3613_v41  ;;  %v3560_v42 = vld [vmem:[%s5724_s18 + $0x190] sm:$0xff] }
 0x65d   : > { %v4019_v50 = vpop.f32.mrf.mxu0  ;;  %v4211_v51 = vpop.f32.mrf.mxu1  ;;  %v3624_v43 = vld [vmem:[%s5724_s18 + $0x390] sm:$0xff] }
 0x65e   : > { %4449 = vst [vmem:[%s5724_s18 + $0x138] sm:$0xff] %v4321_v48  ;;  %4513 = vst [vmem:[%s5724_s18 + $0x338] sm:$0xff] %v4385_v49  ;;  %v4322_v54 = vadd.f32 %v4019_v50, %v3550_v46  ;;  %v4386_v55 = vadd.f32 %v4211_v51, %v3614_v47  ;;  %v3561_v48 = vld [vmem:[%s5724_s18 + $0x198] sm:$0xff] }
 0x65f   : > { %v4021_v56 = vpop.f32.mrf.mxu0  ;;  %v4213_v57 = vpop.f32.mrf.mxu1  ;;  %v3625_v49 = vld [vmem:[%s5724_s18 + $0x398] sm:$0xff] }
 0x660   : > { %4450 = vst [vmem:[%s5724_s18 + $0x140] sm:$0xff] %v4322_v54  ;;  %4514 = vst [vmem:[%s5724_s18 + $0x340] sm:$0xff] %v4386_v55  ;;  %v4323_v60 = vadd.f32 %v4021_v56, %v3551_v52  ;;  %v4387_v61 = vadd.f32 %v4213_v57, %v3615_v53  ;;  %v3562_v54 = vld [vmem:[%s5724_s18 + $0x1a0] sm:$0xff] }
 0x661   : > { %v4025_v62 = vpop.f32.mrf.mxu0  ;;  %v4217_v63 = vpop.f32.mrf.mxu1  ;;  %v3626_v55 = vld [vmem:[%s5724_s18 + $0x3a0] sm:$0xff] }
 0x662   : > { %4451 = vst [vmem:[%s5724_s18 + $0x148] sm:$0xff] %v4323_v60  ;;  %4515 = vst [vmem:[%s5724_s18 + $0x348] sm:$0xff] %v4387_v61  ;;  %v4324_v2 = vadd.f32 %v4025_v62, %v3552_v58  ;;  %v4388_v3 = vadd.f32 %v4217_v63, %v3616_v59  ;;  %v3563_v60 = vld [vmem:[%s5724_s18 + $0x1a8] sm:$0xff] }
 0x663   : > { %v4027_v4 = vpop.f32.mrf.mxu0  ;;  %v4219_v5 = vpop.f32.mrf.mxu1  ;;  %v3627_v61 = vld [vmem:[%s5724_s18 + $0x3a8] sm:$0xff] }
 0x664   : > { %4452 = vst [vmem:[%s5724_s18 + $0x150] sm:$0xff] %v4324_v2  ;;  %4516 = vst [vmem:[%s5724_s18 + $0x350] sm:$0xff] %v4388_v3  ;;  %v4325_v8 = vadd.f32 %v4027_v4, %v3553_v0  ;;  %v4389_v9 = vadd.f32 %v4219_v5, %v3617_v1  ;;  %v3564_v2 = vld [vmem:[%s5724_s18 + $0x1b0] sm:$0xff] }
 0x665   : > { %v4031_v10 = vpop.f32.mrf.mxu0  ;;  %v4223_v11 = vpop.f32.mrf.mxu1  ;;  %v3628_v3 = vld [vmem:[%s5724_s18 + $0x3b0] sm:$0xff] }
 0x666   : > { %4453 = vst [vmem:[%s5724_s18 + $0x158] sm:$0xff] %v4325_v8  ;;  %4517 = vst [vmem:[%s5724_s18 + $0x358] sm:$0xff] %v4389_v9  ;;  %v4326_v14 = vadd.f32 %v4031_v10, %v3554_v6  ;;  %v4390_v15 = vadd.f32 %v4223_v11, %v3618_v7  ;;  %v3565_v8 = vld [vmem:[%s5724_s18 + $0x1b8] sm:$0xff] }
 0x667   : > { %v4033_v16 = vpop.f32.mrf.mxu0  ;;  %v4225_v17 = vpop.f32.mrf.mxu1  ;;  %v3629_v9 = vld [vmem:[%s5724_s18 + $0x3b8] sm:$0xff] }
 0x668   : > { %4454 = vst [vmem:[%s5724_s18 + $0x160] sm:$0xff] %v4326_v14  ;;  %4518 = vst [vmem:[%s5724_s18 + $0x360] sm:$0xff] %v4390_v15  ;;  %v4327_v20 = vadd.f32 %v4033_v16, %v3555_v12  ;;  %v4391_v21 = vadd.f32 %v4225_v17, %v3619_v13  ;;  %v3566_v14 = vld [vmem:[%s5724_s18 + $0x1c0] sm:$0xff] }
 0x669   : > { %v4037_v22 = vpop.f32.mrf.mxu0  ;;  %v4229_v23 = vpop.f32.mrf.mxu1  ;;  %v3630_v15 = vld [vmem:[%s5724_s18 + $0x3c0] sm:$0xff] }
 0x66a   : > { %4455 = vst [vmem:[%s5724_s18 + $0x168] sm:$0xff] %v4327_v20  ;;  %4519 = vst [vmem:[%s5724_s18 + $0x368] sm:$0xff] %v4391_v21  ;;  %v4328_v26 = vadd.f32 %v4037_v22, %v3556_v18  ;;  %v4392_v27 = vadd.f32 %v4229_v23, %v3620_v19  ;;  %v3567_v20 = vld [vmem:[%s5724_s18 + $0x1c8] sm:$0xff] }
 0x66b   : > { %v4039_v28 = vpop.f32.mrf.mxu0  ;;  %v4231_v29 = vpop.f32.mrf.mxu1  ;;  %v3631_v21 = vld [vmem:[%s5724_s18 + $0x3c8] sm:$0xff] }
 0x66c   : > { %4456 = vst [vmem:[%s5724_s18 + $0x170] sm:$0xff] %v4328_v26  ;;  %4520 = vst [vmem:[%s5724_s18 + $0x370] sm:$0xff] %v4392_v27  ;;  %v4329_v32 = vadd.f32 %v4039_v28, %v3557_v24  ;;  %v4393_v33 = vadd.f32 %v4231_v29, %v3621_v25  ;;  %v3568_v26 = vld [vmem:[%s5724_s18 + $0x1d0] sm:$0xff] }
 0x66d   : > { %v4043_v34 = vpop.f32.mrf.mxu0  ;;  %v4235_v35 = vpop.f32.mrf.mxu1  ;;  %v3632_v27 = vld [vmem:[%s5724_s18 + $0x3d0] sm:$0xff] }
 0x66e   : > { %4457 = vst [vmem:[%s5724_s18 + $0x178] sm:$0xff] %v4329_v32  ;;  %4521 = vst [vmem:[%s5724_s18 + $0x378] sm:$0xff] %v4393_v33  ;;  %v4330_v38 = vadd.f32 %v4043_v34, %v3558_v30  ;;  %v4394_v39 = vadd.f32 %v4235_v35, %v3622_v31  ;;  %v3569_v32 = vld [vmem:[%s5724_s18 + $0x1d8] sm:$0xff] }
 0x66f   : > { %v4045_v40 = vpop.f32.mrf.mxu0  ;;  %v4237_v41 = vpop.f32.mrf.mxu1  ;;  %v3633_v33 = vld [vmem:[%s5724_s18 + $0x3d8] sm:$0xff] }
 0x670   : > { %4458 = vst [vmem:[%s5724_s18 + $0x180] sm:$0xff] %v4330_v38  ;;  %4522 = vst [vmem:[%s5724_s18 + $0x380] sm:$0xff] %v4394_v39  ;;  %v4331_v44 = vadd.f32 %v4045_v40, %v3559_v36  ;;  %v4395_v45 = vadd.f32 %v4237_v41, %v3623_v37  ;;  %v3570_v38 = vld [vmem:[%s5724_s18 + $0x1e0] sm:$0xff] }
 0x671   : > { %v4049_v46 = vpop.f32.mrf.mxu0  ;;  %v4241_v47 = vpop.f32.mrf.mxu1  ;;  %v3634_v39 = vld [vmem:[%s5724_s18 + $0x3e0] sm:$0xff] }
 0x672   : > { %4459 = vst [vmem:[%s5724_s18 + $0x188] sm:$0xff] %v4331_v44  ;;  %4523 = vst [vmem:[%s5724_s18 + $0x388] sm:$0xff] %v4395_v45  ;;  %v4332_v50 = vadd.f32 %v4049_v46, %v3560_v42  ;;  %v4396_v51 = vadd.f32 %v4241_v47, %v3624_v43  ;;  %v3571_v44 = vld [vmem:[%s5724_s18 + $0x1e8] sm:$0xff] }
 0x673   : > { %v4051_v52 = vpop.f32.mrf.mxu0  ;;  %v4243_v53 = vpop.f32.mrf.mxu1  ;;  %v3635_v45 = vld [vmem:[%s5724_s18 + $0x3e8] sm:$0xff] }
 0x674   : > { %4460 = vst [vmem:[%s5724_s18 + $0x190] sm:$0xff] %v4332_v50  ;;  %4524 = vst [vmem:[%s5724_s18 + $0x390] sm:$0xff] %v4396_v51  ;;  %v4333_v56 = vadd.f32 %v4051_v52, %v3561_v48  ;;  %v4397_v57 = vadd.f32 %v4243_v53, %v3625_v49  ;;  %v3572_v50 = vld [vmem:[%s5724_s18 + $0x1f0] sm:$0xff] }
 0x675   : > { %v4055_v58 = vpop.f32.mrf.mxu0  ;;  %v4247_v59 = vpop.f32.mrf.mxu1  ;;  %v3636_v51 = vld [vmem:[%s5724_s18 + $0x3f0] sm:$0xff] }
 0x676   : > { %4461 = vst [vmem:[%s5724_s18 + $0x198] sm:$0xff] %v4333_v56  ;;  %4525 = vst [vmem:[%s5724_s18 + $0x398] sm:$0xff] %v4397_v57  ;;  %v4334_v62 = vadd.f32 %v4055_v58, %v3562_v54  ;;  %v4398_v63 = vadd.f32 %v4247_v59, %v3626_v55  ;;  %v3573_v56 = vld [vmem:[%s5724_s18 + $0x1f8] sm:$0xff] }
 0x677   : > { %v4057_v0 = vpop.f32.mrf.mxu0  ;;  %v4249_v1 = vpop.f32.mrf.mxu1  ;;  %v3637_v57 = vld [vmem:[%s5724_s18 + $0x3f8] sm:$0xff] }
 0x678   : > { %4462 = vst [vmem:[%s5724_s18 + $0x1a0] sm:$0xff] %v4334_v62  ;;  %4526 = vst [vmem:[%s5724_s18 + $0x3a0] sm:$0xff] %v4398_v63  ;;  %v4335_v4 = vadd.f32 %v4057_v0, %v3563_v60  ;;  %v4399_v5 = vadd.f32 %v4249_v1, %v3627_v61 }
 0x679   : > { %v4061_v6 = vpop.f32.mrf.mxu0  ;;  %v4253_v7 = vpop.f32.mrf.mxu1 }
 0x67a   : > { %4463 = vst [vmem:[%s5724_s18 + $0x1a8] sm:$0xff] %v4335_v4  ;;  %4527 = vst [vmem:[%s5724_s18 + $0x3a8] sm:$0xff] %v4399_v5  ;;  %v4336_v10 = vadd.f32 %v4061_v6, %v3564_v2  ;;  %v4400_v11 = vadd.f32 %v4253_v7, %v3628_v3 }
 0x67b   : > { %v4063_v12 = vpop.f32.mrf.mxu0  ;;  %v4255_v13 = vpop.f32.mrf.mxu1 }
 0x67c   : > { %4464 = vst [vmem:[%s5724_s18 + $0x1b0] sm:$0xff] %v4336_v10  ;;  %4528 = vst [vmem:[%s5724_s18 + $0x3b0] sm:$0xff] %v4400_v11  ;;  %v4337_v16 = vadd.f32 %v4063_v12, %v3565_v8  ;;  %v4401_v17 = vadd.f32 %v4255_v13, %v3629_v9 }
 0x67d   : > { %v4067_v18 = vpop.f32.mrf.mxu0  ;;  %v4259_v19 = vpop.f32.mrf.mxu1 }
 0x67e   : > { %4465 = vst [vmem:[%s5724_s18 + $0x1b8] sm:$0xff] %v4337_v16  ;;  %4529 = vst [vmem:[%s5724_s18 + $0x3b8] sm:$0xff] %v4401_v17  ;;  %v4338_v22 = vadd.f32 %v4067_v18, %v3566_v14  ;;  %v4402_v23 = vadd.f32 %v4259_v19, %v3630_v15 }
 0x67f   : > { %v4069_v24 = vpop.f32.mrf.mxu0  ;;  %v4261_v25 = vpop.f32.mrf.mxu1 }
 0x680   : > { %4466 = vst [vmem:[%s5724_s18 + $0x1c0] sm:$0xff] %v4338_v22  ;;  %4530 = vst [vmem:[%s5724_s18 + $0x3c0] sm:$0xff] %v4402_v23  ;;  %v4339_v28 = vadd.f32 %v4069_v24, %v3567_v20  ;;  %v4403_v29 = vadd.f32 %v4261_v25, %v3631_v21 }
 0x681   : > { %v4073_v30 = vpop.f32.mrf.mxu0  ;;  %v4265_v31 = vpop.f32.mrf.mxu1 }
 0x682   : > { %4467 = vst [vmem:[%s5724_s18 + $0x1c8] sm:$0xff] %v4339_v28  ;;  %4531 = vst [vmem:[%s5724_s18 + $0x3c8] sm:$0xff] %v4403_v29  ;;  %v4340_v34 = vadd.f32 %v4073_v30, %v3568_v26  ;;  %v4404_v35 = vadd.f32 %v4265_v31, %v3632_v27 }
 0x683   : > { %v4075_v36 = vpop.f32.mrf.mxu0  ;;  %v4267_v37 = vpop.f32.mrf.mxu1 }
 0x684   : > { %4468 = vst [vmem:[%s5724_s18 + $0x1d0] sm:$0xff] %v4340_v34  ;;  %4532 = vst [vmem:[%s5724_s18 + $0x3d0] sm:$0xff] %v4404_v35  ;;  %v4341_v40 = vadd.f32 %v4075_v36, %v3569_v32  ;;  %v4405_v41 = vadd.f32 %v4267_v37, %v3633_v33 }
 0x685   : > { %v4079_v42 = vpop.f32.mrf.mxu0  ;;  %v4271_v43 = vpop.f32.mrf.mxu1 }
 0x686   : > { %4469 = vst [vmem:[%s5724_s18 + $0x1d8] sm:$0xff] %v4341_v40  ;;  %4533 = vst [vmem:[%s5724_s18 + $0x3d8] sm:$0xff] %v4405_v41  ;;  %v4342_v46 = vadd.f32 %v4079_v42, %v3570_v38  ;;  %v4406_v47 = vadd.f32 %v4271_v43, %v3634_v39 }
 0x687   : > { %v4081_v48 = vpop.f32.mrf.mxu0  ;;  %v4273_v49 = vpop.f32.mrf.mxu1 }
 0x688   : > { %4470 = vst [vmem:[%s5724_s18 + $0x1e0] sm:$0xff] %v4342_v46  ;;  %4534 = vst [vmem:[%s5724_s18 + $0x3e0] sm:$0xff] %v4406_v47  ;;  %v4343_v52 = vadd.f32 %v4081_v48, %v3571_v44  ;;  %v4407_v53 = vadd.f32 %v4273_v49, %v3635_v45 }
 0x689   : > { %v4085_v54 = vpop.f32.mrf.mxu0  ;;  %v4277_v55 = vpop.f32.mrf.mxu1 }
 0x68a   : > { %4471 = vst [vmem:[%s5724_s18 + $0x1e8] sm:$0xff] %v4343_v52  ;;  %4535 = vst [vmem:[%s5724_s18 + $0x3e8] sm:$0xff] %v4407_v53  ;;  %v4344_v58 = vadd.f32 %v4085_v54, %v3572_v50  ;;  %v4408_v59 = vadd.f32 %v4277_v55, %v3636_v51 }
 0x68b   : > { %v4087_v60 = vpop.f32.mrf.mxu0  ;;  %v4279_v61 = vpop.f32.mrf.mxu1 }
 0x68c   : > { %4472 = vst [vmem:[%s5724_s18 + $0x1f0] sm:$0xff] %v4344_v58  ;;  %4536 = vst [vmem:[%s5724_s18 + $0x3f0] sm:$0xff] %v4408_v59  ;;  %v4345_v62 = vadd.f32 %v4087_v60, %v3573_v56  ;;  %v4409_v63 = vadd.f32 %v4279_v61, %v3637_v57 }
 0x68e   : > { %4473 = vst [vmem:[%s5724_s18 + $0x1f8] sm:$0xff] %v4345_v62  ;;  %4537 = vst [vmem:[%s5724_s18 + $0x3f8] sm:$0xff] %v4409_v63 }
 0x68f PF: > { %s7518_s30 = sld [smem:[#allocation27_spill]]  ;;  %s4555_s7 = sshll.u32 %s5724_s18, 4  ;;  %s7345_s7 = int_to_ptr.vmem [resolvable:$true] %s4555_s7 }
 0x690   : > { %s7519_s28 = sld [smem:[#allocation38_spill]]  ;;  %s7349_s3 = scalar_lea.sflag [#allocation8], %s388_s19 }
 0x691   : > { %s5159_s9 = scalar_lea.vmem %s7345_s7, 16384  ;;  %p7520_p8 = scmp.ne.s32.totalorder %s7482_s24, 0 }
 0x692   : > { %p5160_p2 = scmp.ne.s32.totalorder %s7345_s7, %s5159_s9  ;;  %s5353_s25 = smov [#allocation14]  }
 0x693   : > { %s5163_s27 = sshll.u32 %s5353_s25, 4  ;;  %s5164_s27 = int_to_ptr.vmem [resolvable:$false] %s5163_s27 }
 0x694   : > { %p5161_p0 = pnand %p5160_p2, %p7520_p8  ;;  %s5165_s23 = scalar_lea.vmem %s5164_s27, 32768 }
 0x695   : > { %s4773_s20 = sshll.u32 %s7518_s30, 8  ;;  %p5166_p7 = scmp.lt.s32.totalorder %s7345_s7, %s5164_s27 }
 0x696   : > { %s7342_s6 = scalar_lea.hbm %s7519_s28, %s4773_s20  ;;  %p5162_p3 = pneg %p5161_p0 }
 0x697   : > { %p5167_p6 = scmp.lt.s32.totalorder %s5165_s23, %s5159_s9 }
 0x699   : > { %p5168_p9 = por %p5167_p6, %p5166_p7 }
 0x69b   : > { %p5169_p11 = pnand %p5168_p9, %p5162_p3 }
 0x69d   : > { %5172 = shalt.err (!%p5169_p11)
}
 0x69e   : > { %s5173_s19 = scalar_lea.hbm %s7342_s6, 16384  ;;  %s5177_s4 = scalar_lea.hbm %s7519_s28, 49152 }
 0x69f   : > { %p5174_p5 = scmp.ne.s32.totalorder %s7342_s6, %s5173_s19  ;;  %p5178_p10 = scmp.lt.s32.totalorder %s7342_s6, %s7519_s28 }
 0x6a0   : > { %p5179_p1 = scmp.lt.s32.totalorder %s5177_s4, %s5173_s19 }
 0x6a1   : > { %p5175_p12 = pnand %p5174_p5, %p7520_p8 }
 0x6a2   : > { %p5180_p4 = por %p5179_p1, %p5178_p10 }
 0x6a3   : > { %p5176_p13 = pneg %p5175_p12 }
 0x6a5   : > { %p5181_p2 = pnand %p5180_p4, %p5176_p13 }
 0x6a7   : > { %5184 = shalt.err (!%p5181_p2)
}
 0x6a8   : > { %s5354_s5 = smov 256   ;;  %s5355_s13 = smov 768  }
 0x6a9   : > { %s5356_s30 = smov 16  }
 0x6aa   : > { %4851 = dma.vmem_to_hbm [thread:$0]  (%p7520_p8), %s7345_s7, 16384, %s7342_s6, %s7349_s3, %s5354_s5, %s5355_s13, %s5356_s30  }
 0x6ab PF: > { %p4876_p0 = scmp.ge.s32.totalorder %s5339_s22, 2  ;;  %s4570_s20 = sand.u32 1, %s5279_s0  }
 0x6ac   : > { %p7521_p3 = scmp.ne.s32.totalorder %s7483_s11, 0  ;;  %s4571_s2 = scalar_lea.sflag [#allocation8], %s4570_s20 }
 0x6ae   : > { %p4870_p7 = pnand %p4876_p0, %p7521_p3 }
 0x6b0   : > { %p4871_p6 = pneg %p4870_p7 }
 0x6b2   : > { %5272 = dma.done.wait (%p4871_p6), %s4571_s2, 16384  }
 0x6b3   : > { %5274 = vsyncadd (%p4871_p6), %s4571_s2, 4294950912  ;;  %s35_s22 = sadd.s32 1, %s5339_s22   ;;  %s7523_s24 = sld [smem:[#allocation23_spill]] }
 0x6b4   : > { %p7377_p9 = scmp.ge.s32.totalorder %s35_s22, 11   ;;  %s7524_s1 = sld [smem:[#allocation33_spill]] }
 0x6b5   : > { %s7525_s6 = sld [smem:[#allocation24_spill]]  ;;  %s7532_s0 = smov %s5283_s10 }
 0x6b6   : > { %s7526_s7 = sld [smem:[#allocation25_spill]]  ;;  %s7534_s11 = smov %s5295_s12 }
 0x6b7   : > { %s7527_s15 = sld [smem:[#allocation32_spill]]  ;;  %s7536_s2 = smov %s5664_s16 }
 0x6b8   : > { %s7528_s18 = sld [smem:[#allocation28_spill]]  ;;  %s7537_s13 = smov %s5307_s14 }
 0x6b9   : > { %s7529_s19 = sld [smem:[#allocation29_spill]]  ;;  %s7533_s10 = smov %s7523_s24 }
 0x6ba   : > { %s7530_s20 = sld [smem:[#allocation30_spill]]  ;;  %s7539_s16 = smov %s5319_s17 }
 0x6bb   : > { %s7531_s21 = sld [smem:[#allocation31_spill]]  ;;  %s7535_s12 = smov %s7525_s6 }
 0x6bc   : > { %s7538_s14 = smov %s7526_s7  ;;  %s7411_s17 = smov 0  }
 0x6bd   :  { %34 = sbr.rel (!%p7377_p9) target bundleno = 26 (0x1a), region = 126 }
 0x6c2   :  { %4576 = vsyncpa [#allocation7], 1 }
 0x6c3   :  { %4578 = vsyncpa [#allocation7 + $0x1], 1 }
 0x6c4   :  { %4579 = vsyncpa [#allocation10], 1 }
 0x6c5   :  { %4581 = vsyncpa [#allocation10 + $0x1], 1 }
 0x6c6   :  { %4582 = vsyncpa [#allocation13], 1 }
 0x6c7   :  { %4583 = vsyncpa [#allocation8], 1 }
 0x6c8   :  { %4585 = vsyncpa [#allocation8 + $0x1], 1 }

</bundles_post_ra>
